<compile_context>
chip_gen: v5e
topology: v5e:2x2
jax: 0.10.0
libtpu: 0.0.40
codegen_flags: <defaults>
</compile_context>

<pallas_src>
import functools

import jax
import jax.numpy as jnp
from jax.experimental import pallas as pl
from jax.experimental.pallas import tpu as pltpu


def _round_up(x, m):
    return ((x + m - 1) // m) * m


def bn_fold(gamma, beta, mean, var, eps=1e-5):
    scale = gamma / jnp.sqrt(var + eps)
    shift = beta - mean * scale
    return scale, shift


# ----------------------------------------------------------------------------
# Fused BasicBlock kernel (stride == 1)
# ----------------------------------------------------------------------------
def _basic_block_kernel(xp_ref, w1_ref, w2_ref, wsc_ref, sh1_ref, shout_ref,
                        out_ref, o1p_ref, *, H, W, Cin, Cop):
    """One image per grid step.  bf16 MXU operands, f32 accumulation.

    xp_ref   : (H+2, W+2, Cin)  bf16  spatially pre-padded NHWC input
    w1_ref   : (9, Cin, Cop)    bf16  conv1 weights, BN1 scale folded in
    w2_ref   : (9, Cop, Cop)    bf16  conv2 weights, BN2 scale folded in
    wsc_ref  : (Cin, Cop)       bf16  1x1 shortcut weights, BN_sc scale folded
    sh1_ref  : (1, Cop)         f32   BN1 shift
    shout_ref: (1, Cop)         f32   BN2 shift + BN_sc shift (merged)
    out_ref  : (H*W, Cop)       f32   lane-dense output tile
    o1p_ref  : (H+2, W+4, Cop)  bf16  VMEM scratch: conv1 activation + zero halo
               (interior lives at [1:H+1, 2:W+2] -> bf16 store lands on an even
                sublane offset, no packed-pair split)
    """
    HW = H * W

    # ---- conv1 (3x3, pad 1) + BN1 (scale folded) + ReLU --------------------
    acc1 = jnp.zeros((HW, Cop), jnp.float32)
    for t in range(9):
        dh, dw = divmod(t, 3)
        tap = xp_ref[dh:dh + H, dw:dw + W, :].reshape(HW, Cin)
        acc1 = acc1 + jnp.dot(tap, w1_ref[t],
                              preferred_element_type=jnp.float32)
    o1 = jnp.maximum(acc1 + sh1_ref[...], 0.0)            # f32 epilogue

    # Stage o1 (with a zero halo) in VMEM so conv2 never touches HBM.
    o1p_ref[...] = jnp.zeros_like(o1p_ref)
    o1p_ref[1:H + 1, 2:W + 2, :] = o1.astype(jnp.bfloat16).reshape(H, W, Cop)

    # ---- conv2 (3x3, pad 1) + BN2 (scale folded) ----------------------------
    acc2 = jnp.zeros((HW, Cop), jnp.float32)
    for t in range(9):
        dh, dw = divmod(t, 3)
        tap = o1p_ref[dh:dh + H, dw + 1:dw + 1 + W, :].reshape(HW, Cop)
        acc2 = acc2 + jnp.dot(tap, w2_ref[t],
                              preferred_element_type=jnp.float32)

    # ---- 1x1 shortcut conv + BN_sc (scale folded) ---------------------------
    xc = xp_ref[1:H + 1, 1:W + 1, :].reshape(HW, Cin)      # un-padded input
    acc2 = acc2 + jnp.dot(xc, wsc_ref[...],
                          preferred_element_type=jnp.float32)

    # ---- merged BN shifts + residual already in acc2; final ReLU ------------
    out_ref[...] = jnp.maximum(acc2 + shout_ref[...], 0.0).astype(out_ref.dtype)


def basic_block_forward(x_nchw, kparams, stride=1):
    """Fused BasicBlock forward. Input/output are NCHW float32 (PyTorch layout)."""
    if stride != 1:
        # TODO(synk): stride>1 needs strided conv taps (pl.ds stride) or spatial
        # phase-splitting; only the module's default stride==1 is implemented.
        raise NotImplementedError("fused BasicBlock kernel implements stride=1")

    N, Cin, H, W = x_nchw.shape
    assert H % 8 == 0 and W % 8 == 0, "spatial dims assumed multiples of 8"
    Cop = kparams["w1"].shape[-1]
    HW = H * W

    x = jnp.transpose(x_nchw, (0, 2, 3, 1))                       # NHWC
    xpad = jnp.pad(x, ((0, 0), (1, 1), (1, 1), (0, 0))).astype(jnp.bfloat16)

    kernel = functools.partial(_basic_block_kernel, H=H, W=W, Cin=Cin, Cop=Cop)

    out2d = pl.pallas_call(
        kernel,
        out_shape=jax.ShapeDtypeStruct((N, HW, Cop), jnp.float32),
        grid=(N,),
        in_specs=[
            pl.BlockSpec((None, H + 2, W + 2, Cin), lambda n: (n, 0, 0, 0)),
            pl.BlockSpec((9, Cin, Cop), lambda n: (0, 0, 0)),
            pl.BlockSpec((9, Cop, Cop), lambda n: (0, 0, 0)),
            pl.BlockSpec((Cin, Cop), lambda n: (0, 0)),
            pl.BlockSpec((1, Cop), lambda n: (0, 0)),
            pl.BlockSpec((1, Cop), lambda n: (0, 0)),
        ],
        out_specs=pl.BlockSpec((None, HW, Cop), lambda n: (n, 0, 0)),
        scratch_shapes=[pltpu.VMEM((H + 2, W + 4, Cop), jnp.bfloat16)],
        compiler_params=pltpu.CompilerParams(
            dimension_semantics=("parallel",),
            vmem_limit_bytes=64 * 1024 * 1024,
        ),
    )(xpad, kparams["w1"], kparams["w2"], kparams["w_sc"],
      kparams["shift1"], kparams["shift_out"])

    out = out2d.reshape(N, H, W, Cop)[..., : kparams["cout"]]
    return jnp.transpose(out, (0, 3, 1, 2))                        # back to NCHW


# ----------------------------------------------------------------------------
# Parameter preparation: fold BN scale into weights, pad channels, cast bf16
# ----------------------------------------------------------------------------
def prepare_kernel_params(raw):
    w1, w2, wsc = raw["w1"], raw["w2"], raw["w_sc"]
    cout, cin = w1.shape[0], w1.shape[1]
    cop = _round_up(max(cout, 1), 128)                   # lane-dense channel pad

    s1, b1 = bn_fold(*raw["bn1"])
    s2, b2 = bn_fold(*raw["bn2"])
    ssc, bsc = bn_fold(*raw["bn_sc"])

    def conv3_to_taps(w, scale, cin_pad, cout_pad):
        # (Cout, Cin, 3, 3), fold BN scale on the output-channel axis,
        # reorder to per-tap (9, Cin, Cout) matmul weights, then zero-pad.
        wf = w * scale[:, None, None, None]
        wf = jnp.transpose(wf, (2, 3, 1, 0)).reshape(9, w.shape[1], w.shape[0])
        wf = jnp.pad(wf, ((0, 0), (0, cin_pad - w.shape[1]),
                          (0, cout_pad - w.shape[0])))
        return wf.astype(jnp.bfloat16)

    w1_k = conv3_to_taps(w1, s1, cin, cop)               # (9, Cin, Cop)
    w2_k = conv3_to_taps(w2, s2, cop, cop)               # (9, Cop, Cop)

    wsc_f = (wsc * ssc[:, None, None, None])[:, :, 0, 0]  # (Cout, Cin)
    wsc_k = jnp.pad(jnp.transpose(wsc_f, (1, 0)),
                    ((0, 0), (0, cop - cout))).astype(jnp.bfloat16)

    shift1 = jnp.pad(b1, (0, cop - cout)).reshape(1, cop).astype(jnp.float32)
    shift_out = jnp.pad(b2 + bsc, (0, cop - cout)).reshape(1, cop).astype(jnp.float32)

    return {"w1": w1_k, "w2": w2_k, "w_sc": wsc_k,
            "shift1": shift1, "shift_out": shift_out,
            "cout": cout, "cin": cin}


# ----------------------------------------------------------------------------
# Deterministic synthetic parameters + pure-JAX (f32, lax.conv) reference
# ----------------------------------------------------------------------------
def make_raw_params(key, in_planes, planes):
    ks = jax.random.split(key, 15)

    def bn(k0, k1, k2, k3, c):
        gamma = 0.5 + jax.random.uniform(k0, (c,), jnp.float32)
        beta = 0.1 * jax.random.normal(k1, (c,), jnp.float32)
        mean = 0.1 * jax.random.normal(k2, (c,), jnp.float32)
        var = 0.5 + jax.random.uniform(k3, (c,), jnp.float32)
        return (gamma, beta, mean, var)

    w1 = 0.1 * jax.random.normal(ks[0], (planes, in_planes, 3, 3), jnp.float32)
    w2 = 0.1 * jax.random.normal(ks[1], (planes, planes, 3, 3), jnp.float32)
    wsc = 0.1 * jax.random.normal(ks[2], (planes, in_planes, 1, 1), jnp.float32)
    return {"w1": w1, "w2": w2, "w_sc": wsc,
            "bn1": bn(ks[3], ks[4], ks[5], ks[6], planes),
            "bn2": bn(ks[7], ks[8], ks[9], ks[10], planes),
            "bn_sc": bn(ks[11], ks[12], ks[13], ks[14], planes)}


def reference_forward(x_nchw, raw, stride=1):
    dn = ("NCHW", "OIHW", "NCHW")

    def conv(x, w, s, pad):
        return jax.lax.conv_general_dilated(x, w, (s, s), pad, dimension_numbers=dn)

    def bn(x, p):
        scale, shift = bn_fold(*p)
        return x * scale[None, :, None, None] + shift[None, :, None, None]

    o = jnp.maximum(bn(conv(x_nchw, raw["w1"], stride, [(1, 1), (1, 1)]), raw["bn1"]), 0.0)
    o = bn(conv(o, raw["w2"], 1, [(1, 1), (1, 1)]), raw["bn2"])
    sc = bn(conv(x_nchw, raw["w_sc"], stride, [(0, 0), (0, 0)]), raw["bn_sc"])
    return jnp.maximum(o + sc, 0.0)


if __name__ == "__main__":
    key = jax.random.PRNGKey(0)
    k_x, k_p = jax.random.split(key)

    N, C_IN, H, W = 2, 4, 16, 16
    PLANES, STRIDE = 8, 1

    x = jax.random.normal(k_x, (N, C_IN, H, W), jnp.float32)
    raw = make_raw_params(k_p, C_IN, PLANES)
    kparams = prepare_kernel_params(raw)

    out = jax.block_until_ready(basic_block_forward(x, kparams, stride=STRIDE))
    ref = jax.block_until_ready(reference_forward(x, raw, stride=STRIDE))

    assert out.shape == (N, PLANES, H // STRIDE, W // STRIDE)
    err = float(jnp.max(jnp.abs(out - ref)))
    # bf16 MXU matmuls with f32 accumulation vs. pure-f32 reference.
    assert jnp.allclose(out, ref, atol=3e-2, rtol=3e-2), f"max abs err {err}"

    print("KERNEL_OK")
</pallas_src>

<mosaic_0001>
module attributes {stable_mosaic.version = 11 : i64} {
  func.func @_basic_block_kernel(%arg0: i32, %arg1: memref<1x18x18x4xbf16, #tpu.memory_space<vmem>>, %arg2: memref<9x4x128xbf16, #tpu.memory_space<vmem>>, %arg3: memref<9x128x128xbf16, #tpu.memory_space<vmem>>, %arg4: memref<4x128xbf16, #tpu.memory_space<vmem>>, %arg5: memref<1x128xf32, #tpu.memory_space<vmem>>, %arg6: memref<1x128xf32, #tpu.memory_space<vmem>>, %arg7: memref<1x256x128xf32, #tpu.memory_space<vmem>>, %arg8: memref<18x20x128xbf16, #tpu.memory_space<vmem>>) attributes {dimension_semantics = [#tpu.dimension_semantics<parallel>], iteration_bounds = array<i64: 2>, scalar_prefetch = 0 : i64, scratch_operands = 1 : i64, tpu.core_type = #tpu.core_type<tc>, window_params = [{transform_indices = @transform_0, window_bounds = array<i64: 1, 18, 18, 4>}, {pipeline_mode = #tpu.pipeline_mode<synchronous>, transform_indices = @transform_1, window_bounds = array<i64: 9, 4, 128>}, {pipeline_mode = #tpu.pipeline_mode<synchronous>, transform_indices = @transform_2, window_bounds = array<i64: 9, 128, 128>}, {pipeline_mode = #tpu.pipeline_mode<synchronous>, transform_indices = @transform_3, window_bounds = array<i64: 4, 128>}, {pipeline_mode = #tpu.pipeline_mode<synchronous>, transform_indices = @transform_4, window_bounds = array<i64: 1, 128>}, {pipeline_mode = #tpu.pipeline_mode<synchronous>, transform_indices = @transform_5, window_bounds = array<i64: 1, 128>}, {transform_indices = @transform_6, window_bounds = array<i64: 1, 256, 128>}]} {
    %cst = arith.constant 0.000000e+00 : f32
    %0 = vector.broadcast %cst : f32 to vector<256x128xf32>
    %c0 = arith.constant 0 : index
    %c0_0 = arith.constant 0 : index
    %c0_1 = arith.constant 0 : index
    %c0_2 = arith.constant 0 : index
    %1 = vector.load %arg1[%c0, %c0_0, %c0_1, %c0_2] : memref<1x18x18x4xbf16, #tpu.memory_space<vmem>>, vector<1x16x16x4xbf16>
    %2 = vector.shape_cast %1 : vector<1x16x16x4xbf16> to vector<16x16x4xbf16>
    %3 = vector.shape_cast %2 : vector<16x16x4xbf16> to vector<256x4xbf16>
    %c0_3 = arith.constant 0 : index
    %c0_4 = arith.constant 0 : index
    %c0_5 = arith.constant 0 : index
    %4 = vector.load %arg2[%c0_3, %c0_4, %c0_5] : memref<9x4x128xbf16, #tpu.memory_space<vmem>>, vector<1x4x128xbf16>
    %5 = vector.shape_cast %4 : vector<1x4x128xbf16> to vector<4x128xbf16>
    %cst_6 = arith.constant dense<0.000000e+00> : vector<256x128xf32>
    %6 = tpu.matmul %3, %5, %cst_6 {dimension_numbers = #tpu.dot_dimension_numbers<[1], [0], [0], [1], [0, 0, 1, 1], [], []>} : vector<256x4xbf16>, vector<4x128xbf16>, vector<256x128xf32> -> vector<256x128xf32>
    %7 = arith.addf %0, %6 : vector<256x128xf32>
    %c0_7 = arith.constant 0 : index
    %c0_8 = arith.constant 0 : index
    %c1 = arith.constant 1 : index
    %c0_9 = arith.constant 0 : index
    %8 = vector.load %arg1[%c0_7, %c0_8, %c1, %c0_9] : memref<1x18x18x4xbf16, #tpu.memory_space<vmem>>, vector<1x16x16x4xbf16>
    %9 = vector.shape_cast %8 : vector<1x16x16x4xbf16> to vector<16x16x4xbf16>
    %10 = vector.shape_cast %9 : vector<16x16x4xbf16> to vector<256x4xbf16>
    %c1_10 = arith.constant 1 : index
    %c0_11 = arith.constant 0 : index
    %c0_12 = arith.constant 0 : index
    %11 = vector.load %arg2[%c1_10, %c0_11, %c0_12] : memref<9x4x128xbf16, #tpu.memory_space<vmem>>, vector<1x4x128xbf16>
    %12 = vector.shape_cast %11 : vector<1x4x128xbf16> to vector<4x128xbf16>
    %cst_13 = arith.constant dense<0.000000e+00> : vector<256x128xf32>
    %13 = tpu.matmul %10, %12, %cst_13 {dimension_numbers = #tpu.dot_dimension_numbers<[1], [0], [0], [1], [0, 0, 1, 1], [], []>} : vector<256x4xbf16>, vector<4x128xbf16>, vector<256x128xf32> -> vector<256x128xf32>
    %14 = arith.addf %7, %13 : vector<256x128xf32>
    %c0_14 = arith.constant 0 : index
    %c0_15 = arith.constant 0 : index
    %c2 = arith.constant 2 : index
    %c0_16 = arith.constant 0 : index
    %15 = vector.load %arg1[%c0_14, %c0_15, %c2, %c0_16] : memref<1x18x18x4xbf16, #tpu.memory_space<vmem>>, vector<1x16x16x4xbf16>
    %16 = vector.shape_cast %15 : vector<1x16x16x4xbf16> to vector<16x16x4xbf16>
    %17 = vector.shape_cast %16 : vector<16x16x4xbf16> to vector<256x4xbf16>
    %c2_17 = arith.constant 2 : index
    %c0_18 = arith.constant 0 : index
    %c0_19 = arith.constant 0 : index
    %18 = vector.load %arg2[%c2_17, %c0_18, %c0_19] : memref<9x4x128xbf16, #tpu.memory_space<vmem>>, vector<1x4x128xbf16>
    %19 = vector.shape_cast %18 : vector<1x4x128xbf16> to vector<4x128xbf16>
    %cst_20 = arith.constant dense<0.000000e+00> : vector<256x128xf32>
    %20 = tpu.matmul %17, %19, %cst_20 {dimension_numbers = #tpu.dot_dimension_numbers<[1], [0], [0], [1], [0, 0, 1, 1], [], []>} : vector<256x4xbf16>, vector<4x128xbf16>, vector<256x128xf32> -> vector<256x128xf32>
    %21 = arith.addf %14, %20 : vector<256x128xf32>
    %c0_21 = arith.constant 0 : index
    %c1_22 = arith.constant 1 : index
    %c0_23 = arith.constant 0 : index
    %c0_24 = arith.constant 0 : index
    %22 = vector.load %arg1[%c0_21, %c1_22, %c0_23, %c0_24] : memref<1x18x18x4xbf16, #tpu.memory_space<vmem>>, vector<1x16x16x4xbf16>
    %23 = vector.shape_cast %22 : vector<1x16x16x4xbf16> to vector<16x16x4xbf16>
    %24 = vector.shape_cast %23 : vector<16x16x4xbf16> to vector<256x4xbf16>
    %c3 = arith.constant 3 : index
    %c0_25 = arith.constant 0 : index
    %c0_26 = arith.constant 0 : index
    %25 = vector.load %arg2[%c3, %c0_25, %c0_26] : memref<9x4x128xbf16, #tpu.memory_space<vmem>>, vector<1x4x128xbf16>
    %26 = vector.shape_cast %25 : vector<1x4x128xbf16> to vector<4x128xbf16>
    %cst_27 = arith.constant dense<0.000000e+00> : vector<256x128xf32>
    %27 = tpu.matmul %24, %26, %cst_27 {dimension_numbers = #tpu.dot_dimension_numbers<[1], [0], [0], [1], [0, 0, 1, 1], [], []>} : vector<256x4xbf16>, vector<4x128xbf16>, vector<256x128xf32> -> vector<256x128xf32>
    %28 = arith.addf %21, %27 : vector<256x128xf32>
    %c0_28 = arith.constant 0 : index
    %c1_29 = arith.constant 1 : index
    %c1_30 = arith.constant 1 : index
    %c0_31 = arith.constant 0 : index
    %29 = vector.load %arg1[%c0_28, %c1_29, %c1_30, %c0_31] : memref<1x18x18x4xbf16, #tpu.memory_space<vmem>>, vector<1x16x16x4xbf16>
    %30 = vector.shape_cast %29 : vector<1x16x16x4xbf16> to vector<16x16x4xbf16>
    %31 = vector.shape_cast %30 : vector<16x16x4xbf16> to vector<256x4xbf16>
    %c4 = arith.constant 4 : index
    %c0_32 = arith.constant 0 : index
    %c0_33 = arith.constant 0 : index
    %32 = vector.load %arg2[%c4, %c0_32, %c0_33] : memref<9x4x128xbf16, #tpu.memory_space<vmem>>, vector<1x4x128xbf16>
    %33 = vector.shape_cast %32 : vector<1x4x128xbf16> to vector<4x128xbf16>
    %cst_34 = arith.constant dense<0.000000e+00> : vector<256x128xf32>
    %34 = tpu.matmul %31, %33, %cst_34 {dimension_numbers = #tpu.dot_dimension_numbers<[1], [0], [0], [1], [0, 0, 1, 1], [], []>} : vector<256x4xbf16>, vector<4x128xbf16>, vector<256x128xf32> -> vector<256x128xf32>
    %35 = arith.addf %28, %34 : vector<256x128xf32>
    %c0_35 = arith.constant 0 : index
    %c1_36 = arith.constant 1 : index
    %c2_37 = arith.constant 2 : index
    %c0_38 = arith.constant 0 : index
    %36 = vector.load %arg1[%c0_35, %c1_36, %c2_37, %c0_38] : memref<1x18x18x4xbf16, #tpu.memory_space<vmem>>, vector<1x16x16x4xbf16>
    %37 = vector.shape_cast %36 : vector<1x16x16x4xbf16> to vector<16x16x4xbf16>
    %38 = vector.shape_cast %37 : vector<16x16x4xbf16> to vector<256x4xbf16>
    %c5 = arith.constant 5 : index
    %c0_39 = arith.constant 0 : index
    %c0_40 = arith.constant 0 : index
    %39 = vector.load %arg2[%c5, %c0_39, %c0_40] : memref<9x4x128xbf16, #tpu.memory_space<vmem>>, vector<1x4x128xbf16>
    %40 = vector.shape_cast %39 : vector<1x4x128xbf16> to vector<4x128xbf16>
    %cst_41 = arith.constant dense<0.000000e+00> : vector<256x128xf32>
    %41 = tpu.matmul %38, %40, %cst_41 {dimension_numbers = #tpu.dot_dimension_numbers<[1], [0], [0], [1], [0, 0, 1, 1], [], []>} : vector<256x4xbf16>, vector<4x128xbf16>, vector<256x128xf32> -> vector<256x128xf32>
    %42 = arith.addf %35, %41 : vector<256x128xf32>
    %c0_42 = arith.constant 0 : index
    %c2_43 = arith.constant 2 : index
    %c0_44 = arith.constant 0 : index
    %c0_45 = arith.constant 0 : index
    %43 = vector.load %arg1[%c0_42, %c2_43, %c0_44, %c0_45] : memref<1x18x18x4xbf16, #tpu.memory_space<vmem>>, vector<1x16x16x4xbf16>
    %44 = vector.shape_cast %43 : vector<1x16x16x4xbf16> to vector<16x16x4xbf16>
    %45 = vector.shape_cast %44 : vector<16x16x4xbf16> to vector<256x4xbf16>
    %c6 = arith.constant 6 : index
    %c0_46 = arith.constant 0 : index
    %c0_47 = arith.constant 0 : index
    %46 = vector.load %arg2[%c6, %c0_46, %c0_47] : memref<9x4x128xbf16, #tpu.memory_space<vmem>>, vector<1x4x128xbf16>
    %47 = vector.shape_cast %46 : vector<1x4x128xbf16> to vector<4x128xbf16>
    %cst_48 = arith.constant dense<0.000000e+00> : vector<256x128xf32>
    %48 = tpu.matmul %45, %47, %cst_48 {dimension_numbers = #tpu.dot_dimension_numbers<[1], [0], [0], [1], [0, 0, 1, 1], [], []>} : vector<256x4xbf16>, vector<4x128xbf16>, vector<256x128xf32> -> vector<256x128xf32>
    %49 = arith.addf %42, %48 : vector<256x128xf32>
    %c0_49 = arith.constant 0 : index
    %c2_50 = arith.constant 2 : index
    %c1_51 = arith.constant 1 : index
    %c0_52 = arith.constant 0 : index
    %50 = vector.load %arg1[%c0_49, %c2_50, %c1_51, %c0_52] : memref<1x18x18x4xbf16, #tpu.memory_space<vmem>>, vector<1x16x16x4xbf16>
    %51 = vector.shape_cast %50 : vector<1x16x16x4xbf16> to vector<16x16x4xbf16>
    %52 = vector.shape_cast %51 : vector<16x16x4xbf16> to vector<256x4xbf16>
    %c7 = arith.constant 7 : index
    %c0_53 = arith.constant 0 : index
    %c0_54 = arith.constant 0 : index
    %53 = vector.load %arg2[%c7, %c0_53, %c0_54] : memref<9x4x128xbf16, #tpu.memory_space<vmem>>, vector<1x4x128xbf16>
    %54 = vector.shape_cast %53 : vector<1x4x128xbf16> to vector<4x128xbf16>
    %cst_55 = arith.constant dense<0.000000e+00> : vector<256x128xf32>
    %55 = tpu.matmul %52, %54, %cst_55 {dimension_numbers = #tpu.dot_dimension_numbers<[1], [0], [0], [1], [0, 0, 1, 1], [], []>} : vector<256x4xbf16>, vector<4x128xbf16>, vector<256x128xf32> -> vector<256x128xf32>
    %56 = arith.addf %49, %55 : vector<256x128xf32>
    %c0_56 = arith.constant 0 : index
    %c2_57 = arith.constant 2 : index
    %c2_58 = arith.constant 2 : index
    %c0_59 = arith.constant 0 : index
    %57 = vector.load %arg1[%c0_56, %c2_57, %c2_58, %c0_59] : memref<1x18x18x4xbf16, #tpu.memory_space<vmem>>, vector<1x16x16x4xbf16>
    %58 = vector.shape_cast %57 : vector<1x16x16x4xbf16> to vector<16x16x4xbf16>
    %59 = vector.shape_cast %58 : vector<16x16x4xbf16> to vector<256x4xbf16>
    %c8 = arith.constant 8 : index
    %c0_60 = arith.constant 0 : index
    %c0_61 = arith.constant 0 : index
    %60 = vector.load %arg2[%c8, %c0_60, %c0_61] : memref<9x4x128xbf16, #tpu.memory_space<vmem>>, vector<1x4x128xbf16>
    %61 = vector.shape_cast %60 : vector<1x4x128xbf16> to vector<4x128xbf16>
    %cst_62 = arith.constant dense<0.000000e+00> : vector<256x128xf32>
    %62 = tpu.matmul %59, %61, %cst_62 {dimension_numbers = #tpu.dot_dimension_numbers<[1], [0], [0], [1], [0, 0, 1, 1], [], []>} : vector<256x4xbf16>, vector<4x128xbf16>, vector<256x128xf32> -> vector<256x128xf32>
    %63 = arith.addf %56, %62 : vector<256x128xf32>
    %c0_63 = arith.constant 0 : index
    %c0_64 = arith.constant 0 : index
    %64 = vector.load %arg5[%c0_63, %c0_64] : memref<1x128xf32, #tpu.memory_space<vmem>>, vector<1x128xf32>
    %65 = vector.broadcast %64 : vector<1x128xf32> to vector<256x128xf32>
    %66 = arith.addf %63, %65 : vector<256x128xf32>
    %cst_65 = arith.constant 0.000000e+00 : f32
    %67 = vector.broadcast %cst_65 : f32 to vector<256x128xf32>
    %68 = arith.maximumf %66, %67 : vector<256x128xf32>
    %cst_66 = arith.constant 0.000000e+00 : bf16
    %69 = vector.broadcast %cst_66 : bf16 to vector<18x20x128xbf16>
    %c0_67 = arith.constant 0 : index
    %c0_68 = arith.constant 0 : index
    %c0_69 = arith.constant 0 : index
    %70 = vector.load %arg8[%c0_67, %c0_68, %c0_69] : memref<18x20x128xbf16, #tpu.memory_space<vmem>>, vector<18x20x128xbf16>
    tpu.vector_store %arg8[%c0_67, %c0_68, %c0_69], %69 {strides = array<i32>} : memref<18x20x128xbf16, #tpu.memory_space<vmem>>, vector<18x20x128xbf16>,
    %71 = arith.truncf %68 : vector<256x128xf32> to vector<256x128xbf16>
    %72 = vector.shape_cast %71 : vector<256x128xbf16> to vector<16x16x128xbf16>
    %c1_70 = arith.constant 1 : index
    %c2_71 = arith.constant 2 : index
    %c0_72 = arith.constant 0 : index
    %73 = vector.load %arg8[%c1_70, %c2_71, %c0_72] : memref<18x20x128xbf16, #tpu.memory_space<vmem>>, vector<16x16x128xbf16>
    tpu.vector_store %arg8[%c1_70, %c2_71, %c0_72], %72 {strides = array<i32>} : memref<18x20x128xbf16, #tpu.memory_space<vmem>>, vector<16x16x128xbf16>,
    %cst_73 = arith.constant 0.000000e+00 : f32
    %74 = vector.broadcast %cst_73 : f32 to vector<256x128xf32>
    %c0_74 = arith.constant 0 : index
    %c1_75 = arith.constant 1 : index
    %c0_76 = arith.constant 0 : index
    %75 = vector.load %arg8[%c0_74, %c1_75, %c0_76] : memref<18x20x128xbf16, #tpu.memory_space<vmem>>, vector<16x16x128xbf16>
    %76 = vector.shape_cast %75 : vector<16x16x128xbf16> to vector<256x128xbf16>
    %c0_77 = arith.constant 0 : index
    %c0_78 = arith.constant 0 : index
    %c0_79 = arith.constant 0 : index
    %77 = vector.load %arg3[%c0_77, %c0_78, %c0_79] : memref<9x128x128xbf16, #tpu.memory_space<vmem>>, vector<1x128x128xbf16>
    %78 = vector.shape_cast %77 : vector<1x128x128xbf16> to vector<128x128xbf16>
    %cst_80 = arith.constant dense<0.000000e+00> : vector<256x128xf32>
    %79 = tpu.matmul %76, %78, %cst_80 {dimension_numbers = #tpu.dot_dimension_numbers<[1], [0], [0], [1], [0, 0, 1, 1], [], []>} : vector<256x128xbf16>, vector<128x128xbf16>, vector<256x128xf32> -> vector<256x128xf32>
    %80 = arith.addf %74, %79 : vector<256x128xf32>
    %c0_81 = arith.constant 0 : index
    %c2_82 = arith.constant 2 : index
    %c0_83 = arith.constant 0 : index
    %81 = vector.load %arg8[%c0_81, %c2_82, %c0_83] : memref<18x20x128xbf16, #tpu.memory_space<vmem>>, vector<16x16x128xbf16>
    %82 = vector.shape_cast %81 : vector<16x16x128xbf16> to vector<256x128xbf16>
    %c1_84 = arith.constant 1 : index
    %c0_85 = arith.constant 0 : index
    %c0_86 = arith.constant 0 : index
    %83 = vector.load %arg3[%c1_84, %c0_85, %c0_86] : memref<9x128x128xbf16, #tpu.memory_space<vmem>>, vector<1x128x128xbf16>
    %84 = vector.shape_cast %83 : vector<1x128x128xbf16> to vector<128x128xbf16>
    %cst_87 = arith.constant dense<0.000000e+00> : vector<256x128xf32>
    %85 = tpu.matmul %82, %84, %cst_87 {dimension_numbers = #tpu.dot_dimension_numbers<[1], [0], [0], [1], [0, 0, 1, 1], [], []>} : vector<256x128xbf16>, vector<128x128xbf16>, vector<256x128xf32> -> vector<256x128xf32>
    %86 = arith.addf %80, %85 : vector<256x128xf32>
    %c0_88 = arith.constant 0 : index
    %c3_89 = arith.constant 3 : index
    %c0_90 = arith.constant 0 : index
    %87 = vector.load %arg8[%c0_88, %c3_89, %c0_90] : memref<18x20x128xbf16, #tpu.memory_space<vmem>>, vector<16x16x128xbf16>
    %88 = vector.shape_cast %87 : vector<16x16x128xbf16> to vector<256x128xbf16>
    %c2_91 = arith.constant 2 : index
    %c0_92 = arith.constant 0 : index
    %c0_93 = arith.constant 0 : index
    %89 = vector.load %arg3[%c2_91, %c0_92, %c0_93] : memref<9x128x128xbf16, #tpu.memory_space<vmem>>, vector<1x128x128xbf16>
    %90 = vector.shape_cast %89 : vector<1x128x128xbf16> to vector<128x128xbf16>
    %cst_94 = arith.constant dense<0.000000e+00> : vector<256x128xf32>
    %91 = tpu.matmul %88, %90, %cst_94 {dimension_numbers = #tpu.dot_dimension_numbers<[1], [0], [0], [1], [0, 0, 1, 1], [], []>} : vector<256x128xbf16>, vector<128x128xbf16>, vector<256x128xf32> -> vector<256x128xf32>
    %92 = arith.addf %86, %91 : vector<256x128xf32>
    %c1_95 = arith.constant 1 : index
    %c1_96 = arith.constant 1 : index
    %c0_97 = arith.constant 0 : index
    %93 = vector.load %arg8[%c1_95, %c1_96, %c0_97] : memref<18x20x128xbf16, #tpu.memory_space<vmem>>, vector<16x16x128xbf16>
    %94 = vector.shape_cast %93 : vector<16x16x128xbf16> to vector<256x128xbf16>
    %c3_98 = arith.constant 3 : index
    %c0_99 = arith.constant 0 : index
    %c0_100 = arith.constant 0 : index
    %95 = vector.load %arg3[%c3_98, %c0_99, %c0_100] : memref<9x128x128xbf16, #tpu.memory_space<vmem>>, vector<1x128x128xbf16>
    %96 = vector.shape_cast %95 : vector<1x128x128xbf16> to vector<128x128xbf16>
    %cst_101 = arith.constant dense<0.000000e+00> : vector<256x128xf32>
    %97 = tpu.matmul %94, %96, %cst_101 {dimension_numbers = #tpu.dot_dimension_numbers<[1], [0], [0], [1], [0, 0, 1, 1], [], []>} : vector<256x128xbf16>, vector<128x128xbf16>, vector<256x128xf32> -> vector<256x128xf32>
    %98 = arith.addf %92, %97 : vector<256x128xf32>
    %c1_102 = arith.constant 1 : index
    %c2_103 = arith.constant 2 : index
    %c0_104 = arith.constant 0 : index
    %99 = vector.load %arg8[%c1_102, %c2_103, %c0_104] : memref<18x20x128xbf16, #tpu.memory_space<vmem>>, vector<16x16x128xbf16>
    %100 = vector.shape_cast %99 : vector<16x16x128xbf16> to vector<256x128xbf16>
    %c4_105 = arith.constant 4 : index
    %c0_106 = arith.constant 0 : index
    %c0_107 = arith.constant 0 : index
    %101 = vector.load %arg3[%c4_105, %c0_106, %c0_107] : memref<9x128x128xbf16, #tpu.memory_space<vmem>>, vector<1x128x128xbf16>
    %102 = vector.shape_cast %101 : vector<1x128x128xbf16> to vector<128x128xbf16>
    %cst_108 = arith.constant dense<0.000000e+00> : vector<256x128xf32>
    %103 = tpu.matmul %100, %102, %cst_108 {dimension_numbers = #tpu.dot_dimension_numbers<[1], [0], [0], [1], [0, 0, 1, 1], [], []>} : vector<256x128xbf16>, vector<128x128xbf16>, vector<256x128xf32> -> vector<256x128xf32>
    %104 = arith.addf %98, %103 : vector<256x128xf32>
    %c1_109 = arith.constant 1 : index
    %c3_110 = arith.constant 3 : index
    %c0_111 = arith.constant 0 : index
    %105 = vector.load %arg8[%c1_109, %c3_110, %c0_111] : memref<18x20x128xbf16, #tpu.memory_space<vmem>>, vector<16x16x128xbf16>
    %106 = vector.shape_cast %105 : vector<16x16x128xbf16> to vector<256x128xbf16>
    %c5_112 = arith.constant 5 : index
    %c0_113 = arith.constant 0 : index
    %c0_114 = arith.constant 0 : index
    %107 = vector.load %arg3[%c5_112, %c0_113, %c0_114] : memref<9x128x128xbf16, #tpu.memory_space<vmem>>, vector<1x128x128xbf16>
    %108 = vector.shape_cast %107 : vector<1x128x128xbf16> to vector<128x128xbf16>
    %cst_115 = arith.constant dense<0.000000e+00> : vector<256x128xf32>
    %109 = tpu.matmul %106, %108, %cst_115 {dimension_numbers = #tpu.dot_dimension_numbers<[1], [0], [0], [1], [0, 0, 1, 1], [], []>} : vector<256x128xbf16>, vector<128x128xbf16>, vector<256x128xf32> -> vector<256x128xf32>
    %110 = arith.addf %104, %109 : vector<256x128xf32>
    %c2_116 = arith.constant 2 : index
    %c1_117 = arith.constant 1 : index
    %c0_118 = arith.constant 0 : index
    %111 = vector.load %arg8[%c2_116, %c1_117, %c0_118] : memref<18x20x128xbf16, #tpu.memory_space<vmem>>, vector<16x16x128xbf16>
    %112 = vector.shape_cast %111 : vector<16x16x128xbf16> to vector<256x128xbf16>
    %c6_119 = arith.constant 6 : index
    %c0_120 = arith.constant 0 : index
    %c0_121 = arith.constant 0 : index
    %113 = vector.load %arg3[%c6_119, %c0_120, %c0_121] : memref<9x128x128xbf16, #tpu.memory_space<vmem>>, vector<1x128x128xbf16>
    %114 = vector.shape_cast %113 : vector<1x128x128xbf16> to vector<128x128xbf16>
    %cst_122 = arith.constant dense<0.000000e+00> : vector<256x128xf32>
    %115 = tpu.matmul %112, %114, %cst_122 {dimension_numbers = #tpu.dot_dimension_numbers<[1], [0], [0], [1], [0, 0, 1, 1], [], []>} : vector<256x128xbf16>, vector<128x128xbf16>, vector<256x128xf32> -> vector<256x128xf32>
    %116 = arith.addf %110, %115 : vector<256x128xf32>
    %c2_123 = arith.constant 2 : index
    %c2_124 = arith.constant 2 : index
    %c0_125 = arith.constant 0 : index
    %117 = vector.load %arg8[%c2_123, %c2_124, %c0_125] : memref<18x20x128xbf16, #tpu.memory_space<vmem>>, vector<16x16x128xbf16>
    %118 = vector.shape_cast %117 : vector<16x16x128xbf16> to vector<256x128xbf16>
    %c7_126 = arith.constant 7 : index
    %c0_127 = arith.constant 0 : index
    %c0_128 = arith.constant 0 : index
    %119 = vector.load %arg3[%c7_126, %c0_127, %c0_128] : memref<9x128x128xbf16, #tpu.memory_space<vmem>>, vector<1x128x128xbf16>
    %120 = vector.shape_cast %119 : vector<1x128x128xbf16> to vector<128x128xbf16>
    %cst_129 = arith.constant dense<0.000000e+00> : vector<256x128xf32>
    %121 = tpu.matmul %118, %120, %cst_129 {dimension_numbers = #tpu.dot_dimension_numbers<[1], [0], [0], [1], [0, 0, 1, 1], [], []>} : vector<256x128xbf16>, vector<128x128xbf16>, vector<256x128xf32> -> vector<256x128xf32>
    %122 = arith.addf %116, %121 : vector<256x128xf32>
    %c2_130 = arith.constant 2 : index
    %c3_131 = arith.constant 3 : index
    %c0_132 = arith.constant 0 : index
    %123 = vector.load %arg8[%c2_130, %c3_131, %c0_132] : memref<18x20x128xbf16, #tpu.memory_space<vmem>>, vector<16x16x128xbf16>
    %124 = vector.shape_cast %123 : vector<16x16x128xbf16> to vector<256x128xbf16>
    %c8_133 = arith.constant 8 : index
    %c0_134 = arith.constant 0 : index
    %c0_135 = arith.constant 0 : index
    %125 = vector.load %arg3[%c8_133, %c0_134, %c0_135] : memref<9x128x128xbf16, #tpu.memory_space<vmem>>, vector<1x128x128xbf16>
    %126 = vector.shape_cast %125 : vector<1x128x128xbf16> to vector<128x128xbf16>
    %cst_136 = arith.constant dense<0.000000e+00> : vector<256x128xf32>
    %127 = tpu.matmul %124, %126, %cst_136 {dimension_numbers = #tpu.dot_dimension_numbers<[1], [0], [0], [1], [0, 0, 1, 1], [], []>} : vector<256x128xbf16>, vector<128x128xbf16>, vector<256x128xf32> -> vector<256x128xf32>
    %128 = arith.addf %122, %127 : vector<256x128xf32>
    %c0_137 = arith.constant 0 : index
    %c1_138 = arith.constant 1 : index
    %c1_139 = arith.constant 1 : index
    %c0_140 = arith.constant 0 : index
    %129 = vector.load %arg1[%c0_137, %c1_138, %c1_139, %c0_140] : memref<1x18x18x4xbf16, #tpu.memory_space<vmem>>, vector<1x16x16x4xbf16>
    %130 = vector.shape_cast %129 : vector<1x16x16x4xbf16> to vector<16x16x4xbf16>
    %131 = vector.shape_cast %130 : vector<16x16x4xbf16> to vector<256x4xbf16>
    %c0_141 = arith.constant 0 : index
    %c0_142 = arith.constant 0 : index
    %132 = vector.load %arg4[%c0_141, %c0_142] : memref<4x128xbf16, #tpu.memory_space<vmem>>, vector<4x128xbf16>
    %cst_143 = arith.constant dense<0.000000e+00> : vector<256x128xf32>
    %133 = tpu.matmul %131, %132, %cst_143 {dimension_numbers = #tpu.dot_dimension_numbers<[1], [0], [0], [1], [0, 0, 1, 1], [], []>} : vector<256x4xbf16>, vector<4x128xbf16>, vector<256x128xf32> -> vector<256x128xf32>
    %134 = arith.addf %128, %133 : vector<256x128xf32>
    %c0_144 = arith.constant 0 : index
    %c0_145 = arith.constant 0 : index
    %135 = vector.load %arg6[%c0_144, %c0_145] : memref<1x128xf32, #tpu.memory_space<vmem>>, vector<1x128xf32>
    %136 = vector.broadcast %135 : vector<1x128xf32> to vector<256x128xf32>
    %137 = arith.addf %134, %136 : vector<256x128xf32>
    %cst_146 = arith.constant 0.000000e+00 : f32
    %138 = vector.broadcast %cst_146 : f32 to vector<256x128xf32>
    %139 = arith.maximumf %137, %138 : vector<256x128xf32>
    %c0_147 = arith.constant 0 : index
    %c0_148 = arith.constant 0 : index
    %c0_149 = arith.constant 0 : index
    %140 = vector.load %arg7[%c0_147, %c0_148, %c0_149] : memref<1x256x128xf32, #tpu.memory_space<vmem>>, vector<1x256x128xf32>
    %141 = vector.shape_cast %140 : vector<1x256x128xf32> to vector<256x128xf32>
    %142 = vector.shape_cast %139 : vector<256x128xf32> to vector<1x256x128xf32>
    tpu.vector_store %arg7[%c0_147, %c0_148, %c0_149], %142 {strides = array<i32>} : memref<1x256x128xf32, #tpu.memory_space<vmem>>, vector<1x256x128xf32>,
    return
  }
  func.func @transform_0(%arg0: i32) -> (i32, i32, i32, i32) {
    %c0_i32 = arith.constant 0 : i32
    %c0_i32_0 = arith.constant 0 : i32
    %c0_i32_1 = arith.constant 0 : i32
    %c0_i32_2 = arith.constant 0 : i32
    return %arg0, %c0_i32, %c0_i32_0, %c0_i32_1 : i32, i32, i32, i32
  }
  func.func @transform_1(%arg0: i32) -> (i32, i32, i32) {
    %c0_i32 = arith.constant 0 : i32
    %c0_i32_0 = arith.constant 0 : i32
    %c0_i32_1 = arith.constant 0 : i32
    %c0_i32_2 = arith.constant 0 : i32
    return %c0_i32, %c0_i32_0, %c0_i32_1 : i32, i32, i32
  }
  func.func @transform_2(%arg0: i32) -> (i32, i32, i32) {
    %c0_i32 = arith.constant 0 : i32
    %c0_i32_0 = arith.constant 0 : i32
    %c0_i32_1 = arith.constant 0 : i32
    %c0_i32_2 = arith.constant 0 : i32
    return %c0_i32, %c0_i32_0, %c0_i32_1 : i32, i32, i32
  }
  func.func @transform_3(%arg0: i32) -> (i32, i32) {
    %c0_i32 = arith.constant 0 : i32
    %c0_i32_0 = arith.constant 0 : i32
    %c0_i32_1 = arith.constant 0 : i32
    return %c0_i32, %c0_i32_0 : i32, i32
  }
  func.func @transform_4(%arg0: i32) -> (i32, i32) {
    %c0_i32 = arith.constant 0 : i32
    %c0_i32_0 = arith.constant 0 : i32
    %c0_i32_1 = arith.constant 0 : i32
    return %c0_i32, %c0_i32_0 : i32, i32
  }
  func.func @transform_5(%arg0: i32) -> (i32, i32) {
    %c0_i32 = arith.constant 0 : i32
    %c0_i32_0 = arith.constant 0 : i32
    %c0_i32_1 = arith.constant 0 : i32
    return %c0_i32, %c0_i32_0 : i32, i32
  }
  func.func @transform_6(%arg0: i32) -> (i32, i32, i32) {
    %c0_i32 = arith.constant 0 : i32
    %c0_i32_0 = arith.constant 0 : i32
    %c0_i32_1 = arith.constant 0 : i32
    return %arg0, %c0_i32, %c0_i32_0 : i32, i32, i32
  }
}

</mosaic_0001>

<bundles_post_ra>
// kernel: tpu_custom_call.1
= control target key start
LH: loop header
LB: loop body
LE: loop exit
PB: predicated region body
PF: predicated region fallthrough
CT: control target
= control target key end

     0   :  { %11 = vsyncpa [#allocation4], 0  ;;  %s15942_s0 = inlined_call_operand.vmem [shape: bf16[2,18,18,4], index: 0, kind: input, shape index: {}]   ;;  %s15943_s1 = inlined_call_operand.vmem [shape: bf16[9,4,128], index: 1, kind: input, shape index: {}]   ;;  %s15944_s2 = inlined_call_operand.hbm [shape: bf16[9,128,128], index: 2, kind: input, shape index: {}]   ;;  %s15945_s3 = inlined_call_operand.vmem [shape: bf16[4,128], index: 3, kind: input, shape index: {}]   ;;  %s15946_s4 = inlined_call_operand.vmem [shape: f32[1,128], index: 4, kind: input, shape index: {}]   ;;  %s15947_s5 = inlined_call_operand.vmem [shape: f32[1,128], index: 5, kind: input, shape index: {}]   ;;  %s15948_s6 = inlined_call_operand.hbm [shape: f32[2,256,128], index: 6, kind: output, shape index: {}]  }
   0x1   :  { %12 = vsyncpa [#allocation5], 0 }
   0x2   :  { %14 = vsyncpa [#allocation5 + $0x1], 0  ;;  %s11938_s21 = smov 0   ;;  %s11940_s22 = smov 0  }
   0x3   :  { %s11942_s23 = smov 0   ;;  %s11944_s24 = smov 0  }
   0x4 LB: > { %s11959_s25 = sadd.s32 4294967295, %s11895_s24   ;;  %s10553_s26 = sadd.s32 4294967294, %s11895_s24   ;;  %s11895_s24 = sphi %s11944_s24, %s16447_s24   ;;  %s11891_s23 = sphi %s11942_s23, %s16446_s23   ;;  %s11887_s22 = sphi %s11940_s22, %s16445_s22   ;;  %s11883_s21 = sphi %s11938_s21, %s16444_s21  }
   0x5   : > { %s11963_s27 = sadd.s32 1, %s11895_s24   ;;  %s158_s28 = sadd.s32 1, %s11891_s23 }
   0x6   : > { %s155_s29 = ssub.s32 %s11895_s24, %s11963_s27  ;;  %p168_p0 = scmp.ne.s32.totalorder %s11891_s23, %s11887_s22 }
   0x7   : > { %p156_p1 = scmp.eq.s32.totalorder %s155_s29, 0  ;;  %p169_p2 = scmp.eq.s32.totalorder %s11959_s25, 1 }
   0x8   : > { %p174_p3 = scmp.ne.s32.totalorder %s11887_s22, %s11883_s21  ;;  %p175_p4 = scmp.eq.s32.totalorder %s10553_s26, 1 }
   0x9   : > { %s11974_s30 = scalar_select %p156_p1, %s11891_s23, %s158_s28  }
   0xa   : > { %p11976_p5 = por %p169_p2, %p168_p0  ;;  %p11980_p6 = por %p175_p4, %p174_p3 }
   0xb   : > { %p10554_p7 = scmp.ge.s32.totalorder %s11895_s24, 1  ;;  %p182_p8 = scmp.lt.s32.totalorder %s11895_s24, 3 }
   0xc   : > { %p11689_p9 = scmp.eq.s32.totalorder %s11959_s25, 0  ;;  %s196_s11 = sshll.u32 %s15944_s2, 4  ;;  %s197_s11 = int_to_ptr.hbm [resolvable:$true] %s196_s11 }
   0xd   : > { %p183_p10 = pnand %p10554_p7, %p182_p8  ;;  %s11897_s12 = smov [#allocation3]  }
   0xe   : > { %s198_s13 = sshll.u32 %s11897_s12, 4  ;;  %s11898_s14 = smov 64   ;;  %s199_s13 = int_to_ptr.vmem [resolvable:$true] %s198_s13 }
   0xf   : > { %p11681_p11 = pneg %p183_p10  ;;  %s11899_s15 = smov 4  }
  0x10   : > { %231 = sbr.rel (%p183_p10) target bundleno = 1638 (0x666), region = 44 }
  0x11   : > { %p11682_p12 = pnand %p11689_p9, %p11681_p11 }
  0x13   : > { %11684 = dma.hbm_to_vmem [thread:$0]  (!%p11682_p12), %s197_s11, 9216, %s199_s13, [#allocation4], %s11898_s14, %s11898_s14, %s11899_s15  }
  0x15   : > { %11874 = dma.done.wait (%p11689_p9), [#allocation4], 9216  }
  0x16   : > { %11876 = vsyncadd (%p11689_p9), [#allocation4], 4294958080  ;;  %p262_p13 = scmp.lt.s32.totalorder %s11959_s25, 1  ;;  %vm803_vm0 = vcmask 1041408   ;;  %vm1164_vm1 = vcmask 1042432   ;;  %vm1165_vm2 = vcmask 1046532  }
  0x17   : > { %vm754_vm3 = vcmask 31744   ;;  %vm317_vm4 = vsmask.f32 3328  ;;  %vm318_vm5 = vsmask.f32 7440  ;;  %vm12012_vm6 = vmor %vm1164_vm1, %vm1165_vm2  ;;  %vm4365_vm8 = vcmask 1040384  }
  0x18   : > { %s263_s16 = scalar_select %p262_p13, %s11959_s25, 1  ;;  %v10674_v0 = vld [vmem:[%s15943_s1 + $0x4] sm:$0x3]  ;;  %v10561_v10 = vld [vmem:[%s15943_s1 + $0x2] sm:$0x3]  ;;  %vm12040_vm7 = vmor %vm317_vm4, %vm318_vm5  ;;  %vm4366_vm9 = vcmask 1044484  }
  0x19   : > { %v12009_v3 = vsel %vm803_vm0, %v10674_v0, 0  ;;  %v300_v11 = vld [vmem:[%s15943_s1] sm:$0x3]  ;;  %v805_v14 = vsel %vm803_vm0, %v10561_v10, 0  ;;  %v10852_v43 = vld [vmem:[%s15943_s1 + $0x8] sm:$0x3]  ;;  %vm13387_vm10 = vmor %vm4365_vm8, %vm4366_vm9 }
  0x1a   : > { %s11674_s17 = smul.u32 216, %s263_s16  ;;  %1387 = vmatpush.bf16.msra.mxu2 %v12009_v3  ;;  %v1025_v15 = vsel %vm803_vm0, %v300_v11, 0  ;;  %814 = vmatpush.bf16.msra.mxu0 %v805_v14  ;;  %v2319_v59 = vsel %vm803_vm0, %v10852_v43, 0  ;;  %vm5604_vm11 = vsmask.f32 2304  ;;  %s259_s18 = sand.u32 1, %s11887_s22  }
  0x1b   : > { %11671 = vmatpush.bf16.msra.mxu3 %v805_v14  ;;  %1034 = vmatpush.bf16.msra.mxu1 %v1025_v15  ;;  %vm5605_vm12 = vsmask.f32 6416  ;;  %s10559_s28 = sshll.u32 %s259_s18, 8  ;;  %s11670_s10 = sshll.u32 %s11959_s25, 8 }
  0x1c   : > { %s12001_s20 = scalar_lea.vmem %s15942_s0, %s11674_s17  ;;  %vm13779_vm13 = vmor %vm5604_vm11, %vm5605_vm12  ;;  %s15568_s29 = scalar_lea.vmem [#allocation6], %s10559_s28 }
  0x1d   : > { %v269_v1 = vld [vmem:[%s12001_s20 + $0x4] sm:$0xf]  ;;  %v301_v2 = vld [vmem:[%s12001_s20 + $0x8] sm:$0x1]  ;;  %v1116_v4 = vld [vmem:[%s12001_s20] sm:$0xe]  ;;  %s10475_s13 = scalar_lea.hbm %s15948_s6, %s11670_s10 }
  0x1e   : > { %v1169_v6 = vrot.slane %v269_v1, 5  ;;  %v1172_v7 = vrot.slane %v301_v2, 5  ;;  %v330_v8 = vshll.u32 %v269_v1, 16  ;;  %v10658_v9 = vrot.slane %v1116_v4, 9  ;;  %v268_v16 = vld [vmem:[%s12001_s20] sm:$0xf]  ;;  %2328 = vmatpush.bf16.msrb.mxu0 %v2319_v59 }
  0x1f   : > { %v334_v12 = vshrl.u32 %v269_v1, 16  ;;  %v321_v19 = vshrl.u32 %v268_v16, 16  ;;  %v324_v20 = vshll.u32 %v268_v16, 16  ;;  %v292_v22 = vld [vmem:[%s12001_s20 + $0x90] sm:$0xf]  ;;  %v11550_v23 = vld [vmem:[%s12001_s20] sm:$0xff]  ;;  %11672 = vmatpush.bf16.msrb.mxu3 %v1025_v15 }
  0x20   : > { %v1171_v13 = vrot.slane %v1169_v6, 4  ;;  %v332_v17 = vrot.slane %v330_v8, 5  ;;  %v1170_v18 = vsel %vm12012_vm6, %v10658_v9, %v1169_v6  ;;  %v340_v26 = vshll.u32 %v301_v2, 16  ;;  %v12033_v27 = vld [vmem:[%s12001_s20 + $0x94] sm:$0xf]  ;;  %10642 = vmatmul.msk.bf16.vlgmr.msra.gmra.mxu1 %vm754_vm3, %v11550_v23  ;;  %s10476_s14 = sshll.u32 %s15568_s29, 4  ;;  %s10477_s14 = int_to_ptr.vmem [resolvable:$true] %s10476_s14 }
  0x21   : > { %v336_v21 = vrot.slane %v334_v12, 4  ;;  %v1281_v25 = vunpack.c.l.b16 %v1170_v18  ;;  %v609_v28 = vshrl.u32 %v292_v22, 16  ;;  %v323_v30 = vrot.slane %v321_v19, 4  ;;  %v12036_v33 = vld [vmem:[%s12001_s20 + $0x98] sm:$0x1]  ;;  %s10478_s15 = sshll.u32 %s10475_s13, 4  ;;  %s10479_s15 = int_to_ptr.hbm [resolvable:$true] %s10478_s15 }
  0x22   : > { %v1173_v24 = vsel %vm12012_vm6, %v1171_v13, %v1172_v7  ;;  %v326_v31 = vrot.slane %v324_v20, 5  ;;  %v342_v35 = vrot.slane %v340_v26, 5  ;;  %v612_v37 = vshll.u32 %v292_v22, 16  ;;  %v1117_v47 = vld [vmem:[%s12001_s20 + $0xc] sm:$0xe]  ;;  %s10464_s25 = scalar_lea.sflag [#allocation5], %s259_s18 }
  0x23   : > { %v1282_v29 = vunpack.c.l.b16 %v1173_v24  ;;  %v337_v32 = vor.u32 %v336_v21, %v332_v17  ;;  %v611_v36 = vrot.slane %v609_v28, 4  ;;  %v618_v38 = vshll.u32 %v12033_v27, 16  ;;  %v271_v51 = vld [vmem:[%s12001_s20 + $0x10] sm:$0xf]  ;;  %v302_v52 = vld [vmem:[%s12001_s20 + $0x14] sm:$0x1] }
  0x24   : > { %v327_v40 = vor.u32 %v326_v31, %v323_v30  ;;  %v622_v42 = vshrl.u32 %v12033_v27, 16  ;;  %v614_v44 = vrot.slane %v612_v37, 5  ;;  %v628_v46 = vshll.u32 %v12036_v33, 16  ;;  %v270_v56 = vld [vmem:[%s12001_s20 + $0xc] sm:$0xf]  ;;  %s11843_s16 = sshra.s32 %s10479_s15, 4  ;;  %s11844_s16 = int_to_ptr.hbm [resolvable:$true] %s11843_s16 }
  0x25   : > { %v1313_v39 = vpack.c.b16 %v1282_v29, %v1281_v25  ;;  %v338_v41 = vrot.slane %v337_v32, 4  ;;  %v620_v45 = vrot.slane %v618_v38, 5  ;;  %v10659_v60 = vrot.slane %v1117_v47, 9  ;;  %v294_v11 = vld [vmem:[%s12001_s20 + $0x9c] sm:$0xf]  ;;  %s11845_s17 = scalar_lea.hbm %s11844_s16, 256  ;;  %p11850_p3 = scmp.lt.s32.totalorder %s11844_s16, %s15948_s6 }
  0x26   : > { %v328_v48 = vrot.slane %v327_v40, 4  ;;  %v624_v50 = vrot.slane %v622_v42, 4  ;;  %v615_v54 = vor.u32 %v614_v44, %v611_v36  ;;  %v630_v55 = vrot.slane %v628_v46, 5  ;;  %v12067_v12 = vld [vmem:[%s12001_s20 + $0xa0] sm:$0xf]  ;;  %p11846_p0 = scmp.ne.s32.totalorder %s11844_s16, %s11845_s17  ;;  %s11849_s28 = scalar_lea.hbm %s15948_s6, 512 }
  0x27   : > { %10675 = vmatmul.msk.bf16.vlgmr.msra.gmra.mxu2 %vm754_vm3, %v1313_v39  ;;  %v343_v49 = vsel %vm12040_vm7, %v338_v41, %v342_v35  ;;  %v1176_v63 = vrot.slane %v271_v51, 5  ;;  %v1179_v0 = vrot.slane %v302_v52, 5  ;;  %v345_v2 = vshrl.u32 %v270_v56, 16  ;;  %v12075_v24 = vld [vmem:[%s12001_s20 + $0xa4] sm:$0x1]  ;;  %v11551_v39 = vld [vmem:[%s12001_s20 + $0xc] sm:$0xff]  ;;  %p11851_p4 = scmp.lt.s32.totalorder %s11849_s28, %s11845_s17 }
  0x28   : > { %v707_v53 = vunpack.c.l.b16 %v343_v49  ;;  %v333_v57 = vsel %vm12040_vm7, %v328_v48, %v332_v17  ;;  %v625_v58 = vor.u32 %v624_v50, %v620_v45  ;;  %v616_v62 = vrot.slane %v615_v54, 4  ;;  %v273_v31 = vld [vmem:[%s12001_s20 + $0x1c] sm:$0xf]  ;;  %v1118_v32 = vld [vmem:[%s12001_s20 + $0x18] sm:$0xe]  ;;  %p11847_p1 = pnand %p11846_p0, %p11976_p5 }
  0x29   : > { %v706_v61 = vunpack.c.l.b16 %v333_v57  ;;  %v348_v4 = vshll.u32 %v270_v56, 16  ;;  %v354_v6 = vshll.u32 %v271_v51, 16  ;;  %v1177_v9 = vsel %vm12012_vm6, %v10659_v60, %v1176_v63  ;;  %v303_v40 = vld [vmem:[%s12001_s20 + $0x20] sm:$0x1]  ;;  %p11852_p7 = por %p11851_p4, %p11850_p3 }
  0x2a   : > { %v626_v1 = vrot.slane %v625_v58, 4  ;;  %v621_v8 = vsel %vm12040_vm7, %v616_v62, %v620_v45  ;;  %v1178_v10 = vrot.slane %v1176_v63, 4  ;;  %v1283_v15 = vunpack.c.l.b16 %v1177_v9  ;;  %p11848_p2 = pneg %p11847_p1 }
  0x2b   : > { %v738_v7 = vpack.c.b16 %v707_v53, %v706_v61  ;;  %v730_v14 = vunpack.c.l.b16 %v621_v8  ;;  %v347_v16 = vrot.slane %v345_v2, 4  ;;  %v350_v19 = vrot.slane %v348_v4, 5  ;;  %v272_v53 = vld [vmem:[%s12001_s20 + $0x18] sm:$0xf] }
  0x2c   : > { %v631_v13 = vsel %vm12040_vm7, %v626_v1, %v630_v55  ;;  %v1180_v18 = vsel %vm12012_vm6, %v1178_v10, %v1179_v0  ;;  %v356_v20 = vrot.slane %v354_v6, 5  ;;  %v358_v22 = vshrl.u32 %v271_v51, 16  ;;  %v296_v10 = vld [vmem:[%s12001_s20 + $0xa8] sm:$0xf]  ;;  %p11853_p8 = pnand %p11852_p7, %p11848_p2 }
  0x2d   : > { %10562 = vmatmul.msk.bf16.vlgmr.msra.gmra.mxu0 %vm754_vm3, %v738_v7  ;;  %v731_v17 = vunpack.c.l.b16 %v631_v13  ;;  %v1284_v21 = vunpack.c.l.b16 %v1180_v18  ;;  %v364_v23 = vshll.u32 %v302_v52, 16  ;;  %v633_v25 = vshrl.u32 %v294_v11, 16 }
  0x2e   : > { %v351_v28 = vor.u32 %v350_v19, %v347_v16  ;;  %v636_v29 = vshll.u32 %v294_v11, 16  ;;  %v642_v30 = vshll.u32 %v12067_v12, 16  ;;  %v360_v36 = vrot.slane %v358_v22, 4  ;;  %v12101_v11 = vld [vmem:[%s12001_s20 + $0xac] sm:$0xf] }
  0x2f   : > { %v750_v26 = vpack.c.b16 %v731_v17, %v730_v14  ;;  %v1314_v35 = vpack.c.b16 %v1284_v21, %v1283_v15  ;;  %v366_v37 = vrot.slane %v364_v23, 5  ;;  %v635_v38 = vrot.slane %v633_v25, 4  ;;  %v12106_v22 = vld [vmem:[%s12001_s20 + $0xb0] sm:$0x1] }
  0x30   : > { %v352_v41 = vrot.slane %v351_v28, 4  ;;  %v638_v42 = vrot.slane %v636_v29, 5  ;;  %v644_v43 = vrot.slane %v642_v30, 5  ;;  %v646_v44 = vshrl.u32 %v12067_v12, 16  ;;  %10643 = vmatmul.msk.bf16.gmra.mxu1 %vm754_vm3, %v11551_v39  ;;  %v274_v39 = vld [vmem:[%s12001_s20 + $0x24] sm:$0xf] }
  0x31   : > { %10574 = vmatmul.msk.bf16.vlgmr.msra.gmra.mxu3 %vm754_vm3, %v750_v26  ;;  %v361_v45 = vor.u32 %v360_v36, %v356_v20  ;;  %v652_v46 = vshll.u32 %v12075_v24, 16  ;;  %v10660_v47 = vrot.slane %v1118_v32, 9  ;;  %v1183_v48 = vrot.slane %v273_v31, 5 }
  0x32   : > { %11673 = vmatpush.bf16.msra.mxu3 %v12009_v3  ;;  %v357_v49 = vsel %vm12040_vm7, %v352_v41, %v356_v20  ;;  %v639_v50 = vor.u32 %v638_v42, %v635_v38  ;;  %v648_v51 = vrot.slane %v646_v44, 4  ;;  %v1186_v52 = vrot.slane %v303_v40, 5 }
  0x33   : > { %v362_v54 = vrot.slane %v361_v45, 4  ;;  %v708_v55 = vunpack.c.l.b16 %v357_v49  ;;  %v654_v56 = vrot.slane %v652_v46, 5  ;;  %v1184_v59 = vsel %vm12012_vm6, %v10660_v47, %v1183_v48  ;;  %v304_v45 = vld [vmem:[%s12001_s20 + $0x2c] sm:$0x1]  ;;  %v1119_v46 = vld [vmem:[%s12001_s20 + $0x24] sm:$0xe] }
  0x34   : > { %v640_v57 = vrot.slane %v639_v50, 4  ;;  %v649_v58 = vor.u32 %v648_v51, %v644_v43  ;;  %v1185_v3 = vrot.slane %v1183_v48, 4  ;;  %v369_v61 = vshrl.u32 %v272_v53, 16  ;;  %v11552_v49 = vld [vmem:[%s12001_s20 + $0x18] sm:$0xff] }
  0x35   : > { %v367_v60 = vsel %vm12040_vm7, %v362_v54, %v366_v37  ;;  %v372_v62 = vshll.u32 %v272_v53, 16  ;;  %v378_v63 = vshll.u32 %v273_v31, 16  ;;  %v1285_v7 = vunpack.c.l.b16 %v1184_v59 }
  0x36   : > { %v709_v0 = vunpack.c.l.b16 %v367_v60  ;;  %v645_v1 = vsel %vm12040_vm7, %v640_v57, %v644_v43  ;;  %v650_v2 = vrot.slane %v649_v58, 4  ;;  %v1187_v4 = vsel %vm12012_vm6, %v1185_v3, %v1186_v52 }
  0x37   : > { %10676 = vmatmul.msk.bf16.gmra.mxu2 %vm754_vm3, %v1314_v35  ;;  %v732_v6 = vunpack.c.l.b16 %v645_v1  ;;  %v371_v8 = vrot.slane %v369_v61, 4  ;;  %v374_v9 = vrot.slane %v372_v62, 5  ;;  %v380_v15 = vrot.slane %v378_v63, 5  ;;  %v298_v62 = vld [vmem:[%s12001_s20 + $0xb4] sm:$0xf] }
  0x38   : > { %v739_v13 = vpack.c.b16 %v709_v0, %v708_v55  ;;  %v655_v14 = vsel %vm12040_vm7, %v650_v2, %v654_v56  ;;  %v382_v16 = vshrl.u32 %v273_v31, 16  ;;  %v1286_v18 = vunpack.c.l.b16 %v1187_v4  ;;  %v275_v31 = vld [vmem:[%s12001_s20 + $0x28] sm:$0xf]  ;;  %v12127_v1 = vld [vmem:[%s12001_s20 + $0xb8] sm:$0xf] }
  0x39   : > { %v733_v17 = vunpack.c.l.b16 %v655_v14  ;;  %v375_v19 = vor.u32 %v374_v9, %v371_v8  ;;  %v388_v20 = vshll.u32 %v303_v40, 16  ;;  %v657_v23 = vshrl.u32 %v296_v10, 16 }
  0x3a   : > { %v384_v21 = vrot.slane %v382_v16, 4  ;;  %v660_v25 = vshll.u32 %v296_v10, 16  ;;  %v666_v26 = vshll.u32 %v12101_v11, 16  ;;  %v670_v32 = vshrl.u32 %v12101_v11, 16 }
  0x3b   : > { %v751_v28 = vpack.c.b16 %v733_v17, %v732_v6  ;;  %v376_v29 = vrot.slane %v375_v19, 4  ;;  %v390_v30 = vrot.slane %v388_v20, 5  ;;  %v659_v36 = vrot.slane %v657_v23, 4 }
  0x3c   : > { %v385_v35 = vor.u32 %v384_v21, %v380_v15  ;;  %v662_v37 = vrot.slane %v660_v25, 5  ;;  %v668_v38 = vrot.slane %v666_v26, 5  ;;  %v672_v40 = vrot.slane %v670_v32, 4 }
  0x3d   : > { %10563 = vmatmul.msk.bf16.gmra.mxu0 %vm754_vm3, %v739_v13  ;;  %v676_v41 = vshll.u32 %v12106_v22, 16  ;;  %v381_v42 = vsel %vm12040_vm7, %v376_v29, %v380_v15  ;;  %v1190_v47 = vrot.slane %v275_v31, 5  ;;  %v393_v50 = vshrl.u32 %v274_v39, 16 }
  0x3e   : > { %v386_v43 = vrot.slane %v385_v35, 4  ;;  %v663_v44 = vor.u32 %v662_v37, %v659_v36  ;;  %v673_v48 = vor.u32 %v672_v40, %v668_v38  ;;  %v1315_v51 = vpack.c.b16 %v1286_v18, %v1285_v7 }
  0x3f   : > { %v678_v54 = vrot.slane %v676_v41, 5  ;;  %v710_v55 = vunpack.c.l.b16 %v381_v42  ;;  %v10661_v57 = vrot.slane %v1119_v46, 9  ;;  %v1193_v58 = vrot.slane %v304_v45, 5  ;;  %v277_v41 = vld [vmem:[%s12001_s20 + $0x34] sm:$0xf]  ;;  %v11553_v46 = vld [vmem:[%s12001_s20 + $0x24] sm:$0xff] }
  0x40   : > { %v391_v52 = vsel %vm12040_vm7, %v386_v43, %v390_v30  ;;  %v664_v53 = vrot.slane %v663_v44, 4  ;;  %v674_v56 = vrot.slane %v673_v48, 4  ;;  %v1192_v3 = vrot.slane %v1190_v47, 4  ;;  %10644 = vmatmul.msk.bf16.gmra.mxu1 %vm754_vm3, %v11552_v49  ;;  %v276_v43 = vld [vmem:[%s12001_s20 + $0x30] sm:$0xf] }
  0x41   : > { %10575 = vmatmul.msk.bf16.gmra.mxu3 %vm754_vm3, %v751_v28  ;;  %v711_v59 = vunpack.c.l.b16 %v391_v52  ;;  %v396_v60 = vshll.u32 %v274_v39, 16  ;;  %v402_v61 = vshll.u32 %v275_v31, 16  ;;  %v395_v0 = vrot.slane %v393_v50, 4  ;;  %v12139_v28 = vld [vmem:[%s12001_s20 + $0xbc] sm:$0x1] }
  0x42   : > { %v669_v63 = vsel %vm12040_vm7, %v664_v53, %v668_v38  ;;  %v679_v2 = vsel %vm12040_vm7, %v674_v56, %v678_v54  ;;  %v406_v7 = vshrl.u32 %v275_v31, 16  ;;  %v1191_v8 = vsel %vm12012_vm6, %v10661_v57, %v1190_v47  ;;  %v305_v47 = vld [vmem:[%s12001_s20 + $0x38] sm:$0x1]  ;;  %v1120_v52 = vld [vmem:[%s12001_s20 + $0x30] sm:$0xe] }
  0x43   : > { %v398_v4 = vrot.slane %v396_v60, 5  ;;  %v404_v6 = vrot.slane %v402_v61, 5  ;;  %v681_v9 = vshrl.u32 %v298_v62, 16  ;;  %v684_v10 = vshll.u32 %v298_v62, 16 }
  0x44   : > { %v740_v13 = vpack.c.b16 %v711_v59, %v710_v55  ;;  %v1194_v14 = vsel %vm12012_vm6, %v1192_v3, %v1193_v58  ;;  %v408_v15 = vrot.slane %v406_v7, 4  ;;  %v690_v16 = vshll.u32 %v12127_v1, 16 }
  0x45   : > { %v734_v17 = vunpack.c.l.b16 %v669_v63  ;;  %v735_v18 = vunpack.c.l.b16 %v679_v2  ;;  %v399_v19 = vor.u32 %v398_v4, %v395_v0  ;;  %v694_v20 = vshrl.u32 %v12127_v1, 16 }
  0x46   : > { %v409_v21 = vor.u32 %v408_v15, %v404_v6  ;;  %v412_v23 = vshll.u32 %v304_v45, 16  ;;  %v683_v25 = vrot.slane %v681_v9, 4  ;;  %v686_v26 = vrot.slane %v684_v10, 5 }
  0x47   : > { %10677 = vmatmul.msk.bf16.gmra.mxu2 %vm754_vm3, %v1315_v51  ;;  %v692_v29 = vrot.slane %v690_v16, 5  ;;  %v696_v30 = vrot.slane %v694_v20, 4  ;;  %v752_v32 = vpack.c.b16 %v735_v18, %v734_v17  ;;  %v1287_v31 = vunpack.c.l.b16 %v1191_v8 }
  0x48   : > { %v1288_v35 = vunpack.c.l.b16 %v1194_v14  ;;  %v400_v36 = vrot.slane %v399_v19, 4  ;;  %v410_v37 = vrot.slane %v409_v21, 4  ;;  %v414_v38 = vrot.slane %v412_v23, 5 }
  0x49   : > { %v687_v39 = vor.u32 %v686_v26, %v683_v25  ;;  %v700_v40 = vshll.u32 %v12139_v28, 16  ;;  %v697_v42 = vor.u32 %v696_v30, %v692_v29  ;;  %v1197_v48 = vrot.slane %v277_v41, 5  ;;  %v278_v25 = vld [vmem:[%s12001_s20 + $0x3c] sm:$0xf]  ;;  %v279_v26 = vld [vmem:[%s12001_s20 + $0x40] sm:$0xf] }
  0x4a   : > { %v1316_v44 = vpack.c.b16 %v1288_v35, %v1287_v31  ;;  %v405_v45 = vsel %vm12040_vm7, %v400_v36, %v404_v6  ;;  %v415_v49 = vsel %vm12040_vm7, %v410_v37, %v414_v38  ;;  %v417_v53 = vshrl.u32 %v276_v43, 16  ;;  %v1121_v37 = vld [vmem:[%s12001_s20 + $0x3c] sm:$0xe] }
  0x4b   : > { %v688_v50 = vrot.slane %v687_v39, 4  ;;  %v702_v51 = vrot.slane %v700_v40, 5  ;;  %v698_v54 = vrot.slane %v697_v42, 4  ;;  %v420_v55 = vshll.u32 %v276_v43, 16 }
  0x4c   : > { %v426_v56 = vshll.u32 %v277_v41, 16  ;;  %v430_v57 = vshrl.u32 %v277_v41, 16  ;;  %v712_v58 = vunpack.c.l.b16 %v405_v45  ;;  %v10662_v59 = vrot.slane %v1120_v52, 9  ;;  %v306_v41 = vld [vmem:[%s12001_s20 + $0x44] sm:$0x1] }
  0x4d   : > { %10564 = vmatmul.msk.bf16.gmra.mxu0 %vm754_vm3, %v740_v13  ;;  %v1200_v3 = vrot.slane %v305_v47, 5  ;;  %v713_v60 = vunpack.c.l.b16 %v415_v49  ;;  %v693_v61 = vsel %vm12040_vm7, %v688_v50, %v692_v29  ;;  %v1199_v62 = vrot.slane %v1197_v48, 4  ;;  %v11554_v29 = vld [vmem:[%s12001_s20 + $0x30] sm:$0xff] }
  0x4e   : > { %v419_v63 = vrot.slane %v417_v53, 4  ;;  %v703_v0 = vsel %vm12040_vm7, %v698_v54, %v702_v51  ;;  %v422_v2 = vrot.slane %v420_v55, 5  ;;  %v428_v4 = vrot.slane %v426_v56, 5 }
  0x4f   : > { %v432_v6 = vrot.slane %v430_v57, 4  ;;  %v741_v7 = vpack.c.b16 %v713_v60, %v712_v58  ;;  %v736_v8 = vunpack.c.l.b16 %v693_v61  ;;  %v737_v9 = vunpack.c.l.b16 %v703_v0  ;;  %v11562_v57 = vld [vmem:[%s12001_s20 + $0x90] sm:$0xff]  ;;  %v11555_v0 = vld [vmem:[%s12001_s20 + $0x3c] sm:$0xff] }
  0x50   : > { %10645 = vmatmul.msk.bf16.gmra.mxu1 %vm754_vm3, %v11553_v46  ;;  %v1198_v10 = vsel %vm12012_vm6, %v10662_v59, %v1197_v48  ;;  %v1201_v13 = vsel %vm12012_vm6, %v1199_v62, %v1200_v3  ;;  %v423_v14 = vor.u32 %v422_v2, %v419_v63  ;;  %v436_v16 = vshll.u32 %v305_v47, 16  ;;  %v281_v59 = vld [vmem:[%s12001_s20 + $0x4c] sm:$0xf]  ;;  %v280_v3 = vld [vmem:[%s12001_s20 + $0x48] sm:$0xf] }
  0x51   : > { %10576 = vmatmul.msk.bf16.gmra.mxu3 %vm754_vm3, %v752_v32  ;;  %v433_v15 = vor.u32 %v432_v6, %v428_v4  ;;  %v753_v17 = vpack.c.b16 %v737_v9, %v736_v8  ;;  %v1289_v18 = vunpack.c.l.b16 %v1198_v10  ;;  %v1290_v19 = vunpack.c.l.b16 %v1201_v13  ;;  %v307_v13 = vld [vmem:[%s12001_s20 + $0x50] sm:$0x1] }
  0x52   : > { %v424_v20 = vrot.slane %v423_v14, 4  ;;  %v438_v23 = vrot.slane %v436_v16, 5  ;;  %v441_v32 = vshrl.u32 %v278_v25, 16  ;;  %v444_v31 = vshll.u32 %v278_v25, 16 }
  0x53   : > { %v434_v21 = vrot.slane %v433_v15, 4  ;;  %v1317_v30 = vpack.c.b16 %v1290_v19, %v1289_v18  ;;  %v450_v38 = vshll.u32 %v279_v26, 16  ;;  %v454_v39 = vshrl.u32 %v279_v26, 16  ;;  %v1122_v15 = vld [vmem:[%s12001_s20 + $0x48] sm:$0xe] }
  0x54   : > { %v429_v35 = vsel %vm12040_vm7, %v424_v20, %v428_v4  ;;  %v1204_v40 = vrot.slane %v279_v26, 5  ;;  %v443_v45 = vrot.slane %v441_v32, 4  ;;  %v446_v46 = vrot.slane %v444_v31, 5 }
  0x55   : > { %v439_v36 = vsel %vm12040_vm7, %v434_v21, %v438_v23  ;;  %v714_v42 = vunpack.c.l.b16 %v429_v35  ;;  %v452_v47 = vrot.slane %v450_v38, 5  ;;  %v456_v48 = vrot.slane %v454_v39, 4 }
  0x56   : > { %v715_v43 = vunpack.c.l.b16 %v439_v36  ;;  %v1206_v49 = vrot.slane %v1204_v40, 4  ;;  %v1207_v50 = vrot.slane %v306_v41, 5  ;;  %v447_v53 = vor.u32 %v446_v46, %v443_v45 }
  0x57   : > { %10678 = vmatmul.msk.bf16.gmra.mxu2 %vm754_vm3, %v1316_v44  ;;  %v10663_v44 = vrot.slane %v1121_v37, 9  ;;  %v457_v54 = vor.u32 %v456_v48, %v452_v47  ;;  %v460_v55 = vshll.u32 %v306_v41, 16  ;;  %v465_v2 = vshrl.u32 %v280_v3, 16  ;;  %v283_v41 = vld [vmem:[%s12001_s20 + $0x58] sm:$0xf] }
  0x58   : > { %v742_v51 = vpack.c.b16 %v715_v43, %v714_v42  ;;  %v1208_v56 = vsel %vm12012_vm6, %v1206_v49, %v1207_v50  ;;  %v448_v61 = vrot.slane %v447_v53, 4  ;;  %v468_v4 = vshll.u32 %v280_v3, 16  ;;  %v308_v48 = vld [vmem:[%s12001_s20 + $0x5c] sm:$0x1]  ;;  %v1123_v50 = vld [vmem:[%s12001_s20 + $0x54] sm:$0xe] }
  0x59   : > { %v1205_v52 = vsel %vm12012_vm6, %v10663_v44, %v1204_v40  ;;  %v1292_v60 = vunpack.c.l.b16 %v1208_v56  ;;  %v458_v62 = vrot.slane %v457_v54, 4  ;;  %v462_v63 = vrot.slane %v460_v55, 5  ;;  %v11563_v40 = vld [vmem:[%s12001_s20 + $0x9c] sm:$0xff]  ;;  %v282_v44 = vld [vmem:[%s12001_s20 + $0x54] sm:$0xf] }
  0x5a   : > { %v1291_v58 = vunpack.c.l.b16 %v1205_v52  ;;  %v474_v6 = vshll.u32 %v281_v59, 16  ;;  %v453_v9 = vsel %vm12040_vm7, %v448_v61, %v452_v47  ;;  %v1211_v14 = vrot.slane %v281_v59, 5  ;;  %v11556_v47 = vld [vmem:[%s12001_s20 + $0x48] sm:$0xff] }
  0x5b   : > { %v463_v10 = vsel %vm12040_vm7, %v458_v62, %v462_v63  ;;  %v467_v16 = vrot.slane %v465_v2, 4  ;;  %v716_v20 = vunpack.c.l.b16 %v453_v9  ;;  %v10664_v23 = vrot.slane %v1122_v15, 9 }
  0x5c   : > { %v1318_v8 = vpack.c.b16 %v1292_v60, %v1291_v58  ;;  %v476_v18 = vrot.slane %v474_v6, 5  ;;  %v717_v21 = vunpack.c.l.b16 %v463_v10  ;;  %v1213_v25 = vrot.slane %v1211_v14, 4 }
  0x5d   : > { %10565 = vmatmul.msk.bf16.gmra.mxu0 %vm754_vm3, %v741_v7  ;;  %v478_v7 = vshrl.u32 %v281_v59, 16  ;;  %v1214_v26 = vrot.slane %v307_v13, 5  ;;  %v484_v32 = vshll.u32 %v307_v13, 16  ;;  %v1212_v35 = vsel %vm12012_vm6, %v10664_v23, %v1211_v14  ;;  %v1128_v13 = vld [vmem:[%s12001_s20 + $0x90] sm:$0xe] }
  0x5e   : > { %v743_v31 = vpack.c.b16 %v717_v21, %v716_v20  ;;  %v1293_v42 = vunpack.c.l.b16 %v1212_v35  ;;  %v1218_v49 = vrot.slane %v283_v41, 5  ;;  %v492_v52 = vshll.u32 %v282_v44, 16 }
  0x5f   : > { %v480_v19 = vrot.slane %v478_v7, 4  ;;  %v1215_v36 = vsel %vm12012_vm6, %v1213_v25, %v1214_v26  ;;  %v486_v39 = vrot.slane %v484_v32, 5  ;;  %v498_v53 = vshll.u32 %v283_v41, 16  ;;  %v284_v26 = vld [vmem:[%s12001_s20 + $0x60] sm:$0xf]  ;;  %v11557_v32 = vld [vmem:[%s12001_s20 + $0x54] sm:$0xff] }
  0x60   : > { %10646 = vmatmul.msk.bf16.gmra.mxu1 %vm754_vm3, %v11554_v29  ;;  %v1294_v43 = vunpack.c.l.b16 %v1215_v36  ;;  %v502_v54 = vshrl.u32 %v283_v41, 16  ;;  %v1253_v56 = vrot.slane %v12033_v27, 5  ;;  %v10665_v59 = vrot.slane %v1123_v50, 9 }
  0x61   : > { %10577 = vmatmul.msk.bf16.gmra.mxu3 %vm754_vm3, %v753_v17  ;;  %v470_v17 = vrot.slane %v468_v4, 5  ;;  %v1220_v3 = vrot.slane %v1218_v49, 4  ;;  %v1221_v60 = vrot.slane %v308_v48, 5  ;;  %v494_v62 = vrot.slane %v492_v52, 5 }
  0x62   : > { %v1319_v55 = vpack.c.b16 %v1294_v43, %v1293_v42  ;;  %v500_v63 = vrot.slane %v498_v53, 5  ;;  %v1255_v2 = vrot.slane %v1253_v56, 4  ;;  %v1256_v4 = vrot.slane %v12036_v33, 5 }
  0x63   : > { %v471_v29 = vor.u32 %v470_v17, %v467_v16  ;;  %v1219_v27 = vsel %vm12012_vm6, %v10665_v59, %v1218_v49  ;;  %v508_v6 = vshll.u32 %v308_v48, 16  ;;  %v10670_v14 = vrot.slane %v1128_v13, 9 }
  0x64   : > { %v1295_v15 = vunpack.c.l.b16 %v1219_v27 }
  0x65   : > { %v472_v37 = vrot.slane %v471_v29, 4  ;;  %v510_v17 = vrot.slane %v508_v6, 5  ;;  %v1254_v33 = vsel %vm12012_vm6, %v10670_v14, %v1253_v56  ;;  %v285_v29 = vld [vmem:[%s12001_s20 + $0x64] sm:$0xf] }
  0x66   : > { %v1305_v23 = vunpack.c.l.b16 %v1254_v33  ;;  %v522_v41 = vshll.u32 %v285_v29, 16  ;;  %v526_v42 = vshrl.u32 %v285_v29, 16  ;;  %v11558_v6 = vld [vmem:[%s12001_s20 + $0x60] sm:$0xff] }
  0x67   : > { %10679 = vmatmul.msk.bf16.gmra.mxu2 %vm754_vm3, %v1317_v30  ;;  %v481_v30 = vor.u32 %v480_v19, %v476_v18  ;;  %v477_v45 = vsel %vm12040_vm7, %v472_v37, %v476_v18  ;;  %v1257_v18 = vsel %vm12012_vm6, %v1255_v2, %v1256_v4  ;;  %v11564_v19 = vld [vmem:[%s12001_s20 + $0xa8] sm:$0xff]  ;;  %v513_v37 = vshrl.u32 %v284_v26, 16 }
  0x68   : > { %v1306_v25 = vunpack.c.l.b16 %v1257_v18  ;;  %v528_v52 = vrot.slane %v526_v42, 4  ;;  %v1125_v18 = vld [vmem:[%s12001_s20 + $0x6c] sm:$0xe] }
  0x69   : > { %v482_v38 = vrot.slane %v481_v30, 4  ;;  %v515_v49 = vrot.slane %v513_v37, 4 }
  0x6a   : > { %v12227_v30 = vpack.c.b16 %v1306_v25, %v1305_v23 }
  0x6b   : > { %v487_v46 = vsel %vm12040_vm7, %v482_v38, %v486_v39  ;;  %v10723_v38 = vld [vmem:[%s15943_s1 + $0x6] sm:$0x3]  ;;  %v1124_v39 = vld [vmem:[%s12001_s20 + $0x60] sm:$0xe] }
  0x6c   : > { %v719_v58 = vunpack.c.l.b16 %v487_v46  ;;  %v1665_v43 = vsel %vm803_vm0, %v10723_v38, 0  ;;  %v10666_v48 = vrot.slane %v1124_v39, 9 }
  0x6d   : > { %10566 = vmatmul.msk.bf16.gmra.mxu0 %vm754_vm3, %v742_v51  ;;  %v489_v51 = vshrl.u32 %v282_v44, 16  ;;  %v1225_v44 = vrot.slane %v285_v29, 5  ;;  %v10667_v29 = vrot.slane %v1125_v18, 9 }
  0x6f   : > { %v491_v61 = vrot.slane %v489_v51, 4  ;;  %v524_v51 = vrot.slane %v522_v41, 5  ;;  %v1227_v53 = vrot.slane %v1225_v44, 4  ;;  %v1226_v56 = vsel %vm12012_vm6, %v10666_v48, %v1225_v44 }
  0x70   : > { %10647 = vmatmul.msk.bf16.gmra.mxu1 %vm754_vm3, %v11555_v0  ;;  %v504_v0 = vrot.slane %v502_v54, 4 }
  0x71   : > { %10654 = vmatmul.msk.bf16.vlgmr.msrb.gmra.mxu3 %vm754_vm3, %v11562_v57  ;;  %v718_v57 = vunpack.c.l.b16 %v477_v45  ;;  %v495_v9 = vor.u32 %v494_v62, %v491_v61  ;;  %v309_v45 = vld [vmem:[%s12001_s20 + $0x68] sm:$0x1]  ;;  %v1297_v61 = vunpack.c.l.b16 %v1226_v56  ;;  %v287_v62 = vld [vmem:[%s12001_s20 + $0x70] sm:$0xf]  ;;  %v288_v56 = vld [vmem:[%s12001_s20 + $0x78] sm:$0xf] }
  0x72   : > { %v505_v10 = vor.u32 %v504_v0, %v500_v63  ;;  %1674 = vmatpush.bf16.msrb.mxu3 %v1665_v43  ;;  %v1228_v54 = vrot.slane %v309_v45, 5  ;;  %v532_v59 = vshll.u32 %v309_v45, 16  ;;  %v1232_v33 = vrot.slane %v287_v62, 5  ;;  %v1129_v45 = vld [vmem:[%s12001_s20 + $0x9c] sm:$0xe] }
  0x73   : > { %v744_v7 = vpack.c.b16 %v719_v58, %v718_v57  ;;  %v496_v20 = vrot.slane %v495_v9, 4  ;;  %v529_v58 = vor.u32 %v528_v52, %v524_v51  ;;  %v546_v9 = vshll.u32 %v287_v62, 16 }
  0x74   : > { %v506_v21 = vrot.slane %v505_v10, 4  ;;  %v534_v27 = vrot.slane %v532_v59, 5  ;;  %v550_v10 = vshrl.u32 %v287_v62, 16  ;;  %v1233_v43 = vsel %vm12012_vm6, %v10667_v29, %v1232_v33  ;;  %v11559_v59 = vld [vmem:[%s12001_s20 + $0x6c] sm:$0xff] }
  0x75   : > { %v501_v35 = vsel %vm12040_vm7, %v496_v20, %v500_v63  ;;  %v286_v63 = vld [vmem:[%s12001_s20 + $0x6c] sm:$0xf]  ;;  %v530_v4 = vrot.slane %v529_v58, 4 }
  0x76   : > { %v511_v36 = vsel %vm12040_vm7, %v506_v21, %v510_v17  ;;  %v720_v46 = vunpack.c.l.b16 %v501_v35  ;;  %v310_v17 = vld [vmem:[%s12001_s20 + $0x74] sm:$0x1]  ;;  %v548_v21 = vrot.slane %v546_v9, 5  ;;  %v552_v23 = vrot.slane %v550_v10, 4  ;;  %v1126_v9 = vld [vmem:[%s12001_s20 + $0x78] sm:$0xe] }
  0x77   : > { %10680 = vmatmul.msk.bf16.gmra.mxu2 %vm754_vm3, %v1318_v8  ;;  %v1222_v8 = vsel %vm12012_vm6, %v1220_v3, %v1221_v60  ;;  %v1229_v3 = vsel %vm12012_vm6, %v1227_v53, %v1228_v54  ;;  %v11565_v60 = vld [vmem:[%s12001_s20 + $0xb4] sm:$0xff]  ;;  %v556_v37 = vshll.u32 %v310_v17, 16  ;;  %v1299_v53 = vunpack.c.l.b16 %v1233_v43 }
  0x78   : > { %v1296_v16 = vunpack.c.l.b16 %v1222_v8  ;;  %v1298_v0 = vunpack.c.l.b16 %v1229_v3  ;;  %v540_v8 = vshll.u32 %v286_v63, 16  ;;  %v10668_v18 = vrot.slane %v1126_v9, 9 }
  0x79   : > { %v558_v48 = vrot.slane %v556_v37, 5 }
  0x7a   : > { %v1321_v14 = vpack.c.b16 %v1298_v0, %v1297_v61  ;;  %v542_v20 = vrot.slane %v540_v8, 5  ;;  %v561_v0 = vshrl.u32 %v288_v56, 16  ;;  %v311_v8 = vld [vmem:[%s12001_s20 + $0x80] sm:$0x1] }
  0x7d   : > { %10567 = vmatmul.msk.bf16.gmra.mxu0 %vm754_vm3, %v743_v31  ;;  %v1320_v31 = vpack.c.b16 %v1296_v16, %v1295_v15  ;;  %v535_v16 = vsel %vm12040_vm7, %v530_v4, %v534_v27  ;;  %v10901_v27 = vld [vmem:[%s15943_s1 + $0xa] sm:$0x3] }
  0x80   : > { %10648 = vmatmul.msk.bf16.gmra.mxu1 %vm754_vm3, %v11556_v47  ;;  %v721_v47 = vunpack.c.l.b16 %v511_v36  ;;  %v553_v36 = vor.u32 %v552_v23, %v548_v21 }
  0x81   : > { %10655 = vmatmul.msk.bf16.gmra.mxu3 %vm754_vm3, %v11563_v40  ;;  %v516_v40 = vshll.u32 %v284_v26, 16  ;;  %v723_v26 = vunpack.c.l.b16 %v535_v16 }
  0x83   : > { %v518_v50 = vrot.slane %v516_v40, 5 }
  0x85   : > { %v519_v57 = vor.u32 %v518_v50, %v515_v49  ;;  %v1260_v49 = vrot.slane %v12067_v12, 5  ;;  %v10950_v50 = vld [vmem:[%s15943_s1 + $0xc] sm:$0x3] }
  0x86   : > { %v3004_v52 = vsel %vm803_vm0, %v10950_v50, 0 }
  0x87   : > { %10681 = vmatmul.msk.bf16.gmra.mxu2 %vm754_vm3, %v1319_v55  ;;  %v745_v55 = vpack.c.b16 %v721_v47, %v720_v46  ;;  %v520_v2 = vrot.slane %v519_v57, 4  ;;  %v554_v47 = vrot.slane %v553_v36, 4  ;;  %v10671_v57 = vrot.slane %v1129_v45, 9 }
  0x88   : > { %3013 = vmatpush.bf16.msrb.mxu2 %v3004_v52  ;;  %v1262_v3 = vrot.slane %v1260_v49, 4  ;;  %v1267_v52 = vrot.slane %v12101_v11, 5  ;;  %v1270_v11 = vrot.slane %v12106_v22, 5 }
  0x89   : > { %v525_v15 = vsel %vm12040_vm7, %v520_v2, %v524_v51  ;;  %v559_v58 = vsel %vm12040_vm7, %v554_v47, %v558_v48  ;;  %v564_v2 = vshll.u32 %v288_v56, 16  ;;  %v1261_v16 = vsel %vm12012_vm6, %v10671_v57, %v1260_v49  ;;  %v291_v47 = vld [vmem:[%s12001_s20 + $0x88] sm:$0xf] }
  0x8a   : > { %v722_v25 = vunpack.c.l.b16 %v525_v15  ;;  %v725_v15 = vunpack.c.l.b16 %v559_v58  ;;  %v1307_v29 = vunpack.c.l.b16 %v1261_v16  ;;  %v1130_v56 = vld [vmem:[%s12001_s20 + $0xa8] sm:$0xe]  ;;  %v594_v58 = vshll.u32 %v291_v47, 16 }
  0x8b   : > { %v566_v23 = vrot.slane %v564_v2, 5 }
  0x8c   : > { %v746_v39 = vpack.c.b16 %v723_v26, %v722_v25 }
  0x8d   : > { %10568 = vmatmul.msk.bf16.gmra.mxu0 %vm754_vm3, %v744_v7  ;;  %v537_v7 = vshrl.u32 %v286_v63, 16 }
  0x90   : > { %10649 = vmatmul.msk.bf16.gmra.mxu1 %vm754_vm3, %v11557_v32  ;;  %v1234_v32 = vrot.slane %v1232_v33, 4 }
  0x91   : > { %10656 = vmatmul.msk.bf16.gmra.mxu3 %vm754_vm3, %v11564_v19  ;;  %v539_v19 = vrot.slane %v537_v7, 4 }
  0x93   : > { %v543_v35 = vor.u32 %v542_v20, %v539_v19  ;;  %v1242_v20 = vrot.slane %v311_v8, 5 }
  0x95   : > { %v544_v46 = vrot.slane %v543_v35, 4 }
  0x97   : > { %10682 = vmatmul.msk.bf16.gmra.mxu2 %vm754_vm3, %v1320_v31  ;;  %v1235_v31 = vrot.slane %v310_v17, 5  ;;  %v549_v12 = vsel %vm12040_vm7, %v544_v46, %v548_v21  ;;  %v563_v21 = vrot.slane %v561_v0, 4  ;;  %v1269_v0 = vrot.slane %v1267_v52, 4 }
  0x99   : > { %v1236_v44 = vsel %vm12012_vm6, %v1234_v32, %v1235_v31 }
  0x9a   : > { %v1300_v54 = vunpack.c.l.b16 %v1236_v44  ;;  %v290_v44 = vld [vmem:[%s12001_s20 + $0x84] sm:$0xf] }
  0x9b   : > { %v585_v57 = vshrl.u32 %v290_v44, 16 }
  0x9c   : > { %v1322_v7 = vpack.c.b16 %v1300_v54, %v1299_v53 }
  0x9d   : > { %10569 = vmatmul.msk.bf16.gmra.mxu0 %vm754_vm3, %v745_v55  ;;  %v1036_v13 = vpop.f32.mrf.mxu1  ;;  %v289_v55 = vld [vmem:[%s12001_s20 + $0x7c] sm:$0xf] }
  0x9e   : > { %v1239_v63 = vrot.slane %v289_v55, 5  ;;  %v570_v4 = vshll.u32 %v289_v55, 16  ;;  %v574_v10 = vshrl.u32 %v289_v55, 16 }
  0xa0   : > { %10650 = vmatmul.msk.bf16.gmra.mxu1 %vm754_vm3, %v11558_v6  ;;  %v1241_v19 = vrot.slane %v1239_v63, 4  ;;  %v572_v25 = vrot.slane %v570_v4, 5  ;;  %v576_v26 = vrot.slane %v574_v10, 4  ;;  %v1240_v37 = vsel %vm12012_vm6, %v10668_v18, %v1239_v63  ;;  %v1127_v10 = vld [vmem:[%s12001_s20 + $0x84] sm:$0xe] }
  0xa1   : > { %10657 = vmatmul.msk.bf16.gmra.mxu3 %vm754_vm3, %v11565_v60  ;;  %v1263_v60 = vrot.slane %v12075_v24, 5  ;;  %v2717_v24 = vsel %vm803_vm0, %v10901_v27, 0  ;;  %v1301_v49 = vunpack.c.l.b16 %v1240_v37  ;;  %v10672_v63 = vrot.slane %v1130_v56, 9 }
  0xa2   : > { %2726 = vmatpush.bf16.msrb.mxu1 %v2717_v24 }
  0xa3   : > { %v1264_v17 = vsel %vm12012_vm6, %v1262_v3, %v1263_v60  ;;  %v11560_v3 = vld [vmem:[%s12001_s20 + $0x78] sm:$0xff]  ;;  %v1268_v18 = vsel %vm12012_vm6, %v10672_v63, %v1267_v52 }
  0xa4   : > { %v1308_v32 = vunpack.c.l.b16 %v1264_v17 }
  0xa5   : > { %v1038_v40 = vpop.f32.mrf.mxu1 }
  0xa6   : > { %v1326_v46 = vpack.c.b16 %v1308_v32, %v1307_v29 }
  0xa7   : > { %10683 = vmatmul.msk.bf16.gmra.mxu2 %vm754_vm3, %v1321_v14  ;;  %v724_v14 = vunpack.c.l.b16 %v549_v12  ;;  %v588_v12 = vshll.u32 %v290_v44, 16 }
  0xa9   : > { %v747_v35 = vpack.c.b16 %v725_v15, %v724_v14  ;;  %v590_v24 = vrot.slane %v588_v12, 5 }
  0xaa   : > { %v1389_v38 = vpop.f32.mrf.mxu2  ;;  %v816_v41 = vpop.f32.mrf.mxu0 }
  0xab   : > { %v1037_v42 = vadd.f32 %v1036_v13, %v816_v41  ;;  %v577_v41 = vor.u32 %v576_v26, %v572_v25 }
  0xad   : > { %v12270_v51 = vadd.f32 %v1389_v38, %v1037_v42  ;;  %10570 = vmatmul.msk.bf16.gmra.mxu0 %vm754_vm3, %v746_v39  ;;  %v1041_v62 = vpop.f32.mrf.mxu1  ;;  %v1243_v39 = vsel %vm12012_vm6, %v1241_v19, %v1242_v20  ;;  %v580_v42 = vshll.u32 %v311_v8, 16  ;;  %v578_v54 = vrot.slane %v577_v41, 4 }
  0xae   : > { %v1302_v50 = vunpack.c.l.b16 %v1243_v39  ;;  %v587_v8 = vrot.slane %v585_v57, 4  ;;  %v1271_v19 = vsel %vm12012_vm6, %v1269_v0, %v1270_v11  ;;  %v10669_v20 = vrot.slane %v1127_v10, 9 }
  0xaf   : > { %v582_v55 = vrot.slane %v580_v42, 5  ;;  %v1274_v41 = vrot.slane %v12127_v1, 5 }
  0xb0   : > { %10651 = vmatmul.msk.bf16.gmra.mxu1 %vm754_vm3, %v11559_v59  ;;  %v598_v59 = vshrl.u32 %v291_v47, 16 }
  0xb1   : > { %10687 = vmatmul.msk.bf16.vlgmr.msra.gmra.mxu3 %vm754_vm3, %v12227_v30  ;;  %v583_v27 = vsel %vm12040_vm7, %v578_v54, %v582_v55  ;;  %v10805_v54 = vld [vmem:[%s12001_s20 + $0x10] sm:$0xf] }
  0xb2   : > { %v1391_v61 = vpop.f32.mrf.mxu2  ;;  %v818_v6 = vpop.f32.mrf.mxu0  ;;  %v600_v14 = vrot.slane %v598_v59, 4  ;;  %v727_v17 = vunpack.c.l.b16 %v583_v27  ;;  %v1277_v59 = vrot.slane %v12139_v28, 5  ;;  %v1850_v63 = vshrl.u32 %v10805_v54, 16 }
  0xb3   : > { %v1039_v13 = vadd.f32 %v1038_v40, %v818_v6  ;;  %v567_v40 = vor.u32 %v566_v23, %v563_v21  ;;  %v312_v6 = vld [vmem:[%s12001_s20 + $0x8c] sm:$0x1] }
  0xb4   : > { %v12290_v30 = vpop.f32.mrf.mxu3  ;;  %v1249_v23 = vrot.slane %v312_v6, 5  ;;  %v604_v29 = vshll.u32 %v312_v6, 16 }
  0xb5   : > { %v12297_v33 = vadd.f32 %v1391_v61, %v1039_v13  ;;  %v1043_v36 = vpop.f32.mrf.mxu1  ;;  %v568_v53 = vrot.slane %v567_v40, 4  ;;  %v1323_v61 = vpack.c.b16 %v1302_v50, %v1301_v49  ;;  %v596_v13 = vrot.slane %v594_v58, 5 }
  0xb6   : > { %v1276_v58 = vrot.slane %v1274_v41, 4 }
  0xb7   : > { %10684 = vmatmul.msk.bf16.gmra.mxu2 %vm754_vm3, %v1322_v7  ;;  %v573_v4 = vsel %vm12040_vm7, %v568_v53, %v572_v25  ;;  %v1246_v7 = vrot.slane %v291_v47, 5  ;;  %v591_v25 = vor.u32 %v590_v24, %v587_v8  ;;  %v601_v26 = vor.u32 %v600_v14, %v596_v13  ;;  %v1131_v47 = vld [vmem:[%s12001_s20 + $0xb4] sm:$0xe]  ;;  %v10804_v53 = vld [vmem:[%s12001_s20 + $0xc] sm:$0xf] }
  0xb8   : > { %v726_v16 = vunpack.c.l.b16 %v573_v4  ;;  %v10673_v57 = vrot.slane %v1131_v47, 9  ;;  %v1278_v24 = vsel %vm12012_vm6, %v1276_v58, %v1277_v59  ;;  %v10807_v47 = vld [vmem:[%s12001_s20 + $0x18] sm:$0xf] }
  0xb9   : > { %v1248_v21 = vrot.slane %v1246_v7, 4  ;;  %v1247_v39 = vsel %vm12012_vm6, %v10669_v20, %v1246_v7  ;;  %v602_v44 = vrot.slane %v601_v26, 4  ;;  %v2508_v7 = vrot.slane %v10805_v54, 5 }
  0xba   : > { %v1394_v31 = vpop.f32.mrf.mxu2  ;;  %v821_v38 = vpop.f32.mrf.mxu0  ;;  %v1303_v55 = vunpack.c.l.b16 %v1247_v39  ;;  %v1275_v28 = vsel %vm12012_vm6, %v10673_v57, %v1274_v41  ;;  %v1852_v20 = vrot.slane %v1850_v63, 4  ;;  %v1861_v59 = vshrl.u32 %v10807_v47, 16 }
  0xbb   : > { %v1042_v43 = vadd.f32 %v1041_v62, %v821_v38  ;;  %v1250_v40 = vsel %vm12012_vm6, %v1248_v21, %v1249_v23  ;;  %v11128_v23 = vld [vmem:[%s15943_s1 + $0x10] sm:$0x3]  ;;  %v2510_v26 = vrot.slane %v2508_v7, 4 }
  0xbc   : > { %v12305_v45 = vpop.f32.mrf.mxu3  ;;  %v1304_v56 = vunpack.c.l.b16 %v1250_v40 }
  0xbd   : > { %v12308_v48 = vadd.f32 %v1394_v31, %v1042_v43  ;;  %10571 = vmatmul.msk.bf16.gmra.mxu0 %vm754_vm3, %v747_v35  ;;  %v1046_v62 = vpop.f32.mrf.mxu1  ;;  %v748_v31 = vpack.c.b16 %v727_v17, %v726_v16  ;;  %v1309_v35 = vunpack.c.l.b16 %v1268_v18  ;;  %v592_v43 = vrot.slane %v591_v25, 4  ;;  %v10806_v16 = vld [vmem:[%s12001_s20 + $0x14] sm:$0x1] }
  0xbe   : > { %v1324_v27 = vpack.c.b16 %v1304_v56, %v1303_v55  ;;  %v1856_v41 = vshll.u32 %v10806_v16, 16  ;;  %v10808_v56 = vld [vmem:[%s12001_s20 + $0x1c] sm:$0xf] }
  0xbf   : > { %v597_v1 = vsel %vm12040_vm7, %v592_v43, %v596_v13  ;;  %v10869_v13 = vld [vmem:[%s12001_s20 + $0xc] sm:$0xe] }
  0xc0   : > { %10652 = vmatmul.msk.bf16.gmra.mxu1 %vm754_vm3, %v11560_v3  ;;  %v11561_v3 = vld [vmem:[%s12001_s20 + $0x84] sm:$0xff]  ;;  %v10885_v25 = vrot.slane %v10869_v13, 9  ;;  %v1858_v58 = vrot.slane %v1856_v41, 5 }
  0xc1   : > { %10688 = vmatmul.msk.bf16.gmra.mxu3 %vm754_vm3, %v1326_v46  ;;  %v606_v46 = vrot.slane %v604_v29, 5  ;;  %v2511_v29 = vrot.slane %v10806_v16, 5 }
  0xc2   : > { %v1396_v60 = vpop.f32.mrf.mxu2  ;;  %v823_v2 = vpop.f32.mrf.mxu0 }
  0xc3   : > { %v1044_v9 = vadd.f32 %v1043_v36, %v823_v2  ;;  %v1310_v36 = vunpack.c.l.b16 %v1271_v19  ;;  %v607_v12 = vsel %vm12040_vm7, %v602_v44, %v606_v46  ;;  %v11079_v2 = vld [vmem:[%s15943_s1 + $0xe] sm:$0x3]  ;;  %v2512_v43 = vsel %vm12012_vm6, %v2510_v26, %v2511_v29 }
  0xc4   : > { %v12322_v15 = vpop.f32.mrf.mxu3  ;;  %v3658_v6 = vsel %vm803_vm0, %v11079_v2, 0  ;;  %v729_v10 = vunpack.c.l.b16 %v607_v12  ;;  %v2621_v55 = vunpack.c.l.b16 %v2512_v43 }
  0xc5   : > { %v12325_v22 = vadd.f32 %v1396_v60, %v1044_v9  ;;  %v1048_v37 = vpop.f32.mrf.mxu1  ;;  %v1327_v52 = vpack.c.b16 %v1310_v36, %v1309_v35  ;;  %v1837_v60 = vshrl.u32 %v10804_v53, 16  ;;  %v728_v9 = vunpack.c.l.b16 %v597_v1  ;;  %3667 = vmatpush.bf16.msra.mxu3 %v3658_v6 }
  0xc6   : > { %v1311_v35 = vunpack.c.l.b16 %v1275_v28  ;;  %v1312_v36 = vunpack.c.l.b16 %v1278_v24  ;;  %v1863_v28 = vrot.slane %v1861_v59, 4  ;;  %v2515_v6 = vrot.slane %v10808_v56, 5  ;;  %v10870_v24 = vld [vmem:[%s12001_s20 + $0x18] sm:$0xe] }
  0xc7   : > { %10685 = vmatmul.msk.bf16.gmra.mxu2 %vm754_vm3, %v1323_v61  ;;  %v1840_v61 = vshll.u32 %v10804_v53, 16  ;;  %v1839_v17 = vrot.slane %v1837_v60, 4  ;;  %v1870_v60 = vshll.u32 %v10808_v56, 16 }
  0xc8   : > { %v1328_v53 = vpack.c.b16 %v1312_v36, %v1311_v35 }
  0xc9   : > { %v1842_v18 = vrot.slane %v1840_v61, 5  ;;  %v1874_v61 = vshrl.u32 %v10808_v56, 16  ;;  %v10811_v56 = vld [vmem:[%s12001_s20 + $0x28] sm:$0xf] }
  0xca   : > { %v1399_v32 = vpop.f32.mrf.mxu2  ;;  %v826_v38 = vpop.f32.mrf.mxu0 }
  0xcb   : > { %v1047_v42 = vadd.f32 %v1046_v62, %v826_v38  ;;  %v1846_v62 = vshll.u32 %v10805_v54, 16 }
  0xcc   : > { %v12338_v49 = vpop.f32.mrf.mxu3 }
  0xcd   : > { %v12340_v50 = vadd.f32 %v1399_v32, %v1047_v42  ;;  %10572 = vmatmul.msk.bf16.gmra.mxu0 %vm754_vm3, %v748_v31  ;;  %v1051_v11 = vpop.f32.mrf.mxu1  ;;  %v1848_v19 = vrot.slane %v1846_v62, 5  ;;  %v4056_v32 = vsel %vm803_vm0, %v11128_v23, 0  ;;  %v749_v31 = vpack.c.b16 %v729_v10, %v728_v9 }
  0xce   : > { %4065 = vmatpush.bf16.msra.mxu0 %v4056_v32  ;;  %v2509_v42 = vsel %vm12012_vm6, %v10885_v25, %v2508_v7  ;;  %v1872_v9 = vrot.slane %v1870_v60, 5  ;;  %v1876_v10 = vrot.slane %v1874_v61, 4  ;;  %v2517_v23 = vrot.slane %v2515_v6, 4 }
  0xcf   : > { %v1853_v40 = vor.u32 %v1852_v20, %v1848_v19  ;;  %v2620_v54 = vunpack.c.l.b16 %v2509_v42  ;;  %v10886_v20 = vrot.slane %v10870_v24, 9  ;;  %v1894_v60 = vshll.u32 %v10811_v56, 16 }
  0xd0   : > { %10653 = vmatmul.msk.bf16.gmra.mxu1 %vm754_vm3, %v11561_v3  ;;  %v1864_v3 = vshll.u32 %v10807_v47, 16  ;;  %v1877_v29 = vor.u32 %v1876_v10, %v1872_v9  ;;  %v1898_v61 = vshrl.u32 %v10811_v56, 16 }
  0xd1   : > { %10689 = vmatmul.msk.bf16.gmra.mxu3 %vm754_vm3, %v1327_v52  ;;  %v1854_v12 = vrot.slane %v1853_v40, 4  ;;  %v2652_v62 = vpack.c.b16 %v2621_v55, %v2620_v54  ;;  %v11566_v55 = vld [vmem:[%s12001_s20 + $0xc] sm:$0xff]  ;;  %v1896_v24 = vrot.slane %v1894_v60, 5 }
  0xd2   : > { %v1401_v0 = vpop.f32.mrf.mxu2  ;;  %v828_v4 = vpop.f32.mrf.mxu0  ;;  %v1878_v42 = vrot.slane %v1877_v29, 4 }
  0xd3   : > { %v1049_v8 = vadd.f32 %v1048_v37, %v828_v4  ;;  %v1843_v37 = vor.u32 %v1842_v18, %v1839_v17  ;;  %v1859_v2 = vsel %vm12040_vm7, %v1854_v12, %v1858_v58  ;;  %v10809_v18 = vld [vmem:[%s12001_s20 + $0x20] sm:$0x1] }
  0xd4   : > { %v12361_v14 = vpop.f32.mrf.mxu3  ;;  %v2223_v17 = vunpack.c.l.b16 %v1859_v2  ;;  %v2518_v25 = vrot.slane %v10809_v18, 5  ;;  %v1880_v32 = vshll.u32 %v10809_v18, 16  ;;  %v2522_v2 = vrot.slane %v10811_v56, 5  ;;  %v11567_v56 = vld [vmem:[%s12001_s20 + $0x18] sm:$0xff] }
  0xd5   : > { %v12365_v21 = vadd.f32 %v1401_v0, %v1049_v8  ;;  %v1053_v39 = vpop.f32.mrf.mxu1  ;;  %v1844_v1 = vrot.slane %v1843_v37, 4  ;;  %v1866_v8 = vrot.slane %v1864_v3, 5  ;;  %v2516_v37 = vsel %vm12012_vm6, %v10886_v20, %v2515_v6 }
  0xd6   : > { %v1882_v43 = vrot.slane %v1880_v32, 5 }
  0xd7   : > { %10686 = vmatmul.msk.bf16.gmra.mxu2 %vm754_vm3, %v1324_v27  ;;  %v11582_v27 = vld [vmem:[%s12001_s20 + $0x18] sm:$0xff]  ;;  %v1867_v26 = vor.u32 %v1866_v8, %v1863_v28 }
  0xd8   : > { %v1883_v12 = vsel %vm12040_vm7, %v1878_v42, %v1882_v43 }
  0xd9   : > { %v1868_v41 = vrot.slane %v1867_v26, 4  ;;  %v2225_v28 = vunpack.c.l.b16 %v1883_v12 }
  0xda   : > { %v1404_v38 = vpop.f32.mrf.mxu2  ;;  %v831_v44 = vpop.f32.mrf.mxu0 }
  0xdb   : > { %v1052_v46 = vadd.f32 %v1051_v11, %v831_v44  ;;  %v1849_v11 = vsel %vm12040_vm7, %v1844_v1, %v1848_v19  ;;  %v1873_v1 = vsel %vm12040_vm7, %v1868_v41, %v1872_v9  ;;  %v10812_v9 = vld [vmem:[%s12001_s20 + $0x2c] sm:$0x1] }
  0xdc   : > { %v12377_v52 = vpop.f32.mrf.mxu3  ;;  %v2222_v16 = vunpack.c.l.b16 %v1849_v11  ;;  %v11583_v11 = vld [vmem:[%s12001_s20 + $0x24] sm:$0xff]  ;;  %v1904_v29 = vshll.u32 %v10812_v9, 16 }
  0xdd   : > { %v12380_v57 = vadd.f32 %v1404_v38, %v1052_v46  ;;  %10573 = vmatmul.msk.bf16.gmra.mxu0 %vm754_vm3, %v749_v31  ;;  %v1056_v0 = vpop.f32.mrf.mxu1  ;;  %v2519_v38 = vsel %vm12012_vm6, %v2517_v23, %v2518_v25  ;;  %v2622_v46 = vunpack.c.l.b16 %v2516_v37  ;;  %v2524_v23 = vrot.slane %v2522_v2, 4 }
  0xde   : > { %v2254_v35 = vpack.c.b16 %v2223_v17, %v2222_v16  ;;  %v2623_v47 = vunpack.c.l.b16 %v2519_v38  ;;  %v1900_v16 = vrot.slane %v1898_v61, 4  ;;  %v2525_v25 = vrot.slane %v10812_v9, 5  ;;  %v10872_v9 = vld [vmem:[%s12001_s20 + $0x30] sm:$0xe] }
  0xdf   : > { %v1906_v42 = vrot.slane %v1904_v29, 5 }
  0xe0   : > { %10902 = vmatmul.msk.bf16.vlgmr.msrb.gmra.mxu1 %vm754_vm3, %v2652_v62  ;;  %v2653_v59 = vpack.c.b16 %v2623_v47, %v2622_v46  ;;  %v10814_v47 = vld [vmem:[%s12001_s20 + $0x34] sm:$0xf] }
  0xe1   : > { %10690 = vmatmul.msk.bf16.gmra.mxu3 %vm754_vm3, %v1328_v53  ;;  %v10810_v53 = vld [vmem:[%s12001_s20 + $0x24] sm:$0xf]  ;;  %v1922_v60 = vshrl.u32 %v10814_v47, 16 }
  0xe2   : > { %v1406_v63 = vpop.f32.mrf.mxu2  ;;  %v833_v4 = vpop.f32.mrf.mxu0  ;;  %v1885_v58 = vshrl.u32 %v10810_v53, 16  ;;  %v1888_v3 = vshll.u32 %v10810_v53, 16 }
  0xe3   : > { %v1054_v7 = vadd.f32 %v1053_v39, %v833_v4 }
  0xe4   : > { %v12390_v13 = vpop.f32.mrf.mxu3  ;;  %v1887_v6 = vrot.slane %v1885_v58, 4  ;;  %v1890_v10 = vrot.slane %v1888_v3, 5  ;;  %v1918_v3 = vshll.u32 %v10814_v47, 16 }
  0xe5   : > { %v12394_v19 = vadd.f32 %v1406_v63, %v1054_v7  ;;  %v1058_v36 = vpop.f32.mrf.mxu1  ;;  %v10871_v7 = vld [vmem:[%s12001_s20 + $0x24] sm:$0xe] }
  0xe6   : > { %v10887_v17 = vrot.slane %v10871_v7, 9  ;;  %v1920_v7 = vrot.slane %v1918_v3, 5  ;;  %v11568_v3 = vld [vmem:[%s12001_s20 + $0x24] sm:$0xff] }
  0xe7   : > { %11015 = vmatmul.msk.bf16.vlgmr.msrb.gmra.mxu2 %vm754_vm3, %v11582_v27  ;;  %v2224_v27 = vunpack.c.l.b16 %v1873_v1 }
  0xe8   : > { %v2523_v37 = vsel %vm12012_vm6, %v10887_v17, %v2522_v2  ;;  %v11584_v2 = vld [vmem:[%s12001_s20 + $0x30] sm:$0xff] }
  0xe9   : > { %v2255_v26 = vpack.c.b16 %v2225_v28, %v2224_v27  ;;  %v2624_v43 = vunpack.c.l.b16 %v2523_v37  ;;  %v2529_v27 = vrot.slane %v10814_v47, 5 }
  0xea   : > { %v1409_v31 = vpop.f32.mrf.mxu2  ;;  %v836_v39 = vpop.f32.mrf.mxu0 }
  0xeb   : > { %v1057_v40 = vadd.f32 %v1056_v0, %v836_v39  ;;  %v2531_v29 = vrot.slane %v2529_v27, 4 }
  0xec   : > { %v12401_v44 = vpop.f32.mrf.mxu3 }
  0xed   : > { %v12404_v54 = vadd.f32 %v1409_v31, %v1057_v40  ;;  %10853 = vmatmul.msk.bf16.vlgmr.msrb.gmra.mxu0 %vm754_vm3, %v2254_v35  ;;  %v1061_v63 = vpop.f32.mrf.mxu1  ;;  %v1891_v35 = vor.u32 %v1890_v10, %v1887_v6  ;;  %v10813_v40 = vld [vmem:[%s12001_s20 + $0x30] sm:$0xf] }
  0xee   : > { %v1909_v58 = vshrl.u32 %v10813_v40, 16 }
  0xef   : > { %v1892_v1 = vrot.slane %v1891_v35, 4 }
  0xf0   : > { %10903 = vmatmul.msk.bf16.gmra.mxu1 %vm754_vm3, %v2653_v59  ;;  %v1912_v59 = vshll.u32 %v10813_v40, 16 }
  0xf1   : > { %10788 = vmatmul.msk.bf16.vlgmr.msrb.gmra.mxu3 %vm754_vm3, %v11566_v55 }
  0xf2   : > { %v1411_v62 = vpop.f32.mrf.mxu2  ;;  %v838_v0 = vpop.f32.mrf.mxu0  ;;  %v1914_v6 = vrot.slane %v1912_v59, 5 }
  0xf3   : > { %v1059_v4 = vadd.f32 %v1058_v36, %v838_v0  ;;  %v1901_v36 = vor.u32 %v1900_v16, %v1896_v24 }
  0xf4   : > { %v1096_v8 = vpop.f32.mrf.mxu3 }
  0xf5   : > { %v12419_v18 = vadd.f32 %v1096_v8, %v12290_v30  ;;  %v12421_v20 = vadd.f32 %v1411_v62, %v1059_v4  ;;  %v1063_v31 = vpop.f32.mrf.mxu1  ;;  %v2526_v30 = vsel %vm12012_vm6, %v2524_v23, %v2525_v25  ;;  %v1902_v12 = vrot.slane %v1901_v36, 4  ;;  %v10815_v23 = vld [vmem:[%s12001_s20 + $0x38] sm:$0x1] }
  0xf6   : > { %v2625_v46 = vunpack.c.l.b16 %v2526_v30  ;;  %v1911_v4 = vrot.slane %v1909_v58, 4  ;;  %v1924_v8 = vrot.slane %v1922_v60, 4  ;;  %v10888_v25 = vrot.slane %v10872_v9, 9  ;;  %v10817_v60 = vld [vmem:[%s12001_s20 + $0x40] sm:$0xf] }
  0xf7   : > { %11016 = vmatmul.msk.bf16.gmra.mxu2 %vm754_vm3, %v11583_v11  ;;  %v1907_v0 = vsel %vm12040_vm7, %v1902_v12, %v1906_v42  ;;  %v1928_v36 = vshll.u32 %v10815_v23, 16  ;;  %v10816_v12 = vld [vmem:[%s12001_s20 + $0x3c] sm:$0xf] }
  0xf8   : > { %v2654_v61 = vpack.c.b16 %v2625_v46, %v2624_v43  ;;  %v2227_v17 = vunpack.c.l.b16 %v1907_v0  ;;  %v1925_v35 = vor.u32 %v1924_v8, %v1920_v7  ;;  %v1936_v0 = vshll.u32 %v10816_v12, 16 }
  0xf9   : > { %v1930_v46 = vrot.slane %v1928_v36, 5 }
  0xfa   : > { %v1414_v32 = vpop.f32.mrf.mxu2  ;;  %v841_v38 = vpop.f32.mrf.mxu0  ;;  %v1926_v43 = vrot.slane %v1925_v35, 4 }
  0xfb   : > { %v1062_v39 = vadd.f32 %v1061_v63, %v841_v38 }
  0xfc   : > { %v1098_v41 = vpop.f32.mrf.mxu3 }
  0xfd   : > { %v12431_v53 = vadd.f32 %v1098_v41, %v12305_v45  ;;  %v12433_v55 = vadd.f32 %v1414_v32, %v1062_v39  ;;  %10854 = vmatmul.msk.bf16.gmra.mxu0 %vm754_vm3, %v2255_v26  ;;  %v1066_v63 = vpop.f32.mrf.mxu1  ;;  %v1897_v45 = vsel %vm12040_vm7, %v1892_v1, %v1896_v24  ;;  %v2532_v32 = vrot.slane %v10815_v23, 5  ;;  %v10818_v23 = vld [vmem:[%s12001_s20 + $0x44] sm:$0x1] }
  0xfe   : > { %v2226_v16 = vunpack.c.l.b16 %v1897_v45  ;;  %v2530_v39 = vsel %vm12012_vm6, %v10888_v25, %v2529_v27  ;;  %v1938_v25 = vrot.slane %v1936_v0, 5 }
 0x100   : > { %10904 = vmatmul.msk.bf16.gmra.mxu1 %vm754_vm3, %v2654_v61  ;;  %v2256_v30 = vpack.c.b16 %v2227_v17, %v2226_v16  ;;  %v10873_v16 = vld [vmem:[%s12001_s20 + $0x3c] sm:$0xe] }
 0x101   : > { %10789 = vmatmul.msk.bf16.gmra.mxu3 %vm754_vm3, %v11567_v56  ;;  %v2626_v56 = vunpack.c.l.b16 %v2530_v39  ;;  %v1952_v39 = vshll.u32 %v10818_v23, 16 }
 0x102   : > { %v1416_v62 = vpop.f32.mrf.mxu2  ;;  %v843_v11 = vpop.f32.mrf.mxu0 }
 0x103   : > { %v1064_v28 = vadd.f32 %v1063_v31, %v843_v11  ;;  %v1915_v31 = vor.u32 %v1914_v6, %v1911_v4  ;;  %v1946_v11 = vshrl.u32 %v10817_v60, 16  ;;  %v2536_v6 = vrot.slane %v10817_v60, 5 }
 0x104   : > { %v1101_v10 = vpop.f32.mrf.mxu3 }
 0x105   : > { %v12447_v24 = vadd.f32 %v1101_v10, %v12322_v15  ;;  %v12449_v26 = vadd.f32 %v1416_v62, %v1064_v28  ;;  %v1068_v38 = vpop.f32.mrf.mxu1  ;;  %v2533_v15 = vsel %vm12012_vm6, %v2531_v29, %v2532_v32  ;;  %v1916_v42 = vrot.slane %v1915_v31, 4  ;;  %v11585_v28 = vld [vmem:[%s12001_s20 + $0x3c] sm:$0xff] }
 0x106   : > { %v2627_v1 = vunpack.c.l.b16 %v2533_v15  ;;  %v1931_v62 = vsel %vm12040_vm7, %v1926_v43, %v1930_v46  ;;  %v1948_v32 = vrot.slane %v1946_v11, 4  ;;  %v10889_v31 = vrot.slane %v10873_v16, 9 }
 0x107   : > { %11017 = vmatmul.msk.bf16.gmra.mxu2 %vm754_vm3, %v11584_v2  ;;  %v1921_v61 = vsel %vm12040_vm7, %v1916_v42, %v1920_v7  ;;  %v2229_v7 = vunpack.c.l.b16 %v1931_v62 }
 0x108   : > { %v2655_v45 = vpack.c.b16 %v2627_v1, %v2626_v56  ;;  %v2228_v9 = vunpack.c.l.b16 %v1921_v61  ;;  %v2537_v43 = vsel %vm12012_vm6, %v10889_v31, %v2536_v6  ;;  %v10819_v56 = vld [vmem:[%s12001_s20 + $0x48] sm:$0xf]  ;;  %v10820_v61 = vld [vmem:[%s12001_s20 + $0x4c] sm:$0xf] }
 0x109   : > { %v1957_v11 = vshrl.u32 %v10819_v56, 16 }
 0x10a   : > { %v1419_v37 = vpop.f32.mrf.mxu2  ;;  %v846_v40 = vpop.f32.mrf.mxu0 }
 0x10b   : > { %v1067_v41 = vadd.f32 %v1066_v63, %v846_v40  ;;  %v1933_v63 = vshrl.u32 %v10816_v12, 16  ;;  %v1954_v12 = vrot.slane %v1952_v39, 5  ;;  %v1959_v16 = vrot.slane %v1957_v11, 4 }
 0x10c   : > { %v1103_v47 = vpop.f32.mrf.mxu3 }
 0x10d   : > { %v12458_v58 = vadd.f32 %v1103_v47, %v12338_v49  ;;  %v12460_v59 = vadd.f32 %v1419_v37, %v1067_v41  ;;  %10855 = vmatmul.msk.bf16.gmra.mxu0 %vm754_vm3, %v2256_v30  ;;  %v1942_v49 = vshll.u32 %v10817_v60, 16  ;;  %v1071_v4 = vpop.f32.mrf.mxu1  ;;  %v1935_v10 = vrot.slane %v1933_v63, 4 }
 0x10e   : > { %v2538_v37 = vrot.slane %v2536_v6, 4  ;;  %v2539_v30 = vrot.slane %v10818_v23, 5 }
 0x10f   : > { %v1944_v29 = vrot.slane %v1942_v49, 5  ;;  %v1939_v41 = vor.u32 %v1938_v25, %v1935_v10  ;;  %v11586_v10 = vld [vmem:[%s12001_s20 + $0x48] sm:$0xff] }
 0x110   : > { %10905 = vmatmul.msk.bf16.gmra.mxu1 %vm754_vm3, %v2655_v45  ;;  %v11569_v45 = vld [vmem:[%s12001_s20 + $0x30] sm:$0xff] }
 0x111   : > { %10790 = vmatmul.msk.bf16.gmra.mxu3 %vm754_vm3, %v11568_v3  ;;  %v1949_v42 = vor.u32 %v1948_v32, %v1944_v29  ;;  %v2628_v3 = vunpack.c.l.b16 %v2537_v43  ;;  %v1940_v0 = vrot.slane %v1939_v41, 4 }
 0x112   : > { %v1421_v2 = vpop.f32.mrf.mxu2  ;;  %v848_v27 = vpop.f32.mrf.mxu0 }
 0x113   : > { %v1069_v8 = vadd.f32 %v1068_v38, %v848_v27  ;;  %v2257_v38 = vpack.c.b16 %v2229_v7, %v2228_v9  ;;  %v1950_v49 = vrot.slane %v1949_v42, 4  ;;  %v1970_v27 = vshrl.u32 %v10820_v61, 16 }
 0x114   : > { %v1106_v17 = vpop.f32.mrf.mxu3 }
 0x115   : > { %v12475_v35 = vadd.f32 %v1106_v17, %v12361_v14  ;;  %v12477_v36 = vadd.f32 %v1421_v2, %v1069_v8  ;;  %v1073_v40 = vpop.f32.mrf.mxu1  ;;  %v2540_v14 = vsel %vm12012_vm6, %v2538_v37, %v2539_v30  ;;  %v1960_v2 = vshll.u32 %v10819_v56, 16  ;;  %v10874_v37 = vld [vmem:[%s12001_s20 + $0x48] sm:$0xe] }
 0x116   : > { %v2629_v60 = vunpack.c.l.b16 %v2540_v14  ;;  %v1955_v9 = vsel %vm12040_vm7, %v1950_v49, %v1954_v12  ;;  %v2543_v17 = vrot.slane %v10820_v61, 5  ;;  %v1972_v31 = vrot.slane %v1970_v27, 4  ;;  %v10822_v27 = vld [vmem:[%s12001_s20 + $0x54] sm:$0xf] }
 0x117   : > { %11018 = vmatmul.msk.bf16.gmra.mxu2 %vm754_vm3, %v11585_v28  ;;  %v1962_v25 = vrot.slane %v1960_v2, 5  ;;  %v2231_v39 = vunpack.c.l.b16 %v1955_v9  ;;  %v10890_v41 = vrot.slane %v10874_v37, 9  ;;  %v10823_v9 = vld [vmem:[%s12001_s20 + $0x58] sm:$0xf] }
 0x118   : > { %v2656_v28 = vpack.c.b16 %v2629_v60, %v2628_v3  ;;  %v2545_v43 = vrot.slane %v2543_v17, 4 }
 0x119   : > { %v2544_v3 = vsel %vm12012_vm6, %v10890_v41, %v2543_v17  ;;  %v1984_v17 = vshll.u32 %v10822_v27, 16 }
 0x11a   : > { %v1424_v15 = vpop.f32.mrf.mxu2  ;;  %v851_v46 = vpop.f32.mrf.mxu0  ;;  %v2630_v2 = vunpack.c.l.b16 %v2544_v3 }
 0x11b   : > { %v1072_v47 = vadd.f32 %v1071_v4, %v851_v46  ;;  %v1966_v4 = vshll.u32 %v10820_v61, 16 }
 0x11c   : > { %v1108_v1 = vpop.f32.mrf.mxu3 }
 0x11d   : > { %v12487_v62 = vadd.f32 %v1108_v1, %v12377_v52  ;;  %v12489_v63 = vadd.f32 %v1424_v15, %v1072_v47  ;;  %10856 = vmatmul.msk.bf16.gmra.mxu0 %vm754_vm3, %v2257_v38  ;;  %v1076_v8 = vpop.f32.mrf.mxu1  ;;  %v1945_v52 = vsel %vm12040_vm7, %v1940_v0, %v1944_v29  ;;  %v1968_v32 = vrot.slane %v1966_v4, 5  ;;  %v10821_v15 = vld [vmem:[%s12001_s20 + $0x50] sm:$0x1] }
 0x11e   : > { %v2230_v38 = vunpack.c.l.b16 %v1945_v52  ;;  %v2546_v14 = vrot.slane %v10821_v15, 5  ;;  %v1976_v47 = vshll.u32 %v10821_v15, 16  ;;  %v11570_v52 = vld [vmem:[%s12001_s20 + $0x3c] sm:$0xff] }
 0x11f   : > { %v1973_v46 = vor.u32 %v1972_v31, %v1968_v32 }
 0x120   : > { %10906 = vmatmul.msk.bf16.gmra.mxu1 %vm754_vm3, %v2656_v28  ;;  %v2258_v1 = vpack.c.b16 %v2231_v39, %v2230_v38  ;;  %v1978_v49 = vrot.slane %v1976_v47, 5  ;;  %v2550_v38 = vrot.slane %v10823_v9, 5 }
 0x121   : > { %10791 = vmatmul.msk.bf16.gmra.mxu3 %vm754_vm3, %v11569_v45  ;;  %v1974_v0 = vrot.slane %v1973_v46, 4  ;;  %v1986_v46 = vrot.slane %v1984_v17, 5  ;;  %v10826_v17 = vld [vmem:[%s12001_s20 + $0x64] sm:$0xf] }
 0x122   : > { %v1426_v6 = vpop.f32.mrf.mxu2  ;;  %v853_v7 = vpop.f32.mrf.mxu0 }
 0x123   : > { %v1074_v23 = vadd.f32 %v1073_v40, %v853_v7  ;;  %v1963_v40 = vor.u32 %v1962_v25, %v1959_v16  ;;  %v1979_v7 = vsel %vm12040_vm7, %v1974_v0, %v1978_v49 }
 0x124   : > { %v1111_v30 = vpop.f32.mrf.mxu3 }
 0x125   : > { %v12503_v29 = vadd.f32 %v1111_v30, %v12390_v13  ;;  %v12505_v42 = vadd.f32 %v1426_v6, %v1074_v23  ;;  %v1078_v12 = vpop.f32.mrf.mxu1  ;;  %v2547_v13 = vsel %vm12012_vm6, %v2545_v43, %v2546_v14  ;;  %v1964_v45 = vrot.slane %v1963_v40, 4  ;;  %v11587_v30 = vld [vmem:[%s12001_s20 + $0x54] sm:$0xff]  ;;  %v10824_v40 = vld [vmem:[%s12001_s20 + $0x5c] sm:$0x1] }
 0x126   : > { %v2631_v4 = vunpack.c.l.b16 %v2547_v13  ;;  %v1994_v23 = vshrl.u32 %v10823_v9, 16  ;;  %v10875_v43 = vld [vmem:[%s12001_s20 + $0x54] sm:$0xe] }
 0x127   : > { %11019 = vmatmul.msk.bf16.gmra.mxu2 %vm754_vm3, %v11586_v10  ;;  %v1981_v10 = vshrl.u32 %v10822_v27, 16 }
 0x128   : > { %v2657_v16 = vpack.c.b16 %v2631_v4, %v2630_v2 }
 0x129   : > { %v1983_v41 = vrot.slane %v1981_v10, 4 }
 0x12a   : > { %v1429_v56 = vpop.f32.mrf.mxu2  ;;  %v856_v60 = vpop.f32.mrf.mxu0 }
 0x12b   : > { %v1077_v61 = vadd.f32 %v1076_v8, %v856_v60  ;;  %v1969_v8 = vsel %vm12040_vm7, %v1964_v45, %v1968_v32  ;;  %v2233_v32 = vunpack.c.l.b16 %v1979_v7  ;;  %v2552_v60 = vrot.slane %v2550_v38, 4 }
 0x12c   : > { %v1113_v11 = vpop.f32.mrf.mxu3  ;;  %v2232_v15 = vunpack.c.l.b16 %v1969_v8  ;;  %v2000_v45 = vshll.u32 %v10824_v40, 16 }
 0x12d   : > { %v12514_v28 = vadd.f32 %v1113_v11, %v12401_v44  ;;  %v12516_v6 = vadd.f32 %v1429_v56, %v1077_v61  ;;  %10857 = vmatmul.msk.bf16.gmra.mxu0 %vm754_vm3, %v2258_v1  ;;  %v1990_v44 = vshll.u32 %v10823_v9, 16  ;;  %v1081_v31 = vpop.f32.mrf.mxu1  ;;  %v1996_v56 = vrot.slane %v1994_v23, 4  ;;  %v10825_v9 = vld [vmem:[%s12001_s20 + $0x60] sm:$0xf] }
 0x12e   : > { %v10891_v1 = vrot.slane %v10875_v43, 9  ;;  %v2259_v61 = vpack.c.b16 %v2233_v32, %v2232_v15  ;;  %v1987_v11 = vor.u32 %v1986_v46, %v1983_v41  ;;  %v2002_v7 = vrot.slane %v2000_v45, 5  ;;  %v11588_v46 = vld [vmem:[%s12001_s20 + $0x60] sm:$0xff] }
 0x12f   : > { %v1992_v47 = vrot.slane %v1990_v44, 5  ;;  %v2018_v15 = vshrl.u32 %v10826_v17, 16 }
 0x130   : > { %10907 = vmatmul.msk.bf16.gmra.mxu1 %vm754_vm3, %v2657_v16  ;;  %v2551_v4 = vsel %vm12012_vm6, %v10891_v1, %v2550_v38  ;;  %v2005_v38 = vshrl.u32 %v10825_v9, 16  ;;  %v2557_v1 = vrot.slane %v10826_v17, 5 }
 0x131   : > { %10792 = vmatmul.msk.bf16.gmra.mxu3 %vm754_vm3, %v11570_v52  ;;  %v1997_v2 = vor.u32 %v1996_v56, %v1992_v47  ;;  %v2632_v10 = vunpack.c.l.b16 %v2551_v4  ;;  %v2020_v45 = vrot.slane %v2018_v15, 4 }
 0x132   : > { %v1431_v25 = vpop.f32.mrf.mxu2  ;;  %v858_v37 = vpop.f32.mrf.mxu0  ;;  %v2007_v56 = vrot.slane %v2005_v38, 4 }
 0x133   : > { %v1079_v39 = vadd.f32 %v1078_v12, %v858_v37  ;;  %v2553_v12 = vrot.slane %v10824_v40, 5  ;;  %v1988_v37 = vrot.slane %v1987_v11, 4 }
 0x134   : > { %v1449_v14 = vpop.f32.mrf.mxu3 }
 0x135   : > { %v12531_v3 = vadd.f32 %v1449_v14, %v12419_v18  ;;  %v12533_v13 = vadd.f32 %v1431_v25, %v1079_v39  ;;  %v1083_v49 = vpop.f32.mrf.mxu1  ;;  %v2554_v18 = vsel %vm12012_vm6, %v2552_v60, %v2553_v12  ;;  %v11571_v25 = vld [vmem:[%s12001_s20 + $0x48] sm:$0xff]  ;;  %v2008_v39 = vshll.u32 %v10825_v9, 16 }
 0x136   : > { %v2633_v16 = vunpack.c.l.b16 %v2554_v18  ;;  %v10827_v18 = vld [vmem:[%s12001_s20 + $0x68] sm:$0x1]  ;;  %v2559_v9 = vrot.slane %v2557_v1, 4 }
 0x137   : > { %11020 = vmatmul.msk.bf16.gmra.mxu2 %vm754_vm3, %v11587_v30  ;;  %v1998_v30 = vrot.slane %v1997_v2, 4  ;;  %v2010_v12 = vrot.slane %v2008_v39, 5 }
 0x138   : > { %v2658_v32 = vpack.c.b16 %v2633_v16, %v2632_v10  ;;  %v2024_v10 = vshll.u32 %v10827_v18, 16 }
 0x139   : > { %v2003_v14 = vsel %vm12040_vm7, %v1998_v30, %v2002_v7 }
 0x13a   : > { %v1434_v0 = vpop.f32.mrf.mxu2  ;;  %v861_v27 = vpop.f32.mrf.mxu0  ;;  %v2235_v4 = vunpack.c.l.b16 %v2003_v14  ;;  %v2026_v15 = vrot.slane %v2024_v10, 5  ;;  %v10828_v14 = vld [vmem:[%s12001_s20 + $0x6c] sm:$0xf] }
 0x13b   : > { %v1082_v52 = vadd.f32 %v1081_v31, %v861_v27  ;;  %v2014_v31 = vshll.u32 %v10826_v17, 16  ;;  %v10877_v10 = vld [vmem:[%s12001_s20 + $0x6c] sm:$0xe] }
 0x13c   : > { %v1451_v8 = vpop.f32.mrf.mxu3 }
 0x13d   : > { %v12543_v44 = vadd.f32 %v1451_v8, %v12431_v53  ;;  %v12545_v23 = vadd.f32 %v1434_v0, %v1082_v52  ;;  %10858 = vmatmul.msk.bf16.gmra.mxu0 %vm754_vm3, %v2259_v61  ;;  %v1086_v43 = vpop.f32.mrf.mxu1  ;;  %v1993_v53 = vsel %vm12040_vm7, %v1988_v37, %v1992_v47  ;;  %v2016_v61 = vrot.slane %v2014_v31, 5  ;;  %v10876_v0 = vld [vmem:[%s12001_s20 + $0x60] sm:$0xe] }
 0x13e   : > { %v2234_v2 = vunpack.c.l.b16 %v1993_v53  ;;  %v10892_v27 = vrot.slane %v10876_v0, 9  ;;  %v2560_v8 = vrot.slane %v10827_v18, 5  ;;  %v2032_v0 = vshll.u32 %v10828_v14, 16 }
 0x13f   : > { %v2021_v7 = vor.u32 %v2020_v45, %v2016_v61 }
 0x140   : > { %10908 = vmatmul.msk.bf16.gmra.mxu1 %vm754_vm3, %v2658_v32  ;;  %v2260_v17 = vpack.c.b16 %v2235_v4, %v2234_v2  ;;  %v2558_v37 = vsel %vm12012_vm6, %v10892_v27, %v2557_v1  ;;  %v10829_v1 = vld [vmem:[%s12001_s20 + $0x70] sm:$0xf] }
 0x141   : > { %10793 = vmatmul.msk.bf16.gmra.mxu3 %vm754_vm3, %v11571_v25  ;;  %v2022_v31 = vrot.slane %v2021_v7, 4  ;;  %v11589_v27 = vld [vmem:[%s12001_s20 + $0x6c] sm:$0xff] }
 0x142   : > { %v1436_v41 = vpop.f32.mrf.mxu2  ;;  %v863_v40 = vpop.f32.mrf.mxu0 }
 0x143   : > { %v1084_v60 = vadd.f32 %v1083_v49, %v863_v40  ;;  %v2011_v49 = vor.u32 %v2010_v12, %v2007_v56  ;;  %v11572_v56 = vld [vmem:[%s12001_s20 + $0x54] sm:$0xff]  ;;  %v2029_v12 = vshrl.u32 %v10828_v14, 16 }
 0x144   : > { %v1454_v11 = vpop.f32.mrf.mxu3 }
 0x145   : > { %v12559_v47 = vadd.f32 %v1454_v11, %v12447_v24  ;;  %v12561_v52 = vadd.f32 %v1436_v41, %v1084_v60  ;;  %v1088_v25 = vpop.f32.mrf.mxu1  ;;  %v2561_v24 = vsel %vm12012_vm6, %v2559_v9, %v2560_v8  ;;  %v2012_v39 = vrot.slane %v2011_v49, 4 }
 0x146   : > { %v2634_v41 = vunpack.c.l.b16 %v2558_v37  ;;  %v2635_v53 = vunpack.c.l.b16 %v2561_v24  ;;  %v2027_v60 = vsel %vm12040_vm7, %v2022_v31, %v2026_v15  ;;  %v2042_v11 = vshrl.u32 %v10829_v1, 16 }
 0x147   : > { %11021 = vmatmul.msk.bf16.gmra.mxu2 %vm754_vm3, %v11588_v46  ;;  %v2564_v9 = vrot.slane %v10829_v1, 5  ;;  %v2031_v7 = vrot.slane %v2029_v12, 4  ;;  %v2034_v37 = vrot.slane %v2032_v0, 5 }
 0x148   : > { %v2659_v45 = vpack.c.b16 %v2635_v53, %v2634_v41 }
 0x149   : > { %v2566_v15 = vrot.slane %v2564_v9, 4 }
 0x14a   : > { %v1439_v16 = vpop.f32.mrf.mxu2  ;;  %v866_v30 = vpop.f32.mrf.mxu0 }
 0x14b   : > { %v1087_v38 = vadd.f32 %v1086_v43, %v866_v30  ;;  %v2017_v43 = vsel %vm12040_vm7, %v2012_v39, %v2016_v61  ;;  %v2237_v61 = vunpack.c.l.b16 %v2027_v60  ;;  %v2044_v30 = vrot.slane %v2042_v11, 4 }
 0x14c   : > { %v1456_v32 = vpop.f32.mrf.mxu3  ;;  %v2236_v49 = vunpack.c.l.b16 %v2017_v43 }
 0x14d   : > { %v12570_v40 = vadd.f32 %v1456_v32, %v12458_v58  ;;  %v12572_v46 = vadd.f32 %v1439_v16, %v1087_v38  ;;  %10859 = vmatmul.msk.bf16.gmra.mxu0 %vm754_vm3, %v2260_v17  ;;  %v2038_v58 = vshll.u32 %v10829_v1, 16  ;;  %v1091_v4 = vpop.f32.mrf.mxu1  ;;  %v10830_v17 = vld [vmem:[%s12001_s20 + $0x74] sm:$0x1]  ;;  %v10893_v38 = vrot.slane %v10877_v10, 9 }
 0x14e   : > { %v2261_v32 = vpack.c.b16 %v2237_v61, %v2236_v49  ;;  %v2048_v41 = vshll.u32 %v10830_v17, 16  ;;  %v11573_v49 = vld [vmem:[%s12001_s20 + $0x60] sm:$0xff] }
 0x14f   : > { %v2040_v24 = vrot.slane %v2038_v58, 5  ;;  %v2565_v43 = vsel %vm12012_vm6, %v10893_v38, %v2564_v9 }
 0x150   : > { %10909 = vmatmul.msk.bf16.gmra.mxu1 %vm754_vm3, %v2659_v45  ;;  %v10831_v45 = vld [vmem:[%s12001_s20 + $0x78] sm:$0xf]  ;;  %v2050_v58 = vrot.slane %v2048_v41, 5  ;;  %v2636_v11 = vunpack.c.l.b16 %v2565_v43 }
 0x151   : > { %10794 = vmatmul.msk.bf16.gmra.mxu3 %vm754_vm3, %v11572_v56  ;;  %v2035_v56 = vor.u32 %v2034_v37, %v2031_v7  ;;  %v2045_v1 = vor.u32 %v2044_v30, %v2040_v24  ;;  %v2053_v7 = vshrl.u32 %v10831_v45, 16  ;;  %v2056_v10 = vshll.u32 %v10831_v45, 16 }
 0x152   : > { %v1441_v2 = vpop.f32.mrf.mxu2  ;;  %v868_v18 = vpop.f32.mrf.mxu0 }
 0x153   : > { %v1089_v8 = vadd.f32 %v1088_v25, %v868_v18  ;;  %v2567_v25 = vrot.slane %v10830_v17, 5  ;;  %v10832_v18 = vld [vmem:[%s12001_s20 + $0x7c] sm:$0xf]  ;;  %v2036_v9 = vrot.slane %v2035_v56, 4  ;;  %v2046_v61 = vrot.slane %v2045_v1, 4 }
 0x154   : > { %v1459_v16 = vpop.f32.mrf.mxu3  ;;  %v2571_v41 = vrot.slane %v10832_v18, 5  ;;  %v2058_v56 = vrot.slane %v2056_v10, 5 }
 0x155   : > { %v12587_v39 = vadd.f32 %v1459_v16, %v12475_v35  ;;  %v12589_v31 = vadd.f32 %v1441_v2, %v1089_v8  ;;  %v1093_v14 = vpop.f32.mrf.mxu1  ;;  %v2568_v35 = vsel %vm12012_vm6, %v2566_v15, %v2567_v25  ;;  %v2066_v16 = vshrl.u32 %v10832_v18, 16  ;;  %v11590_v25 = vld [vmem:[%s12001_s20 + $0x78] sm:$0xff] }
 0x156   : > { %v2637_v2 = vunpack.c.l.b16 %v2568_v35  ;;  %v2051_v30 = vsel %vm12040_vm7, %v2046_v61, %v2050_v58  ;;  %v10878_v35 = vld [vmem:[%s12001_s20 + $0x78] sm:$0xe] }
 0x157   : > { %11022 = vmatmul.msk.bf16.gmra.mxu2 %vm754_vm3, %v11589_v27  ;;  %v2068_v43 = vrot.slane %v2066_v16, 4  ;;  %v2239_v45 = vunpack.c.l.b16 %v2051_v30 }
 0x158   : > { %v2660_v17 = vpack.c.b16 %v2637_v2, %v2636_v11  ;;  %v2573_v2 = vrot.slane %v2571_v41, 4 }
 0x15a   : > { %v1444_v53 = vpop.f32.mrf.mxu2  ;;  %v871_v60 = vpop.f32.mrf.mxu0 }
 0x15b   : > { %v1092_v12 = vadd.f32 %v1091_v4, %v871_v60  ;;  %v2062_v4 = vshll.u32 %v10832_v18, 16 }
 0x15c   : > { %v1461_v0 = vpop.f32.mrf.mxu3 }
 0x15d   : > { %v12599_v27 = vadd.f32 %v1461_v0, %v12487_v62  ;;  %v12601_v8 = vadd.f32 %v1444_v53, %v1092_v12  ;;  %10860 = vmatmul.msk.bf16.gmra.mxu0 %vm754_vm3, %v2261_v32  ;;  %v2041_v62 = vsel %vm12040_vm7, %v2036_v9, %v2040_v24  ;;  %v12610_v38 = vpop.f32.mrf.mxu1  ;;  %v2055_v32 = vrot.slane %v2053_v7, 4  ;;  %v10833_v24 = vld [vmem:[%s12001_s20 + $0x80] sm:$0x1] }
 0x15e   : > { %v2064_v1 = vrot.slane %v2062_v4, 5  ;;  %v2238_v12 = vunpack.c.l.b16 %v2041_v62  ;;  %v10894_v0 = vrot.slane %v10878_v35, 9  ;;  %v2072_v9 = vshll.u32 %v10833_v24, 16 }
 0x160   : > { %10910 = vmatmul.msk.bf16.gmra.mxu1 %vm754_vm3, %v2660_v17  ;;  %v2069_v18 = vor.u32 %v2068_v43, %v2064_v1  ;;  %v2262_v61 = vpack.c.b16 %v2239_v45, %v2238_v12  ;;  %v2074_v62 = vrot.slane %v2072_v9, 5  ;;  %v11605_v43 = vld [vmem:[#allocation3 + $0x38] sm:$0xff] }
 0x161   : > { %10795 = vmatmul.msk.bf16.gmra.mxu3 %vm754_vm3, %v11573_v49  ;;  %v2574_v49 = vrot.slane %v10833_v24, 5  ;;  %5499 = vmatpush.bf16.msra.mxu2 %v11605_v43 }
 0x162   : > { %v1446_v37 = vpop.f32.mrf.mxu2  ;;  %v873_v15 = vpop.f32.mrf.mxu0 }
 0x163   : > { %v1094_v53 = vadd.f32 %v1093_v14, %v873_v15  ;;  %v2059_v14 = vor.u32 %v2058_v56, %v2055_v32  ;;  %v2575_v4 = vsel %vm12012_vm6, %v2573_v2, %v2574_v49  ;;  %v10834_v32 = vld [vmem:[%s12001_s20 + $0x84] sm:$0xf]  ;;  %v11574_v56 = vld [vmem:[%s12001_s20 + $0x6c] sm:$0xff] }
 0x164   : > { %v1464_v60 = vpop.f32.mrf.mxu3  ;;  %v2077_v12 = vshrl.u32 %v10834_v32, 16  ;;  %v2080_v24 = vshll.u32 %v10834_v32, 16 }
 0x165   : > { %v12617_v58 = vadd.f32 %v1464_v60, %v12503_v29  ;;  %v12619_v11 = vadd.f32 %v1446_v37, %v1094_v53  ;;  %v12622_v10 = vpop.f32.mrf.mxu1  ;;  %v2572_v29 = vsel %vm12012_vm6, %v10894_v0, %v2571_v41  ;;  %v2060_v17 = vrot.slane %v2059_v14, 4  ;;  %v10835_v41 = vld [vmem:[%s12001_s20 + $0x88] sm:$0xf] }
 0x166   : > { %v2070_v37 = vrot.slane %v2069_v18, 4  ;;  %v2638_v15 = vunpack.c.l.b16 %v2572_v29  ;;  %v2090_v0 = vshrl.u32 %v10835_v41, 16  ;;  %v11591_v18 = vld [vmem:[%s12001_s20 + $0x84] sm:$0xff]  ;;  %v2578_v9 = vrot.slane %v10835_v41, 5  ;;  %v11613_v29 = vld [vmem:[#allocation3 + $0x78] sm:$0xff] }
 0x167   : > { %11023 = vmatmul.msk.bf16.gmra.mxu2 %vm754_vm3, %v11590_v25  ;;  %v2639_v25 = vunpack.c.l.b16 %v2575_v4  ;;  %v2065_v35 = vsel %vm12040_vm7, %v2060_v17, %v2064_v1  ;;  %v10879_v4 = vld [vmem:[%s12001_s20 + $0x84] sm:$0xe]  ;;  %5298 = vmatpush.bf16.msra.mxu1 %v11613_v29 }
 0x168   : > { %v2075_v60 = vsel %vm12040_vm7, %v2070_v37, %v2074_v62  ;;  %v2240_v1 = vunpack.c.l.b16 %v2065_v35  ;;  %v10836_v37 = vld [vmem:[%s12001_s20 + $0x8c] sm:$0x1]  ;;  %v2079_v62 = vrot.slane %v2077_v12, 4  ;;  %v2580_v43 = vrot.slane %v2578_v9, 4 }
 0x169   : > { %v2661_v45 = vpack.c.b16 %v2639_v25, %v2638_v15  ;;  %v2092_v25 = vrot.slane %v2090_v0, 4 }
 0x16a   : > { %v3015_v7 = vpop.f32.mrf.mxu2  ;;  %v2330_v16 = vpop.f32.mrf.mxu0 }
 0x16c   : > { %v1466_v30 = vpop.f32.mrf.mxu3 }
 0x16d   : > { %v12630_v53 = vadd.f32 %v1466_v30, %v12514_v28  ;;  %10861 = vmatmul.msk.bf16.gmra.mxu0 %vm754_vm3, %v2262_v61  ;;  %v2086_v28 = vshll.u32 %v10835_v41, 16  ;;  %v12640_v49 = vpop.f32.mrf.mxu1  ;;  %v2241_v61 = vunpack.c.l.b16 %v2075_v60  ;;  %v2082_v30 = vrot.slane %v2080_v24, 5 }
 0x16f   : > { %16061 = vst [vmem:[#allocation9_spill] sm:$0xff] %v12630_v53  ;;  %v2088_v15 = vrot.slane %v2086_v28, 5  ;;  %v2581_v53 = vrot.slane %v10836_v37, 5  ;;  %v2263_v35 = vpack.c.b16 %v2241_v61, %v2240_v1  ;;  %v2083_v60 = vor.u32 %v2082_v30, %v2079_v62  ;;  %v11575_v62 = vld [vmem:[%s12001_s20 + $0x78] sm:$0xff] }
 0x170   : > { %10911 = vmatmul.msk.bf16.gmra.mxu1 %vm754_vm3, %v2661_v45  ;;  %v2096_v45 = vshll.u32 %v10836_v37, 16  ;;  %v10838_v37 = vld [vmem:[%s12001_s20 + $0x94] sm:$0xf] }
 0x171   : > { %10796 = vmatmul.msk.bf16.gmra.mxu3 %vm754_vm3, %v11574_v56  ;;  %v10895_v56 = vrot.slane %v10879_v4, 9  ;;  %v2093_v0 = vor.u32 %v2092_v25, %v2088_v15  ;;  %v2582_v29 = vsel %vm12012_vm6, %v2580_v43, %v2581_v53  ;;  %v2084_v30 = vrot.slane %v2083_v60, 4 }
 0x172   : > { %v3017_v2 = vpop.f32.mrf.mxu2  ;;  %v2332_v14 = vpop.f32.mrf.mxu0  ;;  %v2110_v43 = vshll.u32 %v10838_v37, 16 }
 0x173   : > { %v2094_v25 = vrot.slane %v2093_v0, 4  ;;  %v11592_v0 = vld [vmem:[%s12001_s20 + $0x90] sm:$0xff] }
 0x174   : > { %v1676_v17 = vpop.f32.mrf.mxu3 }
 0x175   : > { %v1756_v32 = vadd.f32 %v1676_v17, %v12270_v51  ;;  %v12649_v28 = vpop.f32.mrf.mxu1  ;;  %v2579_v51 = vsel %vm12012_vm6, %v10895_v56, %v2578_v9  ;;  %v2641_v17 = vunpack.c.l.b16 %v2582_v29  ;;  %v2098_v9 = vrot.slane %v2096_v45, 5 }
 0x176   : > { %v2640_v61 = vunpack.c.l.b16 %v2579_v51  ;;  %v2585_v29 = vrot.slane %v10838_v37, 5 }
 0x177   : > { %11024 = vmatmul.msk.bf16.gmra.mxu2 %vm754_vm3, %v11591_v18  ;;  %v2410_v41 = vadd.f32 %v2330_v16, %v1756_v32  ;;  %v10837_v16 = vld [vmem:[%s12001_s20 + $0x90] sm:$0xf] }
 0x178   : > { %v2101_v32 = vshrl.u32 %v10837_v16, 16  ;;  %v2104_v53 = vshll.u32 %v10837_v16, 16 }
 0x179   : > { %v2808_v12 = vadd.f32 %v12610_v38, %v2410_v41  ;;  %v2662_v41 = vpack.c.b16 %v2641_v17, %v2640_v61  ;;  %v10880_v17 = vld [vmem:[%s12001_s20 + $0x90] sm:$0xe] }
 0x17a   : > { %v3020_v24 = vpop.f32.mrf.mxu2  ;;  %v2335_v4 = vpop.f32.mrf.mxu0  ;;  %v2103_v51 = vrot.slane %v2101_v32, 4 }
 0x17b   : > { %v12655_v18 = vadd.f32 %v3015_v7, %v2808_v12  ;;  %v2114_v7 = vshrl.u32 %v10838_v37, 16 }
 0x17c   : > { %v1678_v1 = vpop.f32.mrf.mxu3 }
 0x17d   : > { %16062 = vst [vmem:[#allocation10_spill] sm:$0xff] %v12655_v18  ;;  %v1757_v38 = vadd.f32 %v1678_v1, %v12297_v33  ;;  %10862 = vmatmul.msk.bf16.gmra.mxu0 %vm754_vm3, %v2263_v35  ;;  %v2089_v33 = vsel %vm12040_vm7, %v2084_v30, %v2088_v15  ;;  %v2099_v35 = vsel %vm12040_vm7, %v2094_v25, %v2098_v9  ;;  %v12668_v45 = vpop.f32.mrf.mxu1  ;;  %v2106_v1 = vrot.slane %v2104_v53, 5  ;;  %v10839_v30 = vld [vmem:[%s12001_s20 + $0x98] sm:$0x1] }
 0x17e   : > { %v2116_v61 = vrot.slane %v2114_v7, 4  ;;  %v2243_v15 = vunpack.c.l.b16 %v2099_v35  ;;  %v10896_v9 = vrot.slane %v10880_v17, 9  ;;  %v2588_v18 = vrot.slane %v10839_v30, 5 }
 0x17f   : > { %v2411_v56 = vadd.f32 %v2332_v14, %v1757_v38  ;;  %v2120_v53 = vshll.u32 %v10839_v30, 16  ;;  %v11604_v30 = vld [vmem:[#allocation3 + $0x30] sm:$0xff] }
 0x180   : > { %10912 = vmatmul.msk.bf16.gmra.mxu1 %vm754_vm3, %v2662_v41  ;;  %5500 = vmatpush.bf16.msra.mxu2 %v11604_v30 }
 0x181   : > { %v2809_v12 = vadd.f32 %v12622_v10, %v2411_v56  ;;  %10797 = vmatmul.msk.bf16.gmra.mxu3 %vm754_vm3, %v11575_v62  ;;  %v2112_v10 = vrot.slane %v2110_v43, 5  ;;  %v2242_v62 = vunpack.c.l.b16 %v2089_v33  ;;  %v2587_v56 = vrot.slane %v2585_v29, 4 }
 0x182   : > { %v3022_v60 = vpop.f32.mrf.mxu2  ;;  %v2337_v14 = vpop.f32.mrf.mxu0 }
 0x183   : > { %v12671_v16 = vadd.f32 %v3017_v2, %v2809_v12  ;;  %v2107_v2 = vor.u32 %v2106_v1, %v2103_v51  ;;  %v2117_v32 = vor.u32 %v2116_v61, %v2112_v10  ;;  %v2264_v7 = vpack.c.b16 %v2243_v15, %v2242_v62  ;;  %v11576_v15 = vld [vmem:[%s12001_s20 + $0x84] sm:$0xff] }
 0x184   : > { %v1681_v38 = vpop.f32.mrf.mxu3  ;;  %v2589_v33 = vsel %vm12012_vm6, %v2587_v56, %v2588_v18  ;;  %v2122_v1 = vrot.slane %v2120_v53, 5 }
 0x185   : > { %16063 = vst [vmem:[#allocation11_spill] sm:$0xff] %v12671_v16  ;;  %v1758_v25 = vadd.f32 %v1681_v38, %v12308_v48  ;;  %v12681_v41 = vpop.f32.mrf.mxu1  ;;  %v2586_v48 = vsel %vm12012_vm6, %v10896_v9, %v2585_v29  ;;  %v2118_v51 = vrot.slane %v2117_v32, 4  ;;  %v2643_v17 = vunpack.c.l.b16 %v2589_v33  ;;  %v10840_v38 = vld [vmem:[%s12001_s20 + $0x9c] sm:$0xf]  ;;  %v10841_v29 = vld [vmem:[%s12001_s20 + $0xa0] sm:$0xf] }
 0x186   : > { %v2642_v61 = vunpack.c.l.b16 %v2586_v48  ;;  %v2125_v9 = vshrl.u32 %v10840_v38, 16 }
 0x187   : > { %11025 = vmatmul.msk.bf16.gmra.mxu2 %vm754_vm3, %v11592_v0  ;;  %v2412_v37 = vadd.f32 %v2335_v4, %v1758_v25  ;;  %v2108_v0 = vrot.slane %v2107_v2, 4  ;;  %v2123_v18 = vsel %vm12040_vm7, %v2118_v51, %v2122_v1  ;;  %v2134_v2 = vshll.u32 %v10841_v29, 16  ;;  %v11612_v51 = vld [vmem:[#allocation3 + $0x70] sm:$0xff]  ;;  %v10881_v1 = vld [vmem:[%s12001_s20 + $0x9c] sm:$0xe] }
 0x188   : > { %v2663_v56 = vpack.c.b16 %v2643_v17, %v2642_v61  ;;  %v10842_v61 = vld [vmem:[%s12001_s20 + $0xa4] sm:$0x1]  ;;  %v2127_v17 = vrot.slane %v2125_v9, 4  ;;  %5299 = vmatpush.bf16.msra.mxu1 %v11612_v51  ;;  %v10897_v30 = vrot.slane %v10881_v1, 9 }
 0x189   : > { %v2810_v43 = vadd.f32 %v12640_v49, %v2412_v37  ;;  %v2128_v37 = vshll.u32 %v10840_v38, 16  ;;  %v2136_v38 = vrot.slane %v2134_v2, 5 }
 0x18a   : > { %v12679_v12 = vpop.f32.mrf.mxu2  ;;  %v2340_v4 = vpop.f32.mrf.mxu0 }
 0x18b   : > { %v12687_v35 = vadd.f32 %v3020_v24, %v2810_v43  ;;  %v2113_v24 = vsel %vm12040_vm7, %v2108_v0, %v2112_v10  ;;  %v11593_v10 = vld [vmem:[%s12001_s20 + $0x9c] sm:$0xff]  ;;  %v2245_v0 = vunpack.c.l.b16 %v2123_v18 }
 0x18c   : > { %v1683_v49 = vpop.f32.mrf.mxu3  ;;  %v2244_v33 = vunpack.c.l.b16 %v2113_v24 }
 0x18d   : > { %16064 = vst [vmem:[#allocation12_spill] sm:$0xff] %v12687_v35  ;;  %v1759_v62 = vadd.f32 %v1683_v49, %v12325_v22  ;;  %10863 = vmatmul.msk.bf16.gmra.mxu0 %vm754_vm3, %v2264_v7  ;;  %v2138_v22 = vshrl.u32 %v10841_v29, 16  ;;  %v2592_v7 = vrot.slane %v10841_v29, 5 }
 0x18e   : > { %v2265_v24 = vpack.c.b16 %v2245_v0, %v2244_v33 }
 0x18f   : > { %v2413_v25 = vadd.f32 %v2337_v14, %v1759_v62  ;;  %v12700_v14 = vpop.f32.mrf.mxu1  ;;  %v2140_v62 = vrot.slane %v2138_v22, 4  ;;  %v2594_v29 = vrot.slane %v2592_v7, 4 }
 0x190   : > { %10913 = vmatmul.msk.bf16.gmra.mxu1 %vm754_vm3, %v2663_v56  ;;  %v2144_v56 = vshll.u32 %v10842_v61, 16 }
 0x191   : > { %v2811_v32 = vadd.f32 %v12649_v28, %v2413_v25  ;;  %10798 = vmatmul.msk.bf16.gmra.mxu3 %vm754_vm3, %v11576_v15  ;;  %v2130_v28 = vrot.slane %v2128_v37, 5  ;;  %v2141_v22 = vor.u32 %v2140_v62, %v2136_v38 }
 0x192   : > { %v3027_v53 = vpop.f32.mrf.mxu2  ;;  %v2342_v43 = vpop.f32.mrf.mxu0 }
 0x193   : > { %v12703_v48 = vadd.f32 %v3022_v60, %v2811_v32  ;;  %v2595_v60 = vrot.slane %v10842_v61, 5  ;;  %v2131_v18 = vor.u32 %v2130_v28, %v2127_v17  ;;  %v11577_v61 = vld [vmem:[%s12001_s20 + $0x90] sm:$0xff]  ;;  %v2146_v28 = vrot.slane %v2144_v56, 5 }
 0x194   : > { %v1686_v49 = vpop.f32.mrf.mxu3 }
 0x195   : > { %16065 = vst [vmem:[#allocation13_spill] sm:$0xff] %v12703_v48  ;;  %v1760_v15 = vadd.f32 %v1686_v49, %v12340_v50  ;;  %v2593_v50 = vsel %vm12012_vm6, %v10897_v30, %v2592_v7  ;;  %v2596_v32 = vsel %vm12012_vm6, %v2594_v29, %v2595_v60  ;;  %v10844_v49 = vld [vmem:[%s12001_s20 + $0xac] sm:$0xf]  ;;  %v2132_v17 = vrot.slane %v2131_v18, 4 }
 0x196   : > { %v2644_v0 = vunpack.c.l.b16 %v2593_v50  ;;  %v2645_v1 = vunpack.c.l.b16 %v2596_v32  ;;  %v2142_v7 = vrot.slane %v2141_v22, 4  ;;  %v2158_v29 = vshll.u32 %v10844_v49, 16 }
 0x197   : > { %11026 = vmatmul.msk.bf16.gmra.mxu2 %vm754_vm3, %v11593_v10  ;;  %v2414_v25 = vadd.f32 %v2340_v4, %v1760_v15  ;;  %v12711_v2 = vpop.f32.mrf.mxu1  ;;  %v10843_v10 = vld [vmem:[%s12001_s20 + $0xa8] sm:$0xf]  ;;  %v2599_v50 = vrot.slane %v10844_v49, 5 }
 0x198   : > { %v2149_v62 = vshrl.u32 %v10843_v10, 16  ;;  %v2152_v30 = vshll.u32 %v10843_v10, 16  ;;  %v2664_v60 = vpack.c.b16 %v2645_v1, %v2644_v0  ;;  %v10882_v0 = vld [vmem:[%s12001_s20 + $0xa8] sm:$0xe] }
 0x199   : > { %v2812_v9 = vadd.f32 %v12668_v45, %v2414_v25 }
 0x19a   : > { %v3030_v37 = vpop.f32.mrf.mxu2  ;;  %v2345_v51 = vpop.f32.mrf.mxu0  ;;  %v2151_v22 = vrot.slane %v2149_v62, 4  ;;  %v2154_v10 = vrot.slane %v2152_v30, 5 }
 0x19b   : > { %v12718_v4 = vadd.f32 %v12679_v12, %v2812_v9  ;;  %v2162_v12 = vshrl.u32 %v10844_v49, 16  ;;  %v11594_v9 = vld [vmem:[%s12001_s20 + $0xa8] sm:$0xff] }
 0x19c   : > { %v1688_v33 = vpop.f32.mrf.mxu3 }
 0x19d   : > { %16066 = vst [vmem:[#allocation14_spill] sm:$0xff] %v12718_v4  ;;  %v1761_v45 = vadd.f32 %v1688_v33, %v12365_v21  ;;  %10864 = vmatmul.msk.bf16.gmra.mxu0 %vm754_vm3, %v2265_v24  ;;  %v2137_v21 = vsel %vm12040_vm7, %v2132_v17, %v2136_v38  ;;  %v2147_v24 = vsel %vm12040_vm7, %v2142_v7, %v2146_v28  ;;  %v2164_v33 = vrot.slane %v2162_v12, 4 }
 0x19e   : > { %v2247_v38 = vunpack.c.l.b16 %v2147_v24  ;;  %v10898_v7 = vrot.slane %v10882_v0, 9  ;;  %v2601_v28 = vrot.slane %v2599_v50, 4 }
 0x19f   : > { %v2415_v15 = vadd.f32 %v2342_v43, %v1761_v45  ;;  %v12731_v56 = vpop.f32.mrf.mxu1  ;;  %v2246_v45 = vunpack.c.l.b16 %v2137_v21 }
 0x1a0   : > { %10914 = vmatmul.msk.bf16.gmra.mxu1 %vm754_vm3, %v2664_v60 }
 0x1a1   : > { %v2813_v25 = vadd.f32 %v12681_v41, %v2415_v15  ;;  %10799 = vmatmul.msk.bf16.gmra.mxu3 %vm754_vm3, %v11577_v61  ;;  %v2160_v41 = vrot.slane %v2158_v29, 5  ;;  %v10845_v61 = vld [vmem:[%s12001_s20 + $0xb0] sm:$0x1]  ;;  %v2266_v12 = vpack.c.b16 %v2247_v38, %v2246_v45  ;;  %v11578_v38 = vld [vmem:[%s12001_s20 + $0x9c] sm:$0xff] }
 0x1a2   : > { %v3032_v18 = vpop.f32.mrf.mxu2  ;;  %v2347_v43 = vpop.f32.mrf.mxu0  ;;  %v2602_v15 = vrot.slane %v10845_v61, 5  ;;  %v2168_v30 = vshll.u32 %v10845_v61, 16  ;;  %v11603_v61 = vld [vmem:[#allocation3 + $0x28] sm:$0xff] }
 0x1a3   : > { %v12734_v32 = vadd.f32 %v3027_v53, %v2813_v25  ;;  %v2155_v53 = vor.u32 %v2154_v10, %v2151_v22  ;;  %v2165_v62 = vor.u32 %v2164_v33, %v2160_v41  ;;  %5501 = vmatpush.bf16.msra.mxu2 %v11603_v61 }
 0x1a4   : > { %v1691_v1 = vpop.f32.mrf.mxu3  ;;  %v2603_v21 = vsel %vm12012_vm6, %v2601_v28, %v2602_v15  ;;  %v2170_v10 = vrot.slane %v2168_v30, 5 }
 0x1a5   : > { %16067 = vst [vmem:[#allocation15_spill] sm:$0xff] %v12734_v32  ;;  %v1762_v17 = vadd.f32 %v1691_v1, %v12380_v57  ;;  %v2600_v57 = vsel %vm12012_vm6, %v10898_v7, %v2599_v50  ;;  %v2166_v22 = vrot.slane %v2165_v62, 4  ;;  %v2647_v0 = vunpack.c.l.b16 %v2603_v21  ;;  %v10846_v1 = vld [vmem:[%s12001_s20 + $0xb4] sm:$0xf]  ;;  %v10847_v50 = vld [vmem:[%s12001_s20 + $0xb8] sm:$0xf] }
 0x1a6   : > { %v2646_v33 = vunpack.c.l.b16 %v2600_v57  ;;  %v2173_v28 = vshrl.u32 %v10846_v1, 16 }
 0x1a7   : > { %11027 = vmatmul.msk.bf16.gmra.mxu2 %vm754_vm3, %v11594_v9  ;;  %v2416_v49 = vadd.f32 %v2345_v51, %v1762_v17  ;;  %v12744_v60 = vpop.f32.mrf.mxu1  ;;  %v2156_v9 = vrot.slane %v2155_v53, 4  ;;  %v2171_v7 = vsel %vm12040_vm7, %v2166_v22, %v2170_v10  ;;  %v2182_v53 = vshll.u32 %v10847_v50, 16  ;;  %v11611_v22 = vld [vmem:[#allocation3 + $0x68] sm:$0xff]  ;;  %v10883_v10 = vld [vmem:[%s12001_s20 + $0xb4] sm:$0xe] }
 0x1a8   : > { %v2665_v15 = vpack.c.b16 %v2647_v0, %v2646_v33  ;;  %v10848_v33 = vld [vmem:[%s12001_s20 + $0xbc] sm:$0x1]  ;;  %5300 = vmatpush.bf16.msra.mxu1 %v11611_v22  ;;  %v10899_v61 = vrot.slane %v10883_v10, 9  ;;  %v11579_v22 = vld [vmem:[%s12001_s20 + $0xa8] sm:$0xff] }
 0x1a9   : > { %v2814_v29 = vadd.f32 %v12700_v14, %v2416_v49  ;;  %v2176_v49 = vshll.u32 %v10846_v1, 16  ;;  %v2184_v1 = vrot.slane %v2182_v53, 5 }
 0x1aa   : > { %v12742_v25 = vpop.f32.mrf.mxu2  ;;  %v2350_v51 = vpop.f32.mrf.mxu0 }
 0x1ab   : > { %v12750_v24 = vadd.f32 %v3030_v37, %v2814_v29  ;;  %v2161_v37 = vsel %vm12040_vm7, %v2156_v9, %v2160_v41  ;;  %v11595_v29 = vld [vmem:[%s12001_s20 + $0xb4] sm:$0xff]  ;;  %v2249_v9 = vunpack.c.l.b16 %v2171_v7  ;;  %v2178_v0 = vrot.slane %v2176_v49, 5 }
 0x1ac   : > { %v1693_v14 = vpop.f32.mrf.mxu3  ;;  %v2248_v21 = vunpack.c.l.b16 %v2161_v37 }
 0x1ad   : > { %16068 = vst [vmem:[#allocation16_spill] sm:$0xff] %v12750_v24  ;;  %v1763_v45 = vadd.f32 %v1693_v14, %v12394_v19  ;;  %10865 = vmatmul.msk.bf16.gmra.mxu0 %vm754_vm3, %v2266_v12  ;;  %v2186_v19 = vshrl.u32 %v10847_v50, 16  ;;  %v2606_v12 = vrot.slane %v10847_v50, 5  ;;  %v2609_v50 = vrot.slane %v10848_v33, 5  ;;  %v11033_v24 = vld [vmem:[%s12001_s20 + $0x20] sm:$0x1] }
 0x1ae   : > { %v2267_v37 = vpack.c.b16 %v2249_v9, %v2248_v21 }
 0x1af   : > { %v2417_v17 = vadd.f32 %v2347_v43, %v1763_v45  ;;  %v12765_v43 = vpop.f32.mrf.mxu1  ;;  %v2188_v45 = vrot.slane %v2186_v19, 4 }
 0x1b0   : > { %10915 = vmatmul.msk.bf16.gmra.mxu1 %vm754_vm3, %v2665_v15 }
 0x1b1   : > { %v2815_v62 = vadd.f32 %v12711_v2, %v2417_v17  ;;  %10800 = vmatmul.msk.bf16.gmra.mxu3 %vm754_vm3, %v11578_v38  ;;  %v2175_v2 = vrot.slane %v2173_v28, 4  ;;  %v2608_v17 = vrot.slane %v2606_v12, 4  ;;  %v2189_v49 = vor.u32 %v2188_v45, %v2184_v1 }
 0x1b2   : > { %v12763_v30 = vpop.f32.mrf.mxu2  ;;  %v2352_v41 = vpop.f32.mrf.mxu0 }
 0x1b3   : > { %v12768_v57 = vadd.f32 %v3032_v18, %v2815_v62  ;;  %v2179_v7 = vor.u32 %v2178_v0, %v2175_v2  ;;  %v2192_v62 = vshll.u32 %v10848_v33, 16  ;;  %v2610_v53 = vsel %vm12012_vm6, %v2608_v17, %v2609_v50  ;;  %v10850_v0 = vld [vmem:[%s12001_s20 + $0xc4] sm:$0xf] }
 0x1b4   : > { %v1696_v14 = vpop.f32.mrf.mxu3 }
 0x1b5   : > { %16069 = vst [vmem:[#allocation17_spill] sm:$0xff] %v12768_v57  ;;  %v1764_v38 = vadd.f32 %v1696_v14, %v12404_v54  ;;  %v2607_v54 = vsel %vm12012_vm6, %v10899_v61, %v2606_v12  ;;  %v2180_v10 = vrot.slane %v2179_v7, 4  ;;  %v2190_v14 = vrot.slane %v2189_v49, 4  ;;  %v10849_v12 = vld [vmem:[%s12001_s20 + $0xc0] sm:$0xf] }
 0x1b6   : > { %v2648_v21 = vunpack.c.l.b16 %v2607_v54  ;;  %v2194_v33 = vrot.slane %v2192_v62, 5  ;;  %v2197_v17 = vshrl.u32 %v10849_v12, 16  ;;  %v2210_v7 = vshrl.u32 %v10850_v0, 16 }
 0x1b7   : > { %11028 = vmatmul.msk.bf16.gmra.mxu2 %vm754_vm3, %v11595_v29  ;;  %v2418_v18 = vadd.f32 %v2350_v51, %v1764_v38  ;;  %v12778_v28 = vpop.f32.mrf.mxu1  ;;  %v2613_v62 = vrot.slane %v10850_v0, 5 }
 0x1b9   : > { %v2816_v15 = vadd.f32 %v12731_v56, %v2418_v18  ;;  %v2649_v56 = vunpack.c.l.b16 %v2610_v53  ;;  %v11596_v18 = vld [vmem:[%s12001_s20 + $0xc0] sm:$0xff] }
 0x1ba   : > { %v12776_v57 = vpop.f32.mrf.mxu2  ;;  %v2355_v51 = vpop.f32.mrf.mxu0 }
 0x1bb   : > { %v12785_v19 = vadd.f32 %v12742_v25, %v2816_v15  ;;  %v2666_v45 = vpack.c.b16 %v2649_v56, %v2648_v21  ;;  %v2185_v25 = vsel %vm12040_vm7, %v2180_v10, %v2184_v1  ;;  %v10884_v15 = vld [vmem:[%s12001_s20 + $0xc0] sm:$0xe]  ;;  %v10851_v1 = vld [vmem:[%s12001_s20 + $0xc8] sm:$0x1]  ;;  %v2615_v56 = vrot.slane %v2613_v62, 4 }
 0x1bc   : > { %v1698_v29 = vpop.f32.mrf.mxu3  ;;  %v2250_v54 = vunpack.c.l.b16 %v2185_v25  ;;  %v10900_v21 = vrot.slane %v10884_v15, 9 }
 0x1bd   : > { %16070 = vst [vmem:[#allocation18_spill] sm:$0xff] %v12785_v19  ;;  %v1765_v9 = vadd.f32 %v1698_v29, %v12421_v20  ;;  %10866 = vmatmul.msk.bf16.gmra.mxu0 %vm754_vm3, %v2267_v37  ;;  %v2195_v20 = vsel %vm12040_vm7, %v2190_v14, %v2194_v33  ;;  %v2206_v37 = vshll.u32 %v10850_v0, 16  ;;  %v2212_v33 = vrot.slane %v2210_v7, 4 }
 0x1be   : > { %v2251_v53 = vunpack.c.l.b16 %v2195_v20 }
 0x1bf   : > { %v12791_v2 = vadd.f32 %v2352_v41, %v1765_v9  ;;  %v12801_v61 = vpop.f32.mrf.mxu1  ;;  %v2200_v41 = vshll.u32 %v10849_v12, 16  ;;  %v2616_v9 = vrot.slane %v10851_v1, 5  ;;  %v2208_v14 = vrot.slane %v2206_v37, 5 }
 0x1c0   : > { %10916 = vmatmul.msk.bf16.gmra.mxu1 %vm754_vm3, %v2666_v45  ;;  %v2268_v0 = vpack.c.b16 %v2251_v53, %v2250_v54  ;;  %v11580_v54 = vld [vmem:[%s12001_s20 + $0xb4] sm:$0xff] }
 0x1c1   : > { %10801 = vmatmul.msk.bf16.gmra.mxu3 %vm754_vm3, %v11579_v22  ;;  %v2199_v22 = vrot.slane %v2197_v17, 4  ;;  %v2202_v10 = vrot.slane %v2200_v41, 5  ;;  %v2617_v45 = vsel %vm12012_vm6, %v2615_v56, %v2616_v9  ;;  %v2213_v17 = vor.u32 %v2212_v33, %v2208_v14  ;;  %v11602_v53 = vld [vmem:[#allocation3 + $0x20] sm:$0xff] }
 0x1c2   : > { %v12799_v38 = vpop.f32.mrf.mxu2  ;;  %v2357_v50 = vpop.f32.mrf.mxu0  ;;  %v2216_v41 = vshll.u32 %v10851_v1, 16  ;;  %5502 = vmatpush.bf16.msra.mxu2 %v11602_v53 }
 0x1c4   : > { %v1701_v49 = vpop.f32.mrf.mxu3 }
 0x1c5   : > { %v1766_v29 = vadd.f32 %v1701_v49, %v12433_v55  ;;  %v2614_v55 = vsel %vm12012_vm6, %v10900_v21, %v2613_v62  ;;  %v2218_v21 = vrot.slane %v2216_v41, 5 }
 0x1c6   : > { %v2650_v7 = vunpack.c.l.b16 %v2614_v55 }
 0x1c7   : > { %11029 = vmatmul.msk.bf16.gmra.mxu2 %vm754_vm3, %v11596_v18  ;;  %v12809_v12 = vadd.f32 %v2355_v51, %v1766_v29  ;;  %v12813_v20 = vpop.f32.mrf.mxu1  ;;  %v2203_v18 = vor.u32 %v2202_v10, %v2199_v22  ;;  %v2651_v51 = vunpack.c.l.b16 %v2617_v45  ;;  %v2214_v29 = vrot.slane %v2213_v17, 4  ;;  %v11031_v22 = vld [vmem:[%s12001_s20 + $0x18] sm:$0xf]  ;;  %v11597_v45 = vld [vmem:[%s12001_s20 + $0xcc] sm:$0xff] }
 0x1c8   : > { %v11610_v17 = vld [vmem:[#allocation3 + $0x60] sm:$0xff] }
 0x1c9   : > { %v2204_v62 = vrot.slane %v2203_v18, 4  ;;  %v2667_v9 = vpack.c.b16 %v2651_v51, %v2650_v7  ;;  %v2219_v55 = vsel %vm12040_vm7, %v2214_v29, %v2218_v21  ;;  %v3179_v18 = vshll.u32 %v11031_v22, 16  ;;  %5301 = vmatpush.bf16.msra.mxu1 %v11610_v17 }
 0x1ca   : > { %v12811_v25 = vpop.f32.mrf.mxu2  ;;  %v2360_v15 = vpop.f32.mrf.mxu0 }
 0x1cc   : > { %v1703_v37 = vpop.f32.mrf.mxu3 }
 0x1cd   : > { %v1767_v49 = vadd.f32 %v1703_v37, %v12449_v26  ;;  %10867 = vmatmul.msk.bf16.gmra.mxu0 %vm754_vm3, %v2268_v0  ;;  %v11032_v26 = vld [vmem:[%s12001_s20 + $0x1c] sm:$0xf]  ;;  %v2209_v0 = vsel %vm12040_vm7, %v2204_v62, %v2208_v14  ;;  %v3181_v62 = vrot.slane %v3179_v18, 5 }
 0x1ce   : > { %v3185_v37 = vshll.u32 %v11032_v26, 16  ;;  %v3189_v7 = vshrl.u32 %v11032_v26, 16 }
 0x1cf   : > { %v12822_v56 = vadd.f32 %v2357_v50, %v1767_v49  ;;  %v12828_v10 = vpop.f32.mrf.mxu1  ;;  %v3176_v50 = vshrl.u32 %v11031_v22, 16  ;;  %v2252_v49 = vunpack.c.l.b16 %v2209_v0  ;;  %v11096_v0 = vld [vmem:[%s12001_s20 + $0x18] sm:$0xe] }
 0x1d0   : > { %10917 = vmatmul.msk.bf16.gmra.mxu1 %vm754_vm3, %v2667_v9  ;;  %v3187_v29 = vrot.slane %v3185_v37, 5  ;;  %v3191_v21 = vrot.slane %v3189_v7, 4  ;;  %v11112_v18 = vrot.slane %v11096_v0, 9  ;;  %v3850_v7 = vrot.slane %v11033_v24, 5 }
 0x1d1   : > { %10802 = vmatmul.msk.bf16.gmra.mxu3 %vm754_vm3, %v11580_v54  ;;  %v2253_v54 = vunpack.c.l.b16 %v2219_v55  ;;  %v3178_v53 = vrot.slane %v3176_v50, 4  ;;  %v11581_v50 = vld [vmem:[%s12001_s20 + $0xc0] sm:$0xff] }
 0x1d2   : > { %v12826_v1 = vpop.f32.mrf.mxu2  ;;  %v2362_v33 = vpop.f32.mrf.mxu0  ;;  %v3192_v32 = vor.u32 %v3191_v21, %v3187_v29 }
 0x1d3   : > { %v2269_v22 = vpack.c.b16 %v2253_v54, %v2252_v49  ;;  %v3182_v55 = vor.u32 %v3181_v62, %v3178_v53 }
 0x1d4   : > { %v1706_v41 = vpop.f32.mrf.mxu3 }
 0x1d5   : > { %v1768_v51 = vadd.f32 %v1706_v41, %v12460_v59  ;;  %v3847_v59 = vrot.slane %v11032_v26, 5  ;;  %v3183_v49 = vrot.slane %v3182_v55, 4  ;;  %v3193_v26 = vrot.slane %v3192_v32, 4 }
 0x1d7   : > { %11030 = vmatmul.msk.bf16.gmra.mxu2 %vm754_vm3, %v11597_v45  ;;  %v12839_v14 = vadd.f32 %v2360_v15, %v1768_v51  ;;  %v12843_v19 = vpop.f32.mrf.mxu1  ;;  %v3195_v45 = vshll.u32 %v11033_v24, 16  ;;  %v3849_v37 = vrot.slane %v3847_v59, 4  ;;  %v3848_v53 = vsel %vm12012_vm6, %v11112_v18, %v3847_v59  ;;  %v11035_v24 = vld [vmem:[%s12001_s20 + $0x28] sm:$0xf] }
 0x1d8   : > { %v3209_v18 = vshll.u32 %v11035_v24, 16 }
 0x1d9   : > { %v3197_v54 = vrot.slane %v3195_v45, 5 }
 0x1da   : > { %v12841_v9 = vpop.f32.mrf.mxu2  ;;  %v2365_v41 = vpop.f32.mrf.mxu0 }
 0x1db   : > { %v3198_v55 = vsel %vm12040_vm7, %v3193_v26, %v3197_v54 }
 0x1dc   : > { %v1708_v17 = vpop.f32.mrf.mxu3  ;;  %v3562_v48 = vunpack.c.l.b16 %v3198_v55 }
 0x1dd   : > { %v1769_v15 = vadd.f32 %v1708_v17, %v12477_v36  ;;  %10868 = vmatmul.msk.bf16.gmra.mxu0 %vm754_vm3, %v2269_v22  ;;  %v3851_v36 = vsel %vm12012_vm6, %v3849_v37, %v3850_v7  ;;  %v11034_v22 = vld [vmem:[%s12001_s20 + $0x24] sm:$0xf]  ;;  %v3959_v17 = vunpack.c.l.b16 %v3848_v53  ;;  %v3213_v37 = vshrl.u32 %v11035_v24, 16 }
 0x1de   : > { %v3960_v45 = vunpack.c.l.b16 %v3851_v36  ;;  %v3200_v59 = vshrl.u32 %v11034_v22, 16  ;;  %v3211_v53 = vrot.slane %v3209_v18, 5 }
 0x1df   : > { %v12850_v51 = vadd.f32 %v2362_v33, %v1769_v15  ;;  %v12859_v21 = vpop.f32.mrf.mxu1  ;;  %v3188_v33 = vsel %vm12040_vm7, %v3183_v49, %v3187_v29  ;;  %v3215_v36 = vrot.slane %v3213_v37, 4 }
 0x1e0   : > { %16072 = vst [vmem:[#allocation20_spill] sm:$0xff] %v12859_v21  ;;  %v3561_v4 = vunpack.c.l.b16 %v3188_v33  ;;  %v3991_v35 = vpack.c.b16 %v3960_v45, %v3959_v17  ;;  %v3202_v26 = vrot.slane %v3200_v59, 4  ;;  %v11601_v17 = vld [vmem:[#allocation3 + $0x18] sm:$0xff] }
 0x1e1   : > { %10803 = vmatmul.msk.bf16.gmra.mxu3 %vm754_vm3, %v11581_v50  ;;  %v3203_v50 = vshll.u32 %v11034_v22, 16  ;;  %v11097_v22 = vld [vmem:[%s12001_s20 + $0x24] sm:$0xe]  ;;  %v3216_v55 = vor.u32 %v3215_v36, %v3211_v53  ;;  %5503 = vmatpush.bf16.msra.mxu2 %v11601_v17 }
 0x1e2   : > { %v12857_v62 = vpop.f32.mrf.mxu2  ;;  %v2367_v0 = vpop.f32.mrf.mxu0  ;;  %v11113_v59 = vrot.slane %v11097_v22, 9 }
 0x1e3   : > { %16071 = vst [vmem:[#allocation19_spill] sm:$0xff] %v12857_v62  ;;  %v3205_v54 = vrot.slane %v3203_v50, 5 }
 0x1e4   : > { %v1711_v32 = vpop.f32.mrf.mxu3 }
 0x1e5   : > { %v1770_v15 = vadd.f32 %v1711_v32, %v12489_v63  ;;  %v3854_v63 = vrot.slane %v11035_v24, 5  ;;  %v11036_v32 = vld [vmem:[%s12001_s20 + $0x2c] sm:$0x1]  ;;  %v3206_v33 = vor.u32 %v3205_v54, %v3202_v26 }
 0x1e6   : > { %v3219_v45 = vshll.u32 %v11036_v32, 16  ;;  %v3857_v50 = vrot.slane %v11036_v32, 5 }
 0x1e7   : > { %v12868_v7 = vadd.f32 %v2365_v41, %v1770_v15  ;;  %v12872_v49 = vpop.f32.mrf.mxu1  ;;  %v3593_v41 = vpack.c.b16 %v3562_v48, %v3561_v4  ;;  %v3856_v15 = vrot.slane %v3854_v63, 4  ;;  %v3207_v24 = vrot.slane %v3206_v33, 4  ;;  %v11037_v48 = vld [vmem:[%s12001_s20 + $0x30] sm:$0xf] }
 0x1e8   : > { %16074 = vst [vmem:[#allocation22_spill] sm:$0xff] %v12872_v49  ;;  %v3217_v4 = vrot.slane %v3216_v55, 4  ;;  %v3855_v26 = vsel %vm12012_vm6, %v11113_v59, %v3854_v63  ;;  %v3224_v32 = vshrl.u32 %v11037_v48, 16  ;;  %v3227_v22 = vshll.u32 %v11037_v48, 16 }
 0x1e9   : > { %v3858_v54 = vsel %vm12012_vm6, %v3856_v15, %v3857_v50  ;;  %v3961_v33 = vunpack.c.l.b16 %v3855_v26  ;;  %v3212_v55 = vsel %vm12040_vm7, %v3207_v24, %v3211_v53  ;;  %v11098_v24 = vld [vmem:[%s12001_s20 + $0x30] sm:$0xe] }
 0x1ea   : > { %v12870_v29 = vpop.f32.mrf.mxu2  ;;  %v2370_v16 = vpop.f32.mrf.mxu0  ;;  %v3962_v17 = vunpack.c.l.b16 %v3858_v54  ;;  %v3226_v50 = vrot.slane %v3224_v32, 4  ;;  %v3563_v48 = vunpack.c.l.b16 %v3212_v55 }
 0x1eb   : > { %16073 = vst [vmem:[#allocation21_spill] sm:$0xff] %v12870_v29 }
 0x1ec   : > { %v1713_v62 = vpop.f32.mrf.mxu3 }
 0x1ed   : > { %v1771_v21 = vadd.f32 %v1713_v62, %v12505_v42  ;;  %11129 = vmatmul.msk.bf16.vlgmr.msra.gmra.mxu0 %vm754_vm3, %v3991_v35  ;;  %v3221_v62 = vrot.slane %v3219_v45, 5 }
 0x1ef   : > { %v12878_v18 = vadd.f32 %v2367_v0, %v1771_v21  ;;  %v12883_v42 = vpop.f32.mrf.mxu1  ;;  %v11038_v21 = vld [vmem:[%s12001_s20 + $0x34] sm:$0xf]  ;;  %v3222_v63 = vsel %vm12040_vm7, %v3217_v4, %v3221_v62  ;;  %v11039_v4 = vld [vmem:[%s12001_s20 + $0x38] sm:$0x1] }
 0x1f0   : > { %16076 = vst [vmem:[#allocation24_spill] sm:$0xff] %v12883_v42  ;;  %v11609_v0 = vld [vmem:[#allocation3 + $0x58] sm:$0xff]  ;;  %v3233_v45 = vshll.u32 %v11038_v21, 16  ;;  %v3237_v59 = vshrl.u32 %v11038_v21, 16  ;;  %v3564_v29 = vunpack.c.l.b16 %v3222_v63  ;;  %v3861_v42 = vrot.slane %v11038_v21, 5 }
 0x1f1   : > { %11080 = vmatmul.msk.bf16.vlgmr.msra.gmra.mxu3 %vm754_vm3, %v3593_v41  ;;  %5302 = vmatpush.bf16.msra.mxu1 %v11609_v0  ;;  %v3864_v55 = vrot.slane %v11039_v4, 5 }
 0x1f2   : > { %v12881_v37 = vpop.f32.mrf.mxu2  ;;  %v2372_v35 = vpop.f32.mrf.mxu0  ;;  %v3239_v53 = vrot.slane %v3237_v59, 4  ;;  %v3594_v32 = vpack.c.b16 %v3564_v29, %v3563_v48 }
 0x1f3   : > { %16075 = vst [vmem:[#allocation23_spill] sm:$0xff] %v12881_v37  ;;  %v3229_v37 = vrot.slane %v3227_v22, 5  ;;  %v11114_v22 = vrot.slane %v11098_v24, 9 }
 0x1f4   : > { %v1716_v36 = vpop.f32.mrf.mxu3 }
 0x1f5   : > { %v1772_v41 = vadd.f32 %v1716_v36, %v12516_v6  ;;  %v3992_v6 = vpack.c.b16 %v3962_v17, %v3961_v33  ;;  %v3235_v36 = vrot.slane %v3233_v45, 5  ;;  %v3230_v49 = vor.u32 %v3229_v37, %v3226_v50 }
 0x1f6   : > { %v3243_v33 = vshll.u32 %v11039_v4, 16  ;;  %v3863_v17 = vrot.slane %v3861_v42, 4  ;;  %v3862_v21 = vsel %vm12012_vm6, %v11114_v22, %v3861_v42 }
 0x1f7   : > { %v12896_v15 = vadd.f32 %v2370_v16, %v1772_v41  ;;  %v12900_v54 = vpop.f32.mrf.mxu1  ;;  %v3240_v41 = vor.u32 %v3239_v53, %v3235_v36  ;;  %v3231_v45 = vrot.slane %v3230_v49, 4  ;;  %v11041_v53 = vld [vmem:[%s12001_s20 + $0x40] sm:$0xf]  ;;  %v3963_v24 = vunpack.c.l.b16 %v3862_v21 }
 0x1f8   : > { %16078 = vst [vmem:[#allocation26_spill] sm:$0xff] %v12900_v54  ;;  %v3245_v50 = vrot.slane %v3243_v33, 5  ;;  %v3865_v48 = vsel %vm12012_vm6, %v3863_v17, %v3864_v55  ;;  %v3261_v22 = vshrl.u32 %v11041_v53, 16 }
 0x1f9   : > { %v3241_v59 = vrot.slane %v3240_v41, 4  ;;  %v3236_v49 = vsel %vm12040_vm7, %v3231_v45, %v3235_v36 }
 0x1fa   : > { %v12898_v26 = vpop.f32.mrf.mxu2  ;;  %v2375_v0 = vpop.f32.mrf.mxu0  ;;  %v3565_v17 = vunpack.c.l.b16 %v3236_v49 }
 0x1fb   : > { %16077 = vst [vmem:[#allocation25_spill] sm:$0xff] %v12898_v26  ;;  %v3246_v41 = vsel %vm12040_vm7, %v3241_v59, %v3245_v50 }
 0x1fc   : > { %v1718_v62 = vpop.f32.mrf.mxu3  ;;  %v3566_v26 = vunpack.c.l.b16 %v3246_v41 }
 0x1fd   : > { %v1773_v16 = vadd.f32 %v1718_v62, %v12533_v13  ;;  %11130 = vmatmul.msk.bf16.gmra.mxu0 %vm754_vm3, %v3992_v6  ;;  %v11040_v13 = vld [vmem:[%s12001_s20 + $0x3c] sm:$0xf] }
 0x1fe   : > { %v3248_v4 = vshrl.u32 %v11040_v13, 16  ;;  %v3251_v62 = vshll.u32 %v11040_v13, 16  ;;  %v3263_v13 = vrot.slane %v3261_v22, 4  ;;  %v3595_v50 = vpack.c.b16 %v3566_v26, %v3565_v17  ;;  %v11043_v22 = vld [vmem:[%s12001_s20 + $0x48] sm:$0xf] }
 0x1ff   : > { %v12906_v63 = vadd.f32 %v2372_v35, %v1773_v16  ;;  %v12916_v6 = vpop.f32.mrf.mxu1  ;;  %v3964_v16 = vunpack.c.l.b16 %v3865_v48  ;;  %v3868_v48 = vrot.slane %v11041_v53, 5  ;;  %v11044_v26 = vld [vmem:[%s12001_s20 + $0x4c] sm:$0xf] }
 0x200   : > { %16081 = vst [vmem:[#allocation29_spill] sm:$0xff] %v12916_v6  ;;  %v3250_v55 = vrot.slane %v3248_v4, 4  ;;  %v11600_v4 = vld [vmem:[#allocation3 + $0x10] sm:$0xff] }
 0x201   : > { %16079 = vst [vmem:[#allocation27_spill] sm:$0xff] %v12906_v63  ;;  %11081 = vmatmul.msk.bf16.gmra.mxu3 %vm754_vm3, %v3594_v32  ;;  %v3257_v32 = vshll.u32 %v11041_v53, 16  ;;  %v3993_v36 = vpack.c.b16 %v3964_v16, %v3963_v24  ;;  %5504 = vmatpush.bf16.msra.mxu2 %v11600_v4 }
 0x202   : > { %v12911_v37 = vpop.f32.mrf.mxu2  ;;  %v2377_v29 = vpop.f32.mrf.mxu0 }
 0x203   : > { %16080 = vst [vmem:[#allocation28_spill] sm:$0xff] %v12911_v37  ;;  %v3253_v37 = vrot.slane %v3251_v62, 5  ;;  %v3259_v21 = vrot.slane %v3257_v32, 5 }
 0x204   : > { %v1721_v35 = vpop.f32.mrf.mxu3 }
 0x205   : > { %v1774_v42 = vadd.f32 %v1721_v35, %v12545_v23  ;;  %v11042_v23 = vld [vmem:[%s12001_s20 + $0x44] sm:$0x1]  ;;  %v11099_v35 = vld [vmem:[%s12001_s20 + $0x3c] sm:$0xe]  ;;  %v3254_v59 = vor.u32 %v3253_v37, %v3250_v55  ;;  %v3264_v49 = vor.u32 %v3263_v13, %v3259_v21  ;;  %v11608_v13 = vld [vmem:[#allocation3 + $0x50] sm:$0xff] }
 0x206   : > { %v3267_v24 = vshll.u32 %v11042_v23, 16  ;;  %v11115_v62 = vrot.slane %v11099_v35, 9  ;;  %v3871_v16 = vrot.slane %v11042_v23, 5  ;;  %5303 = vmatpush.bf16.msra.mxu1 %v11608_v13 }
 0x207   : > { %v12924_v33 = vadd.f32 %v2375_v0, %v1774_v42  ;;  %v12930_v63 = vpop.f32.mrf.mxu1  ;;  %v3870_v42 = vrot.slane %v3868_v48, 4  ;;  %v3255_v53 = vrot.slane %v3254_v59, 4  ;;  %v3265_v37 = vrot.slane %v3264_v49, 4 }
 0x208   : > { %16083 = vst [vmem:[#allocation31_spill] sm:$0xff] %v12930_v63  ;;  %v3269_v41 = vrot.slane %v3267_v24, 5  ;;  %v3869_v17 = vsel %vm12012_vm6, %v11115_v62, %v3868_v48  ;;  %v3281_v59 = vshll.u32 %v11044_v26, 16 }
 0x209   : > { %v3872_v55 = vsel %vm12012_vm6, %v3870_v42, %v3871_v16  ;;  %v3260_v35 = vsel %vm12040_vm7, %v3255_v53, %v3259_v21  ;;  %v3965_v24 = vunpack.c.l.b16 %v3869_v17 }
 0x20a   : > { %v12926_v45 = vpop.f32.mrf.mxu2  ;;  %v2380_v6 = vpop.f32.mrf.mxu0  ;;  %v3270_v49 = vsel %vm12040_vm7, %v3265_v37, %v3269_v41  ;;  %v3966_v48 = vunpack.c.l.b16 %v3872_v55  ;;  %v3283_v53 = vrot.slane %v3281_v59, 5  ;;  %v11100_v41 = vld [vmem:[%s12001_s20 + $0x48] sm:$0xe] }
 0x20b   : > { %16082 = vst [vmem:[#allocation30_spill] sm:$0xff] %v12926_v45  ;;  %v3568_v21 = vunpack.c.l.b16 %v3270_v49 }
 0x20c   : > { %v1723_v54 = vpop.f32.mrf.mxu3  ;;  %v3994_v63 = vpack.c.b16 %v3966_v48, %v3965_v24  ;;  %v11046_v48 = vld [vmem:[%s12001_s20 + $0x54] sm:$0xf] }
 0x20d   : > { %v1775_v0 = vadd.f32 %v1723_v54, %v12561_v52  ;;  %11131 = vmatmul.msk.bf16.gmra.mxu0 %vm754_vm3, %v3993_v36  ;;  %v3272_v36 = vshrl.u32 %v11043_v22, 16 }
 0x20f   : > { %v12934_v32 = vadd.f32 %v2377_v29, %v1775_v0  ;;  %v3275_v29 = vshll.u32 %v11043_v22, 16  ;;  %v3285_v0 = vshrl.u32 %v11044_v26, 16  ;;  %v12950_v4 = vpop.f32.mrf.mxu1  ;;  %v3274_v42 = vrot.slane %v3272_v36, 4 }
 0x210   : > { %16085 = vst [vmem:[#allocation33_spill] sm:$0xff] %v12950_v4  ;;  %v3567_v22 = vunpack.c.l.b16 %v3260_v35 }
 0x211   : > { %11082 = vmatmul.msk.bf16.gmra.mxu3 %vm754_vm3, %v3595_v50  ;;  %v3277_v16 = vrot.slane %v3275_v29, 5  ;;  %v11116_v29 = vrot.slane %v11100_v41, 9  ;;  %v3296_v41 = vshrl.u32 %v11046_v48, 16 }
 0x212   : > { %v12938_v52 = vpop.f32.mrf.mxu2  ;;  %v2382_v54 = vpop.f32.mrf.mxu0  ;;  %v3596_v13 = vpack.c.b16 %v3568_v21, %v3567_v22 }
 0x213   : > { %16084 = vst [vmem:[#allocation32_spill] sm:$0xff] %v12938_v52  ;;  %v3287_v52 = vrot.slane %v3285_v0, 4  ;;  %v3278_v17 = vor.u32 %v3277_v16, %v3274_v42  ;;  %v11047_v16 = vld [vmem:[%s12001_s20 + $0x58] sm:$0xf] }
 0x214   : > { %v1726_v23 = vpop.f32.mrf.mxu3 }
 0x215   : > { %v1776_v50 = vadd.f32 %v1726_v23, %v12572_v46  ;;  %v11045_v46 = vld [vmem:[%s12001_s20 + $0x50] sm:$0x1]  ;;  %v3875_v23 = vrot.slane %v11044_v26, 5  ;;  %v3288_v4 = vor.u32 %v3287_v52, %v3283_v53 }
 0x216   : > { %v3878_v59 = vrot.slane %v11045_v46, 5 }
 0x217   : > { %v12952_v62 = vadd.f32 %v2380_v6, %v1776_v50  ;;  %v3291_v6 = vshll.u32 %v11045_v46, 16  ;;  %v3877_v35 = vrot.slane %v3875_v23, 4  ;;  %v3279_v50 = vrot.slane %v3278_v17, 4  ;;  %v12962_v26 = vpop.f32.mrf.mxu1 }
 0x218   : > { %16087 = vst [vmem:[#allocation35_spill] sm:$0xff] %v12962_v26  ;;  %v3289_v49 = vrot.slane %v3288_v4, 4  ;;  %v3876_v52 = vsel %vm12012_vm6, %v11116_v29, %v3875_v23  ;;  %v3299_v17 = vshll.u32 %v11046_v48, 16 }
 0x219   : > { %v3293_v24 = vrot.slane %v3291_v6, 5  ;;  %v3967_v21 = vunpack.c.l.b16 %v3876_v52  ;;  %v11048_v52 = vld [vmem:[%s12001_s20 + $0x5c] sm:$0x1] }
 0x21a   : > { %v12954_v45 = vpop.f32.mrf.mxu2  ;;  %v2385_v37 = vpop.f32.mrf.mxu0 }
 0x21b   : > { %16086 = vst [vmem:[#allocation34_spill] sm:$0xff] %v12954_v45  ;;  %v3294_v4 = vsel %vm12040_vm7, %v3289_v49, %v3293_v24 }
 0x21c   : > { %v1728_v55 = vpop.f32.mrf.mxu3  ;;  %v3570_v29 = vunpack.c.l.b16 %v3294_v4 }
 0x21d   : > { %v1777_v36 = vadd.f32 %v1728_v55, %v12589_v31  ;;  %11132 = vmatmul.msk.bf16.gmra.mxu0 %vm754_vm3, %v3994_v63  ;;  %v3879_v31 = vsel %vm12012_vm6, %v3877_v35, %v3878_v59  ;;  %v3305_v55 = vshll.u32 %v11047_v16, 16  ;;  %v3301_v59 = vrot.slane %v3299_v17, 5 }
 0x21e   : > { %v3968_v46 = vunpack.c.l.b16 %v3879_v31  ;;  %v3882_v31 = vrot.slane %v11047_v16, 5  ;;  %v3885_v17 = vrot.slane %v11048_v52, 5 }
 0x21f   : > { %v12960_v0 = vadd.f32 %v2382_v54, %v1777_v36  ;;  %v3284_v54 = vsel %vm12040_vm7, %v3279_v50, %v3283_v53  ;;  %v3298_v53 = vrot.slane %v3296_v41, 4  ;;  %v3307_v50 = vrot.slane %v3305_v55, 5  ;;  %v12980_v24 = vpop.f32.mrf.mxu1 }
 0x220   : > { %v3569_v36 = vunpack.c.l.b16 %v3284_v54  ;;  %v3995_v35 = vpack.c.b16 %v3968_v46, %v3967_v21  ;;  %16089 = vst [vmem:[#allocation37_spill] sm:$0xff] %v12980_v24  ;;  %v3315_v21 = vshll.u32 %v11048_v52, 16  ;;  %v11599_v46 = vld [vmem:[#allocation3 + $0x8] sm:$0xff]  ;;  %v11051_v24 = vld [vmem:[%s12001_s20 + $0x68] sm:$0x1] }
 0x221   : > { %11083 = vmatmul.msk.bf16.gmra.mxu3 %vm754_vm3, %v3596_v13  ;;  %v3309_v13 = vshrl.u32 %v11047_v16, 16  ;;  %v3302_v54 = vor.u32 %v3301_v59, %v3298_v53  ;;  %5505 = vmatpush.bf16.msra.mxu2 %v11599_v46  ;;  %v11049_v16 = vld [vmem:[%s12001_s20 + $0x60] sm:$0xf] }
 0x222   : > { %v2387_v63 = vpop.f32.mrf.mxu0  ;;  %v12970_v42 = vpop.f32.mrf.mxu2  ;;  %v3320_v53 = vshrl.u32 %v11049_v16, 16  ;;  %v3323_v59 = vshll.u32 %v11049_v16, 16 }
 0x223   : > { %16088 = vst [vmem:[#allocation36_spill] sm:$0xff] %v12970_v42  ;;  %v3311_v42 = vrot.slane %v3309_v13, 4  ;;  %v11050_v13 = vld [vmem:[%s12001_s20 + $0x64] sm:$0xf] }
 0x224   : > { %v1731_v22 = vpop.f32.mrf.mxu3  ;;  %v3329_v52 = vshll.u32 %v11050_v13, 16  ;;  %v3889_v26 = vrot.slane %v11050_v13, 5 }
 0x225   : > { %v1778_v23 = vadd.f32 %v1731_v22, %v12601_v8  ;;  %v11101_v8 = vld [vmem:[%s12001_s20 + $0x54] sm:$0xe]  ;;  %v3597_v22 = vpack.c.b16 %v3570_v29, %v3569_v36  ;;  %v3312_v4 = vor.u32 %v3311_v42, %v3307_v50  ;;  %v3303_v36 = vrot.slane %v3302_v54, 4 }
 0x226   : > { %v11117_v41 = vrot.slane %v11101_v8, 9  ;;  %v11607_v8 = vld [vmem:[#allocation3 + $0x48] sm:$0xff]  ;;  %v3331_v16 = vrot.slane %v3329_v52, 5 }
 0x227   : > { %v12978_v6 = vadd.f32 %v2385_v37, %v1778_v23  ;;  %v3884_v23 = vrot.slane %v3882_v31, 4  ;;  %v3313_v29 = vrot.slane %v3312_v4, 4  ;;  %5304 = vmatpush.bf16.msra.mxu1 %v11607_v8 }
 0x229   : > { %v3886_v42 = vsel %vm12012_vm6, %v3884_v23, %v3885_v17  ;;  %v3325_v23 = vrot.slane %v3323_v59, 5 }
 0x22a   : > { %v2390_v49 = vpop.f32.mrf.mxu0  ;;  %v12984_v45 = vpop.f32.mrf.mxu2  ;;  %v3970_v4 = vunpack.c.l.b16 %v3886_v42 }
 0x22b   : > { %16090 = vst [vmem:[#allocation38_spill] sm:$0xff] %v12984_v45  ;;  %v3317_v45 = vrot.slane %v3315_v21, 5 }
 0x22c   : > { %v1733_v48 = vpop.f32.mrf.mxu3 }
 0x22d   : > { %v1779_v37 = vadd.f32 %v1733_v48, %v12619_v11  ;;  %11133 = vmatmul.msk.bf16.gmra.mxu0 %vm754_vm3, %v3995_v35  ;;  %v3883_v35 = vsel %vm12012_vm6, %v11117_v41, %v3882_v31  ;;  %v3308_v31 = vsel %vm12040_vm7, %v3303_v36, %v3307_v50  ;;  %v3318_v21 = vsel %vm12040_vm7, %v3313_v29, %v3317_v45  ;;  %v11102_v45 = vld [vmem:[%s12001_s20 + $0x60] sm:$0xe] }
 0x22e   : > { %v3969_v54 = vunpack.c.l.b16 %v3883_v35  ;;  %v3322_v41 = vrot.slane %v3320_v53, 4  ;;  %v3572_v35 = vunpack.c.l.b16 %v3318_v21  ;;  %v3339_v36 = vshll.u32 %v11051_v24, 16 }
 0x22f   : > { %v12988_v55 = vadd.f32 %v2387_v63, %v1779_v37  ;;  %v3333_v63 = vshrl.u32 %v11050_v13, 16  ;;  %v12997_v37 = vpop.f32.mrf.mxu1 }
 0x230   : > { %16091 = vst [vmem:[#allocation39_spill] sm:$0xff] %v12997_v37  ;;  %v3996_v42 = vpack.c.b16 %v3970_v4, %v3969_v54  ;;  %v3892_v54 = vrot.slane %v11051_v24, 5 }
 0x231   : > { %11084 = vmatmul.msk.bf16.gmra.mxu3 %vm754_vm3, %v3597_v22  ;;  %v3335_v37 = vrot.slane %v3333_v63, 4  ;;  %v11118_v63 = vrot.slane %v11102_v45, 9 }
 0x232   : > { %v2392_v11 = vpop.f32.mrf.mxu0  ;;  %v13004_v46 = vpop.f32.mrf.mxu2 }
 0x233   : > { %16092 = vst [vmem:[#allocation40_spill] sm:$0xff] %v13004_v46  ;;  %v3336_v50 = vor.u32 %v3335_v37, %v3331_v16  ;;  %v11052_v37 = vld [vmem:[%s12001_s20 + $0x6c] sm:$0xf]  ;;  %v11055_v46 = vld [vmem:[%s12001_s20 + $0x78] sm:$0xf] }
 0x234   : > { %v1736_v48 = vpop.f32.mrf.mxu3 }
 0x235   : > { %v1780_v22 = vadd.f32 %v1736_v48, %v12531_v3  ;;  %v3571_v3 = vunpack.c.l.b16 %v3308_v31  ;;  %v3326_v48 = vor.u32 %v3325_v23, %v3322_v41  ;;  %v3337_v13 = vrot.slane %v3336_v50, 4  ;;  %v11053_v41 = vld [vmem:[%s12001_s20 + $0x70] sm:$0xf] }
 0x236   : > { %v3341_v31 = vrot.slane %v3339_v36, 5  ;;  %v3357_v50 = vshrl.u32 %v11053_v41, 16 }
 0x237   : > { %v13006_v17 = vadd.f32 %v2390_v49, %v1780_v22  ;;  %v3598_v59 = vpack.c.b16 %v3572_v35, %v3571_v3  ;;  %v13012_v49 = vpop.f32.mrf.mxu1  ;;  %v3327_v52 = vrot.slane %v3326_v48, 4  ;;  %v3891_v22 = vrot.slane %v3889_v26, 4 }
 0x238   : > { %16093 = vst [vmem:[#allocation41_spill] sm:$0xff] %v13012_v49  ;;  %v3890_v3 = vsel %vm12012_vm6, %v11118_v63, %v3889_v26  ;;  %v3342_v35 = vsel %vm12040_vm7, %v3337_v13, %v3341_v31  ;;  %v3353_v48 = vshll.u32 %v11053_v41, 16  ;;  %v11054_v31 = vld [vmem:[%s12001_s20 + $0x74] sm:$0x1]  ;;  %v11103_v49 = vld [vmem:[%s12001_s20 + $0x6c] sm:$0xe] }
 0x239   : > { %v3332_v23 = vsel %vm12040_vm7, %v3327_v52, %v3331_v16  ;;  %v3893_v24 = vsel %vm12012_vm6, %v3891_v22, %v3892_v54  ;;  %v3971_v16 = vunpack.c.l.b16 %v3890_v3  ;;  %v3359_v54 = vrot.slane %v3357_v50, 4 }
 0x23a   : > { %v2395_v8 = vpop.f32.mrf.mxu0  ;;  %v13017_v21 = vpop.f32.mrf.mxu2  ;;  %v3573_v26 = vunpack.c.l.b16 %v3332_v23  ;;  %v13032_v22 = vrot.slane %v3353_v48, 5  ;;  %v11119_v48 = vrot.slane %v11103_v49, 9 }
 0x23b   : > { %16094 = vst [vmem:[#allocation42_spill] sm:$0xff] %v13017_v21 }
 0x23c   : > { %v1738_v29 = vpop.f32.mrf.mxu3 }
 0x23d   : > { %v1781_v53 = vadd.f32 %v1738_v29, %v12543_v44  ;;  %11134 = vmatmul.msk.bf16.gmra.mxu0 %vm754_vm3, %v3996_v42  ;;  %v3347_v42 = vshll.u32 %v11052_v37, 16  ;;  %v3972_v29 = vunpack.c.l.b16 %v3893_v24  ;;  %v13042_v24 = vld [vmem:[%s12001_s20 + $0x7c] sm:$0xf] }
 0x23f   : > { %v13014_v4 = vadd.f32 %v2392_v11, %v1781_v53  ;;  %v3344_v11 = vshrl.u32 %v11052_v37, 16  ;;  %v3574_v53 = vunpack.c.l.b16 %v3342_v35  ;;  %v3349_v63 = vrot.slane %v3347_v42, 5  ;;  %v13034_v13 = vpop.f32.mrf.mxu1 }
 0x240   : > { %16095 = vst [vmem:[#allocation43_spill] sm:$0xff] %v13034_v13  ;;  %v3896_v37 = vrot.slane %v11053_v41, 5  ;;  %v3997_v21 = vpack.c.b16 %v3972_v29, %v3971_v16  ;;  %v3363_v35 = vshll.u32 %v11054_v31, 16  ;;  %v11598_v16 = vld [vmem:[#allocation3] sm:$0xff]  ;;  %v3371_v29 = vshll.u32 %v11055_v46, 16 }
 0x241   : > { %11085 = vmatmul.msk.bf16.gmra.mxu3 %vm754_vm3, %v3598_v59  ;;  %v3346_v59 = vrot.slane %v3344_v11, 4  ;;  %v3599_v23 = vpack.c.b16 %v3574_v53, %v3573_v26  ;;  %v3381_v13 = vshrl.u32 %v13042_v24, 16  ;;  %5506 = vmatpush.bf16.msra.mxu2 %v11598_v16 }
 0x242   : > { %v2397_v44 = vpop.f32.mrf.mxu0  ;;  %v13039_v3 = vpop.f32.mrf.mxu2  ;;  %v3898_v50 = vrot.slane %v3896_v37, 4  ;;  %v3365_v49 = vrot.slane %v3363_v35, 5  ;;  %v11606_v35 = vld [vmem:[#allocation3 + $0x40] sm:$0xff] }
 0x243   : > { %16096 = vst [vmem:[#allocation44_spill] sm:$0xff] %v13039_v3  ;;  %v3350_v11 = vor.u32 %v3349_v63, %v3346_v59  ;;  %v3377_v3 = vshll.u32 %v13042_v24, 16  ;;  %v3897_v63 = vsel %vm12012_vm6, %v11119_v48, %v3896_v37  ;;  %v13065_v37 = vld [vmem:[%s12001_s20 + $0x80] sm:$0x1]  ;;  %5305 = vmatpush.bf16.msra.mxu1 %v11606_v35 }
 0x244   : > { %v1741_v36 = vpop.f32.mrf.mxu3  ;;  %v3973_v48 = vunpack.c.l.b16 %v3897_v63  ;;  %v3387_v16 = vshll.u32 %v13065_v37, 16 }
 0x245   : > { %v1782_v45 = vadd.f32 %v1741_v36, %v12559_v47  ;;  %v3899_v36 = vrot.slane %v11054_v31, 5  ;;  %v3351_v53 = vrot.slane %v3350_v11, 4  ;;  %v3383_v31 = vrot.slane %v3381_v13, 4 }
 0x247   : > { %v13030_v52 = vadd.f32 %v2395_v8, %v1782_v45  ;;  %v3360_v8 = vor.u32 %v3359_v54, %v13032_v22  ;;  %v3368_v45 = vshrl.u32 %v11055_v46, 16  ;;  %v3373_v54 = vrot.slane %v3371_v29, 5 }
 0x248   : > { %v3356_v13 = vsel %vm12040_vm7, %v3351_v53, %v13032_v22  ;;  %v2817_v22 = vadd.f32 %v12744_v60, %v12791_v2  ;;  %v2818_v29 = vadd.f32 %v12765_v43, %v12809_v12  ;;  %v2819_v53 = vadd.f32 %v12778_v28, %v12822_v56 }
 0x249   : > { %v3361_v59 = vrot.slane %v3360_v8, 4  ;;  %v3370_v46 = vrot.slane %v3368_v45, 4  ;;  %v13062_v8 = vpop.f32.mrf.mxu1  ;;  %v3389_v12 = vrot.slane %v3387_v16, 5 }
 0x24a   : > { %v2400_v47 = vpop.f32.mrf.mxu0  ;;  %v13101_v56 = vadd.f32 %v12763_v30, %v2817_v22 }
 0x24b   : > { %v3374_v45 = vor.u32 %v3373_v54, %v3370_v46  ;;  %v3903_v46 = vrot.slane %v13042_v24, 5 }
 0x24c   : > { %v1743_v42 = vpop.f32.mrf.mxu3 }
 0x24d   : > { %v1783_v41 = vadd.f32 %v1743_v42, %v12570_v40  ;;  %11135 = vmatmul.msk.bf16.gmra.mxu0 %vm754_vm3, %v3997_v21  ;;  %v3900_v40 = vsel %vm12012_vm6, %v3898_v50, %v3899_v36  ;;  %v11900_v21 = vmov 0   ;;  %v3375_v2 = vrot.slane %v3374_v45, 4 }
 0x24e   : > { %4250 = vst [vmem:[#allocation2 + $0xc] sm:$0xf] %v11900_v21  ;;  %v3974_v50 = vunpack.c.l.b16 %v3900_v40  ;;  %v11104_v40 = vld [vmem:[%s12001_s20 + $0x78] sm:$0xe]  ;;  %v3905_v30 = vrot.slane %v3903_v46, 4 }
 0x24f   : > { %v13049_v26 = vadd.f32 %v2397_v44, %v1783_v41  ;;  %v13057_v44 = vrot.slane %v3377_v3, 5  ;;  %4247 = vst [vmem:[#allocation2] sm:$0xf] %v11900_v21  ;;  %v3366_v3 = vsel %vm12040_vm7, %v3361_v59, %v3365_v49  ;;  %v2820_v59 = vadd.f32 %v12801_v61, %v12839_v14 }
 0x250   : > { %4248 = vst [vmem:[#allocation2 + $0x4] sm:$0xf] %v11900_v21  ;;  %v3575_v49 = vunpack.c.l.b16 %v3356_v13  ;;  %v3576_v63 = vunpack.c.l.b16 %v3366_v3  ;;  %v3998_v60 = vpack.c.b16 %v3974_v50, %v3973_v48  ;;  %v13104_v61 = vadd.f32 %v12776_v57, %v2818_v29 }
 0x251   : > { %11086 = vmatmul.msk.bf16.gmra.mxu3 %vm754_vm3, %v3599_v23  ;;  %4249 = vst [vmem:[#allocation2 + $0x8] sm:$0x3] %v11900_v21  ;;  %v13069_v23 = vpop.f32.mrf.mxu2  ;;  %v3384_v41 = vor.u32 %v3383_v31, %v13057_v44  ;;  %v13107_v14 = vadd.f32 %v12799_v38, %v2819_v53  ;;  %v13111_v54 = vadd.f32 %v12811_v25, %v2820_v59  ;;  %v13113_v35 = vpop.f32.mrf.mxu1  ;;  %v3906_v48 = vrot.slane %v13065_v37, 5 }
 0x252   : > { %v13060_v11 = vpop.f32.mrf.mxu0  ;;  %4251 = vst [vmem:[#allocation2 + $0x10] sm:$0xf] %v11900_v21  ;;  %v3380_v25 = vsel %vm12040_vm7, %v3375_v2, %v13057_v44  ;;  %v11058_v44 = vld [vmem:[%s12001_s20 + $0x84] sm:$0xf] }
 0x253   : > { %4252 = vst [vmem:[#allocation2 + $0x14] sm:$0x3] %v11900_v21  ;;  %v3385_v43 = vrot.slane %v3384_v41, 4  ;;  %v3907_v59 = vsel %vm12012_vm6, %v3905_v30, %v3906_v48 }
 0x254   : > { %v1746_v42 = vpop.f32.mrf.mxu3  ;;  %4253 = vst [vmem:[#allocation2 + $0x18] sm:$0xf] %v11900_v21 }
 0x255   : > { %v1784_v36 = vadd.f32 %v1746_v42, %v12587_v39  ;;  %4254 = vst [vmem:[#allocation2 + $0x1c] sm:$0xf] %v11900_v21  ;;  %v3600_v42 = vpack.c.b16 %v3576_v63, %v3575_v49  ;;  %v3390_v3 = vsel %vm12040_vm7, %v3385_v43, %v3389_v12  ;;  %v3392_v49 = vshrl.u32 %v11058_v44, 16 }
 0x256   : > { %4255 = vst [vmem:[#allocation2 + $0x20] sm:$0x3] %v11900_v21  ;;  %v4545_v24 = vld [vmem:[#allocation2] sm:$0xf]  ;;  %v13152_v29 = vunpack.c.l.b16 %v3390_v3 }
 0x257   : > { %v13088_v39 = vadd.f32 %v2400_v47, %v1784_v36  ;;  %4256 = vst [vmem:[#allocation2 + $0x24] sm:$0xf] %v11900_v21  ;;  %v11120_v47 = vrot.slane %v11104_v40, 9  ;;  %v13116_v57 = vld [vmem:[#allocation2 + $0x4] sm:$0xf]  ;;  %v4594_v13 = vshrl.u32 %v4545_v24, 16  ;;  %v13129_v36 = vadd.f32 %v12813_v20, %v12850_v51 }
 0x258   : > { %4257 = vst [vmem:[#allocation2 + $0x28] sm:$0xf] %v11900_v21  ;;  %v4547_v50 = vld [vmem:[#allocation2 + $0x8] sm:$0x1]  ;;  %v4597_v16 = vshll.u32 %v4545_v24, 16  ;;  %v15950_v51 = vshrl.u32 %v13116_v57, 16 }
 0x259   : > { %4258 = vst [vmem:[#allocation2 + $0x2c] sm:$0x3] %v11900_v21  ;;  %v13135_v45 = vpop.f32.mrf.mxu2  ;;  %v4596_v41 = vrot.slane %v4594_v13, 4  ;;  %v3904_v22 = vsel %vm12012_vm6, %v11120_v47, %v3903_v46  ;;  %v13146_v20 = vld [vmem:[%s12001_s20 + $0x88] sm:$0xf]  ;;  %v5059_v12 = vrot.slane %v13116_v57, 5 }
 0x25a   : > { %v13097_v28 = vpop.f32.mrf.mxu0  ;;  %16097 = vst [vmem:[#allocation45_spill] sm:$0xff] %v13113_v35  ;;  %v4599_v53 = vrot.slane %v4597_v16, 5  ;;  %v4609_v40 = vrot.slane %v15950_v51, 4  ;;  %v3401_v2 = vshll.u32 %v13146_v20, 16  ;;  %v3975_v47 = vunpack.c.l.b16 %v3904_v22  ;;  %v4993_v30 = vld [vmem:[#allocation2] sm:$0xe] }
 0x25b   : > { %4259 = vst [vmem:[#allocation2 + $0x30] sm:$0xf] %v11900_v21  ;;  %v3405_v24 = vshrl.u32 %v13146_v20, 16  ;;  %v5061_v3 = vrot.slane %v5059_v12, 4  ;;  %v5062_v48 = vrot.slane %v4547_v50, 5  ;;  %v13173_v16 = vrot.slane %v3392_v49, 4 }
 0x25c   : > { %v1748_v31 = vpop.f32.mrf.mxu3  ;;  %4260 = vst [vmem:[#allocation2 + $0x34] sm:$0xf] %v11900_v21  ;;  %v4600_v43 = vor.u32 %v4599_v53, %v4596_v41  ;;  %v3976_v41 = vunpack.c.l.b16 %v3907_v59  ;;  %v2803_v53 = vpop.f32.mrf.mxu1 }
 0x25d   : > { %v1785_v38 = vadd.f32 %v1748_v31, %v12599_v27  ;;  %11136 = vmatmul.msk.bf16.gmra.mxu0 %vm754_vm3, %v3998_v60  ;;  %v13133_v27 = vadd.f32 %v12828_v10, %v12868_v7  ;;  %16098 = vst [vmem:[#allocation46_spill] sm:$0xff] %v13135_v45  ;;  %v15949_v10 = vshll.u32 %v13116_v57, 16  ;;  %v13150_v7 = vunpack.c.l.b16 %v3380_v25  ;;  %v16134_v45 = vld [vmem:[#allocation15_spill] sm:$0xff] }
 0x25e   : > { %4261 = vst [vmem:[#allocation2 + $0x38] sm:$0x3] %v11900_v21  ;;  %v3395_v60 = vshll.u32 %v11058_v44, 16  ;;  %v11145_v25 = vrot.slane %v4993_v30, 9 }
 0x25f   : > { %v13140_v37 = vadd.f32 %v13060_v11, %v1785_v38  ;;  %4262 = vst [vmem:[#allocation2 + $0x3c] sm:$0xf] %v11900_v21  ;;  %v4613_v11 = vshll.u32 %v4547_v50, 16  ;;  %v4605_v63 = vrot.slane %v15949_v10, 5  ;;  %v4601_v38 = vrot.slane %v4600_v43, 4  ;;  %v11645_v10 = vld [vmem:[#allocation3 + $0x178] sm:$0xff] }
 0x260   : > { %4263 = vst [vmem:[#allocation2 + $0x40] sm:$0xf] %v11900_v21  ;;  %v5060_v50 = vsel %vm12012_vm6, %v11145_v25, %v5059_v12  ;;  %v3910_v25 = vrot.slane %v13146_v20, 5  ;;  %v16102_v20 = vld [vmem:[#allocation22_spill] sm:$0xff]  ;;  %7846 = vmatpush.bf16.msrb.mxu2 %v11645_v10 }
 0x261   : > { %16099 = vst [vmem:[#allocation47_spill] sm:$0xff] %v13140_v37  ;;  %11087 = vmatmul.msk.bf16.gmra.mxu3 %vm754_vm3, %v3600_v42  ;;  %v4610_v31 = vor.u32 %v4609_v40, %v4605_v63  ;;  %v4615_v42 = vrot.slane %v4613_v11, 5  ;;  %v3397_v11 = vrot.slane %v3395_v60, 5  ;;  %v13176_v40 = vrot.slane %v3401_v2, 5  ;;  %v3090_v2 = vpop.f32.mrf.mxu2 }
 0x262   : > { %4264 = vst [vmem:[#allocation2 + $0x44] sm:$0x3] %v11900_v21  ;;  %v13163_v46 = vpop.f32.mrf.mxu0  ;;  %v4606_v43 = vsel %vm12040_vm7, %v4601_v38, %v4605_v63  ;;  %v5063_v60 = vsel %vm12012_vm6, %v5061_v3, %v5062_v48  ;;  %v3407_v63 = vrot.slane %v3405_v24, 4  ;;  %v5186_v30 = vunpack.c.l.b16 %v5060_v50 }
 0x263   : > { %4265 = vst [vmem:[#allocation2 + $0x48] sm:$0xf] %v11900_v21  ;;  %v4611_v22 = vrot.slane %v4610_v31, 4  ;;  %v5387_v49 = vunpack.c.l.b16 %v4606_v43  ;;  %v5187_v12 = vunpack.c.l.b16 %v5063_v60  ;;  %v3999_v38 = vpack.c.b16 %v3976_v41, %v3975_v47 }
 0x264   : > { %4266 = vst [vmem:[#allocation2 + $0x4c] sm:$0xf] %v11900_v21  ;;  %v1751_v13 = vpop.f32.mrf.mxu3  ;;  %v13198_v3 = vadd.f32 %v12841_v9, %v13133_v27  ;;  %v2823_v24 = vadd.f32 %v12843_v19, %v12878_v18  ;;  %v3601_v9 = vpack.c.b16 %v13152_v29, %v13150_v7  ;;  %v11061_v19 = vld [vmem:[%s12001_s20 + $0x90] sm:$0xf]  ;;  %v3398_v27 = vor.u32 %v3397_v11, %v13173_v16  ;;  %v16106_v16 = vld [vmem:[#allocation26_spill] sm:$0xff] }
 0x265   : > { %4267 = vst [vmem:[#allocation2 + $0x50] sm:$0x3] %v11900_v21  ;;  %v1786_v44 = vadd.f32 %v1751_v13, %v12617_v58  ;;  %v4616_v59 = vsel %vm12040_vm7, %v4611_v22, %v4615_v42  ;;  %v11060_v42 = vld [vmem:[%s12001_s20 + $0x8c] sm:$0x1]  ;;  %v5218_v47 = vpack.c.b16 %v5187_v12, %v5186_v30  ;;  %v3408_v50 = vor.u32 %v3407_v63, %v13176_v40  ;;  %v16107_v63 = vld [vmem:[#allocation29_spill] sm:$0xff] }
 0x266   : > { %4268 = vst [vmem:[#allocation2 + $0x54] sm:$0xf] %v11900_v21  ;;  %v5388_v31 = vunpack.c.l.b16 %v4616_v59  ;;  %v16101_v22 = vld [vmem:[#allocation27_spill] sm:$0xff]  ;;  %v16104_v59 = vld [vmem:[#allocation9_spill] sm:$0xff]  ;;  %v3912_v29 = vrot.slane %v3910_v25, 4  ;;  %v3913_v60 = vrot.slane %v11060_v42, 5  ;;  %v2827_v11 = vadd.f32 %v16106_v16, %v12934_v32 }
 0x267   : > { %4269 = vst [vmem:[#allocation2 + $0x58] sm:$0xf] %v11900_v21  ;;  %v2440_v58 = vadd.f32 %v13097_v28, %v1786_v44  ;;  %v13191_v28 = vadd.f32 %v12826_v1, %v13129_v36  ;;  %v11105_v1 = vld [vmem:[%s12001_s20 + $0x84] sm:$0xe]  ;;  %v16100_v44 = vld [vmem:[#allocation20_spill] sm:$0xff]  ;;  %5306 = vmatmul.bf16.vlgmr.msra.gmra.mxu1 %v5218_v47  ;;  %v2828_v30 = vadd.f32 %v16107_v63, %v12952_v62  ;;  %v3416_v12 = vshrl.u32 %v11061_v19, 16 }
 0x268   : > { %4270 = vst [vmem:[#allocation2 + $0x5c] sm:$0x3] %v11900_v21  ;;  %v5419_v36 = vpack.c.b16 %v5388_v31, %v5387_v49  ;;  %v2824_v41 = vadd.f32 %v16100_v44, %v12896_v15  ;;  %v13220_v15 = vld [vmem:[%s12001_s20 + $0x94] sm:$0xf]  ;;  %v11121_v7 = vrot.slane %v11105_v1, 9  ;;  %v3399_v32 = vrot.slane %v3398_v27, 4 }
 0x269   : > { %4271 = vst [vmem:[#allocation2 + $0x60] sm:$0xf] %v11900_v21  ;;  %v2838_v13 = vadd.f32 %v2803_v53, %v2440_v58  ;;  %v2825_v53 = vadd.f32 %v16102_v20, %v16101_v22  ;;  %v3411_v58 = vshll.u32 %v11060_v42, 16  ;;  %v3425_v42 = vshll.u32 %v13220_v15, 16  ;;  %v16110_v44 = vld [vmem:[#allocation21_spill] sm:$0xff]  ;;  %v11621_v20 = vld [vmem:[#allocation3 + $0xb8] sm:$0xff] }
 0x26a   : > { %4272 = vst [vmem:[#allocation2 + $0x64] sm:$0xf] %v11900_v21  ;;  %v13202_v48 = vpop.f32.mrf.mxu0  ;;  %5507 = vmatmul.bf16.vlgmr.msra.gmra.mxu2 %v5419_v36  ;;  %v3429_v1 = vshrl.u32 %v13220_v15, 16  ;;  %v3409_v62 = vrot.slane %v3408_v50, 4  ;;  %v13243_v22 = vadd.f32 %v16110_v44, %v2824_v41  ;;  %v16112_v27 = vld [vmem:[#allocation25_spill] sm:$0xff]  ;;  %6104 = vmatpush.bf16.msrb.mxu3 %v11621_v20  ;;  %v3404_v16 = vsel %vm12040_vm7, %v3399_v32, %v13176_v40 }
 0x26b   : > { %4273 = vst [vmem:[#allocation2 + $0x68] sm:$0x3] %v11900_v21  ;;  %v13210_v43 = vadd.f32 %v3090_v2, %v2838_v13  ;;  %v16105_v2 = vld [vmem:[#allocation24_spill] sm:$0xff]  ;;  %v3413_v47 = vrot.slane %v3411_v58, 5  ;;  %v16117_v32 = vld [vmem:[#allocation33_spill] sm:$0xff] }
 0x26c   : > { %4274 = vst [vmem:[#allocation2 + $0x6c] sm:$0xf] %v11900_v21  ;;  %v1753_v18 = vpop.f32.mrf.mxu3  ;;  %v2826_v31 = vadd.f32 %v16105_v2, %v12924_v33  ;;  %v16109_v33 = vld [vmem:[#allocation19_spill] sm:$0xff]  ;;  %v16113_v58 = vld [vmem:[#allocation28_spill] sm:$0xff]  ;;  %v3431_v2 = vrot.slane %v3429_v1, 4 }
 0x26d   : > { %16103 = vst [vmem:[#allocation20_spill] sm:$0xff] %v13210_v43  ;;  %v1787_v49 = vadd.f32 %v1753_v18, %v16104_v59  ;;  %11137 = vmatmul.msk.bf16.gmra.mxu0 %vm754_vm3, %v3999_v38  ;;  %v3419_v38 = vshll.u32 %v11061_v19, 16  ;;  %v13239_v36 = vadd.f32 %v16109_v33, %v2823_v24  ;;  %v3914_v24 = vsel %vm12012_vm6, %v3912_v29, %v3913_v60  ;;  %v16111_v19 = vld [vmem:[#allocation23_spill] sm:$0xff]  ;;  %v16114_v59 = vld [vmem:[#allocation30_spill] sm:$0xff]  ;;  %v11064_v33 = vld [vmem:[%s12001_s20 + $0x9c] sm:$0xf] }
 0x26e   : > { %4275 = vst [vmem:[#allocation2 + $0x70] sm:$0xf] %v11900_v21  ;;  %v13252_v18 = vadd.f32 %v16111_v19, %v2825_v53  ;;  %v13255_v50 = vadd.f32 %v16112_v27, %v2826_v31  ;;  %v13258_v41 = vadd.f32 %v16113_v58, %v2827_v11  ;;  %v13272_v53 = vld [vmem:[%s15946_s4] ss:$0 sm:$0xff]  ;;  %v13279_v60 = vrot.slane %v3425_v42, 5  ;;  %v16116_v19 = vld [vmem:[#allocation31_spill] sm:$0xff] }
 0x26f   : > { %4276 = vst [vmem:[#allocation2 + $0x74] sm:$0x3] %v11900_v21  ;;  %v13233_v13 = vadd.f32 %v13163_v46, %v1787_v49  ;;  %v3911_v46 = vsel %vm12012_vm6, %v11121_v7, %v3910_v25  ;;  %v13267_v49 = vld [vmem:[%s12001_s20 + $0x98] sm:$0x1]  ;;  %v13275_v7 = vrot.slane %v3416_v12, 4  ;;  %v13277_v29 = vrot.slane %v3419_v38, 5 }
 0x270   : > { %4277 = vst [vmem:[#allocation2 + $0x78] sm:$0xf] %v11900_v21  ;;  %v3414_v11 = vsel %vm12040_vm7, %v3409_v62, %v3413_v47  ;;  %v3977_v63 = vunpack.c.l.b16 %v3911_v46  ;;  %v13289_v12 = vld [vmem:[%s12001_s20 + $0xa0] sm:$0xf]  ;;  %v3440_v1 = vshrl.u32 %v11064_v33, 16  ;;  %v3443_v44 = vshll.u32 %v11064_v33, 16 }
 0x271   : > { %16108 = vst [vmem:[#allocation27_spill] sm:$0xff] %v13233_v13  ;;  %11088 = vmatmul.msk.bf16.gmra.mxu3 %vm754_vm3, %v3601_v9  ;;  %v13261_v9 = vadd.f32 %v16114_v59, %v2828_v30  ;;  %v3978_v30 = vunpack.c.l.b16 %v3914_v24  ;;  %v16115_v38 = vld [vmem:[#allocation10_spill] sm:$0xff]  ;;  %v3449_v20 = vshll.u32 %v13289_v12, 16  ;;  %v2829_v40 = vadd.f32 %v16116_v19, %v12960_v0  ;;  %v16118_v19 = vld [vmem:[#allocation35_spill] sm:$0xff] }
 0x272   : > { %4278 = vst [vmem:[#allocation2 + $0x7c] sm:$0xf] %v11900_v21  ;;  %v13264_v25 = vpop.f32.mrf.mxu0  ;;  %v2830_v62 = vadd.f32 %v16117_v32, %v12978_v6  ;;  %v3917_v47 = vrot.slane %v13220_v15, 5  ;;  %v3453_v46 = vshrl.u32 %v13289_v12, 16  ;;  %v3579_v27 = vunpack.c.l.b16 %v3404_v16 }
 0x273   : > { %4279 = vst [vmem:[#allocation2 + $0x80] sm:$0x3] %v11900_v21  ;;  %v3580_v58 = vunpack.c.l.b16 %v3414_v11  ;;  %v3435_v59 = vshll.u32 %v13267_v49, 16  ;;  %v3442_v0 = vrot.slane %v3440_v1, 4  ;;  %v3445_v6 = vrot.slane %v3443_v44, 5 }
 0x274   : > { %4280 = vst [vmem:[#allocation2 + $0x84] sm:$0xf] %v11900_v21  ;;  %v3669_v31 = vpop.f32.mrf.mxu3  ;;  %v13306_v33 = vrot.slane %v3449_v20, 5  ;;  %v3432_v16 = vor.u32 %v3431_v2, %v13279_v60  ;;  %v13314_v11 = vld [vmem:[%s12001_s20 + $0xa4] sm:$0x1]  ;;  %v2831_v32 = vadd.f32 %v16118_v19, %v12988_v55  ;;  %v3919_v20 = vrot.slane %v3917_v47, 4 }
 0x275   : > { %4281 = vst [vmem:[#allocation2 + $0x88] sm:$0xf] %v11900_v21  ;;  %v3749_v42 = vadd.f32 %v3669_v31, %v16115_v38  ;;  %v11106_v31 = vld [vmem:[%s12001_s20 + $0x90] sm:$0xe]  ;;  %v3455_v38 = vrot.slane %v3453_v46, 4  ;;  %v3920_v46 = vrot.slane %v13267_v49, 5  ;;  %v3602_v2 = vpack.c.b16 %v3580_v58, %v3579_v27 }
 0x276   : > { %4282 = vst [vmem:[#allocation2 + $0x8c] sm:$0x3] %v11900_v21  ;;  %v11122_v44 = vrot.slane %v11106_v31, 9  ;;  %v11629_v55 = vld [vmem:[#allocation3 + $0xf8] sm:$0xff]  ;;  %v3437_v31 = vrot.slane %v3435_v59, 5  ;;  %v3446_v43 = vor.u32 %v3445_v6, %v3442_v0  ;;  %v3433_v58 = vrot.slane %v3432_v16, 4 }
 0x277   : > { %4283 = vst [vmem:[#allocation2 + $0x90] sm:$0xf] %v11900_v21  ;;  %v4147_v24 = vadd.f32 %v13202_v48, %v3749_v42  ;;  %v4000_v48 = vpack.c.b16 %v3978_v30, %v3977_v63  ;;  %v3422_v42 = vor.u32 %v13277_v29, %v13275_v7  ;;  %v16120_v30 = vld [vmem:[#allocation34_spill] sm:$0xff]  ;;  %v11637_v19 = vld [vmem:[#allocation3 + $0x138] sm:$0xff]  ;;  %v3456_v49 = vor.u32 %v3455_v38, %v13306_v33  ;;  %v16123_v59 = vld [vmem:[#allocation37_spill] sm:$0xff] }
 0x278   : > { %4284 = vst [vmem:[#allocation2 + $0x94] sm:$0xf] %v11900_v21  ;;  %v13326_v7 = vadd.f32 %v16120_v30, %v2830_v62  ;;  %v16121_v62 = vld [vmem:[#allocation11_spill] sm:$0xff]  ;;  %v16122_v30 = vld [vmem:[#allocation36_spill] sm:$0xff]  ;;  %v13340_v0 = vadd.f32 %v16123_v59, %v13006_v17  ;;  %v3918_v6 = vsel %vm12012_vm6, %v11122_v44, %v3917_v47  ;;  %6786 = vmatpush.bf16.msrb.mxu0 %v11629_v55  ;;  %v3447_v47 = vrot.slane %v3446_v43, 4 }
 0x279   : > { %4285 = vst [vmem:[#allocation2 + $0x98] sm:$0x3] %v11900_v21  ;;  %v4183_v15 = vadd.f32 %v13272_v53, %v4147_v24  ;;  %v16119_v24 = vld [vmem:[#allocation32_spill] sm:$0xff]  ;;  %v3423_v27 = vrot.slane %v3422_v42, 4  ;;  %v13336_v13 = vadd.f32 %v16122_v30, %v2831_v32  ;;  %7212 = vmatpush.bf16.msrb.mxu1 %v11637_v19  ;;  %v3921_v38 = vsel %vm12012_vm6, %v3919_v20, %v3920_v46  ;;  %v16124_v17 = vld [vmem:[#allocation39_spill] sm:$0xff] }
 0x27a   : > { %4286 = vst [vmem:[#allocation2 + $0x9c] sm:$0xf] %v11900_v21  ;;  %v13319_v1 = vpop.f32.mrf.mxu0  ;;  %v13323_v63 = vadd.f32 %v16119_v24, %v2829_v40  ;;  %v3459_v40 = vshll.u32 %v13314_v11, 16  ;;  %v3924_v42 = vrot.slane %v13289_v12, 5  ;;  %v13353_v16 = vadd.f32 %v16124_v17, %v13014_v4 }
 0x27b   : > { %4287 = vst [vmem:[#allocation2 + $0xa0] sm:$0xf] %v11900_v21  ;;  %v4215_v29 = vmax.f32 %v4183_v15, 0.0  ;;  %v3457_v32 = vrot.slane %v3456_v49, 4  ;;  %v3438_v12 = vsel %vm12040_vm7, %v3433_v58, %v3437_v31  ;;  %v3979_v43 = vunpack.c.l.b16 %v3918_v6 }
 0x27c   : > { %4288 = vst [vmem:[#allocation2 + $0xa4] sm:$0x3] %v11900_v21  ;;  %v3671_v51 = vpop.f32.mrf.mxu3  ;;  %v3461_v44 = vrot.slane %v3459_v40, 5  ;;  %v3980_v20 = vunpack.c.l.b16 %v3921_v38  ;;  %v3926_v55 = vrot.slane %v3924_v42, 4  ;;  %v13371_v49 = vunpack.c.l.b16 %v3438_v12 }
 0x27d   : > { %4289 = vst [vmem:[#allocation2 + $0xa8] sm:$0xf] %v11900_v21  ;;  %v4301_v24 = vpack.c.bf16 %v4215_v29, %v4215_v29  ;;  %v3750_v15 = vadd.f32 %v3671_v51, %v16121_v62  ;;  %11138 = vmatmul.msk.bf16.gmra.mxu0 %vm754_vm3, %v4000_v48  ;;  %v11107_v48 = vld [vmem:[%s12001_s20 + $0x9c] sm:$0xe]  ;;  %v3452_v40 = vsel %vm12040_vm7, %v3447_v47, %v13306_v33  ;;  %v11067_v62 = vld [vmem:[%s12001_s20 + $0xa8] sm:$0xf] }
 0x27e   : > { %4290 = vst [vmem:[#allocation2 + $0xac] sm:$0xf] %v11900_v21  ;;  %v3464_v30 = vshrl.u32 %v11067_v62, 16  ;;  %v3467_v59 = vshll.u32 %v11067_v62, 16 }
 0x27f   : > { %4291 = vst [vmem:[#allocation2 + $0xb0] sm:$0x3] %v11900_v21  ;;  %v4368_v51 = vrot.slane %v4301_v24, 7  ;;  %v4148_v10 = vadd.f32 %v13264_v25, %v3750_v15  ;;  %v3428_v25 = vsel %vm12040_vm7, %v3423_v27, %v13279_v60  ;;  %v3927_v60 = vrot.slane %v13314_v11, 5  ;;  %v13380_v15 = vld [vmem:[%s12001_s20 + $0xac] sm:$0xf] }
 0x280   : > { %4292 = vst [vmem:[#allocation2 + $0xb4] sm:$0xf] %v11900_v21  ;;  %v13369_v31 = vunpack.c.l.b16 %v3428_v25  ;;  %v3462_v24 = vsel %vm12040_vm7, %v3457_v32, %v3461_v44  ;;  %v16125_v27 = vld [vmem:[#allocation12_spill] sm:$0xff]  ;;  %v3473_v38 = vshll.u32 %v13380_v15, 16  ;;  %v3466_v32 = vrot.slane %v3464_v30, 4 }
 0x281   : > { %4293 = vst [vmem:[#allocation2 + $0xb8] sm:$0xf] %v11900_v21  ;;  %v4184_v29 = vadd.f32 %v13272_v53, %v4148_v10  ;;  %11089 = vmatmul.msk.bf16.gmra.mxu3 %vm754_vm3, %v3602_v2  ;;  %v11123_v2 = vrot.slane %v11107_v48, 9  ;;  %v4369_v6 = vrot.slane %v4368_v51, 4  ;;  %v4001_v10 = vpack.c.b16 %v3980_v20, %v3979_v43  ;;  %v13403_v43 = vld [vmem:[%s12001_s20 + $0xb0] sm:$0x1] }
 0x282   : > { %4294 = vst [vmem:[#allocation2 + $0xbc] sm:$0x3] %v11900_v21  ;;  %v13364_v4 = vpop.f32.mrf.mxu0  ;;  %v3477_v48 = vshrl.u32 %v13380_v15, 16  ;;  %v3469_v44 = vrot.slane %v3467_v59, 5  ;;  %v13398_v25 = vunpack.c.l.b16 %v3462_v24  ;;  %v3475_v62 = vrot.slane %v3473_v38, 5 }
 0x283   : > { %4295 = vst [vmem:[#allocation2 + $0xc0] sm:$0xf] %v11900_v21  ;;  %v4216_v46 = vmax.f32 %v4184_v29, 0.0  ;;  %v13396_v29 = vunpack.c.l.b16 %v3452_v40  ;;  %v3925_v12 = vsel %vm12012_vm6, %v11123_v2, %v3924_v42 }
 0x284   : > { %4497 = vst [vmem:[#allocation2 + $0xc] sm:$0xe] %v4368_v51  ;;  %v3674_v19 = vpop.f32.mrf.mxu3  ;;  %v3603_v51 = vpack.c.b16 %v13371_v49, %v13369_v31  ;;  %v3470_v24 = vor.u32 %v3469_v44, %v3466_v32  ;;  %v3981_v2 = vunpack.c.l.b16 %v3925_v12  ;;  %v16131_v12 = vld [vmem:[#allocation40_spill] sm:$0xff] }
 0x285   : > { %4296 = vst [vmem:[#allocation2 + $0xc4] sm:$0xf] %v11900_v21  ;;  %v4302_v11 = vpack.c.bf16 %v4216_v46, %v4216_v46  ;;  %v3751_v58 = vadd.f32 %v3674_v19, %v16125_v27  ;;  %v3928_v19 = vsel %vm12012_vm6, %v3926_v55, %v3927_v60  ;;  %v3483_v27 = vshll.u32 %v13403_v43, 16 }
 0x286   : > { %4297 = vst [vmem:[#allocation2 + $0xc8] sm:$0x3] %v11900_v21  ;;  %v3931_v55 = vrot.slane %v13380_v15, 5  ;;  %v3982_v38 = vunpack.c.l.b16 %v3928_v19 }
 0x287   : > { %4298 = vst [vmem:[#allocation2 + $0xcc] sm:$0xf] %v11900_v21  ;;  %v4370_v17 = vrot.slane %v4302_v11, 7  ;;  %v4149_v47 = vadd.f32 %v13319_v1, %v3751_v58  ;;  %v3479_v11 = vrot.slane %v3477_v48, 4 }
 0x288   : > { %4299 = vst [vmem:[#allocation2 + $0xd0] sm:$0xf] %v11900_v21 }
 0x289   : > { %4300 = vst [vmem:[#allocation2 + $0xd4] sm:$0x3] %v11900_v21  ;;  %v4371_v20 = vsel %vm13387_vm10, %v4369_v6, %v4370_v17  ;;  %v4372_v46 = vrot.slane %v4370_v17, 4  ;;  %v4185_v1 = vadd.f32 %v13272_v53, %v4149_v47  ;;  %v3471_v6 = vrot.slane %v3470_v24, 4  ;;  %v11108_v17 = vld [vmem:[%s12001_s20 + $0xa8] sm:$0xe] }
 0x28a   : > { %4498 = vst [vmem:[#allocation2 + $0x10] sm:$0xf] %v4371_v20  ;;  %v13410_v31 = vpop.f32.mrf.mxu0  ;;  %v16128_v47 = vld [vmem:[#allocation13_spill] sm:$0xff]  ;;  %v3480_v44 = vor.u32 %v3479_v11, %v3475_v62  ;;  %v11124_v19 = vrot.slane %v11108_v17, 9  ;;  %v3933_v11 = vrot.slane %v3931_v55, 4 }
 0x28b   : > { %v4548_v21 = vld [vmem:[#allocation2 + $0xc] sm:$0xf]  ;;  %4499 = vst [vmem:[#allocation2 + $0x14] sm:$0x1] %v4372_v46  ;;  %v4217_v42 = vmax.f32 %v4185_v1, 0.0  ;;  %v13423_v46 = vadd.f32 %v16131_v12, %v13353_v16  ;;  %v3476_v15 = vsel %vm12040_vm7, %v3471_v6, %v3475_v62  ;;  %v13435_v62 = vpack.c.b16 %v3982_v38, %v3981_v2 }
 0x28c   : > { %v4618_v49 = vshrl.u32 %v4548_v21, 16  ;;  %v4621_v40 = vshll.u32 %v4548_v21, 16  ;;  %v3676_v58 = vpop.f32.mrf.mxu3  ;;  %v4994_v32 = vld [vmem:[#allocation2 + $0xc] sm:$0xe]  ;;  %v16129_v21 = vld [vmem:[#allocation38_spill] sm:$0xff]  ;;  %v13446_v2 = vsel %vm12012_vm6, %v11124_v19, %v3931_v55 }
 0x28d   : > { %v4303_v60 = vpack.c.bf16 %v4217_v42, %v4217_v42  ;;  %v3752_v20 = vadd.f32 %v3676_v58, %v16128_v47  ;;  %11139 = vmatmul.msk.bf16.gmra.mxu0 %vm754_vm3, %v4001_v10  ;;  %v13419_v48 = vadd.f32 %v16129_v21, %v13340_v0  ;;  %16132 = vst [vmem:[#allocation9_spill] sm:$0xff] %v13423_v46  ;;  %v11146_v24 = vrot.slane %v4994_v32, 9  ;;  %v11070_v55 = vld [vmem:[%s12001_s20 + $0xb4] sm:$0xf] }
 0x28e   : > { %v4620_v30 = vrot.slane %v4618_v49, 4  ;;  %v4623_v59 = vrot.slane %v4621_v40, 5  ;;  %v3485_v42 = vrot.slane %v3483_v27, 5  ;;  %v3934_v0 = vrot.slane %v13403_v43, 5 }
 0x28f   : > { %16130 = vst [vmem:[#allocation22_spill] sm:$0xff] %v13419_v48  ;;  %v4373_v49 = vrot.slane %v4303_v60, 7  ;;  %v4150_v40 = vadd.f32 %v13364_v4, %v3752_v20  ;;  %v3481_v4 = vrot.slane %v3480_v44, 4 }
 0x290   : > { %v4624_v1 = vor.u32 %v4623_v59, %v4620_v30  ;;  %v11620_v30 = vld [vmem:[#allocation3 + $0xb0] sm:$0xff]  ;;  %v13437_v59 = vunpack.c.l.b16 %v3476_v15 }
 0x291   : > { %4500 = vst [vmem:[#allocation2 + $0x18] sm:$0xe] %v4373_v49  ;;  %v4186_v16 = vadd.f32 %v13272_v53, %v4150_v40  ;;  %11090 = vmatmul.msk.bf16.gmra.mxu3 %vm754_vm3, %v3603_v51  ;;  %v13433_v58 = vld [vmem:[#allocation2 + $0x10] sm:$0xf]  ;;  %v4374_v15 = vrot.slane %v4373_v49, 4 }
 0x292   : > { %v13439_v6 = vpop.f32.mrf.mxu0  ;;  %v4550_v17 = vld [vmem:[#allocation2 + $0x14] sm:$0x1]  ;;  %v5066_v27 = vrot.slane %v13433_v58, 5  ;;  %v4625_v60 = vrot.slane %v4624_v1, 4  ;;  %v15951_v43 = vshll.u32 %v13433_v58, 16  ;;  %v15952_v47 = vshrl.u32 %v13433_v58, 16  ;;  %6105 = vmatpush.bf16.msrb.mxu3 %v11620_v30 }
 0x293   : > { %v4218_v51 = vmax.f32 %v4186_v16, 0.0  ;;  %v5069_v20 = vrot.slane %v4550_v17, 5  ;;  %v4637_v32 = vshll.u32 %v4550_v17, 16  ;;  %v16133_v16 = vld [vmem:[#allocation14_spill] sm:$0xff]  ;;  %v13457_v30 = vsel %vm12012_vm6, %v3933_v11, %v3934_v0 }
 0x294   : > { %v3679_v38 = vpop.f32.mrf.mxu3  ;;  %v5067_v44 = vsel %vm12012_vm6, %v11146_v24, %v5066_v27  ;;  %v5068_v21 = vrot.slane %v5066_v27, 4  ;;  %v4629_v12 = vrot.slane %v15951_v43, 5  ;;  %v4633_v1 = vrot.slane %v15952_v47, 4 }
 0x295   : > { %v4304_v40 = vpack.c.bf16 %v4218_v51, %v4218_v51  ;;  %v3753_v17 = vadd.f32 %v3679_v38, %v16133_v16  ;;  %v3486_v27 = vsel %vm12040_vm7, %v3481_v4, %v3485_v42  ;;  %v5188_v51 = vunpack.c.l.b16 %v5067_v44 }
 0x296   : > { %v5070_v19 = vsel %vm12012_vm6, %v5068_v21, %v5069_v20  ;;  %v4634_v24 = vor.u32 %v4633_v1, %v4629_v12  ;;  %v4630_v11 = vsel %vm12040_vm7, %v4625_v60, %v4629_v12  ;;  %v4639_v16 = vrot.slane %v4637_v32, 5 }
 0x297   : > { %v4375_v47 = vrot.slane %v4304_v40, 7  ;;  %v4151_v49 = vadd.f32 %v13410_v31, %v3753_v17  ;;  %v5189_v38 = vunpack.c.l.b16 %v5070_v19  ;;  %v3488_v20 = vshrl.u32 %v11070_v55, 16  ;;  %v13472_v40 = vld [vmem:[%s12001_s20 + $0xb8] sm:$0xf]  ;;  %v13481_v17 = vld [vmem:[%s12001_s20 + $0xbc] sm:$0x1] }
 0x298   : > { %v4635_v0 = vrot.slane %v4634_v24, 4  ;;  %v4551_v10 = vld [vmem:[#allocation2 + $0x18] sm:$0xf]  ;;  %v13478_v32 = vunpack.c.l.b16 %v3486_v27  ;;  %v11644_v24 = vld [vmem:[#allocation3 + $0x170] sm:$0xff] }
 0x299   : > { %v4376_v21 = vsel %vm13387_vm10, %v4374_v15, %v4375_v47  ;;  %v4377_v1 = vrot.slane %v4375_v47, 4  ;;  %v4187_v42 = vadd.f32 %v13272_v53, %v4151_v49  ;;  %v5219_v4 = vpack.c.b16 %v5189_v38, %v5188_v51  ;;  %v11628_v51 = vld [vmem:[#allocation3 + $0xf0] sm:$0xff]  ;;  %7847 = vmatpush.bf16.msrb.mxu2 %v11644_v24 }
 0x29a   : > { %4501 = vst [vmem:[#allocation2 + $0x1c] sm:$0xf] %v4376_v21  ;;  %v13474_v31 = vpop.f32.mrf.mxu0  ;;  %v4640_v60 = vsel %vm12040_vm7, %v4635_v0, %v4639_v16  ;;  %v4642_v44 = vshrl.u32 %v4551_v10, 16  ;;  %v4645_v12 = vshll.u32 %v4551_v10, 16  ;;  %v5389_v47 = vunpack.c.l.b16 %v4630_v11  ;;  %v11636_v38 = vld [vmem:[#allocation3 + $0x130] sm:$0xff]  ;;  %6787 = vmatpush.bf16.msrb.mxu0 %v11628_v51 }
 0x29b   : > { %4502 = vst [vmem:[#allocation2 + $0x20] sm:$0x1] %v4377_v1  ;;  %v4219_v15 = vmax.f32 %v4187_v42, 0.0  ;;  %5311 = vmatmul.bf16.gmra.mxu1 %v5219_v4  ;;  %v5390_v19 = vunpack.c.l.b16 %v4640_v60  ;;  %v3984_v49 = vunpack.c.l.b16 %v13457_v30  ;;  %v3490_v16 = vrot.slane %v3488_v20, 4  ;;  %v4995_v11 = vld [vmem:[#allocation2 + $0x18] sm:$0xe] }
 0x29c   : > { %v3681_v21 = vpop.f32.mrf.mxu3  ;;  %v4644_v43 = vrot.slane %v4642_v44, 4  ;;  %v4647_v0 = vrot.slane %v4645_v12, 5  ;;  %v3491_v10 = vshll.u32 %v11070_v55, 16  ;;  %v3497_v1 = vshll.u32 %v13472_v40, 16  ;;  %v13489_v42 = vld [vmem:[%s12001_s20 + $0xb4] sm:$0xe]  ;;  %7213 = vmatpush.bf16.msrb.mxu1 %v11636_v38 }
 0x29d   : > { %v4305_v27 = vpack.c.bf16 %v4219_v15, %v4219_v15  ;;  %v3754_v46 = vadd.f32 %v3681_v21, %v16134_v45  ;;  %v5420_v48 = vpack.c.b16 %v5390_v19, %v5389_v47  ;;  %11140 = vmatmul.msk.bf16.gmra.mxu0 %vm754_vm3, %v13435_v62  ;;  %v3501_v20 = vshrl.u32 %v13472_v40, 16 }
 0x29e   : > { %v4648_v30 = vor.u32 %v4647_v0, %v4644_v43  ;;  %v3493_v4 = vrot.slane %v3491_v10, 5  ;;  %v3507_v55 = vshll.u32 %v13481_v17, 16  ;;  %v3499_v44 = vrot.slane %v3497_v1, 5 }
 0x29f   : > { %v4378_v60 = vrot.slane %v4305_v27, 7  ;;  %v4152_v45 = vadd.f32 %v13439_v6, %v3754_v46  ;;  %5512 = vmatmul.bf16.gmra.mxu2 %v5420_v48  ;;  %v11147_v12 = vrot.slane %v4995_v11, 9  ;;  %v3503_v47 = vrot.slane %v3501_v20, 4 }
 0x2a0   : > { %v3494_v15 = vor.u32 %v3493_v4, %v3490_v16  ;;  %v11125_v43 = vrot.slane %v13489_v42, 9  ;;  %v16135_v24 = vpack.c.b16 %v13398_v25, %v13396_v29  ;;  %v4649_v48 = vrot.slane %v4648_v30, 4 }
 0x2a1   : > { %4503 = vst [vmem:[#allocation2 + $0x24] sm:$0xe] %v4378_v60  ;;  %v4188_v19 = vadd.f32 %v13272_v53, %v4152_v45  ;;  %v13502_v51 = vld [vmem:[#allocation2 + $0x1c] sm:$0xf]  ;;  %v16136_v46 = vunpack.c.l.b16 %v13446_v2  ;;  %v3509_v38 = vrot.slane %v3507_v55, 5  ;;  %v3504_v42 = vor.u32 %v3503_v47, %v3499_v44 }
 0x2a2   : > { %11091 = vmatmul.msk.bf16.gmra.mxu3 %vm754_vm3, %v16135_v24  ;;  %v13506_v21 = vpop.f32.mrf.mxu0  ;;  %v4553_v0 = vld [vmem:[#allocation2 + $0x20] sm:$0x1]  ;;  %v5073_v16 = vrot.slane %v13502_v51, 5  ;;  %v15953_v10 = vshll.u32 %v13502_v51, 16  ;;  %v15954_v27 = vshrl.u32 %v13502_v51, 16  ;;  %v3495_v11 = vrot.slane %v3494_v15, 4 }
 0x2a3   : > { %v4003_v6 = vpack.c.b16 %v3984_v49, %v16136_v46  ;;  %v4220_v29 = vmax.f32 %v4188_v19, 0.0  ;;  %v5076_v25 = vrot.slane %v4553_v0, 5  ;;  %v4661_v1 = vshll.u32 %v4553_v0, 16  ;;  %v16137_v24 = vld [vmem:[#allocation16_spill] sm:$0xff] }
 0x2a4   : > { %v3684_v4 = vpop.f32.mrf.mxu3  ;;  %v5074_v2 = vsel %vm12012_vm6, %v11147_v12, %v5073_v16  ;;  %v5075_v49 = vrot.slane %v5073_v16, 4  ;;  %v4653_v30 = vrot.slane %v15953_v10, 5  ;;  %v4657_v20 = vrot.slane %v15954_v27, 4 }
 0x2a5   : > { %v4379_v55 = vrot.slane %v4378_v60, 4  ;;  %v4306_v45 = vpack.c.bf16 %v4220_v29, %v4220_v29  ;;  %v3755_v46 = vadd.f32 %v3684_v4, %v16137_v24  ;;  %v3938_v15 = vrot.slane %v13472_v40, 5 }
 0x2a6   : > { %v5077_v47 = vsel %vm12012_vm6, %v5075_v49, %v5076_v25  ;;  %v5190_v19 = vunpack.c.l.b16 %v5074_v2  ;;  %v4654_v12 = vsel %vm12040_vm7, %v4649_v48, %v4653_v30  ;;  %v4658_v0 = vor.u32 %v4657_v20, %v4653_v30 }
 0x2a7   : > { %v4380_v16 = vrot.slane %v4306_v45, 7  ;;  %v4153_v10 = vadd.f32 %v13474_v31, %v3755_v46  ;;  %v5191_v62 = vunpack.c.l.b16 %v5077_v47  ;;  %v3500_v60 = vsel %vm12040_vm7, %v3495_v11, %v3499_v44 }
 0x2a8   : > { %v4659_v29 = vrot.slane %v4658_v0, 4  ;;  %v4663_v27 = vrot.slane %v4661_v1, 5  ;;  %v5391_v4 = vunpack.c.l.b16 %v4654_v12  ;;  %v4554_v24 = vld [vmem:[#allocation2 + $0x24] sm:$0xf]  ;;  %v3505_v40 = vrot.slane %v3504_v42, 4 }
 0x2a9   : > { %v4381_v25 = vsel %vm13387_vm10, %v4379_v55, %v4380_v16  ;;  %v4382_v2 = vrot.slane %v4380_v16, 4  ;;  %v4189_v48 = vadd.f32 %v13272_v53, %v4153_v10  ;;  %v5220_v49 = vpack.c.b16 %v5191_v62, %v5190_v19  ;;  %v11073_v10 = vld [vmem:[%s12001_s20 + $0xc0] sm:$0xf]  ;;  %v13541_v12 = vld [vmem:[#allocation2 + $0xc] sm:$0xf]  ;;  %v16138_v16 = vld [vmem:[#allocation17_spill] sm:$0xff] }
 0x2aa   : > { %4504 = vst [vmem:[#allocation2 + $0x28] sm:$0xf] %v4381_v25  ;;  %v13529_v30 = vpop.f32.mrf.mxu0  ;;  %v4664_v31 = vsel %vm12040_vm7, %v4659_v29, %v4663_v27  ;;  %v4666_v44 = vshrl.u32 %v4554_v24, 16  ;;  %v4669_v11 = vshll.u32 %v4554_v24, 16  ;;  %v13533_v1 = vunpack.c.l.b16 %v3500_v60 }
 0x2ab   : > { %4505 = vst [vmem:[#allocation2 + $0x2c] sm:$0x1] %v4382_v2  ;;  %v4221_v42 = vmax.f32 %v4189_v48, 0.0  ;;  %5316 = vmatmul.bf16.gmra.mxu1 %v5220_v49  ;;  %v5392_v20 = vunpack.c.l.b16 %v4664_v31  ;;  %v3510_v55 = vsel %vm12040_vm7, %v3505_v40, %v3509_v38  ;;  %v3940_v45 = vrot.slane %v3938_v15, 4  ;;  %v4996_v38 = vld [vmem:[#allocation2 + $0x24] sm:$0xe] }
 0x2ac   : > { %v3686_v62 = vpop.f32.mrf.mxu3  ;;  %v4668_v46 = vrot.slane %v4666_v44, 4  ;;  %v4671_v47 = vrot.slane %v4669_v11, 5  ;;  %v3939_v27 = vsel %vm12012_vm6, %v11125_v43, %v3938_v15  ;;  %v3941_v19 = vrot.slane %v13481_v17, 5  ;;  %v16139_v40 = vld [vmem:[#allocation41_spill] sm:$0xff]  ;;  %v13554_v17 = vld [vmem:[%s12001_s20 + $0xc4] sm:$0xf] }
 0x2ad   : > { %v4307_v0 = vpack.c.bf16 %v4221_v42, %v4221_v42  ;;  %v3756_v60 = vadd.f32 %v3686_v62, %v16138_v16  ;;  %v5421_v29 = vpack.c.b16 %v5392_v20, %v5391_v4  ;;  %11141 = vmatmul.msk.bf16.gmra.mxu0 %vm754_vm3, %v4003_v6  ;;  %v13545_v24 = vunpack.c.l.b16 %v3510_v55 }
 0x2ae   : > { %v13549_v25 = vadd.f32 %v16139_v40, %v13030_v52  ;;  %v4672_v2 = vor.u32 %v4671_v47, %v4668_v46  ;;  %v3942_v43 = vsel %vm12012_vm6, %v3940_v45, %v3941_v19  ;;  %v3512_v15 = vshrl.u32 %v11073_v10, 16 }
 0x2af   : > { %v4383_v48 = vrot.slane %v4307_v0, 7  ;;  %v4154_v49 = vadd.f32 %v13506_v21, %v3756_v60  ;;  %5517 = vmatmul.bf16.gmra.mxu2 %v5421_v29  ;;  %v3515_v4 = vshll.u32 %v11073_v10, 16  ;;  %v11148_v31 = vrot.slane %v4996_v38, 9  ;;  %v11619_v10 = vld [vmem:[#allocation3 + $0xa8] sm:$0xff] }
 0x2b0   : > { %v4673_v44 = vrot.slane %v4672_v2, 4  ;;  %v3985_v11 = vunpack.c.l.b16 %v3939_v27  ;;  %v3514_v42 = vrot.slane %v3512_v15, 4  ;;  %v16140_v20 = vpack.c.b16 %v13478_v32, %v13437_v59  ;;  %6106 = vmatpush.bf16.msrb.mxu3 %v11619_v10 }
 0x2b1   : > { %4506 = vst [vmem:[#allocation2 + $0x30] sm:$0xe] %v4383_v48  ;;  %v4190_v52 = vadd.f32 %v13272_v53, %v4154_v49  ;;  %v13563_v55 = vld [vmem:[#allocation2 + $0x28] sm:$0xf]  ;;  %v3986_v45 = vunpack.c.l.b16 %v3942_v43  ;;  %v3521_v62 = vshll.u32 %v13554_v17, 16  ;;  %v3517_v32 = vrot.slane %v3515_v4, 5 }
 0x2b2   : > { %11092 = vmatmul.msk.bf16.gmra.mxu3 %vm754_vm3, %v16140_v20  ;;  %v13568_v46 = vpop.f32.mrf.mxu0  ;;  %v4556_v47 = vld [vmem:[#allocation2 + $0x2c] sm:$0x1]  ;;  %v5080_v27 = vrot.slane %v13563_v55, 5  ;;  %v15955_v19 = vshll.u32 %v13563_v55, 16  ;;  %v15956_v59 = vshrl.u32 %v13563_v55, 16  ;;  %v3525_v29 = vshrl.u32 %v13554_v17, 16 }
 0x2b3   : > { %v4222_v0 = vmax.f32 %v4190_v52, 0.0  ;;  %v5083_v16 = vrot.slane %v4556_v47, 5  ;;  %v4685_v60 = vshll.u32 %v4556_v47, 16  ;;  %v4384_v49 = vrot.slane %v4383_v48, 4  ;;  %v16141_v4 = vld [vmem:[#allocation18_spill] sm:$0xff] }
 0x2b4   : > { %v3689_v38 = vpop.f32.mrf.mxu3  ;;  %v5081_v40 = vsel %vm12012_vm6, %v11148_v31, %v5080_v27  ;;  %v5082_v2 = vrot.slane %v5080_v27, 4  ;;  %v4677_v43 = vrot.slane %v15955_v19, 5  ;;  %v4681_v15 = vrot.slane %v15956_v59, 4 }
 0x2b5   : > { %v4308_v20 = vpack.c.bf16 %v4222_v0, %v4222_v0  ;;  %v3757_v52 = vadd.f32 %v3689_v38, %v16141_v4  ;;  %v13581_v6 = vrot.slane %v3521_v62, 5  ;;  %v5192_v47 = vunpack.c.l.b16 %v5081_v40 }
 0x2b6   : > { %v5084_v10 = vsel %vm12012_vm6, %v5082_v2, %v5083_v16  ;;  %v4682_v21 = vor.u32 %v4681_v15, %v4677_v43  ;;  %v3518_v31 = vor.u32 %v3517_v32, %v3514_v42  ;;  %v4687_v37 = vrot.slane %v4685_v60, 5  ;;  %v13594_v2 = vld [vmem:[%s12001_s20 + $0xc8] sm:$0x1]  ;;  %v11627_v60 = vld [vmem:[#allocation3 + $0xe8] sm:$0xff] }
 0x2b7   : > { %v4385_v27 = vrot.slane %v4308_v20, 7  ;;  %v4155_v19 = vadd.f32 %v13529_v30, %v3757_v52  ;;  %v5193_v35 = vunpack.c.l.b16 %v5084_v10  ;;  %v4678_v48 = vsel %vm12040_vm7, %v4673_v44, %v4677_v43  ;;  %v11110_v30 = vld [vmem:[%s12001_s20 + $0xc0] sm:$0xe]  ;;  %6788 = vmatpush.bf16.msrb.mxu0 %v11627_v60 }
 0x2b8   : > { %v4683_v0 = vrot.slane %v4682_v21, 4  ;;  %v4004_v38 = vpack.c.b16 %v3986_v45, %v3985_v11  ;;  %v13588_v62 = vld [vmem:[#allocation2 + $0x30] sm:$0xe]  ;;  %v3519_v59 = vrot.slane %v3518_v31, 4  ;;  %v3527_v20 = vrot.slane %v3525_v29, 4  ;;  %v11635_v52 = vld [vmem:[#allocation3 + $0x128] sm:$0xff] }
 0x2b9   : > { %v4557_v4 = vld [vmem:[#allocation2 + $0x30] sm:$0xf]  ;;  %v4386_v16 = vsel %vm13387_vm10, %v4384_v49, %v4385_v27  ;;  %v4387_v40 = vrot.slane %v4385_v27, 4  ;;  %v4191_v42 = vadd.f32 %v13272_v53, %v4155_v19  ;;  %v5221_v32 = vpack.c.b16 %v5193_v35, %v5192_v47  ;;  %v11643_v35 = vld [vmem:[#allocation3 + $0x168] sm:$0xff]  ;;  %7214 = vmatpush.bf16.msrb.mxu1 %v11635_v52 }
 0x2ba   : > { %4507 = vst [vmem:[#allocation2 + $0x34] sm:$0xf] %v4386_v16  ;;  %v13597_v15 = vpop.f32.mrf.mxu0  ;;  %v4688_v44 = vsel %vm12040_vm7, %v4683_v0, %v4687_v37  ;;  %v11149_v11 = vrot.slane %v13588_v62, 9  ;;  %v4690_v21 = vshrl.u32 %v4557_v4, 16  ;;  %v4693_v45 = vshll.u32 %v4557_v4, 16  ;;  %7848 = vmatpush.bf16.msrb.mxu2 %v11643_v35 }
 0x2bb   : > { %4508 = vst [vmem:[#allocation2 + $0x38] sm:$0x1] %v4387_v40  ;;  %v4223_v43 = vmax.f32 %v4191_v42, 0.0  ;;  %5321 = vmatmul.bf16.gmra.mxu1 %v5221_v32  ;;  %v5393_v49 = vunpack.c.l.b16 %v4678_v48  ;;  %v5394_v19 = vunpack.c.l.b16 %v4688_v44  ;;  %v3524_v37 = vsel %vm12040_vm7, %v3519_v59, %v13581_v6  ;;  %v11618_v48 = vld [vmem:[#allocation3 + $0xa0] sm:$0xff]  ;;  %v13609_v42 = vld [vmem:[%s12001_s20 + $0xcc] sm:$0xf] }
 0x2bc   : > { %v3691_v10 = vpop.f32.mrf.mxu3  ;;  %v4692_v47 = vrot.slane %v4690_v21, 4  ;;  %v4695_v31 = vrot.slane %v4693_v45, 5  ;;  %v3531_v27 = vshll.u32 %v13594_v2, 16  ;;  %v11126_v29 = vrot.slane %v11110_v30, 9  ;;  %v11626_v40 = vld [vmem:[#allocation3 + $0xe0] sm:$0xff]  ;;  %6107 = vmatpush.bf16.msrb.mxu3 %v11618_v48 }
 0x2bd   : > { %v4309_v0 = vpack.c.bf16 %v4223_v43, %v4223_v43  ;;  %v3758_v4 = vadd.f32 %v3691_v10, %v13101_v56  ;;  %v5422_v16 = vpack.c.b16 %v5394_v19, %v5393_v49  ;;  %11142 = vmatmul.msk.bf16.gmra.mxu0 %vm754_vm3, %v4004_v38  ;;  %v3528_v60 = vor.u32 %v3527_v20, %v13581_v6 }
 0x2be   : > { %v4696_v32 = vor.u32 %v4695_v31, %v4692_v47  ;;  %v3533_v44 = vrot.slane %v3531_v27, 5  ;;  %v3945_v59 = vrot.slane %v13554_v17, 5  ;;  %v13614_v56 = vunpack.c.l.b16 %v3524_v37  ;;  %6789 = vmatpush.bf16.msrb.mxu0 %v11626_v40 }
 0x2bf   : > { %v4388_v21 = vrot.slane %v4309_v0, 7  ;;  %v4156_v45 = vadd.f32 %v13568_v46, %v3758_v4  ;;  %5522 = vmatmul.bf16.gmra.mxu2 %v5422_v16  ;;  %v3948_v38 = vrot.slane %v13594_v2, 5  ;;  %v3529_v43 = vrot.slane %v3528_v60, 4 }
 0x2c0   : > { %v4697_v30 = vrot.slane %v4696_v32, 4  ;;  %v13619_v49 = vsel %vm12012_vm6, %v11126_v29, %v3945_v59  ;;  %v3536_v6 = vshrl.u32 %v13609_v42, 16  ;;  %v16142_v46 = vpack.c.b16 %v13545_v24, %v13533_v1  ;;  %v11617_v1 = vld [vmem:[#allocation3 + $0x98] sm:$0xff] }
 0x2c1   : > { %v4389_v17 = vrot.slane %v4388_v21, 4  ;;  %4509 = vst [vmem:[#allocation2 + $0x3c] sm:$0xe] %v4388_v21  ;;  %v4192_v19 = vadd.f32 %v13272_v53, %v4156_v45  ;;  %v13627_v2 = vld [vmem:[#allocation2 + $0x34] sm:$0xf]  ;;  %v3947_v35 = vrot.slane %v3945_v59, 4  ;;  %v3987_v20 = vunpack.c.l.b16 %v13619_v49  ;;  %6108 = vmatpush.bf16.msrb.mxu3 %v11617_v1 }
 0x2c2   : > { %11093 = vmatmul.msk.bf16.gmra.mxu3 %vm754_vm3, %v16142_v46  ;;  %v13630_v52 = vpop.f32.mrf.mxu0  ;;  %v4559_v10 = vld [vmem:[#allocation2 + $0x38] sm:$0x1]  ;;  %v5087_v47 = vrot.slane %v13627_v2, 5  ;;  %v4699_v31 = vshll.u32 %v13627_v2, 16  ;;  %v4703_v37 = vshrl.u32 %v13627_v2, 16  ;;  %v3534_v27 = vsel %vm12040_vm7, %v3529_v43, %v3533_v44  ;;  %v11625_v29 = vld [vmem:[#allocation3 + $0xd8] sm:$0xff] }
 0x2c3   : > { %v4224_v24 = vmax.f32 %v4192_v19, 0.0  ;;  %v5090_v0 = vrot.slane %v4559_v10, 5  ;;  %v4709_v4 = vshll.u32 %v4559_v10, 16  ;;  %v13637_v16 = vunpack.c.l.b16 %v3534_v27  ;;  %6790 = vmatpush.bf16.msrb.mxu0 %v11625_v29  ;;  %v11616_v10 = vld [vmem:[#allocation3 + $0x90] sm:$0xff] }
 0x2c4   : > { %v3694_v48 = vpop.f32.mrf.mxu3  ;;  %v5088_v40 = vsel %vm12012_vm6, %v11149_v11, %v5087_v47  ;;  %v5089_v32 = vrot.slane %v5087_v47, 4  ;;  %v4701_v60 = vrot.slane %v4699_v31, 5  ;;  %v4705_v44 = vrot.slane %v4703_v37, 4  ;;  %v11624_v47 = vld [vmem:[#allocation3 + $0xd0] sm:$0xff] }
 0x2c5   : > { %v4310_v59 = vpack.c.bf16 %v4224_v24, %v4224_v24  ;;  %v3759_v21 = vadd.f32 %v3694_v48, %v13104_v61  ;;  %v5194_v45 = vunpack.c.l.b16 %v5088_v40  ;;  %v13648_v43 = vrot.slane %v3536_v6, 4  ;;  %6109 = vmatpush.bf16.msrb.mxu3 %v11616_v10 }
 0x2c6   : > { %v5091_v62 = vsel %vm12012_vm6, %v5089_v32, %v5090_v0  ;;  %v4702_v11 = vsel %vm12040_vm7, %v4697_v30, %v4701_v60  ;;  %v4706_v19 = vor.u32 %v4705_v44, %v4701_v60  ;;  %v4711_v46 = vrot.slane %v4709_v4, 5  ;;  %v13666_v44 = vld [vmem:[%s12001_s20 + $0xd0] sm:$0xf] }
 0x2c7   : > { %v4390_v27 = vrot.slane %v4310_v59, 7  ;;  %v4157_v1 = vadd.f32 %v13597_v15, %v3759_v21  ;;  %v5195_v61 = vunpack.c.l.b16 %v5091_v62  ;;  %v3607_v6 = vpack.c.b16 %v13637_v16, %v13614_v56  ;;  %v13669_v59 = vld [vmem:[%s12001_s20 + $0xd4] sm:$0x1]  ;;  %6791 = vmatpush.bf16.msrb.mxu0 %v11624_v47  ;;  %v11615_v62 = vld [vmem:[#allocation3 + $0x88] sm:$0xff] }
 0x2c8   : > { %v4707_v24 = vrot.slane %v4706_v19, 4  ;;  %v5395_v29 = vunpack.c.l.b16 %v4702_v11  ;;  %v3949_v0 = vsel %vm12012_vm6, %v3947_v35, %v3948_v38  ;;  %v13659_v48 = vld [vmem:[#allocation2 + $0x3c] sm:$0xe]  ;;  %v3539_v4 = vshll.u32 %v13609_v42, 16  ;;  %v11623_v11 = vld [vmem:[#allocation3 + $0xc8] sm:$0xff] }
 0x2c9   : > { %v4560_v30 = vld [vmem:[#allocation2 + $0x3c] sm:$0xf]  ;;  %v4391_v40 = vsel %vm13387_vm10, %v4389_v17, %v4390_v27  ;;  %v4392_v32 = vrot.slane %v4390_v27, 4  ;;  %v4193_v15 = vadd.f32 %v13272_v53, %v4157_v1  ;;  %v5222_v60 = vpack.c.b16 %v5195_v61, %v5194_v45  ;;  %6110 = vmatpush.bf16.msrb.mxu3 %v11615_v62 }
 0x2ca   : > { %4510 = vst [vmem:[#allocation2 + $0x40] sm:$0xf] %v4391_v40  ;;  %v13671_v38 = vpop.f32.mrf.mxu0  ;;  %v4712_v35 = vsel %vm12040_vm7, %v4707_v24, %v4711_v46  ;;  %v3988_v42 = vunpack.c.l.b16 %v3949_v0  ;;  %v11150_v21 = vrot.slane %v13659_v48, 9  ;;  %v4714_v17 = vshrl.u32 %v4560_v30, 16  ;;  %v13681_v24 = vld [vmem:[%s12001_s20 + $0xcc] sm:$0xe] }
 0x2cb   : > { %4511 = vst [vmem:[#allocation2 + $0x44] sm:$0x1] %v4392_v32  ;;  %v4225_v53 = vmax.f32 %v4193_v15, 0.0  ;;  %5326 = vmatmul.bf16.gmra.mxu1 %v5222_v60  ;;  %v5396_v45 = vunpack.c.l.b16 %v4712_v35  ;;  %v4717_v19 = vshll.u32 %v4560_v30, 16  ;;  %v3541_v10 = vrot.slane %v3539_v4, 5  ;;  %6792 = vmatpush.bf16.msrb.mxu0 %v11623_v11  ;;  %v11614_v15 = vld [vmem:[#allocation3 + $0x80] sm:$0xff] }
 0x2cc   : > { %v3696_v47 = vpop.f32.mrf.mxu3  ;;  %v4005_v27 = vpack.c.b16 %v3988_v42, %v3987_v20  ;;  %v4716_v1 = vrot.slane %v4714_v17, 4  ;;  %v3545_v46 = vshll.u32 %v13666_v44, 16  ;;  %v3549_v61 = vshrl.u32 %v13666_v44, 16  ;;  %v11622_v60 = vld [vmem:[#allocation3 + $0xc0] sm:$0xff] }
 0x2cd   : > { %v4311_v0 = vpack.c.bf16 %v4225_v53, %v4225_v53  ;;  %v3760_v48 = vadd.f32 %v3696_v47, %v13107_v14  ;;  %v5423_v40 = vpack.c.b16 %v5396_v45, %v5395_v29  ;;  %v4719_v32 = vrot.slane %v4717_v19, 5  ;;  %6111 = vmatpush.bf16.msrb.mxu3 %v11614_v15 }
 0x2ce   : > { %11143 = vmatmul.msk.bf16.gmra.mxu0 %vm754_vm3, %v4005_v27  ;;  %v3542_v30 = vor.u32 %v3541_v10, %v13648_v43  ;;  %v3547_v49 = vrot.slane %v3545_v46, 5  ;;  %v3551_v20 = vrot.slane %v3549_v61, 4  ;;  %v3555_v4 = vshll.u32 %v13669_v59, 16  ;;  %v16143_v43 = vld [vmem:[#allocation42_spill] sm:$0xff] }
 0x2cf   : > { %v4393_v35 = vrot.slane %v4311_v0, 7  ;;  %v4158_v42 = vadd.f32 %v13630_v52, %v3760_v48  ;;  %5527 = vmatmul.bf16.gmra.mxu2 %v5423_v40  ;;  %v4720_v17 = vor.u32 %v4719_v32, %v4716_v1  ;;  %v11127_v14 = vrot.slane %v13681_v24, 9  ;;  %v13697_v52 = vld [vmem:[%s15946_s4] ss:$0 sm:$0xff]  ;;  %6793 = vmatpush.bf16.msrb.mxu0 %v11622_v60 }
 0x2d0   : > { %v3543_v29 = vrot.slane %v3542_v30, 4  ;;  %v3552_v62 = vor.u32 %v3551_v20, %v3547_v49  ;;  %v3557_v11 = vrot.slane %v3555_v4, 5  ;;  %v3952_v53 = vrot.slane %v13666_v44, 5 }
 0x2d1   : > { %v13692_v45 = vadd.f32 %v16143_v43, %v13549_v25  ;;  %v4394_v19 = vrot.slane %v4393_v35, 4  ;;  %4512 = vst [vmem:[#allocation2 + $0x48] sm:$0xe] %v4393_v35  ;;  %v4194_v10 = vadd.f32 %v13697_v52, %v4158_v42  ;;  %v13704_v44 = vld [vmem:[#allocation2 + $0x40] sm:$0xf]  ;;  %v4721_v47 = vrot.slane %v4720_v17, 4 }
 0x2d2   : > { %11094 = vmatmul.msk.bf16.gmra.mxu3 %vm754_vm3, %v3607_v6  ;;  %v13706_v25 = vpop.f32.mrf.mxu0  ;;  %v4562_v27 = vld [vmem:[#allocation2 + $0x44] sm:$0x1]  ;;  %v5094_v1 = vrot.slane %v13704_v44, 5  ;;  %v15977_v46 = vshll.u32 %v13704_v44, 16  ;;  %v15978_v61 = vshrl.u32 %v13704_v44, 16  ;;  %v3548_v24 = vsel %vm12040_vm7, %v3543_v29, %v3547_v49 }
 0x2d3   : > { %v4226_v0 = vmax.f32 %v4194_v10, 0.0  ;;  %v5097_v56 = vrot.slane %v4562_v27, 5  ;;  %v4733_v16 = vshll.u32 %v4562_v27, 16  ;;  %v3553_v6 = vrot.slane %v3552_v62, 4 }
 0x2d4   : > { %v3699_v48 = vpop.f32.mrf.mxu3  ;;  %v5095_v40 = vsel %vm12012_vm6, %v11150_v21, %v5094_v1  ;;  %v5096_v32 = vrot.slane %v5094_v1, 4  ;;  %v4725_v30 = vrot.slane %v15977_v46, 5  ;;  %v4729_v20 = vrot.slane %v15978_v61, 4 }
 0x2d5   : > { %v4312_v4 = vpack.c.bf16 %v4226_v0, %v4226_v0  ;;  %v3761_v15 = vadd.f32 %v3699_v48, %v13111_v54  ;;  %v5196_v60 = vunpack.c.l.b16 %v5095_v40  ;;  %v4735_v49 = vrot.slane %v4733_v16, 5 }
 0x2d6   : > { %v5098_v35 = vsel %vm12012_vm6, %v5096_v32, %v5097_v56  ;;  %v4726_v42 = vsel %vm12040_vm7, %v4721_v47, %v4725_v30  ;;  %v4730_v17 = vor.u32 %v4729_v20, %v4725_v30  ;;  %v3558_v21 = vsel %vm12040_vm7, %v3553_v6, %v3557_v11 }
 0x2d7   : > { %v4395_v29 = vrot.slane %v4312_v4, 7  ;;  %v4159_v62 = vadd.f32 %v13671_v38, %v3761_v15  ;;  %v5197_v43 = vunpack.c.l.b16 %v5098_v35  ;;  %v5397_v10 = vunpack.c.l.b16 %v4726_v42  ;;  %v11642_v15 = vld [vmem:[#allocation3 + $0x160] sm:$0xff] }
 0x2d8   : > { %v4731_v27 = vrot.slane %v4730_v17, 4  ;;  %v3591_v1 = vunpack.c.l.b16 %v3548_v24  ;;  %v3592_v54 = vunpack.c.l.b16 %v3558_v21  ;;  %v3953_v0 = vsel %vm12012_vm6, %v11127_v14, %v3952_v53  ;;  %v13729_v16 = vld [vmem:[#allocation2 + $0x48] sm:$0xe]  ;;  %7849 = vmatpush.bf16.msrb.mxu2 %v11642_v15 }
 0x2d9   : > { %v4396_v47 = vsel %vm13387_vm10, %v4394_v19, %v4395_v29  ;;  %v4397_v56 = vrot.slane %v4395_v29, 4  ;;  %v4195_v48 = vadd.f32 %v13697_v52, %v4159_v62  ;;  %v5223_v11 = vpack.c.b16 %v5197_v43, %v5196_v60  ;;  %v4563_v6 = vld [vmem:[#allocation2 + $0x48] sm:$0xf]  ;;  %v11634_v60 = vld [vmem:[#allocation3 + $0x120] sm:$0xff] }
 0x2da   : > { %4513 = vst [vmem:[#allocation2 + $0x4c] sm:$0xf] %v4396_v47  ;;  %v13734_v38 = vpop.f32.mrf.mxu0  ;;  %v4736_v24 = vsel %vm12040_vm7, %v4731_v27, %v4735_v49  ;;  %v3608_v40 = vpack.c.b16 %v3592_v54, %v3591_v1  ;;  %v3954_v32 = vrot.slane %v3952_v53, 4  ;;  %v3955_v14 = vrot.slane %v13669_v59, 5  ;;  %v11733_v49 = vld [vmem:[#allocation2] sm:$0xe]  ;;  %7215 = vmatpush.bf16.msrb.mxu1 %v11634_v60 }
 0x2db   : > { %4514 = vst [vmem:[#allocation2 + $0x50] sm:$0x1] %v4397_v56  ;;  %v4227_v30 = vmax.f32 %v4195_v48, 0.0  ;;  %5331 = vmatmul.bf16.gmra.mxu1 %v5223_v11  ;;  %v5398_v20 = vunpack.c.l.b16 %v4736_v24  ;;  %v3989_v19 = vunpack.c.l.b16 %v3953_v0  ;;  %v11151_v4 = vrot.slane %v13729_v16, 9  ;;  %v5588_v27 = vld [vmem:[#allocation2 + $0x8] sm:$0x3] }
 0x2dc   : > { %v3701_v35 = vpop.f32.mrf.mxu3  ;;  %v3956_v42 = vsel %vm12012_vm6, %v3954_v32, %v3955_v14  ;;  %v4738_v17 = vshrl.u32 %v4563_v6, 16  ;;  %v4741_v21 = vshll.u32 %v4563_v6, 16  ;;  %v5608_v29 = vshrl.u32 %v11733_v49, 16 }
 0x2dd   : > { %v4313_v53 = vpack.c.bf16 %v4227_v30, %v4227_v30  ;;  %v3762_v59 = vadd.f32 %v3701_v35, %v13191_v28  ;;  %v5424_v62 = vpack.c.b16 %v5398_v20, %v5397_v10  ;;  %v3990_v43 = vunpack.c.l.b16 %v3956_v42  ;;  %v16146_v30 = vld [vmem:[#allocation43_spill] sm:$0xff] }
 0x2de   : > { %v4740_v1 = vrot.slane %v4738_v17, 4  ;;  %v4743_v54 = vrot.slane %v4741_v21, 5  ;;  %v5610_v0 = vrot.slane %v5608_v29, 5  ;;  %v5611_v16 = vshll.u32 %v11733_v49, 16 }
 0x2df   : > { %v4398_v47 = vrot.slane %v4313_v53, 7  ;;  %v4160_v56 = vadd.f32 %v13706_v25, %v3762_v59  ;;  %5532 = vmatmul.bf16.gmra.mxu2 %v5424_v62  ;;  %v4006_v48 = vpack.c.b16 %v3990_v43, %v3989_v19  ;;  %v16144_v11 = vshrl.u32 %v13116_v57, 16 }
 0x2e0   : > { %v4744_v28 = vor.u32 %v4743_v54, %v4740_v1  ;;  %v5613_v10 = vrot.slane %v5611_v16, 6  ;;  %v16145_v24 = vshll.u32 %v13116_v57, 16  ;;  %v5622_v14 = vshrl.u32 %v5588_v27, 16 }
 0x2e1   : > { %v5616_v6 = vrot.slane %v16144_v11, 5  ;;  %v13750_v20 = vadd.f32 %v16146_v30, %v13049_v26  ;;  %v4399_v15 = vrot.slane %v4398_v47, 4  ;;  %4515 = vst [vmem:[#allocation2 + $0x54] sm:$0xe] %v4398_v47  ;;  %v4196_v60 = vadd.f32 %v13697_v52, %v4160_v56  ;;  %11144 = vmatmul.msk.bf16.gmra.mxu0 %vm754_vm3, %v4006_v48  ;;  %v13755_v25 = vld [vmem:[#allocation2 + $0x4c] sm:$0xf] }
 0x2e2   : > { %v5617_v32 = vrot.slane %v16145_v24, 6  ;;  %11095 = vmatmul.msk.bf16.gmra.mxu3 %vm754_vm3, %v3608_v40  ;;  %v5625_v19 = vshll.u32 %v5588_v27, 16  ;;  %v13757_v35 = vpop.f32.mrf.mxu0  ;;  %v4565_v57 = vld [vmem:[#allocation2 + $0x50] sm:$0x1]  ;;  %v5101_v42 = vrot.slane %v13755_v25, 5  ;;  %v4745_v17 = vrot.slane %v4744_v28, 4 }
 0x2e3   : > { %v15973_v26 = vshll.u32 %v13755_v25, 16  ;;  %v15974_v21 = vshrl.u32 %v13755_v25, 16  ;;  %v4228_v49 = vmax.f32 %v4196_v60, 0.0  ;;  %v5104_v29 = vrot.slane %v4565_v57, 5 }
 0x2e4   : > { %v4757_v53 = vshll.u32 %v4565_v57, 16  ;;  %v5614_v59 = vor.u32 %v5613_v10, %v5610_v0  ;;  %v3704_v40 = vpop.f32.mrf.mxu3  ;;  %v5102_v62 = vsel %vm12012_vm6, %v11151_v4, %v5101_v42  ;;  %v5103_v43 = vrot.slane %v5101_v42, 4 }
 0x2e5   : > { %v4749_v27 = vrot.slane %v15973_v26, 5  ;;  %v4753_v1 = vrot.slane %v15974_v21, 4  ;;  %v4314_v54 = vpack.c.bf16 %v4228_v49, %v4228_v49  ;;  %v3763_v16 = vadd.f32 %v3704_v40, %v13198_v3 }
 0x2e6   : > { %v5198_v47 = vunpack.c.l.b16 %v5102_v62  ;;  %v4759_v56 = vrot.slane %v4757_v53, 5  ;;  %v5105_v48 = vsel %vm12012_vm6, %v5103_v43, %v5104_v29  ;;  %v5615_v4 = vrot.slane %v5614_v59, 4  ;;  %v6227_v43 = vld [vmem:[#allocation2 + $0x14] sm:$0x1] }
 0x2e7   : > { %v4750_v0 = vsel %vm12040_vm7, %v4745_v17, %v4749_v27  ;;  %v4754_v11 = vor.u32 %v4753_v1, %v4749_v27  ;;  %v4400_v28 = vrot.slane %v4314_v54, 7  ;;  %v4161_v10 = vadd.f32 %v13734_v38, %v3763_v16  ;;  %v13783_v38 = vld [vmem:[#allocation2 + $0x10] sm:$0xf] }
 0x2e8   : > { %v5199_v24 = vunpack.c.l.b16 %v5105_v48  ;;  %v5399_v30 = vunpack.c.l.b16 %v4750_v0  ;;  %v5618_v57 = vor.u32 %v5617_v32, %v5616_v6  ;;  %v5624_v42 = vrot.slane %v5622_v14, 5 }
 0x2e9   : > { %v4755_v60 = vrot.slane %v4754_v11, 4  ;;  %v5627_v49 = vrot.slane %v5625_v19, 6  ;;  %v4401_v3 = vsel %vm13387_vm10, %v4399_v15, %v4400_v28  ;;  %v4402_v53 = vrot.slane %v4400_v28, 4  ;;  %v5000_v11 = vld [vmem:[#allocation2 + $0x54] sm:$0xe] }
 0x2ea   : > { %v4197_v29 = vadd.f32 %v13697_v52, %v4161_v10  ;;  %v5224_v40 = vpack.c.b16 %v5199_v24, %v5198_v47  ;;  %4516 = vst [vmem:[#allocation2 + $0x58] sm:$0xf] %v4401_v3  ;;  %v5619_v32 = vsel %vm13779_vm13, %v5615_v4, %v5618_v57  ;;  %v5620_v14 = vrot.slane %v5618_v57, 4  ;;  %v4107_v16 = vpop.f32.mrf.mxu0 }
 0x2eb   : > { %v4760_v6 = vsel %vm12040_vm7, %v4755_v60, %v4759_v56  ;;  %v5628_v15 = vor.u32 %v5627_v49, %v5624_v42  ;;  %4517 = vst [vmem:[#allocation2 + $0x5c] sm:$0x1] %v4402_v53  ;;  %v5992_v62 = vunpack.c.l.b16 %v5619_v32  ;;  %v16149_v27 = vshrl.u32 %v13541_v12, 16  ;;  %v4566_v60 = vld [vmem:[#allocation2 + $0x54] sm:$0xf] }
 0x2ec   : > { %v4229_v19 = vmax.f32 %v4197_v29, 0.0  ;;  %5336 = vmatmul.bf16.gmra.mxu1 %v5224_v40  ;;  %v5400_v59 = vunpack.c.l.b16 %v4760_v6  ;;  %v3706_v54 = vpop.f32.mrf.mxu3  ;;  %v6277_v56 = vshll.u32 %v13541_v12, 16  ;;  %v15957_v48 = vshll.u32 %v13783_v38, 16 }
 0x2ed   : > { %v6276_v1 = vrot.slane %v16149_v27, 4  ;;  %v5629_v47 = vsel %vm13779_vm13, %v5620_v14, %v5628_v15  ;;  %v15958_v0 = vshrl.u32 %v13783_v38, 16  ;;  %v3764_v28 = vadd.f32 %v3706_v54, %v13239_v36  ;;  %v16150_v14 = vld [vmem:[#allocation44_spill] sm:$0xff] }
 0x2ee   : > { %v4315_v4 = vpack.c.bf16 %v4229_v19, %v4229_v19  ;;  %v5425_v10 = vpack.c.b16 %v5400_v59, %v5399_v30  ;;  %v5993_v24 = vunpack.c.l.b16 %v5629_v47  ;;  %v6279_v57 = vrot.slane %v6277_v56, 5 }
 0x2ef   : > { %v6285_v42 = vrot.slane %v15957_v48, 5  ;;  %v6289_v49 = vrot.slane %v15958_v0, 4  ;;  %v6293_v3 = vshll.u32 %v6227_v43, 16  ;;  %v4162_v53 = vadd.f32 %v13757_v35, %v3764_v28 }
 0x2f0   : > { %v4403_v12 = vrot.slane %v4315_v4, 7  ;;  %5537 = vmatmul.bf16.gmra.mxu2 %v5425_v10  ;;  %v6024_v29 = vpack.c.b16 %v5993_v24, %v5992_v62  ;;  %v11152_v40 = vrot.slane %v5000_v11, 9  ;;  %v6280_v6 = vor.u32 %v6279_v57, %v6276_v1 }
 0x2f1   : > { %v6290_v32 = vor.u32 %v6289_v49, %v6285_v42  ;;  %v6295_v36 = vrot.slane %v6293_v3, 5  ;;  %v4762_v30 = vshrl.u32 %v4566_v60, 16  ;;  %v13804_v15 = vadd.f32 %v16150_v14, %v13750_v20  ;;  %v13807_v43 = vld [vmem:[#allocation2 + $0x58] sm:$0xf] }
 0x2f2   : > { %v4404_v19 = vrot.slane %v4403_v12, 4  ;;  %4518 = vst [vmem:[#allocation2 + $0x60] sm:$0xe] %v4403_v12  ;;  %v4198_v59 = vadd.f32 %v13697_v52, %v4162_v53  ;;  %6112 = vmatmul.bf16.vlgmr.msrb.gmra.mxu3 %v6024_v29  ;;  %v4765_v27 = vshll.u32 %v4566_v60, 16  ;;  %v6281_v35 = vrot.slane %v6280_v6, 4  ;;  %v4109_v29 = vpop.f32.mrf.mxu0 }
 0x2f3   : > { %v6291_v54 = vrot.slane %v6290_v32, 4  ;;  %v4568_v62 = vld [vmem:[#allocation2 + $0x5c] sm:$0x1]  ;;  %v5108_v1 = vrot.slane %v13807_v43, 5  ;;  %v4764_v47 = vrot.slane %v4762_v30, 4  ;;  %v15959_v20 = vshll.u32 %v13807_v43, 16 }
 0x2f4   : > { %v4230_v56 = vmax.f32 %v4198_v59, 0.0  ;;  %v5111_v11 = vrot.slane %v4568_v62, 5  ;;  %v4767_v4 = vrot.slane %v4765_v27, 5  ;;  %v6286_v28 = vsel %vm12040_vm7, %v6281_v35, %v6285_v42  ;;  %v3709_v24 = vpop.f32.mrf.mxu3 }
 0x2f5   : > { %v6296_v10 = vsel %vm12040_vm7, %v6291_v54, %v6295_v36  ;;  %v5109_v60 = vsel %vm12012_vm6, %v11152_v40, %v5108_v1  ;;  %v5110_v57 = vrot.slane %v5108_v1, 4  ;;  %v6674_v3 = vunpack.c.l.b16 %v6286_v28  ;;  %v11734_v1 = vld [vmem:[#allocation2 + $0xc] sm:$0xe] }
 0x2f6   : > { %v4316_v49 = vpack.c.bf16 %v4230_v56, %v4230_v56  ;;  %v6675_v12 = vunpack.c.l.b16 %v6296_v10  ;;  %v3765_v53 = vadd.f32 %v3709_v24, %v13243_v22  ;;  %v5200_v32 = vunpack.c.l.b16 %v5109_v60  ;;  %v6228_v10 = vld [vmem:[#allocation2 + $0x18] sm:$0xf] }
 0x2f7   : > { %v5112_v6 = vsel %vm12012_vm6, %v5110_v57, %v5111_v11  ;;  %v4768_v30 = vor.u32 %v4767_v4, %v4764_v47  ;;  %v4773_v42 = vrot.slane %v15959_v20, 5  ;;  %v15965_v35 = vshrl.u32 %v13807_v43, 16  ;;  %v5589_v4 = vld [vmem:[#allocation2 + $0x14] sm:$0x3]  ;;  %v13830_v57 = vpop.f32.mrf.mxu1  ;;  %v13839_v20 = vld [vmem:[#allocation2 + $0x1c] sm:$0xf] }
 0x2f8   : > { %v4405_v36 = vrot.slane %v4316_v49, 7  ;;  %v6706_v14 = vpack.c.b16 %v6675_v12, %v6674_v3  ;;  %v4163_v59 = vadd.f32 %v4107_v16, %v3765_v53  ;;  %v5201_v27 = vunpack.c.l.b16 %v5112_v6  ;;  %v11641_v6 = vld [vmem:[#allocation3 + $0x158] sm:$0xff] }
 0x2f9   : > { %v4769_v40 = vrot.slane %v4768_v30, 4  ;;  %v4781_v54 = vshll.u32 %v4568_v62, 16  ;;  %v5631_v56 = vshrl.u32 %v11734_v1, 16  ;;  %v4777_v24 = vrot.slane %v15965_v35, 4  ;;  %7850 = vmatpush.bf16.msrb.mxu2 %v11641_v6 }
 0x2fa   : > { %v4406_v22 = vsel %vm13387_vm10, %v4404_v19, %v4405_v36  ;;  %v4407_v28 = vrot.slane %v4405_v36, 4  ;;  %6794 = vmatmul.bf16.vlgmr.msrb.gmra.mxu0 %v6706_v14  ;;  %v4199_v47 = vadd.f32 %v13697_v52, %v4163_v59  ;;  %v5225_v11 = vpack.c.b16 %v5201_v27, %v5200_v32  ;;  %v13834_v32 = vpop.f32.mrf.mxu2 }
 0x2fb   : > { %4519 = vst [vmem:[#allocation2 + $0x64] sm:$0xf] %v4406_v22  ;;  %v4774_v16 = vsel %vm12040_vm7, %v4769_v40, %v4773_v42  ;;  %v4783_v62 = vrot.slane %v4781_v54, 5  ;;  %v5633_v60 = vrot.slane %v5631_v56, 5  ;;  %v5634_v3 = vshll.u32 %v11734_v1, 16 }
 0x2fc   : > { %4520 = vst [vmem:[#allocation2 + $0x68] sm:$0x1] %v4407_v28  ;;  %v4231_v19 = vmax.f32 %v4199_v47, 0.0  ;;  %5341 = vmatmul.bf16.gmra.mxu1 %v5225_v11  ;;  %v5401_v49 = vunpack.c.l.b16 %v4774_v16  ;;  %v16151_v12 = vshrl.u32 %v13433_v58, 16  ;;  %v3711_v30 = vpop.f32.mrf.mxu3  ;;  %v4778_v36 = vor.u32 %v4777_v24, %v4773_v42 }
 0x2fd   : > { %v16152_v14 = vshll.u32 %v13433_v58, 16  ;;  %v5645_v27 = vshrl.u32 %v5589_v4, 16  ;;  %v5648_v40 = vshll.u32 %v5589_v4, 16  ;;  %v3766_v56 = vadd.f32 %v3711_v30, %v13252_v18  ;;  %v4112_v58 = vpop.f32.mrf.mxu0 }
 0x2fe   : > { %v5639_v53 = vrot.slane %v16151_v12, 5  ;;  %v4317_v54 = vpack.c.bf16 %v4231_v19, %v4231_v19  ;;  %v5636_v22 = vrot.slane %v5634_v3, 6  ;;  %v6298_v28 = vshrl.u32 %v6228_v10, 16 }
 0x2ff   : > { %v5640_v59 = vrot.slane %v16152_v14, 6  ;;  %v4779_v1 = vrot.slane %v4778_v36, 4  ;;  %v5647_v11 = vrot.slane %v5645_v27, 5  ;;  %v5650_v16 = vrot.slane %v5648_v40, 6 }
 0x300   : > { %v4408_v12 = vrot.slane %v4317_v54, 7  ;;  %v4164_v48 = vadd.f32 %v4109_v29, %v3766_v56  ;;  %v5637_v0 = vor.u32 %v5636_v22, %v5633_v60  ;;  %v6300_v42 = vrot.slane %v6298_v28, 4  ;;  %v6230_v60 = vld [vmem:[#allocation2 + $0x20] sm:$0x1]  ;;  %v5307_v54 = vpop.f32.mrf.mxu1  ;;  %v5001_v56 = vld [vmem:[#allocation2 + $0x60] sm:$0xe] }
 0x301   : > { %v5641_v47 = vor.u32 %v5640_v59, %v5639_v53  ;;  %v4784_v4 = vsel %vm12040_vm7, %v4779_v1, %v4783_v62  ;;  %v5651_v19 = vor.u32 %v5650_v16, %v5647_v11  ;;  %v6301_v18 = vshll.u32 %v6228_v10, 16 }
 0x302   : > { %v4409_v3 = vrot.slane %v4408_v12, 4  ;;  %4521 = vst [vmem:[#allocation2 + $0x6c] sm:$0xe] %v4408_v12  ;;  %v4200_v6 = vadd.f32 %v13697_v52, %v4164_v48  ;;  %v5402_v53 = vunpack.c.l.b16 %v4784_v4  ;;  %v5638_v30 = vrot.slane %v5637_v0, 4  ;;  %v5508_v11 = vpop.f32.mrf.mxu2  ;;  %v13854_v16 = vld [vmem:[#allocation2 + $0x64] sm:$0xf] }
 0x303   : > { %v5643_v24 = vrot.slane %v5641_v47, 4  ;;  %v6303_v36 = vrot.slane %v6301_v18, 5  ;;  %v15960_v14 = vshll.u32 %v13839_v20, 16  ;;  %v15961_v59 = vshrl.u32 %v13839_v20, 16 }
 0x304   : > { %v4232_v27 = vmax.f32 %v4200_v6, 0.0  ;;  %v5426_v62 = vpack.c.b16 %v5402_v53, %v5401_v49  ;;  %v5642_v10 = vsel %vm13779_vm13, %v5638_v30, %v5641_v47  ;;  %v3714_v1 = vpop.f32.mrf.mxu3  ;;  %v6317_v49 = vshll.u32 %v6230_v60, 16 }
 0x305   : > { %v5652_v29 = vsel %vm13779_vm13, %v5643_v24, %v5651_v19  ;;  %v5994_v48 = vunpack.c.l.b16 %v5642_v10  ;;  %v6304_v22 = vor.u32 %v6303_v36, %v6300_v42  ;;  %v6309_v0 = vrot.slane %v15960_v14, 5  ;;  %v4571_v24 = vld [vmem:[#allocation2 + $0x68] sm:$0x1]  ;;  %v4569_v19 = vld [vmem:[#allocation2 + $0x60] sm:$0xf]  ;;  %v11633_v42 = vld [vmem:[#allocation3 + $0x118] sm:$0xff] }
 0x306   : > { %v5995_v40 = vunpack.c.l.b16 %v5652_v29  ;;  %v6313_v28 = vrot.slane %v15961_v59, 4  ;;  %v4318_v12 = vpack.c.bf16 %v4232_v27, %v4232_v27  ;;  %5542 = vmatmul.bf16.gmra.mxu2 %v5426_v62  ;;  %v3767_v47 = vadd.f32 %v3714_v1, %v13255_v50  ;;  %7216 = vmatpush.bf16.msrb.mxu1 %v11633_v42 }
 0x307   : > { %v13857_v4 = vadd.f32 %v5508_v11, %v5307_v54  ;;  %v6305_v6 = vrot.slane %v6304_v22, 4  ;;  %v11153_v30 = vrot.slane %v5001_v56, 9  ;;  %v6319_v36 = vrot.slane %v6317_v49, 5  ;;  %v4114_v22 = vpop.f32.mrf.mxu0 }
 0x308   : > { %v6025_v18 = vpack.c.b16 %v5995_v40, %v5994_v48  ;;  %v6314_v53 = vor.u32 %v6313_v28, %v6309_v0  ;;  %v4410_v29 = vrot.slane %v4318_v12, 7  ;;  %v4165_v10 = vadd.f32 %v4112_v58, %v3767_v47 }
 0x309   : > { %v5115_v14 = vrot.slane %v13854_v16, 5  ;;  %v6310_v60 = vsel %vm12040_vm7, %v6305_v6, %v6309_v0  ;;  %v5118_v27 = vrot.slane %v4571_v24, 5  ;;  %v4786_v62 = vshrl.u32 %v4569_v19, 16 }
 0x30a   : > { %6117 = vmatmul.bf16.gmra.mxu3 %v6025_v18  ;;  %v6315_v50 = vrot.slane %v6314_v53, 4  ;;  %v4411_v54 = vsel %vm13387_vm10, %v4409_v3, %v4410_v29  ;;  %v4412_v40 = vrot.slane %v4410_v29, 4  ;;  %v6676_v48 = vunpack.c.l.b16 %v6310_v60 }
 0x30b   : > { %v4201_v56 = vadd.f32 %v13697_v52, %v4165_v10  ;;  %4522 = vst [vmem:[#allocation2 + $0x70] sm:$0xf] %v4411_v54  ;;  %v5116_v28 = vsel %vm12012_vm6, %v11153_v30, %v5115_v14  ;;  %v5117_v1 = vrot.slane %v5115_v14, 4  ;;  %v4788_v0 = vrot.slane %v4786_v62, 4 }
 0x30c   : > { %v6320_v58 = vsel %vm12040_vm7, %v6315_v50, %v6319_v36  ;;  %4523 = vst [vmem:[#allocation2 + $0x74] sm:$0x1] %v4412_v40  ;;  %v5202_v49 = vunpack.c.l.b16 %v5116_v28  ;;  %v4789_v47 = vshll.u32 %v4569_v19, 16  ;;  %v3716_v42 = vpop.f32.mrf.mxu3  ;;  %v15962_v18 = vshll.u32 %v13854_v16, 16  ;;  %v6231_v28 = vld [vmem:[#allocation2 + $0x24] sm:$0xf] }
 0x30d   : > { %v6677_v11 = vunpack.c.l.b16 %v6320_v58  ;;  %v4233_v12 = vmax.f32 %v4201_v56, 0.0  ;;  %v5119_v3 = vsel %vm12012_vm6, %v5117_v1, %v5118_v27  ;;  %v15963_v6 = vshrl.u32 %v13854_v16, 16  ;;  %v13882_v27 = vpop.f32.mrf.mxu1  ;;  %v5590_v56 = vld [vmem:[#allocation2 + $0x20] sm:$0x3]  ;;  %v11735_v58 = vld [vmem:[#allocation2 + $0x18] sm:$0xe] }
 0x30e   : > { %v4805_v53 = vshll.u32 %v4571_v24, 16  ;;  %v5203_v10 = vunpack.c.l.b16 %v5119_v3  ;;  %v3768_v14 = vadd.f32 %v3716_v42, %v13258_v41  ;;  %v13876_v30 = vadd.f32 %v13062_v8, %v13088_v39  ;;  %16153 = vst [vmem:[#allocation24_spill] sm:$0xff] %v13882_v27 }
 0x30f   : > { %v6707_v29 = vpack.c.b16 %v6677_v11, %v6676_v48  ;;  %v4319_v36 = vpack.c.bf16 %v4233_v12, %v4233_v12  ;;  %v4791_v60 = vrot.slane %v4789_v47, 5  ;;  %v4797_v19 = vrot.slane %v15962_v18, 5 }
 0x310   : > { %v4801_v50 = vrot.slane %v15963_v6, 4  ;;  %v5226_v62 = vpack.c.b16 %v5203_v10, %v5202_v49  ;;  %v4166_v54 = vadd.f32 %v4114_v22, %v3768_v14  ;;  %v4807_v40 = vrot.slane %v4805_v53, 5 }
 0x311   : > { %6799 = vmatmul.bf16.gmra.mxu0 %v6707_v29  ;;  %v4413_v24 = vrot.slane %v4319_v36, 7  ;;  %v4792_v48 = vor.u32 %v4791_v60, %v4788_v0  ;;  %v5654_v8 = vshrl.u32 %v11735_v58, 16  ;;  %v5657_v39 = vshll.u32 %v11735_v58, 16  ;;  %v4117_v60 = vpop.f32.mrf.mxu0 }
 0x312   : > { %v4802_v41 = vor.u32 %v4801_v50, %v4797_v19  ;;  %5346 = vmatmul.bf16.gmra.mxu1 %v5226_v62  ;;  %v4202_v11 = vadd.f32 %v13697_v52, %v4166_v54  ;;  %v16154_v12 = vshrl.u32 %v13502_v51, 16  ;;  %v16155_v3 = vshll.u32 %v13502_v51, 16  ;;  %v13893_v54 = vld [vmem:[#allocation2 + $0x28] sm:$0xf] }
 0x313   : > { %v4414_v1 = vrot.slane %v4413_v24, 4  ;;  %4524 = vst [vmem:[#allocation2 + $0x78] sm:$0xe] %v4413_v24  ;;  %v4793_v22 = vrot.slane %v4792_v48, 4  ;;  %v5656_v0 = vrot.slane %v5654_v8, 5  ;;  %v5659_v53 = vrot.slane %v5657_v39, 6 }
 0x314   : > { %v5662_v47 = vrot.slane %v16154_v12, 5  ;;  %v5663_v49 = vrot.slane %v16155_v3, 6  ;;  %v4803_v42 = vrot.slane %v4802_v41, 4  ;;  %v4234_v29 = vmax.f32 %v4202_v11, 0.0  ;;  %v3719_v58 = vpop.f32.mrf.mxu3  ;;  %v6233_v11 = vld [vmem:[#allocation2 + $0x2c] sm:$0x1] }
 0x315   : > { %v5668_v10 = vshrl.u32 %v5590_v56, 16  ;;  %v5671_v14 = vshll.u32 %v5590_v56, 16  ;;  %v4798_v50 = vsel %vm12040_vm7, %v4793_v22, %v4797_v19  ;;  %v5660_v62 = vor.u32 %v5659_v53, %v5656_v0 }
 0x316   : > { %v5664_v36 = vor.u32 %v5663_v49, %v5662_v47  ;;  %v4808_v24 = vsel %vm12040_vm7, %v4803_v42, %v4807_v40  ;;  %v6322_v51 = vshrl.u32 %v6231_v28, 16  ;;  %v4320_v48 = vpack.c.bf16 %v4234_v29, %v4234_v29 }
 0x317   : > { %v5403_v41 = vunpack.c.l.b16 %v4798_v50  ;;  %v5404_v8 = vunpack.c.l.b16 %v4808_v24  ;;  %v5661_v12 = vrot.slane %v5660_v62, 4  ;;  %v5670_v47 = vrot.slane %v5668_v10, 5  ;;  %v5002_v50 = vld [vmem:[#allocation2 + $0x6c] sm:$0xe] }
 0x318   : > { %v5666_v39 = vrot.slane %v5664_v36, 4  ;;  %v5673_v56 = vrot.slane %v5671_v14, 6  ;;  %v6324_v3 = vrot.slane %v6322_v51, 4  ;;  %v4415_v49 = vrot.slane %v4320_v48, 7  ;;  %v13899_v29 = vpop.f32.mrf.mxu1  ;;  %v4572_v24 = vld [vmem:[#allocation2 + $0x6c] sm:$0xf] }
 0x319   : > { %v5427_v59 = vpack.c.b16 %v5404_v8, %v5403_v41  ;;  %v6325_v19 = vshll.u32 %v6231_v28, 16  ;;  %v15964_v22 = vshll.u32 %v13893_v54, 16  ;;  %v5665_v40 = vsel %vm13779_vm13, %v5661_v12, %v5664_v36  ;;  %v13903_v51 = vld [vmem:[#allocation2 + $0x70] sm:$0xf]  ;;  %v4574_v48 = vld [vmem:[#allocation2 + $0x74] sm:$0x1]  ;;  %v13905_v36 = vpop.f32.mrf.mxu2 }
 0x31a   : > { %v5674_v42 = vor.u32 %v5673_v56, %v5670_v47  ;;  %v15966_v0 = vshrl.u32 %v13893_v54, 16  ;;  %v6341_v53 = vshll.u32 %v6233_v11, 16  ;;  %v4416_v10 = vsel %vm13387_vm10, %v4414_v1, %v4415_v49  ;;  %16156 = vst [vmem:[#allocation26_spill] sm:$0xff] %v13905_v36 }
 0x31b   : > { %v4417_v14 = vrot.slane %v4415_v49, 4  ;;  %5547 = vmatmul.bf16.gmra.mxu2 %v5427_v59  ;;  %v5996_v62 = vunpack.c.l.b16 %v5665_v40  ;;  %v6327_v28 = vrot.slane %v6325_v19, 5  ;;  %4525 = vst [vmem:[#allocation2 + $0x7c] sm:$0xf] %v4416_v10  ;;  %v6333_v8 = vrot.slane %v15964_v22, 5 }
 0x31c   : > { %v5675_v41 = vsel %vm13779_vm13, %v5666_v39, %v5674_v42  ;;  %v6337_v11 = vrot.slane %v15966_v0, 4  ;;  %v6343_v1 = vrot.slane %v6341_v53, 5  ;;  %v3769_v47 = vadd.f32 %v3719_v58, %v13261_v9  ;;  %v3721_v10 = vpop.f32.mrf.mxu3  ;;  %v4119_v0 = vpop.f32.mrf.mxu0 }
 0x31d   : > { %4526 = vst [vmem:[#allocation2 + $0x80] sm:$0x1] %v4417_v14  ;;  %v5997_v59 = vunpack.c.l.b16 %v5675_v41  ;;  %v6328_v12 = vor.u32 %v6327_v28, %v6324_v3  ;;  %v11154_v56 = vrot.slane %v5002_v50, 9  ;;  %v5122_v19 = vrot.slane %v13903_v51, 5 }
 0x31e   : > { %v6338_v49 = vor.u32 %v6337_v11, %v6333_v8  ;;  %v5125_v40 = vrot.slane %v4574_v48, 5  ;;  %v4810_v18 = vshrl.u32 %v4572_v24, 16  ;;  %v4167_v6 = vadd.f32 %v4117_v60, %v3769_v47 }
 0x31f   : > { %v6026_v39 = vpack.c.b16 %v5997_v59, %v5996_v62  ;;  %v6329_v42 = vrot.slane %v6328_v12, 4  ;;  %v3770_v22 = vadd.f32 %v3721_v10, %v13323_v63  ;;  %v5123_v53 = vsel %vm12012_vm6, %v11154_v56, %v5122_v19 }
 0x320   : > { %v6339_v35 = vrot.slane %v6338_v49, 4  ;;  %v5124_v3 = vrot.slane %v5122_v19, 4  ;;  %v4812_v14 = vrot.slane %v4810_v18, 4  ;;  %v4203_v58 = vadd.f32 %v13697_v52, %v4167_v6  ;;  %v13925_v11 = vpop.f32.mrf.mxu1 }
 0x321   : > { %6122 = vmatmul.bf16.gmra.mxu3 %v6026_v39  ;;  %v6334_v9 = vsel %vm12040_vm7, %v6329_v42, %v6333_v8  ;;  %v5204_v50 = vunpack.c.l.b16 %v5123_v53  ;;  %v4168_v28 = vadd.f32 %v4119_v0, %v3770_v22  ;;  %v4813_v41 = vshll.u32 %v4572_v24, 16  ;;  %16157 = vst [vmem:[#allocation29_spill] sm:$0xff] %v13925_v11  ;;  %v11640_v24 = vld [vmem:[#allocation3 + $0x150] sm:$0xff] }
 0x322   : > { %v6344_v60 = vsel %vm12040_vm7, %v6339_v35, %v6343_v1  ;;  %v6678_v62 = vunpack.c.l.b16 %v6334_v9  ;;  %v5126_v63 = vsel %vm12012_vm6, %v5124_v3, %v5125_v40  ;;  %v4235_v18 = vmax.f32 %v4203_v58, 0.0  ;;  %v13930_v56 = vpop.f32.mrf.mxu2  ;;  %v5591_v3 = vld [vmem:[#allocation2 + $0x2c] sm:$0x3]  ;;  %v11736_v9 = vld [vmem:[#allocation2 + $0x24] sm:$0xe]  ;;  %7851 = vmatpush.bf16.msrb.mxu2 %v11640_v24 }
 0x323   : > { %v6679_v59 = vunpack.c.l.b16 %v6344_v60  ;;  %v5205_v12 = vunpack.c.l.b16 %v5126_v63  ;;  %v4204_v47 = vadd.f32 %v13697_v52, %v4168_v28  ;;  %v4815_v8 = vrot.slane %v4813_v41, 5 }
 0x324   : > { %v15969_v6 = vshll.u32 %v13903_v51, 16  ;;  %v15972_v22 = vshrl.u32 %v13903_v51, 16  ;;  %v4829_v0 = vshll.u32 %v4574_v48, 16  ;;  %v4321_v1 = vpack.c.bf16 %v4235_v18, %v4235_v18 }
 0x325   : > { %v6708_v35 = vpack.c.b16 %v6679_v59, %v6678_v62  ;;  %v5227_v49 = vpack.c.b16 %v5205_v12, %v5204_v50  ;;  %v4236_v19 = vmax.f32 %v4204_v47, 0.0  ;;  %v4816_v40 = vor.u32 %v4815_v8, %v4812_v14  ;;  %v3724_v42 = vpop.f32.mrf.mxu3 }
 0x326   : > { %v4821_v10 = vrot.slane %v15969_v6, 5  ;;  %v4825_v52 = vrot.slane %v15972_v22, 4  ;;  %v4831_v39 = vrot.slane %v4829_v0, 5  ;;  %v4418_v53 = vrot.slane %v4321_v1, 7 }
 0x327   : > { %6804 = vmatmul.bf16.gmra.mxu0 %v6708_v35  ;;  %5351 = vmatmul.bf16.gmra.mxu1 %v5227_v49  ;;  %v4322_v48 = vpack.c.bf16 %v4236_v19, %v4236_v19  ;;  %v5677_v58 = vshrl.u32 %v11736_v9, 16  ;;  %v5680_v28 = vshll.u32 %v11736_v9, 16  ;;  %v4817_v50 = vrot.slane %v4816_v40, 4  ;;  %v6234_v49 = vld [vmem:[#allocation2 + $0x30] sm:$0xf] }
 0x328   : > { %v4826_v60 = vor.u32 %v4825_v52, %v4821_v10  ;;  %v16158_v14 = vshrl.u32 %v13563_v55, 16  ;;  %v16159_v63 = vshll.u32 %v13563_v55, 16  ;;  %v4419_v59 = vrot.slane %v4418_v53, 4  ;;  %4527 = vst [vmem:[#allocation2 + $0x84] sm:$0xe] %v4418_v53  ;;  %v13942_v19 = vpop.f32.mrf.mxu1 }
 0x329   : > { %v4420_v18 = vrot.slane %v4322_v48, 7  ;;  %v5679_v12 = vrot.slane %v5677_v58, 5  ;;  %v5682_v47 = vrot.slane %v5680_v28, 6  ;;  %v4822_v8 = vsel %vm12040_vm7, %v4817_v50, %v4821_v10  ;;  %v13946_v9 = vld [vmem:[#allocation2 + $0x34] sm:$0xf]  ;;  %v4122_v48 = vpop.f32.mrf.mxu0 }
 0x32a   : > { %v5685_v62 = vrot.slane %v16158_v14, 5  ;;  %v5686_v41 = vrot.slane %v16159_v63, 6  ;;  %v4827_v0 = vrot.slane %v4826_v60, 4  ;;  %v5691_v1 = vshrl.u32 %v5591_v3, 16  ;;  %v6236_v53 = vld [vmem:[#allocation2 + $0x38] sm:$0x1]  ;;  %v13950_v60 = vpop.f32.mrf.mxu2 }
 0x32b   : > { %v4421_v40 = vsel %vm13387_vm10, %v4419_v59, %v4420_v18  ;;  %v4422_v55 = vrot.slane %v4420_v18, 4  ;;  %v5405_v52 = vunpack.c.l.b16 %v4822_v8  ;;  %v5683_v24 = vor.u32 %v5682_v47, %v5679_v12  ;;  %16160 = vst [vmem:[#allocation19_spill] sm:$0xff] %v13950_v60 }
 0x32c   : > { %v5687_v35 = vor.u32 %v5686_v41, %v5685_v62  ;;  %4528 = vst [vmem:[#allocation2 + $0x88] sm:$0xf] %v4421_v40  ;;  %v4832_v10 = vsel %vm12040_vm7, %v4827_v0, %v4831_v39  ;;  %v5693_v28 = vrot.slane %v5691_v1, 5  ;;  %v5694_v50 = vshll.u32 %v5591_v3, 16  ;;  %v5003_v1 = vld [vmem:[#allocation2 + $0x78] sm:$0xe] }
 0x32d   : > { %4529 = vst [vmem:[#allocation2 + $0x8c] sm:$0x1] %v4422_v55  ;;  %v5406_v14 = vunpack.c.l.b16 %v4832_v10  ;;  %v5684_v62 = vrot.slane %v5683_v24, 4  ;;  %v6346_v63 = vshrl.u32 %v6234_v49, 16  ;;  %v6349_v41 = vshll.u32 %v6234_v49, 16  ;;  %v3726_v8 = vpop.f32.mrf.mxu3 }
 0x32e   : > { %v5689_v58 = vrot.slane %v5687_v35, 4  ;;  %v5696_v59 = vrot.slane %v5694_v50, 6  ;;  %v15967_v18 = vshll.u32 %v13946_v9, 16  ;;  %v15968_v12 = vshrl.u32 %v13946_v9, 16 }
 0x32f   : > { %v6365_v47 = vshll.u32 %v6236_v53, 16  ;;  %v5428_v40 = vpack.c.b16 %v5406_v14, %v5405_v52  ;;  %v5688_v39 = vsel %vm13779_vm13, %v5684_v62, %v5687_v35  ;;  %v6348_v0 = vrot.slane %v6346_v63, 4  ;;  %v13964_v53 = vld [vmem:[#allocation2 + $0x7c] sm:$0xf] }
 0x330   : > { %v6351_v3 = vrot.slane %v6349_v41, 5  ;;  %v13958_v55 = vadd.f32 %v13069_v23, %v13876_v30  ;;  %v5697_v24 = vor.u32 %v5696_v59, %v5693_v28  ;;  %v6357_v49 = vrot.slane %v15967_v18, 5  ;;  %v4577_v23 = vld [vmem:[#allocation2 + $0x80] sm:$0x1]  ;;  %v4575_v30 = vld [vmem:[#allocation2 + $0x78] sm:$0xf]  ;;  %v13973_v18 = vpop.f32.mrf.mxu1 }
 0x331   : > { %v6361_v10 = vrot.slane %v15968_v12, 4  ;;  %5552 = vmatmul.bf16.gmra.mxu2 %v5428_v40  ;;  %v5998_v52 = vunpack.c.l.b16 %v5688_v39  ;;  %v13968_v35 = vadd.f32 %v13930_v56, %v13899_v29  ;;  %v3771_v14 = vadd.f32 %v3724_v42, %v13326_v7  ;;  %v11632_v28 = vld [vmem:[#allocation3 + $0x110] sm:$0xff]  ;;  %16161 = vst [vmem:[#allocation21_spill] sm:$0xff] %v13973_v18 }
 0x332   : > { %v6352_v50 = vor.u32 %v6351_v3, %v6348_v0  ;;  %v5698_v62 = vsel %vm13779_vm13, %v5689_v58, %v5697_v24  ;;  %v6367_v41 = vrot.slane %v6365_v47, 5  ;;  %v11155_v59 = vrot.slane %v5003_v1, 9  ;;  %7217 = vmatpush.bf16.msrb.mxu1 %v11632_v28  ;;  %v13977_v12 = vpop.f32.mrf.mxu2  ;;  %v13984_v47 = vld [vmem:[%s15946_s4] ss:$0 sm:$0xff]  ;;  %v4124_v24 = vpop.f32.mrf.mxu0 }
 0x333   : > { %v6362_v63 = vor.u32 %v6361_v10, %v6357_v49  ;;  %v5999_v40 = vunpack.c.l.b16 %v5698_v62  ;;  %v4169_v0 = vadd.f32 %v4122_v48, %v3771_v14  ;;  %v5129_v3 = vrot.slane %v13964_v53, 5 }
 0x334   : > { %v6353_v39 = vrot.slane %v6352_v50, 4  ;;  %v5132_v56 = vrot.slane %v4577_v23, 5  ;;  %v3772_v7 = vadd.f32 %v3726_v8, %v13336_v13  ;;  %v4834_v42 = vshrl.u32 %v4575_v30, 16 }
 0x335   : > { %v6363_v29 = vrot.slane %v6362_v63, 4  ;;  %v6027_v6 = vpack.c.b16 %v5999_v40, %v5998_v52  ;;  %v4205_v48 = vadd.f32 %v13984_v47, %v4169_v0  ;;  %v5130_v1 = vsel %vm12012_vm6, %v11155_v59, %v5129_v3  ;;  %v13991_v50 = vpop.f32.mrf.mxu3 }
 0x336   : > { %v6358_v58 = vsel %vm12040_vm7, %v6353_v39, %v6357_v49  ;;  %v5131_v10 = vrot.slane %v5129_v3, 4  ;;  %v5206_v52 = vunpack.c.l.b16 %v5130_v1  ;;  %v4170_v28 = vadd.f32 %v4124_v24, %v3772_v7 }
 0x337   : > { %v6368_v13 = vsel %vm12040_vm7, %v6363_v29, %v6367_v41  ;;  %v6680_v8 = vunpack.c.l.b16 %v6358_v58  ;;  %6127 = vmatmul.bf16.gmra.mxu3 %v6027_v6  ;;  %v4237_v14 = vmax.f32 %v4205_v48, 0.0  ;;  %v4836_v62 = vrot.slane %v4834_v42, 4 }
 0x338   : > { %v6681_v49 = vunpack.c.l.b16 %v6368_v13  ;;  %v5133_v63 = vsel %vm12012_vm6, %v5131_v10, %v5132_v56  ;;  %v4837_v40 = vshll.u32 %v4575_v30, 16  ;;  %v15970_v59 = vshll.u32 %v13964_v53, 16  ;;  %v14002_v48 = vpop.f32.mrf.mxu1  ;;  %v11738_v13 = vld [vmem:[#allocation2 + $0x30] sm:$0xe] }
 0x339   : > { %v15971_v39 = vshrl.u32 %v13964_v53, 16  ;;  %v4323_v0 = vpack.c.bf16 %v4237_v14, %v4237_v14  ;;  %v5207_v29 = vunpack.c.l.b16 %v5133_v63  ;;  %v4206_v3 = vadd.f32 %v13984_v47, %v4170_v28  ;;  %v5592_v14 = vld [vmem:[#allocation2 + $0x38] sm:$0x3]  ;;  %v6237_v63 = vld [vmem:[#allocation2 + $0x3c] sm:$0xf] }
 0x33a   : > { %v6709_v41 = vpack.c.b16 %v6681_v49, %v6680_v8  ;;  %v4839_v58 = vrot.slane %v4837_v40, 5  ;;  %v4845_v6 = vrot.slane %v15970_v59, 5  ;;  %v4853_v42 = vshll.u32 %v4577_v23, 16 }
 0x33b   : > { %v4849_v7 = vrot.slane %v15971_v39, 4  ;;  %v4423_v30 = vrot.slane %v4323_v0, 7  ;;  %v5228_v56 = vpack.c.b16 %v5207_v29, %v5206_v52  ;;  %v4238_v1 = vmax.f32 %v4206_v3, 0.0 }
 0x33c   : > { %6809 = vmatmul.bf16.gmra.mxu0 %v6709_v41  ;;  %v5700_v8 = vshrl.u32 %v11738_v13, 16  ;;  %v4840_v24 = vor.u32 %v4839_v58, %v4836_v62  ;;  %v4855_v49 = vrot.slane %v4853_v42, 5  ;;  %v5703_v28 = vshll.u32 %v11738_v13, 16  ;;  %v14008_v62 = vpop.f32.mrf.mxu2 }
 0x33d   : > { %v4850_v10 = vor.u32 %v4849_v7, %v4845_v6  ;;  %v4424_v40 = vrot.slane %v4423_v30, 4  ;;  %4530 = vst [vmem:[#allocation2 + $0x90] sm:$0xe] %v4423_v30  ;;  %5356 = vmatmul.bf16.gmra.mxu1 %v5228_v56  ;;  %v4324_v59 = vpack.c.bf16 %v4238_v1, %v4238_v1  ;;  %v5708_v23 = vrot.slane %v4703_v37, 5  ;;  %v3731_v3 = vpop.f32.mrf.mxu3  ;;  %v4127_v30 = vpop.f32.mrf.mxu0 }
 0x33e   : > { %v5702_v39 = vrot.slane %v5700_v8, 5  ;;  %v4841_v41 = vrot.slane %v4840_v24, 4  ;;  %v5705_v52 = vrot.slane %v5703_v28, 6  ;;  %v5709_v29 = vrot.slane %v4699_v31, 6  ;;  %16162 = vst [vmem:[#allocation23_spill] sm:$0xff] %v14008_v62 }
 0x33f   : > { %v4851_v0 = vrot.slane %v4850_v10, 4  ;;  %v4425_v58 = vrot.slane %v4324_v59, 7  ;;  %v5714_v7 = vshrl.u32 %v5592_v14, 16  ;;  %v5717_v42 = vshll.u32 %v5592_v14, 16  ;;  %v14014_v24 = vld [vmem:[#allocation2 + $0x40] sm:$0xf] }
 0x340   : > { %v6370_v13 = vshrl.u32 %v6237_v63, 16  ;;  %v4846_v56 = vsel %vm12040_vm7, %v4841_v41, %v4845_v6  ;;  %v5706_v1 = vor.u32 %v5705_v52, %v5702_v39  ;;  %v5710_v8 = vor.u32 %v5709_v29, %v5708_v23  ;;  %v6239_v28 = vld [vmem:[#allocation2 + $0x44] sm:$0x1]  ;;  %v14018_v6 = vpop.f32.mrf.mxu1 }
 0x341   : > { %v4856_v37 = vsel %vm12040_vm7, %v4851_v0, %v4855_v49  ;;  %v4426_v2 = vsel %vm13387_vm10, %v4424_v40, %v4425_v58  ;;  %v4427_v31 = vrot.slane %v4425_v58, 4  ;;  %v5407_v10 = vunpack.c.l.b16 %v4846_v56  ;;  %v5004_v58 = vld [vmem:[#allocation2 + $0x84] sm:$0xe]  ;;  %v16163_v56 = vld [vmem:[#allocation47_spill] sm:$0xff] }
 0x342   : > { %v5408_v59 = vunpack.c.l.b16 %v4856_v37  ;;  %4531 = vst [vmem:[#allocation2 + $0x94] sm:$0xf] %v4426_v2  ;;  %v5707_v14 = vrot.slane %v5706_v1, 4  ;;  %v5712_v22 = vrot.slane %v5710_v8, 4  ;;  %v5716_v26 = vrot.slane %v5714_v7, 5  ;;  %v16164_v37 = vld [vmem:[#allocation45_spill] sm:$0xff] }
 0x343   : > { %v5719_v21 = vrot.slane %v5717_v42, 6  ;;  %4532 = vst [vmem:[#allocation2 + $0x98] sm:$0x1] %v4427_v31  ;;  %v6372_v39 = vrot.slane %v6370_v13, 4  ;;  %v6373_v23 = vshll.u32 %v6237_v63, 16  ;;  %v15975_v41 = vshll.u32 %v14014_v24, 16 }
 0x344   : > { %v5429_v49 = vpack.c.b16 %v5408_v59, %v5407_v10  ;;  %v5711_v40 = vsel %vm13779_vm13, %v5707_v14, %v5710_v8  ;;  %v15976_v52 = vshrl.u32 %v14014_v24, 16  ;;  %v6389_v29 = vshll.u32 %v6239_v28, 16  ;;  %v14034_v1 = vld [vmem:[#allocation2 + $0x88] sm:$0xf]  ;;  %v16165_v31 = vld [vmem:[#allocation22_spill] sm:$0xff] }
 0x345   : > { %v5720_v0 = vor.u32 %v5719_v21, %v5716_v26  ;;  %v14026_v7 = vadd.f32 %v16164_v37, %v16163_v56  ;;  %v6375_v42 = vrot.slane %v6373_v23, 5  ;;  %v6381_v13 = vrot.slane %v15975_v41, 5  ;;  %v4580_v26 = vld [vmem:[#allocation2 + $0x8c] sm:$0x1]  ;;  %v4578_v59 = vld [vmem:[#allocation2 + $0x84] sm:$0xf]  ;;  %v14043_v41 = vpop.f32.mrf.mxu2 }
 0x346   : > { %5557 = vmatmul.bf16.gmra.mxu2 %v5429_v49  ;;  %v14032_v63 = vadd.f32 %v13977_v12, %v13942_v19  ;;  %v6000_v8 = vunpack.c.l.b16 %v5711_v40  ;;  %v6385_v2 = vrot.slane %v15976_v52, 4  ;;  %v3773_v10 = vadd.f32 %v13991_v50, %v16165_v31  ;;  %v16166_v52 = vld [vmem:[#allocation9_spill] sm:$0xff]  ;;  %v6258_v36 = vld [vmem:[#allocation2 + $0x90] sm:$0xf] }
 0x347   : > { %v5721_v21 = vsel %vm13779_vm13, %v5712_v22, %v5720_v0  ;;  %v6376_v14 = vor.u32 %v6375_v42, %v6372_v39  ;;  %v6391_v49 = vrot.slane %v6389_v29, 5  ;;  %v11156_v23 = vrot.slane %v5004_v58, 9  ;;  %v14045_v22 = vpop.f32.mrf.mxu3  ;;  %v4129_v39 = vpop.f32.mrf.mxu0 }
 0x348   : > { %v6001_v28 = vunpack.c.l.b16 %v5721_v21  ;;  %v6386_v19 = vor.u32 %v6385_v2, %v6381_v13  ;;  %v4171_v12 = vadd.f32 %v4127_v30, %v3773_v10  ;;  %v5136_v56 = vrot.slane %v14034_v1, 5  ;;  %v14051_v58 = vpop.f32.mrf.mxu1 }
 0x349   : > { %v5139_v37 = vrot.slane %v4580_v26, 5  ;;  %v6377_v0 = vrot.slane %v6376_v14, 4  ;;  %v3774_v46 = vadd.f32 %v3731_v3, %v16166_v52  ;;  %v4858_v61 = vshrl.u32 %v4578_v59, 16 }
 0x34a   : > { %v6028_v40 = vpack.c.b16 %v6001_v28, %v6000_v8  ;;  %v6387_v50 = vrot.slane %v6386_v19, 4  ;;  %v4207_v21 = vadd.f32 %v13984_v47, %v4171_v12  ;;  %v5137_v29 = vsel %vm12012_vm6, %v11156_v23, %v5136_v56 }
 0x34b   : > { %v5138_v30 = vrot.slane %v5136_v56, 4  ;;  %v6382_v42 = vsel %vm12040_vm7, %v6377_v0, %v6381_v13  ;;  %v5208_v2 = vunpack.c.l.b16 %v5137_v29  ;;  %v4172_v8 = vadd.f32 %v4129_v39, %v3774_v46 }
 0x34c   : > { %6132 = vmatmul.bf16.gmra.mxu3 %v6028_v40  ;;  %v4860_v31 = vrot.slane %v4858_v61, 4  ;;  %v6392_v3 = vsel %vm12040_vm7, %v6387_v50, %v6391_v49  ;;  %v6682_v52 = vunpack.c.l.b16 %v6382_v42  ;;  %v4239_v10 = vmax.f32 %v4207_v21, 0.0 }
 0x34d   : > { %v5140_v28 = vsel %vm12012_vm6, %v5138_v30, %v5139_v37  ;;  %v6683_v14 = vunpack.c.l.b16 %v6392_v3  ;;  %v4208_v19 = vadd.f32 %v13984_v47, %v4172_v8  ;;  %v4861_v12 = vshll.u32 %v4578_v59, 16  ;;  %v11639_v30 = vld [vmem:[#allocation3 + $0x148] sm:$0xff]  ;;  %v11739_v3 = vld [vmem:[#allocation2 + $0x3c] sm:$0xe] }
 0x34e   : > { %v5209_v23 = vunpack.c.l.b16 %v5140_v28  ;;  %v4325_v56 = vpack.c.bf16 %v4239_v10, %v4239_v10  ;;  %v15979_v40 = vshll.u32 %v14034_v1, 16  ;;  %v15980_v13 = vshrl.u32 %v14034_v1, 16  ;;  %v5593_v8 = vld [vmem:[#allocation2 + $0x44] sm:$0x3]  ;;  %7852 = vmatpush.bf16.msrb.mxu2 %v11639_v30 }
 0x34f   : > { %v4877_v46 = vshll.u32 %v4580_v26, 16  ;;  %v6710_v61 = vpack.c.b16 %v6683_v14, %v6682_v52  ;;  %v4240_v39 = vmax.f32 %v4208_v19, 0.0  ;;  %v4863_v49 = vrot.slane %v4861_v12, 5  ;;  %v14070_v12 = vpop.f32.mrf.mxu2 }
 0x350   : > { %v5229_v0 = vpack.c.b16 %v5209_v23, %v5208_v2  ;;  %v4428_v50 = vrot.slane %v4325_v56, 7  ;;  %v4869_v21 = vrot.slane %v15979_v40, 5  ;;  %v4873_v37 = vrot.slane %v15980_v13, 4  ;;  %v14072_v56 = vpop.f32.mrf.mxu3  ;;  %v6240_v40 = vld [vmem:[#allocation2 + $0x48] sm:$0xf] }
 0x351   : > { %v4879_v29 = vrot.slane %v4877_v46, 5  ;;  %6814 = vmatmul.bf16.gmra.mxu0 %v6710_v61  ;;  %v4326_v59 = vpack.c.bf16 %v4240_v39, %v4240_v39  ;;  %v4864_v42 = vor.u32 %v4863_v49, %v4860_v31  ;;  %v5723_v26 = vshrl.u32 %v11739_v3, 16  ;;  %v14074_v39 = vpop.f32.mrf.mxu1 }
 0x352   : > { %5361 = vmatmul.bf16.gmra.mxu1 %v5229_v0  ;;  %v5726_v52 = vshll.u32 %v11739_v3, 16  ;;  %v4429_v2 = vrot.slane %v4428_v50, 4  ;;  %4533 = vst [vmem:[#allocation2 + $0x9c] sm:$0xe] %v4428_v50  ;;  %v4874_v10 = vor.u32 %v4873_v37, %v4869_v21  ;;  %v16167_v28 = vshrl.u32 %v13704_v44, 16 }
 0x353   : > { %v16168_v23 = vshll.u32 %v13704_v44, 16  ;;  %v4430_v46 = vrot.slane %v4326_v59, 7  ;;  %v4865_v31 = vrot.slane %v4864_v42, 4  ;;  %v5725_v61 = vrot.slane %v5723_v26, 5  ;;  %16169 = vst [vmem:[#allocation25_spill] sm:$0xff] %v14074_v39 }
 0x354   : > { %v5731_v14 = vrot.slane %v16167_v28, 5  ;;  %v5728_v0 = vrot.slane %v5726_v52, 6  ;;  %v4875_v49 = vrot.slane %v4874_v10, 4  ;;  %v5737_v37 = vshrl.u32 %v5593_v8, 16  ;;  %v14080_v59 = vld [vmem:[#allocation2 + $0x4c] sm:$0xf] }
 0x355   : > { %v5732_v19 = vrot.slane %v16168_v23, 6  ;;  %v5740_v3 = vshll.u32 %v5593_v8, 16  ;;  %v4431_v44 = vsel %vm13387_vm10, %v4429_v2, %v4430_v46  ;;  %v4432_v28 = vrot.slane %v4430_v46, 4  ;;  %v4132_v23 = vpop.f32.mrf.mxu0  ;;  %v6242_v42 = vld [vmem:[#allocation2 + $0x50] sm:$0x1] }
 0x356   : > { %v4870_v13 = vsel %vm12040_vm7, %v4865_v31, %v4869_v21  ;;  %v5729_v30 = vor.u32 %v5728_v0, %v5725_v61  ;;  %4534 = vst [vmem:[#allocation2 + $0xa0] sm:$0xf] %v4431_v44  ;;  %v4880_v26 = vsel %vm12040_vm7, %v4875_v49, %v4879_v29  ;;  %v5739_v8 = vrot.slane %v5737_v37, 5  ;;  %v5005_v49 = vld [vmem:[#allocation2 + $0x90] sm:$0xe]  ;;  %v16170_v37 = vld [vmem:[#allocation46_spill] sm:$0xff] }
 0x357   : > { %v5733_v50 = vor.u32 %v5732_v19, %v5731_v14  ;;  %v5409_v52 = vunpack.c.l.b16 %v4870_v13  ;;  %4535 = vst [vmem:[#allocation2 + $0xa4] sm:$0x1] %v4432_v28  ;;  %v5410_v14 = vunpack.c.l.b16 %v4880_v26  ;;  %v5742_v2 = vrot.slane %v5740_v3, 6  ;;  %v14088_v13 = vld [vmem:[#allocation2 + $0x94] sm:$0xf]  ;;  %v11631_v26 = vld [vmem:[#allocation3 + $0x108] sm:$0xff] }
 0x358   : > { %v5730_v19 = vrot.slane %v5729_v30, 4  ;;  %v6394_v46 = vshrl.u32 %v6240_v40, 16  ;;  %v6397_v39 = vshll.u32 %v6240_v40, 16  ;;  %v15981_v62 = vshll.u32 %v14080_v59, 16  ;;  %7218 = vmatpush.bf16.msrb.mxu1 %v11631_v26 }
 0x359   : > { %v5735_v10 = vrot.slane %v5733_v50, 4  ;;  %v15982_v21 = vshrl.u32 %v14080_v59, 16  ;;  %v6413_v31 = vshll.u32 %v6242_v42, 16  ;;  %v5430_v61 = vpack.c.b16 %v5410_v14, %v5409_v52  ;;  %v4583_v42 = vld [vmem:[#allocation2 + $0x98] sm:$0x1] }
 0x35a   : > { %v5734_v0 = vsel %vm13779_vm13, %v5730_v19, %v5733_v50  ;;  %v5743_v44 = vor.u32 %v5742_v2, %v5739_v8  ;;  %v6396_v29 = vrot.slane %v6394_v46, 4  ;;  %v14092_v28 = vadd.f32 %v16170_v37, %v14026_v7  ;;  %v4581_v46 = vld [vmem:[#allocation2 + $0x90] sm:$0xf]  ;;  %v14106_v37 = vpop.f32.mrf.mxu2 }
 0x35b   : > { %v6399_v3 = vrot.slane %v6397_v39, 5  ;;  %v6405_v40 = vrot.slane %v15981_v62, 5  ;;  %v6409_v30 = vrot.slane %v15982_v21, 4  ;;  %5562 = vmatmul.bf16.gmra.mxu2 %v5430_v61  ;;  %v6002_v52 = vunpack.c.l.b16 %v5734_v0  ;;  %v14108_v61 = vpop.f32.mrf.mxu3 }
 0x35c   : > { %v5744_v50 = vsel %vm13779_vm13, %v5735_v10, %v5743_v44  ;;  %v14102_v8 = vadd.f32 %v14043_v41, %v14002_v48  ;;  %v3775_v7 = vadd.f32 %v14045_v22, %v13692_v45  ;;  %v6415_v2 = vrot.slane %v6413_v31, 5  ;;  %v14111_v48 = vpop.f32.mrf.mxu1 }
 0x35d   : > { %v6003_v39 = vunpack.c.l.b16 %v5744_v50  ;;  %v6400_v14 = vor.u32 %v6399_v3, %v6396_v29  ;;  %v6410_v19 = vor.u32 %v6409_v30, %v6405_v40  ;;  %v11157_v10 = vrot.slane %v5005_v49, 9  ;;  %v4134_v29 = vpop.f32.mrf.mxu0 }
 0x35e   : > { %v4173_v62 = vadd.f32 %v4132_v23, %v3775_v7  ;;  %v5143_v0 = vrot.slane %v14088_v13, 5  ;;  %v5146_v44 = vrot.slane %v4583_v42, 5  ;;  %v3776_v22 = vadd.f32 %v14072_v56, %v13804_v15 }
 0x35f   : > { %v6029_v41 = vpack.c.b16 %v6003_v39, %v6002_v52  ;;  %v6401_v21 = vrot.slane %v6400_v14, 4  ;;  %v6411_v45 = vrot.slane %v6410_v19, 4  ;;  %v4882_v23 = vshrl.u32 %v4581_v46, 16 }
 0x360   : > { %v4209_v31 = vadd.f32 %v13984_v47, %v4173_v62  ;;  %v5144_v3 = vsel %vm12012_vm6, %v11157_v10, %v5143_v0  ;;  %v5145_v30 = vrot.slane %v5143_v0, 4  ;;  %v4174_v52 = vadd.f32 %v4134_v29, %v3776_v22 }
 0x361   : > { %6137 = vmatmul.bf16.gmra.mxu3 %v6029_v41  ;;  %v6406_v49 = vsel %vm12040_vm7, %v6401_v21, %v6405_v40  ;;  %v6416_v26 = vsel %vm12040_vm7, %v6411_v45, %v6415_v2  ;;  %v5210_v50 = vunpack.c.l.b16 %v5144_v3  ;;  %v4884_v19 = vrot.slane %v4882_v23, 4 }
 0x362   : > { %v6684_v7 = vunpack.c.l.b16 %v6406_v49  ;;  %v6685_v39 = vunpack.c.l.b16 %v6416_v26  ;;  %v4241_v15 = vmax.f32 %v4209_v31, 0.0  ;;  %v5147_v62 = vsel %vm12012_vm6, %v5145_v30, %v5146_v44  ;;  %v11740_v30 = vld [vmem:[#allocation2 + $0x48] sm:$0xe] }
 0x363   : > { %v5211_v56 = vunpack.c.l.b16 %v5147_v62  ;;  %v4210_v14 = vadd.f32 %v13984_v47, %v4174_v52  ;;  %v4885_v10 = vshll.u32 %v4581_v46, 16  ;;  %v15983_v21 = vshll.u32 %v14088_v13, 16  ;;  %v5594_v52 = vld [vmem:[#allocation2 + $0x50] sm:$0x3] }
 0x364   : > { %v6711_v0 = vpack.c.b16 %v6685_v39, %v6684_v7  ;;  %v4327_v41 = vpack.c.bf16 %v4241_v15, %v4241_v15  ;;  %v15984_v40 = vshrl.u32 %v14088_v13, 16  ;;  %v4901_v29 = vshll.u32 %v4583_v42, 16  ;;  %v14131_v39 = vpop.f32.mrf.mxu2  ;;  %v14133_v42 = vpop.f32.mrf.mxu3 }
 0x365   : > { %v5230_v2 = vpack.c.b16 %v5211_v56, %v5210_v50  ;;  %v4242_v45 = vmax.f32 %v4210_v14, 0.0  ;;  %v4887_v22 = vrot.slane %v4885_v10, 5  ;;  %v4893_v44 = vrot.slane %v15983_v21, 5  ;;  %v6243_v50 = vld [vmem:[#allocation2 + $0x54] sm:$0xf]  ;;  %16171 = vst [vmem:[#allocation28_spill] sm:$0xff] %v14131_v39 }
 0x366   : > { %6819 = vmatmul.bf16.gmra.mxu0 %v6711_v0  ;;  %v4433_v31 = vrot.slane %v4327_v41, 7  ;;  %v4897_v3 = vrot.slane %v15984_v40, 4  ;;  %v5746_v46 = vshrl.u32 %v11740_v30, 16  ;;  %v4903_v26 = vrot.slane %v4901_v29, 5  ;;  %v14137_v0 = vpop.f32.mrf.mxu1 }
 0x367   : > { %5366 = vmatmul.bf16.gmra.mxu1 %v5230_v2  ;;  %v4328_v23 = vpack.c.bf16 %v4242_v45, %v4242_v45  ;;  %v4888_v49 = vor.u32 %v4887_v22, %v4884_v19  ;;  %v5749_v7 = vshll.u32 %v11740_v30, 16  ;;  %v16172_v14 = vshrl.u32 %v13755_v25, 16  ;;  %16173 = vst [vmem:[#allocation30_spill] sm:$0xff] %v14137_v0  ;;  %v14145_v0 = vld [vmem:[#allocation2 + $0x58] sm:$0xf] }
 0x368   : > { %v4434_v15 = vrot.slane %v4433_v31, 4  ;;  %4536 = vst [vmem:[#allocation2 + $0xa8] sm:$0xe] %v4433_v31  ;;  %v4898_v62 = vor.u32 %v4897_v3, %v4893_v44  ;;  %v5748_v56 = vrot.slane %v5746_v46, 5  ;;  %v16174_v45 = vshll.u32 %v13755_v25, 16  ;;  %v4137_v46 = vpop.f32.mrf.mxu0 }
 0x369   : > { %v5754_v10 = vrot.slane %v16172_v14, 5  ;;  %v4435_v41 = vrot.slane %v4328_v23, 7  ;;  %v4889_v2 = vrot.slane %v4888_v49, 4  ;;  %v5751_v19 = vrot.slane %v5749_v7, 6 }
 0x36a   : > { %v5755_v22 = vrot.slane %v16174_v45, 6  ;;  %v4899_v29 = vrot.slane %v4898_v62, 4  ;;  %v5760_v30 = vshrl.u32 %v5594_v52, 16  ;;  %v5763_v21 = vshll.u32 %v5594_v52, 16  ;;  %v6245_v52 = vld [vmem:[#allocation2 + $0x5c] sm:$0x1] }
 0x36b   : > { %v6418_v40 = vshrl.u32 %v6243_v50, 16  ;;  %v4436_v31 = vsel %vm13387_vm10, %v4434_v15, %v4435_v41  ;;  %v4437_v3 = vrot.slane %v4435_v41, 4  ;;  %v4894_v14 = vsel %vm12040_vm7, %v4889_v2, %v4893_v44 }
 0x36c   : > { %v5752_v39 = vor.u32 %v5751_v19, %v5748_v56  ;;  %4537 = vst [vmem:[#allocation2 + $0xac] sm:$0xf] %v4436_v31  ;;  %v4904_v25 = vsel %vm12040_vm7, %v4899_v29, %v4903_v26  ;;  %v5411_v23 = vunpack.c.l.b16 %v4894_v14  ;;  %v5756_v49 = vor.u32 %v5755_v22, %v5754_v10  ;;  %v14153_v10 = vld [vmem:[#allocation2 + $0xa0] sm:$0xf]  ;;  %v5006_v22 = vld [vmem:[#allocation2 + $0x9c] sm:$0xe] }
 0x36d   : > { %v5762_v7 = vrot.slane %v5760_v30, 5  ;;  %4538 = vst [vmem:[#allocation2 + $0xb0] sm:$0x1] %v4437_v3  ;;  %v5412_v62 = vunpack.c.l.b16 %v4904_v25  ;;  %v5765_v15 = vrot.slane %v5763_v21, 6  ;;  %v6420_v41 = vrot.slane %v6418_v40, 4  ;;  %v16175_v30 = vld [vmem:[#allocation27_spill] sm:$0xff] }
 0x36e   : > { %v5753_v45 = vrot.slane %v5752_v39, 4  ;;  %v5758_v18 = vrot.slane %v5756_v49, 4  ;;  %v6421_v60 = vshll.u32 %v6243_v50, 16  ;;  %v15985_v44 = vshll.u32 %v14145_v0, 16  ;;  %v4586_v31 = vld [vmem:[#allocation2 + $0xa4] sm:$0x1] }
 0x36f   : > { %v15986_v56 = vshrl.u32 %v14145_v0, 16  ;;  %v5431_v2 = vpack.c.b16 %v5412_v62, %v5411_v23  ;;  %v5766_v26 = vor.u32 %v5765_v15, %v5762_v7  ;;  %v6437_v29 = vshll.u32 %v6245_v52, 16  ;;  %v14173_v23 = vpop.f32.mrf.mxu3  ;;  %v14175_v15 = vpop.f32.mrf.mxu1 }
 0x370   : > { %v5757_v19 = vsel %vm13779_vm13, %v5753_v45, %v5756_v49  ;;  %v14157_v39 = vadd.f32 %v13830_v57, %v16175_v30  ;;  %v6423_v21 = vrot.slane %v6421_v60, 5  ;;  %v6429_v40 = vrot.slane %v15985_v44, 5  ;;  %v14171_v60 = vpop.f32.mrf.mxu2  ;;  %v4584_v45 = vld [vmem:[#allocation2 + $0x9c] sm:$0xf] }
 0x371   : > { %v6433_v50 = vrot.slane %v15986_v56, 4  ;;  %5567 = vmatmul.bf16.gmra.mxu2 %v5431_v2  ;;  %v5767_v3 = vsel %vm13779_vm13, %v5758_v18, %v5766_v26  ;;  %v6004_v14 = vunpack.c.l.b16 %v5757_v19  ;;  %v14167_v25 = vadd.f32 %v14106_v37, %v14051_v58 }
 0x372   : > { %v3777_v57 = vadd.f32 %v14108_v61, %v13958_v55  ;;  %v6005_v49 = vunpack.c.l.b16 %v5767_v3  ;;  %v6424_v7 = vor.u32 %v6423_v21, %v6420_v41  ;;  %v6439_v62 = vrot.slane %v6437_v29, 5  ;;  %v4139_v3 = vpop.f32.mrf.mxu0 }
 0x373   : > { %v6434_v52 = vor.u32 %v6433_v50, %v6429_v40  ;;  %v11158_v2 = vrot.slane %v5006_v22, 9  ;;  %v5150_v19 = vrot.slane %v14153_v10, 5  ;;  %v5153_v58 = vrot.slane %v4586_v31, 5 }
 0x374   : > { %v4175_v18 = vadd.f32 %v4137_v46, %v3777_v57  ;;  %v6030_v37 = vpack.c.b16 %v6005_v49, %v6004_v14  ;;  %v6425_v26 = vrot.slane %v6424_v7, 4  ;;  %v3778_v55 = vadd.f32 %v14133_v42, %v14092_v28 }
 0x375   : > { %v6435_v30 = vrot.slane %v6434_v52, 4  ;;  %v5151_v41 = vsel %vm12012_vm6, %v11158_v2, %v5150_v19  ;;  %v5152_v29 = vrot.slane %v5150_v19, 4  ;;  %v4906_v21 = vshrl.u32 %v4584_v45, 16 }
 0x376   : > { %v4211_v61 = vadd.f32 %v13984_v47, %v4175_v18  ;;  %6142 = vmatmul.bf16.gmra.mxu3 %v6030_v37  ;;  %v6430_v46 = vsel %vm12040_vm7, %v6425_v26, %v6429_v40  ;;  %v5212_v50 = vunpack.c.l.b16 %v5151_v41  ;;  %v4176_v14 = vadd.f32 %v4139_v3, %v3778_v55 }
 0x377   : > { %v6440_v22 = vsel %vm12040_vm7, %v6435_v30, %v6439_v62  ;;  %v6686_v57 = vunpack.c.l.b16 %v6430_v46  ;;  %v5154_v42 = vsel %vm12012_vm6, %v5152_v29, %v5153_v58  ;;  %v4908_v18 = vrot.slane %v4906_v21, 4  ;;  %v11741_v29 = vld [vmem:[#allocation2 + $0x54] sm:$0xe]  ;;  %v14198_v46 = vpop.f32.mrf.mxu3 }
 0x378   : > { %v6687_v49 = vunpack.c.l.b16 %v6440_v22  ;;  %v4243_v28 = vmax.f32 %v4211_v61, 0.0  ;;  %v5213_v7 = vunpack.c.l.b16 %v5154_v42  ;;  %v4212_v52 = vadd.f32 %v13984_v47, %v4176_v14  ;;  %v14196_v21 = vpop.f32.mrf.mxu2  ;;  %v11638_v22 = vld [vmem:[#allocation3 + $0x140] sm:$0xff]  ;;  %v14200_v42 = vpop.f32.mrf.mxu1 }
 0x379   : > { %v4909_v2 = vshll.u32 %v4584_v45, 16  ;;  %v15987_v40 = vshll.u32 %v14153_v10, 16  ;;  %v15988_v26 = vshrl.u32 %v14153_v10, 16  ;;  %v4925_v3 = vshll.u32 %v4586_v31, 16  ;;  %16176 = vst [vmem:[#allocation10_spill] sm:$0xff] %v14196_v21  ;;  %7853 = vmatpush.bf16.msrb.mxu2 %v11638_v22 }
 0x37a   : > { %v6712_v19 = vpack.c.b16 %v6687_v49, %v6686_v57  ;;  %v4329_v37 = vpack.c.bf16 %v4243_v28, %v4243_v28  ;;  %v5231_v62 = vpack.c.b16 %v5213_v7, %v5212_v50  ;;  %v4244_v30 = vmax.f32 %v4212_v52, 0.0  ;;  %v5595_v31 = vld [vmem:[#allocation2 + $0x5c] sm:$0x3]  ;;  %v6246_v28 = vld [vmem:[#allocation2 + $0x60] sm:$0xf]  ;;  %16177 = vst [vmem:[#allocation31_spill] sm:$0xff] %v14200_v42 }
 0x37b   : > { %v4911_v55 = vrot.slane %v4909_v2, 5  ;;  %v4917_v58 = vrot.slane %v15987_v40, 5  ;;  %v4921_v41 = vrot.slane %v15988_v26, 4  ;;  %v5769_v45 = vshrl.u32 %v11741_v29, 16  ;;  %v14210_v22 = vld [vmem:[#allocation2 + $0x64] sm:$0xf] }
 0x37c   : > { %6824 = vmatmul.bf16.gmra.mxu0 %v6712_v19  ;;  %v4438_v61 = vrot.slane %v4329_v37, 7  ;;  %5371 = vmatmul.bf16.gmra.mxu1 %v5231_v62  ;;  %v4330_v50 = vpack.c.bf16 %v4244_v30, %v4244_v30  ;;  %v4927_v57 = vrot.slane %v4925_v3, 5  ;;  %v5772_v49 = vshll.u32 %v11741_v29, 16 }
 0x37d   : > { %v4912_v14 = vor.u32 %v4911_v55, %v4908_v18  ;;  %v4922_v52 = vor.u32 %v4921_v41, %v4917_v58  ;;  %v5771_v2 = vrot.slane %v5769_v45, 5  ;;  %v16178_v19 = vshrl.u32 %v13807_v43, 16  ;;  %v4142_v41 = vpop.f32.mrf.mxu0 }
 0x37e   : > { %v4439_v7 = vrot.slane %v4438_v61, 4  ;;  %4539 = vst [vmem:[#allocation2 + $0xb4] sm:$0xe] %v4438_v61  ;;  %v4440_v44 = vrot.slane %v4330_v50, 7  ;;  %v5774_v40 = vrot.slane %v5772_v49, 6  ;;  %v16179_v62 = vshll.u32 %v13807_v43, 16 }
 0x37f   : > { %v5777_v37 = vrot.slane %v16178_v19, 5  ;;  %v4913_v56 = vrot.slane %v4912_v14, 4  ;;  %v4923_v30 = vrot.slane %v4922_v52, 4  ;;  %v5783_v55 = vshrl.u32 %v5595_v31, 16 }
 0x380   : > { %v5778_v18 = vrot.slane %v16179_v62, 6  ;;  %v5786_v3 = vshll.u32 %v5595_v31, 16  ;;  %v6442_v29 = vshrl.u32 %v6246_v28, 16  ;;  %v4441_v26 = vsel %vm13387_vm10, %v4439_v7, %v4440_v44  ;;  %v6248_v31 = vld [vmem:[#allocation2 + $0x68] sm:$0x1] }
 0x381   : > { %v4442_v61 = vrot.slane %v4440_v44, 4  ;;  %v4918_v45 = vsel %vm12040_vm7, %v4913_v56, %v4917_v58  ;;  %v5775_v19 = vor.u32 %v5774_v40, %v5771_v2  ;;  %4540 = vst [vmem:[#allocation2 + $0xb8] sm:$0xf] %v4441_v26  ;;  %v4928_v43 = vsel %vm12040_vm7, %v4923_v30, %v4927_v57 }
 0x382   : > { %v5413_v50 = vunpack.c.l.b16 %v4918_v45  ;;  %v5779_v14 = vor.u32 %v5778_v18, %v5777_v37  ;;  %v5785_v49 = vrot.slane %v5783_v55, 5  ;;  %v5414_v52 = vunpack.c.l.b16 %v4928_v43  ;;  %v14218_v37 = vld [vmem:[#allocation2 + $0xac] sm:$0xf]  ;;  %v5007_v18 = vld [vmem:[#allocation2 + $0xa8] sm:$0xe]  ;;  %v11630_v45 = vld [vmem:[#allocation3 + $0x100] sm:$0xff] }
 0x383   : > { %4541 = vst [vmem:[#allocation2 + $0xbc] sm:$0x1] %v4442_v61  ;;  %v5776_v62 = vrot.slane %v5775_v19, 4  ;;  %v5788_v7 = vrot.slane %v5786_v3, 6  ;;  %v6444_v44 = vrot.slane %v6442_v29, 4  ;;  %v6445_v21 = vshll.u32 %v6246_v28, 16  ;;  %v14226_v61 = vpop.f32.mrf.mxu2  ;;  %v14228_v19 = vpop.f32.mrf.mxu3  ;;  %7219 = vmatpush.bf16.msrb.mxu1 %v11630_v45 }
 0x384   : > { %v5781_v42 = vrot.slane %v5779_v14, 4  ;;  %v15989_v56 = vshll.u32 %v14210_v22, 16  ;;  %v15990_v40 = vshrl.u32 %v14210_v22, 16  ;;  %v5432_v58 = vpack.c.b16 %v5414_v52, %v5413_v50  ;;  %v4589_v29 = vld [vmem:[#allocation2 + $0xb0] sm:$0x1] }
 0x385   : > { %v5780_v26 = vsel %vm13779_vm13, %v5776_v62, %v5779_v14  ;;  %v5789_v57 = vor.u32 %v5788_v7, %v5785_v49  ;;  %v6461_v2 = vshll.u32 %v6248_v31, 16  ;;  %v3126_v30 = vadd.f32 %v13834_v32, %v14157_v39  ;;  %v16180_v39 = vld [vmem:[#allocation20_spill] sm:$0xff]  ;;  %v14238_v14 = vpop.f32.mrf.mxu1  ;;  %v4587_v7 = vld [vmem:[#allocation2 + $0xa8] sm:$0xf] }
 0x386   : > { %v6447_v55 = vrot.slane %v6445_v21, 5  ;;  %v6453_v28 = vrot.slane %v15989_v56, 5  ;;  %v6457_v3 = vrot.slane %v15990_v40, 4  ;;  %5572 = vmatmul.bf16.gmra.mxu2 %v5432_v58  ;;  %v6006_v50 = vunpack.c.l.b16 %v5780_v26 }
 0x387   : > { %v5790_v43 = vsel %vm13779_vm13, %v5781_v42, %v5789_v57  ;;  %v14234_v32 = vadd.f32 %v14171_v60, %v14111_v48  ;;  %v3779_v21 = vadd.f32 %v14173_v23, %v16180_v39  ;;  %v6463_v62 = vrot.slane %v6461_v2, 5  ;;  %v4144_v39 = vpop.f32.mrf.mxu0 }
 0x388   : > { %v6007_v49 = vunpack.c.l.b16 %v5790_v43  ;;  %v6448_v31 = vor.u32 %v6447_v55, %v6444_v44  ;;  %v6458_v52 = vor.u32 %v6457_v3, %v6453_v28  ;;  %v11159_v56 = vrot.slane %v5007_v18, 9 }
 0x389   : > { %v4177_v58 = vadd.f32 %v4142_v41, %v3779_v21  ;;  %v5157_v42 = vrot.slane %v14218_v37, 5  ;;  %v5160_v26 = vrot.slane %v4589_v29, 5  ;;  %v3780_v60 = vadd.f32 %v14198_v46, %v3126_v30 }
 0x38a   : > { %v6031_v57 = vpack.c.b16 %v6007_v49, %v6006_v50  ;;  %v6449_v40 = vrot.slane %v6448_v31, 4  ;;  %v6459_v48 = vrot.slane %v6458_v52, 4  ;;  %v4930_v2 = vshrl.u32 %v4587_v7, 16 }
 0x38b   : > { %v4213_v23 = vadd.f32 %v13984_v47, %v4177_v58  ;;  %v5158_v44 = vsel %vm12012_vm6, %v11159_v56, %v5157_v42  ;;  %v5159_v55 = vrot.slane %v5157_v42, 4  ;;  %v4178_v45 = vadd.f32 %v4144_v39, %v3780_v60  ;;  %v14252_v52 = vpop.f32.mrf.mxu2  ;;  %v14254_v58 = vpop.f32.mrf.mxu3 }
 0x38c   : > { %6147 = vmatmul.bf16.gmra.mxu3 %v6031_v57  ;;  %v6454_v41 = vsel %vm12040_vm7, %v6449_v40, %v6453_v28  ;;  %v6464_v18 = vsel %vm12040_vm7, %v6459_v48, %v6463_v62  ;;  %v5214_v3 = vunpack.c.l.b16 %v5158_v44  ;;  %v4932_v49 = vrot.slane %v4930_v2, 4  ;;  %16181 = vst [vmem:[#allocation33_spill] sm:$0xff] %v14252_v52  ;;  %v11742_v44 = vld [vmem:[#allocation2 + $0x60] sm:$0xe]  ;;  %v11661_v52 = vld [vmem:[#allocation3 + $0x1f8] sm:$0xff] }
 0x38d   : > { %v6688_v43 = vunpack.c.l.b16 %v6454_v41  ;;  %v6689_v50 = vunpack.c.l.b16 %v6464_v18  ;;  %v4245_v46 = vmax.f32 %v4213_v23, 0.0  ;;  %v5161_v30 = vsel %vm12012_vm6, %v5159_v55, %v5160_v26  ;;  %16182 = vst [vmem:[#allocation35_spill] sm:$0xff] %v14254_v58  ;;  %v14258_v26 = vpop.f32.mrf.mxu1  ;;  %8955 = vmatpush.bf16.msra.mxu0 %v11661_v52 }
 0x38e   : > { %v5215_v21 = vunpack.c.l.b16 %v5161_v30  ;;  %v4214_v56 = vadd.f32 %v13984_v47, %v4178_v45  ;;  %v4933_v31 = vshll.u32 %v4587_v7, 16  ;;  %v15991_v62 = vshll.u32 %v14218_v37, 16  ;;  %16183 = vst [vmem:[#allocation32_spill] sm:$0xff] %v14258_v26  ;;  %v14327_v26 = vld [vmem:[#allocation2 + $0x7c] sm:$0xf] }
 0x38f   : > { %v6713_v40 = vpack.c.b16 %v6689_v50, %v6688_v43  ;;  %v4331_v28 = vpack.c.bf16 %v4245_v46, %v4245_v46  ;;  %v15994_v42 = vshrl.u32 %v14218_v37, 16  ;;  %v4949_v23 = vshll.u32 %v4589_v29, 16  ;;  %v6249_v43 = vld [vmem:[#allocation2 + $0x6c] sm:$0xf] }
 0x390   : > { %v5232_v57 = vpack.c.b16 %v5215_v21, %v5214_v3  ;;  %v4246_v48 = vmax.f32 %v4214_v56, 0.0  ;;  %v4935_v60 = vrot.slane %v4933_v31, 5  ;;  %v4941_v7 = vrot.slane %v15991_v62, 5  ;;  %v5596_v3 = vld [vmem:[#allocation2 + $0x68] sm:$0x3] }
 0x391   : > { %6829 = vmatmul.bf16.gmra.mxu0 %v6713_v40  ;;  %v4443_v47 = vrot.slane %v4331_v28, 7  ;;  %v4945_v39 = vrot.slane %v15994_v42, 4  ;;  %v5792_v55 = vshrl.u32 %v11742_v44, 16  ;;  %v4951_v18 = vrot.slane %v4949_v23, 5 }
 0x392   : > { %5376 = vmatmul.bf16.gmra.mxu1 %v5232_v57  ;;  %v4332_v2 = vpack.c.bf16 %v4246_v48, %v4246_v48  ;;  %v4936_v41 = vor.u32 %v4935_v60, %v4932_v49  ;;  %v5795_v45 = vshll.u32 %v11742_v44, 16  ;;  %v16184_v30 = vshrl.u32 %v13854_v16, 16 }
 0x393   : > { %v4444_v29 = vrot.slane %v4443_v47, 4  ;;  %4542 = vst [vmem:[#allocation2 + $0xc0] sm:$0xe] %v4443_v47  ;;  %v4946_v50 = vor.u32 %v4945_v39, %v4941_v7  ;;  %v5794_v46 = vrot.slane %v5792_v55, 5  ;;  %v16185_v28 = vshll.u32 %v13854_v16, 16 }
 0x394   : > { %v5800_v21 = vrot.slane %v16184_v30, 5  ;;  %v4445_v56 = vrot.slane %v4332_v2, 7  ;;  %v4937_v31 = vrot.slane %v4936_v41, 4  ;;  %v5797_v40 = vrot.slane %v5795_v45, 6  ;;  %v14272_v55 = vld [vmem:[#allocation2 + $0x70] sm:$0xf] }
 0x395   : > { %v5801_v62 = vrot.slane %v16185_v28, 6  ;;  %v4947_v57 = vrot.slane %v4946_v50, 4  ;;  %v5806_v48 = vshrl.u32 %v5596_v3, 16  ;;  %v5809_v49 = vshll.u32 %v5596_v3, 16  ;;  %v6251_v50 = vld [vmem:[#allocation2 + $0x74] sm:$0x1]  ;;  %v14278_v28 = vpop.f32.mrf.mxu3 }
 0x396   : > { %v6466_v60 = vshrl.u32 %v6249_v43, 16  ;;  %v4446_v23 = vsel %vm13387_vm10, %v4444_v29, %v4445_v56  ;;  %v4447_v44 = vrot.slane %v4445_v56, 4  ;;  %v4942_v47 = vsel %vm12040_vm7, %v4937_v31, %v4941_v7  ;;  %v14276_v56 = vpop.f32.mrf.mxu2  ;;  %v11653_v7 = vld [vmem:[#allocation3 + $0x1b8] sm:$0xff] }
 0x397   : > { %v5798_v39 = vor.u32 %v5797_v40, %v5794_v46  ;;  %4543 = vst [vmem:[#allocation2 + $0xc4] sm:$0xf] %v4446_v23  ;;  %v4952_v2 = vsel %vm12040_vm7, %v4947_v57, %v4951_v18  ;;  %v5415_v16 = vunpack.c.l.b16 %v4942_v47  ;;  %v5802_v41 = vor.u32 %v5801_v62, %v5800_v21  ;;  %v14282_v57 = vpop.f32.mrf.mxu1  ;;  %v5008_v23 = vld [vmem:[#allocation2 + $0xb4] sm:$0xe]  ;;  %8529 = vmatpush.bf16.msra.mxu3 %v11653_v7 }
 0x398   : > { %v5808_v45 = vrot.slane %v5806_v48, 5  ;;  %4544 = vst [vmem:[#allocation2 + $0xc8] sm:$0x1] %v4447_v44  ;;  %v5416_v3 = vunpack.c.l.b16 %v4952_v2  ;;  %v5811_v33 = vrot.slane %v5809_v49, 6  ;;  %v6468_v29 = vrot.slane %v6466_v60, 4 }
 0x399   : > { %v5799_v30 = vrot.slane %v5798_v39, 4  ;;  %v5804_v46 = vrot.slane %v5802_v41, 4  ;;  %v6469_v31 = vshll.u32 %v6249_v43, 16  ;;  %v15992_v40 = vshll.u32 %v14272_v55, 16  ;;  %v14286_v60 = vld [vmem:[#allocation2 + $0xb8] sm:$0xf] }
 0x39a   : > { %v15993_v18 = vshrl.u32 %v14272_v55, 16  ;;  %v5433_v62 = vpack.c.b16 %v5416_v3, %v5415_v16  ;;  %v5812_v48 = vor.u32 %v5811_v33, %v5808_v45  ;;  %v6485_v49 = vshll.u32 %v6251_v50, 16  ;;  %v4592_v39 = vld [vmem:[#allocation2 + $0xbc] sm:$0x1]  ;;  %v4590_v45 = vld [vmem:[#allocation2 + $0xb4] sm:$0xf] }
 0x39b   : > { %v5803_v21 = vsel %vm13779_vm13, %v5799_v30, %v5802_v41  ;;  %v6471_v44 = vrot.slane %v6469_v31, 5  ;;  %v6477_v43 = vrot.slane %v15992_v40, 5  ;;  %v14296_v16 = vadd.f32 %v14226_v61, %v14175_v15 }
 0x39c   : > { %v6481_v47 = vrot.slane %v15993_v18, 4  ;;  %5577 = vmatmul.bf16.gmra.mxu2 %v5433_v62  ;;  %v5813_v2 = vsel %vm13779_vm13, %v5804_v46, %v5812_v48  ;;  %v14300_v41 = vadd.f32 %v14228_v19, %v13857_v4  ;;  %v6008_v50 = vunpack.c.l.b16 %v5803_v21 }
 0x39d   : > { %v6009_v3 = vunpack.c.l.b16 %v5813_v2  ;;  %v6472_v30 = vor.u32 %v6471_v44, %v6468_v29  ;;  %v6487_v7 = vrot.slane %v6485_v49, 5  ;;  %v11160_v31 = vrot.slane %v5008_v23, 9 }
 0x39e   : > { %v6482_v33 = vor.u32 %v6481_v47, %v6477_v43  ;;  %v5164_v62 = vrot.slane %v14286_v60, 5  ;;  %v5167_v40 = vrot.slane %v4592_v39, 5  ;;  %v4954_v42 = vshrl.u32 %v4590_v45, 16  ;;  %v14306_v21 = vpop.f32.mrf.mxu2 }
 0x39f   : > { %v6032_v18 = vpack.c.b16 %v6009_v3, %v6008_v50  ;;  %v6473_v46 = vrot.slane %v6472_v30, 4  ;;  %v4957_v4 = vshll.u32 %v4590_v45, 16  ;;  %v15995_v19 = vshll.u32 %v14286_v60, 16  ;;  %16186 = vst [vmem:[#allocation34_spill] sm:$0xff] %v14306_v21  ;;  %v14314_v45 = vpop.f32.mrf.mxu3  ;;  %v14316_v30 = vpop.f32.mrf.mxu1 }
 0x3a0   : > { %v6483_v48 = vrot.slane %v6482_v33, 4  ;;  %v5165_v15 = vsel %vm12012_vm6, %v11160_v31, %v5164_v62  ;;  %v5166_v61 = vrot.slane %v5164_v62, 4  ;;  %v4956_v44 = vrot.slane %v4954_v42, 4  ;;  %16187 = vst [vmem:[#allocation11_spill] sm:$0xff] %v14314_v45  ;;  %v5597_v42 = vld [vmem:[#allocation2 + $0x74] sm:$0x3] }
 0x3a1   : > { %6152 = vmatmul.bf16.gmra.mxu3 %v6032_v18  ;;  %v6478_v29 = vsel %vm12040_vm7, %v6473_v46, %v6477_v43  ;;  %v5216_v23 = vunpack.c.l.b16 %v5165_v15  ;;  %v4959_v3 = vrot.slane %v4957_v4, 5  ;;  %16188 = vst [vmem:[#allocation36_spill] sm:$0xff] %v14316_v30  ;;  %v4965_v18 = vrot.slane %v15995_v19, 5  ;;  %v11743_v46 = vld [vmem:[#allocation2 + $0x6c] sm:$0xe] }
 0x3a2   : > { %v6488_v49 = vsel %vm12040_vm7, %v6483_v48, %v6487_v7  ;;  %v6690_v47 = vunpack.c.l.b16 %v6478_v29  ;;  %v5168_v50 = vsel %vm12012_vm6, %v5166_v61, %v5167_v40  ;;  %v15996_v43 = vshrl.u32 %v14286_v60, 16  ;;  %v6252_v29 = vld [vmem:[#allocation2 + $0x78] sm:$0xf] }
 0x3a3   : > { %v6691_v2 = vunpack.c.l.b16 %v6488_v49  ;;  %v5217_v33 = vunpack.c.l.b16 %v5168_v50  ;;  %v4973_v31 = vshll.u32 %v4592_v39, 16  ;;  %v4960_v62 = vor.u32 %v4959_v3, %v4956_v44 }
 0x3a4   : > { %v5815_v48 = vshrl.u32 %v11743_v46, 16  ;;  %v5818_v15 = vshll.u32 %v11743_v46, 16  ;;  %v4969_v61 = vrot.slane %v15996_v43, 4  ;;  %v16189_v4 = vshrl.u32 %v13903_v51, 16 }
 0x3a5   : > { %v6714_v7 = vpack.c.b16 %v6691_v2, %v6690_v47  ;;  %v5233_v40 = vpack.c.b16 %v5217_v33, %v5216_v23  ;;  %v4961_v50 = vrot.slane %v4960_v62, 4  ;;  %v16190_v39 = vshll.u32 %v13903_v51, 16 }
 0x3a6   : > { %v5823_v49 = vrot.slane %v16189_v4, 5  ;;  %v5817_v19 = vrot.slane %v5815_v48, 5  ;;  %v5820_v30 = vrot.slane %v5818_v15, 6  ;;  %v4970_v44 = vor.u32 %v4969_v61, %v4965_v18  ;;  %v6254_v4 = vld [vmem:[#allocation2 + $0x80] sm:$0x1] }
 0x3a7   : > { %6834 = vmatmul.bf16.gmra.mxu0 %v6714_v7  ;;  %v5824_v47 = vrot.slane %v16190_v39, 6  ;;  %5381 = vmatmul.bf16.gmra.mxu1 %v5233_v40  ;;  %v5829_v2 = vshrl.u32 %v5597_v42, 16  ;;  %v5832_v3 = vshll.u32 %v5597_v42, 16  ;;  %v6490_v46 = vshrl.u32 %v6252_v29, 16  ;;  %v14331_v42 = vpop.f32.mrf.mxu2 }
 0x3a8   : > { %v4975_v21 = vrot.slane %v4973_v31, 5  ;;  %v5821_v23 = vor.u32 %v5820_v30, %v5817_v19  ;;  %v6493_v43 = vshll.u32 %v6252_v29, 16  ;;  %v4966_v7 = vsel %vm12040_vm7, %v4961_v50, %v4965_v18  ;;  %v11669_v31 = vld [vmem:[#allocation3 + $0x238] sm:$0xff] }
 0x3a9   : > { %v5825_v33 = vor.u32 %v5824_v47, %v5823_v49  ;;  %v4971_v62 = vrot.slane %v4970_v44, 4  ;;  %v5831_v48 = vrot.slane %v5829_v2, 5  ;;  %v5834_v15 = vrot.slane %v5832_v3, 6  ;;  %9589 = vmatpush.bf16.msra.mxu1 %v11669_v31  ;;  %v14341_v2 = vpop.f32.mrf.mxu1  ;;  %v14343_v3 = vpop.f32.mrf.mxu0 }
 0x3aa   : > { %v5822_v51 = vrot.slane %v5821_v23, 4  ;;  %v6492_v40 = vrot.slane %v6490_v46, 4  ;;  %v6495_v61 = vrot.slane %v6493_v43, 5  ;;  %v15997_v29 = vshll.u32 %v14327_v26, 16  ;;  %v14339_v43 = vpop.f32.mrf.mxu3 }
 0x3ab   : > { %v5827_v39 = vrot.slane %v5825_v33, 4  ;;  %v4976_v19 = vsel %vm12040_vm7, %v4971_v62, %v4975_v21  ;;  %v5835_v30 = vor.u32 %v5834_v15, %v5831_v48  ;;  %v15998_v18 = vshrl.u32 %v14327_v26, 16 }
 0x3ac   : > { %v5417_v49 = vunpack.c.l.b16 %v4966_v7  ;;  %v5418_v50 = vunpack.c.l.b16 %v4976_v19  ;;  %v5826_v47 = vsel %vm13779_vm13, %v5822_v51, %v5825_v33  ;;  %v6496_v44 = vor.u32 %v6495_v61, %v6492_v40  ;;  %v6907_v33 = vld [vmem:[#allocation2 + $0xc] sm:$0xe]  ;;  %v11744_v19 = vld [vmem:[#allocation2 + $0x10] sm:$0xf] }
 0x3ad   : > { %v5836_v21 = vsel %vm13779_vm13, %v5827_v39, %v5835_v30  ;;  %v6501_v46 = vrot.slane %v15997_v29, 5  ;;  %v6505_v23 = vrot.slane %v15998_v18, 4  ;;  %v6509_v7 = vshll.u32 %v6254_v4, 16  ;;  %v11746_v29 = vld [vmem:[#allocation2 + $0x78] sm:$0xe] }
 0x3ae   : > { %v5434_v62 = vpack.c.b16 %v5418_v50, %v5417_v49  ;;  %v6010_v52 = vunpack.c.l.b16 %v5826_v47  ;;  %v6011_v48 = vunpack.c.l.b16 %v5836_v21  ;;  %v6497_v15 = vrot.slane %v6496_v44, 4  ;;  %v11745_v44 = vld [vmem:[#allocation2 + $0x14] sm:$0x1] }
 0x3af   : > { %v6506_v51 = vor.u32 %v6505_v23, %v6501_v46  ;;  %v14353_v40 = vadd.f32 %v14276_v56, %v14238_v14  ;;  %v14357_v39 = vadd.f32 %v14278_v28, %v13968_v35  ;;  %v11289_v4 = vrot.slane %v6907_v33, 9  ;;  %v7333_v35 = vld [vmem:[#allocation2 + $0x14] sm:$0x3] }
 0x3b0   : > { %5582 = vmatmul.bf16.gmra.mxu2 %v5434_v62  ;;  %v6033_v61 = vpack.c.b16 %v6011_v48, %v6010_v52  ;;  %v6502_v31 = vsel %vm12040_vm7, %v6497_v15, %v6501_v46  ;;  %v6973_v30 = vrot.slane %v11744_v19, 5  ;;  %v6511_v50 = vrot.slane %v6509_v7, 5 }
 0x3b1   : > { %v6507_v49 = vrot.slane %v6506_v51, 4  ;;  %v6692_v47 = vunpack.c.l.b16 %v6502_v31  ;;  %v6976_v21 = vrot.slane %v11745_v44, 5  ;;  %v7350_v28 = vshrl.u32 %v6907_v33, 16  ;;  %v10142_v51 = vld [vmem:[%s15945_s3] sm:$0x3] }
 0x3b2   : > { %6157 = vmatmul.bf16.gmra.mxu3 %v6033_v61  ;;  %v6974_v14 = vsel %vm12012_vm6, %v11289_v4, %v6973_v30  ;;  %v6975_v56 = vrot.slane %v6973_v30, 4  ;;  %v7353_v23 = vshll.u32 %v6907_v33, 16  ;;  %v16191_v52 = vshrl.u32 %v13783_v38, 16  ;;  %v14372_v61 = vpop.f32.mrf.mxu2  ;;  %v14377_v45 = vpop.f32.mrf.mxu3 }
 0x3b3   : > { %v6512_v62 = vsel %vm12040_vm7, %v6507_v49, %v6511_v50  ;;  %v7100_v46 = vunpack.c.l.b16 %v6974_v14  ;;  %v16192_v7 = vshll.u32 %v13783_v38, 16  ;;  %16193 = vst [vmem:[#allocation37_spill] sm:$0xff] %v14372_v61  ;;  %v7352_v4 = vrot.slane %v7350_v28, 5  ;;  %v14379_v61 = vpop.f32.mrf.mxu1 }
 0x3b4   : > { %v7358_v48 = vrot.slane %v16191_v52, 5  ;;  %v6693_v31 = vunpack.c.l.b16 %v6512_v62  ;;  %v6977_v33 = vsel %vm12012_vm6, %v6975_v56, %v6976_v21  ;;  %v7355_v19 = vrot.slane %v7353_v23, 6  ;;  %16194 = vst [vmem:[#allocation39_spill] sm:$0xff] %v14377_v45  ;;  %v14381_v62 = vpop.f32.mrf.mxu0 }
 0x3b5   : > { %v7359_v15 = vrot.slane %v16192_v7, 6  ;;  %v7101_v30 = vunpack.c.l.b16 %v6977_v33  ;;  %v7364_v50 = vshrl.u32 %v7333_v35, 16  ;;  %v7367_v44 = vshll.u32 %v7333_v35, 16  ;;  %v5598_v7 = vld [vmem:[#allocation2 + $0x80] sm:$0x3]  ;;  %16195 = vst [vmem:[#allocation12_spill] sm:$0xff] %v14379_v61 }
 0x3b6   : > { %v6715_v14 = vpack.c.b16 %v6693_v31, %v6692_v47  ;;  %v7356_v52 = vor.u32 %v7355_v19, %v7352_v4  ;;  %v10240_v38 = vsel %vm803_vm0, %v10142_v51, 0  ;;  %v5838_v18 = vshrl.u32 %v11746_v29, 16  ;;  %16196 = vst [vmem:[#allocation13_spill] sm:$0xff] %v14381_v62 }
 0x3b7   : > { %v7360_v49 = vor.u32 %v7359_v15, %v7358_v48  ;;  %v7132_v21 = vpack.c.b16 %v7101_v30, %v7100_v46  ;;  %v7366_v28 = vrot.slane %v7364_v50, 5  ;;  %v7369_v23 = vrot.slane %v7367_v44, 6  ;;  %10249 = vmatpush.bf16.msra.mxu2 %v10240_v38  ;;  %v6255_v48 = vld [vmem:[#allocation2 + $0x84] sm:$0xf]  ;;  %v14389_v50 = vld [vmem:[#allocation2 + $0x88] sm:$0xf] }
 0x3b8   : > { %6839 = vmatmul.bf16.gmra.mxu0 %v6715_v14  ;;  %v7357_v47 = vrot.slane %v7356_v52, 4  ;;  %v5840_v35 = vrot.slane %v5838_v18, 5  ;;  %v5841_v15 = vshll.u32 %v11746_v29, 16  ;;  %v16197_v51 = vshrl.u32 %v13964_v53, 16 }
 0x3b9   : > { %v7362_v56 = vrot.slane %v7360_v49, 4  ;;  %7220 = vmatmul.bf16.vlgmr.msrb.gmra.mxu1 %v7132_v21  ;;  %v7370_v33 = vor.u32 %v7369_v23, %v7366_v28  ;;  %v16198_v4 = vshll.u32 %v13964_v53, 16  ;;  %v5852_v61 = vshrl.u32 %v5598_v7, 16  ;;  %v6257_v21 = vld [vmem:[#allocation2 + $0x8c] sm:$0x1] }
 0x3ba   : > { %v5846_v31 = vrot.slane %v16197_v51, 5  ;;  %v5855_v45 = vshll.u32 %v5598_v7, 16  ;;  %v7361_v46 = vsel %vm13779_vm13, %v7357_v47, %v7360_v49  ;;  %v5843_v30 = vrot.slane %v5841_v15, 6  ;;  %v14395_v15 = vpop.f32.mrf.mxu2 }
 0x3bb   : > { %v5847_v19 = vrot.slane %v16198_v4, 6  ;;  %v6514_v44 = vshrl.u32 %v6255_v48, 16  ;;  %v6517_v14 = vshll.u32 %v6255_v48, 16  ;;  %v7371_v29 = vsel %vm13779_vm13, %v7362_v56, %v7370_v33  ;;  %v11652_v48 = vld [vmem:[#allocation3 + $0x1b0] sm:$0xff] }
 0x3bc   : > { %v7734_v18 = vunpack.c.l.b16 %v7361_v46  ;;  %v5854_v38 = vrot.slane %v5852_v61, 5  ;;  %v7735_v28 = vunpack.c.l.b16 %v7371_v29  ;;  %v5844_v53 = vor.u32 %v5843_v30, %v5840_v35  ;;  %8530 = vmatpush.bf16.msra.mxu3 %v11652_v48  ;;  %v14415_v29 = vpop.f32.mrf.mxu1 }
 0x3bd   : > { %v5848_v52 = vor.u32 %v5847_v19, %v5846_v31  ;;  %v5857_v23 = vrot.slane %v5855_v45, 6  ;;  %v6516_v51 = vrot.slane %v6514_v44, 4  ;;  %v6519_v4 = vrot.slane %v6517_v14, 5  ;;  %v6908_v19 = vld [vmem:[#allocation2 + $0x18] sm:$0xe]  ;;  %v14413_v14 = vpop.f32.mrf.mxu3 }
 0x3be   : > { %v15999_v49 = vshll.u32 %v14389_v50, 16  ;;  %v16000_v47 = vshrl.u32 %v14389_v50, 16  ;;  %v7766_v62 = vpack.c.b16 %v7735_v28, %v7734_v18  ;;  %v5845_v58 = vrot.slane %v5844_v53, 4  ;;  %v14417_v18 = vpop.f32.mrf.mxu0  ;;  %v11747_v28 = vld [vmem:[#allocation2 + $0x1c] sm:$0xf] }
 0x3bf   : > { %v5850_v7 = vrot.slane %v5848_v52, 4  ;;  %v5858_v56 = vor.u32 %v5857_v23, %v5854_v38  ;;  %v6533_v33 = vshll.u32 %v6257_v21, 16  ;;  %v6520_v31 = vor.u32 %v6519_v4, %v6516_v51 }
 0x3c0   : > { %v6525_v61 = vrot.slane %v15999_v49, 5  ;;  %v6529_v45 = vrot.slane %v16000_v47, 4  ;;  %v14403_v35 = vadd.f32 %v14331_v42, %v14282_v57  ;;  %7854 = vmatmul.bf16.vlgmr.msrb.gmra.mxu2 %v7766_v62  ;;  %v5849_v46 = vsel %vm13779_vm13, %v5845_v58, %v5848_v52  ;;  %v11748_v52 = vld [vmem:[#allocation2 + $0x20] sm:$0x1] }
 0x3c1   : > { %v5859_v30 = vsel %vm13779_vm13, %v5850_v7, %v5858_v56  ;;  %v14411_v44 = vadd.f32 %v14339_v43, %v14032_v63  ;;  %v6012_v57 = vunpack.c.l.b16 %v5849_v46  ;;  %v6521_v38 = vrot.slane %v6520_v31, 4  ;;  %v7334_v56 = vld [vmem:[#allocation2 + $0x20] sm:$0x3] }
 0x3c2   : > { %v6013_v42 = vunpack.c.l.b16 %v5859_v30  ;;  %v6530_v62 = vor.u32 %v6529_v45, %v6525_v61  ;;  %v11290_v21 = vrot.slane %v6908_v19, 9  ;;  %v6980_v58 = vrot.slane %v11747_v28, 5  ;;  %v14427_v28 = vpop.f32.mrf.mxu2 }
 0x3c3   : > { %v6983_v53 = vrot.slane %v11748_v52, 5  ;;  %v6526_v63 = vsel %vm12040_vm7, %v6521_v38, %v6525_v61  ;;  %v6535_v51 = vrot.slane %v6533_v33, 5  ;;  %v7373_v46 = vshrl.u32 %v6908_v19, 16  ;;  %16200 = vst [vmem:[#allocation38_spill] sm:$0xff] %v14427_v28 }
 0x3c4   : > { %v6034_v23 = vpack.c.b16 %v6013_v42, %v6012_v57  ;;  %v6531_v43 = vrot.slane %v6530_v62, 4  ;;  %v6694_v7 = vunpack.c.l.b16 %v6526_v63  ;;  %v6981_v4 = vsel %vm12012_vm6, %v11290_v21, %v6980_v58 }
 0x3c5   : > { %v6982_v48 = vrot.slane %v6980_v58, 4  ;;  %v7102_v45 = vunpack.c.l.b16 %v6981_v4  ;;  %v7376_v30 = vshll.u32 %v6908_v19, 16  ;;  %v16199_v57 = vshrl.u32 %v13839_v20, 16  ;;  %v5599_v19 = vld [vmem:[#allocation2 + $0x8c] sm:$0x3] }
 0x3c6   : > { %6162 = vmatmul.bf16.gmra.mxu3 %v6034_v23  ;;  %v6536_v31 = vsel %vm12040_vm7, %v6531_v43, %v6535_v51  ;;  %v7375_v38 = vrot.slane %v7373_v46, 5  ;;  %v16201_v62 = vshll.u32 %v13839_v20, 16  ;;  %v7387_v23 = vshrl.u32 %v7334_v56, 16  ;;  %v11749_v4 = vld [vmem:[#allocation2 + $0x84] sm:$0xe] }
 0x3c7   : > { %v7381_v42 = vrot.slane %v16199_v57, 5  ;;  %v6695_v61 = vunpack.c.l.b16 %v6536_v31  ;;  %v6984_v33 = vsel %vm12012_vm6, %v6982_v48, %v6983_v53  ;;  %v7378_v52 = vrot.slane %v7376_v30, 6 }
 0x3c8   : > { %v7382_v21 = vrot.slane %v16201_v62, 6  ;;  %v7103_v58 = vunpack.c.l.b16 %v6984_v33  ;;  %v7390_v63 = vshll.u32 %v7334_v56, 16  ;;  %v5861_v49 = vshrl.u32 %v11749_v4, 16  ;;  %v14435_v33 = vpop.f32.mrf.mxu3  ;;  %v14439_v56 = vpop.f32.mrf.mxu0 }
 0x3c9   : > { %v6716_v43 = vpack.c.b16 %v6695_v61, %v6694_v7  ;;  %v5864_v57 = vshll.u32 %v11749_v4, 16  ;;  %v7379_v28 = vor.u32 %v7378_v52, %v7375_v38  ;;  %v7389_v31 = vrot.slane %v7387_v23, 5  ;;  %16203 = vst [vmem:[#allocation40_spill] sm:$0xff] %v14435_v33  ;;  %v14437_v7 = vpop.f32.mrf.mxu1 }
 0x3ca   : > { %v7383_v51 = vor.u32 %v7382_v21, %v7381_v42  ;;  %v7133_v47 = vpack.c.b16 %v7103_v58, %v7102_v45  ;;  %v7392_v11 = vrot.slane %v7390_v63, 6  ;;  %v5863_v48 = vrot.slane %v5861_v49, 5  ;;  %16204 = vst [vmem:[#allocation14_spill] sm:$0xff] %v14437_v7  ;;  %v14443_v49 = vld [vmem:[#allocation2 + $0x94] sm:$0xf]  ;;  %v11668_v7 = vld [vmem:[#allocation3 + $0x230] sm:$0xff] }
 0x3cb   : > { %6844 = vmatmul.bf16.gmra.mxu0 %v6716_v43  ;;  %v5866_v20 = vrot.slane %v5864_v57, 6  ;;  %v16202_v46 = vshrl.u32 %v14034_v1, 16  ;;  %16205 = vst [vmem:[#allocation15_spill] sm:$0xff] %v14439_v56  ;;  %v7380_v42 = vrot.slane %v7379_v28, 4  ;;  %v16206_v61 = vshll.u32 %v14034_v1, 16  ;;  %9590 = vmatpush.bf16.msra.mxu1 %v11668_v7 }
 0x3cc   : > { %v7385_v53 = vrot.slane %v7383_v51, 4  ;;  %7225 = vmatmul.bf16.gmra.mxu1 %v7133_v47  ;;  %v7393_v45 = vor.u32 %v7392_v11, %v7389_v31  ;;  %v5875_v62 = vshrl.u32 %v5599_v19, 16  ;;  %v5878_v58 = vshll.u32 %v5599_v19, 16  ;;  %v6260_v31 = vld [vmem:[#allocation2 + $0x98] sm:$0x1] }
 0x3cd   : > { %v5869_v30 = vrot.slane %v16202_v46, 5  ;;  %v5870_v38 = vrot.slane %v16206_v61, 6  ;;  %v5867_v21 = vor.u32 %v5866_v20, %v5863_v48  ;;  %v6538_v52 = vshrl.u32 %v6258_v36, 16  ;;  %v11660_v61 = vld [vmem:[#allocation3 + $0x1f0] sm:$0xff] }
 0x3ce   : > { %v6541_v23 = vshll.u32 %v6258_v36, 16  ;;  %v7384_v63 = vsel %vm13779_vm13, %v7380_v42, %v7383_v51  ;;  %v7394_v43 = vsel %vm13779_vm13, %v7385_v53, %v7393_v45  ;;  %v5877_v47 = vrot.slane %v5875_v62, 5  ;;  %v14450_v36 = vpop.f32.mrf.mxu2  ;;  %8956 = vmatpush.bf16.msra.mxu0 %v11660_v61 }
 0x3cf   : > { %v5871_v4 = vor.u32 %v5870_v38, %v5869_v30  ;;  %v7736_v28 = vunpack.c.l.b16 %v7384_v63  ;;  %v7737_v11 = vunpack.c.l.b16 %v7394_v43  ;;  %v5868_v57 = vrot.slane %v5867_v21, 4  ;;  %v6909_v21 = vld [vmem:[#allocation2 + $0x24] sm:$0xe] }
 0x3d0   : > { %v5880_v1 = vrot.slane %v5878_v58, 6  ;;  %v6540_v48 = vrot.slane %v6538_v52, 4  ;;  %v6543_v19 = vrot.slane %v6541_v23, 5  ;;  %v16001_v20 = vshll.u32 %v14443_v49, 16 }
 0x3d1   : > { %v5873_v46 = vrot.slane %v5871_v4, 4  ;;  %v7767_v51 = vpack.c.b16 %v7737_v11, %v7736_v28  ;;  %v5872_v53 = vsel %vm13779_vm13, %v5868_v57, %v5871_v4  ;;  %v16002_v42 = vshrl.u32 %v14443_v49, 16  ;;  %v11750_v11 = vld [vmem:[#allocation2 + $0x28] sm:$0xf] }
 0x3d2   : > { %v5881_v30 = vor.u32 %v5880_v1, %v5877_v47  ;;  %v6544_v45 = vor.u32 %v6543_v19, %v6540_v48  ;;  %v6549_v38 = vrot.slane %v16001_v20, 5  ;;  %v6557_v62 = vshll.u32 %v6260_v31, 16  ;;  %v11751_v1 = vld [vmem:[#allocation2 + $0x2c] sm:$0x1]  ;;  %v14471_v48 = vpop.f32.mrf.mxu1  ;;  %v14473_v19 = vpop.f32.mrf.mxu0 }
 0x3d3   : > { %7859 = vmatmul.bf16.gmra.mxu2 %v7767_v51  ;;  %v6553_v52 = vrot.slane %v16002_v42, 4  ;;  %v14463_v23 = vadd.f32 %v14395_v15, %v14341_v2  ;;  %v14467_v63 = vadd.f32 %v14413_v14, %v14102_v8  ;;  %v6014_v43 = vunpack.c.l.b16 %v5872_v53  ;;  %v7335_v14 = vld [vmem:[#allocation2 + $0x2c] sm:$0x3] }
 0x3d4   : > { %v5882_v58 = vsel %vm13779_vm13, %v5873_v46, %v5881_v30  ;;  %v6545_v47 = vrot.slane %v6544_v45, 4  ;;  %v11291_v7 = vrot.slane %v6909_v21, 9  ;;  %v6987_v57 = vrot.slane %v11750_v11, 5  ;;  %v14469_v46 = vpop.f32.mrf.mxu3 }
 0x3d5   : > { %v6015_v4 = vunpack.c.l.b16 %v5882_v58  ;;  %v6554_v28 = vor.u32 %v6553_v52, %v6549_v38  ;;  %v6990_v31 = vrot.slane %v11751_v1, 5  ;;  %v6559_v15 = vrot.slane %v6557_v62, 5 }
 0x3d6   : > { %v6550_v8 = vsel %vm12040_vm7, %v6545_v47, %v6549_v38  ;;  %v7396_v61 = vshrl.u32 %v6909_v21, 16  ;;  %v6988_v30 = vsel %vm12012_vm6, %v11291_v7, %v6987_v57  ;;  %v6989_v45 = vrot.slane %v6987_v57, 4 }
 0x3d7   : > { %v6035_v2 = vpack.c.b16 %v6015_v4, %v6014_v43  ;;  %v6555_v51 = vrot.slane %v6554_v28, 4  ;;  %v6696_v53 = vunpack.c.l.b16 %v6550_v8  ;;  %v7104_v58 = vunpack.c.l.b16 %v6988_v30  ;;  %v14487_v8 = vpop.f32.mrf.mxu2  ;;  %v5600_v30 = vld [vmem:[#allocation2 + $0x98] sm:$0x3] }
 0x3d8   : > { %v7398_v52 = vrot.slane %v7396_v61, 5  ;;  %v7399_v11 = vshll.u32 %v6909_v21, 16  ;;  %v16207_v1 = vshrl.u32 %v13893_v54, 16  ;;  %v6991_v38 = vsel %vm12012_vm6, %v6989_v45, %v6990_v31  ;;  %16209 = vst [vmem:[#allocation16_spill] sm:$0xff] %v14487_v8  ;;  %v6261_v45 = vld [vmem:[#allocation2 + $0x9c] sm:$0xf] }
 0x3d9   : > { %6167 = vmatmul.bf16.gmra.mxu3 %v6035_v2  ;;  %v6560_v43 = vsel %vm12040_vm7, %v6555_v51, %v6559_v15  ;;  %v16208_v62 = vshll.u32 %v13893_v54, 16  ;;  %v7410_v47 = vshrl.u32 %v7335_v14, 16  ;;  %v7105_v7 = vunpack.c.l.b16 %v6991_v38 }
 0x3da   : > { %v7404_v20 = vrot.slane %v16207_v1, 5  ;;  %v6697_v28 = vunpack.c.l.b16 %v6560_v43  ;;  %v7401_v57 = vrot.slane %v7399_v11, 6  ;;  %v7413_v2 = vshll.u32 %v7335_v14, 16  ;;  %v11752_v1 = vld [vmem:[#allocation2 + $0x90] sm:$0xe] }
 0x3db   : > { %v7405_v4 = vrot.slane %v16208_v62, 6  ;;  %v7412_v61 = vrot.slane %v7410_v47, 5  ;;  %v5884_v42 = vshrl.u32 %v11752_v1, 16  ;;  %v5887_v56 = vshll.u32 %v11752_v1, 16 }
 0x3dc   : > { %v6717_v15 = vpack.c.b16 %v6697_v28, %v6696_v53  ;;  %v7134_v51 = vpack.c.b16 %v7105_v7, %v7104_v58  ;;  %v7402_v27 = vor.u32 %v7401_v57, %v7398_v52  ;;  %v7415_v31 = vrot.slane %v7413_v2, 6  ;;  %v14493_v58 = vld [vmem:[#allocation2 + $0xa0] sm:$0xf]  ;;  %v14495_v7 = vpop.f32.mrf.mxu3 }
 0x3dd   : > { %v7406_v21 = vor.u32 %v7405_v4, %v7404_v20  ;;  %v5886_v62 = vrot.slane %v5884_v42, 5  ;;  %v5889_v33 = vrot.slane %v5887_v56, 6  ;;  %v16210_v43 = vshrl.u32 %v14088_v13, 16  ;;  %16212 = vst [vmem:[#allocation17_spill] sm:$0xff] %v14493_v58  ;;  %v14497_v56 = vpop.f32.mrf.mxu1  ;;  %v14499_v42 = vpop.f32.mrf.mxu0 }
 0x3de   : > { %6849 = vmatmul.bf16.gmra.mxu0 %v6717_v15  ;;  %7230 = vmatmul.bf16.gmra.mxu1 %v7134_v51  ;;  %v7403_v14 = vrot.slane %v7402_v27, 4  ;;  %v7416_v20 = vor.u32 %v7415_v31, %v7412_v61  ;;  %v16211_v38 = vshll.u32 %v14088_v13, 16  ;;  %v5898_v47 = vshrl.u32 %v5600_v30, 16  ;;  %16213 = vst [vmem:[#allocation41_spill] sm:$0xff] %v14495_v7  ;;  %v6263_v51 = vld [vmem:[#allocation2 + $0xa4] sm:$0x1] }
 0x3df   : > { %v7408_v54 = vrot.slane %v7406_v21, 4  ;;  %v5892_v11 = vrot.slane %v16210_v43, 5  ;;  %v5890_v1 = vor.u32 %v5889_v33, %v5886_v62  ;;  %v5901_v53 = vshll.u32 %v5600_v30, 16  ;;  %16214 = vst [vmem:[#allocation18_spill] sm:$0xff] %v14497_v56 }
 0x3e0   : > { %v5893_v4 = vrot.slane %v16211_v38, 6  ;;  %v6562_v52 = vshrl.u32 %v6261_v45, 16  ;;  %v6565_v28 = vshll.u32 %v6261_v45, 16  ;;  %16215 = vst [vmem:[#allocation42_spill] sm:$0xff] %v14499_v42  ;;  %v7407_v27 = vsel %vm13779_vm13, %v7403_v14, %v7406_v21  ;;  %v11651_v38 = vld [vmem:[#allocation3 + $0x1a8] sm:$0xff] }
 0x3e1   : > { %v7417_v13 = vsel %vm13779_vm13, %v7408_v54, %v7416_v20  ;;  %v5900_v2 = vrot.slane %v5898_v47, 5  ;;  %v7738_v33 = vunpack.c.l.b16 %v7407_v27  ;;  %v5891_v30 = vrot.slane %v5890_v1, 4  ;;  %v6910_v47 = vld [vmem:[#allocation2 + $0x30] sm:$0xe]  ;;  %v14511_v1 = vpop.f32.mrf.mxu2  ;;  %8531 = vmatpush.bf16.msra.mxu3 %v11651_v38 }
 0x3e2   : > { %v5894_v57 = vor.u32 %v5893_v4, %v5892_v11  ;;  %v7739_v61 = vunpack.c.l.b16 %v7417_v13  ;;  %v5903_v15 = vrot.slane %v5901_v53, 6  ;;  %v6564_v45 = vrot.slane %v6562_v52, 4 }
 0x3e3   : > { %v6567_v62 = vrot.slane %v6565_v28, 5  ;;  %v16003_v43 = vshll.u32 %v14493_v58, 16  ;;  %v16004_v54 = vshrl.u32 %v14493_v58, 16  ;;  %v6581_v4 = vshll.u32 %v6263_v51, 16  ;;  %v6264_v58 = vld [vmem:[#allocation2 + $0xa8] sm:$0xf] }
 0x3e4   : > { %v5896_v31 = vrot.slane %v5894_v57, 4  ;;  %v7768_v56 = vpack.c.b16 %v7739_v61, %v7738_v33  ;;  %v5895_v21 = vsel %vm13779_vm13, %v5891_v30, %v5894_v57  ;;  %v5904_v14 = vor.u32 %v5903_v15, %v5900_v2  ;;  %v11754_v15 = vld [vmem:[#allocation2 + $0x38] sm:$0x1] }
 0x3e5   : > { %v6568_v11 = vor.u32 %v6567_v62, %v6564_v45  ;;  %v6573_v20 = vrot.slane %v16003_v43, 5  ;;  %v6577_v52 = vrot.slane %v16004_v54, 4  ;;  %v14519_v28 = vadd.f32 %v14450_v36, %v14415_v29  ;;  %v7336_v29 = vld [vmem:[#allocation2 + $0x38] sm:$0x3]  ;;  %v11755_v54 = vld [vmem:[#allocation2 + $0x9c] sm:$0xe] }
 0x3e6   : > { %7864 = vmatmul.bf16.gmra.mxu2 %v7768_v56  ;;  %v5905_v53 = vsel %vm13779_vm13, %v5896_v31, %v5904_v14  ;;  %v14523_v27 = vadd.f32 %v14469_v46, %v14167_v25  ;;  %v6016_v13 = vunpack.c.l.b16 %v5895_v21  ;;  %v11292_v61 = vrot.slane %v6910_v47, 9  ;;  %v11753_v56 = vld [vmem:[#allocation2 + $0x34] sm:$0xf]  ;;  %v14529_v21 = vpop.f32.mrf.mxu3 }
 0x3e7   : > { %v6017_v57 = vunpack.c.l.b16 %v5905_v53  ;;  %v6569_v2 = vrot.slane %v6568_v11, 4  ;;  %v6578_v33 = vor.u32 %v6577_v52, %v6573_v20  ;;  %v6994_v30 = vrot.slane %v11753_v56, 5  ;;  %v14531_v11 = vpop.f32.mrf.mxu1  ;;  %v14533_v53 = vpop.f32.mrf.mxu0 }
 0x3e8   : > { %v6997_v51 = vrot.slane %v11754_v15, 5  ;;  %v6583_v62 = vrot.slane %v6581_v4, 5  ;;  %v7419_v36 = vshrl.u32 %v6910_v47, 16  ;;  %v5907_v8 = vshrl.u32 %v11755_v54, 16 }
 0x3e9   : > { %v6036_v31 = vpack.c.b16 %v6017_v57, %v6016_v13  ;;  %v6574_v45 = vsel %vm12040_vm7, %v6569_v2, %v6573_v20  ;;  %v6579_v38 = vrot.slane %v6578_v33, 4  ;;  %v6995_v25 = vsel %vm12012_vm6, %v11292_v61, %v6994_v30 }
 0x3ea   : > { %v6698_v14 = vunpack.c.l.b16 %v6574_v45  ;;  %v6996_v46 = vrot.slane %v6994_v30, 4  ;;  %v7106_v52 = vunpack.c.l.b16 %v6995_v25  ;;  %v7421_v13 = vrot.slane %v7419_v36, 5 }
 0x3eb   : > { %6172 = vmatmul.bf16.gmra.mxu3 %v6036_v31  ;;  %v7422_v57 = vshll.u32 %v6910_v47, 16  ;;  %v16216_v20 = vshrl.u32 %v13946_v9, 16  ;;  %v6584_v2 = vsel %vm12040_vm7, %v6579_v38, %v6583_v62  ;;  %v16217_v61 = vshll.u32 %v13946_v9, 16  ;;  %v5601_v47 = vld [vmem:[#allocation2 + $0xa4] sm:$0x3] }
 0x3ec   : > { %v6998_v33 = vsel %vm12012_vm6, %v6996_v46, %v6997_v51  ;;  %v7433_v30 = vshrl.u32 %v7336_v29, 16  ;;  %v6699_v15 = vunpack.c.l.b16 %v6584_v2  ;;  %v7436_v31 = vshll.u32 %v7336_v29, 16  ;;  %v14543_v51 = vpop.f32.mrf.mxu2 }
 0x3ed   : > { %v7427_v4 = vrot.slane %v16216_v20, 5  ;;  %v7428_v56 = vrot.slane %v16217_v61, 6  ;;  %v7107_v45 = vunpack.c.l.b16 %v6998_v33  ;;  %v7424_v43 = vrot.slane %v7422_v57, 6  ;;  %16218 = vst [vmem:[#allocation43_spill] sm:$0xff] %v14543_v51 }
 0x3ee   : > { %v7435_v36 = vrot.slane %v7433_v30, 5  ;;  %v5910_v20 = vshll.u32 %v11755_v54, 16  ;;  %v6718_v7 = vpack.c.b16 %v6699_v15, %v6698_v14  ;;  %v7438_v38 = vrot.slane %v7436_v31, 6 }
 0x3ef   : > { %v7429_v25 = vor.u32 %v7428_v56, %v7427_v4  ;;  %v7135_v42 = vpack.c.b16 %v7107_v45, %v7106_v52  ;;  %v7425_v62 = vor.u32 %v7424_v43, %v7421_v13  ;;  %v5909_v46 = vrot.slane %v5907_v8, 5  ;;  %v14549_v13 = vld [vmem:[#allocation2 + $0xac] sm:$0xf] }
 0x3f0   : > { %v5912_v61 = vrot.slane %v5910_v20, 6  ;;  %v16219_v2 = vshrl.u32 %v14153_v10, 16  ;;  %6854 = vmatmul.bf16.gmra.mxu0 %v6718_v7  ;;  %v7439_v4 = vor.u32 %v7438_v38, %v7435_v36  ;;  %v16220_v33 = vshll.u32 %v14153_v10, 16  ;;  %16221 = vst [vmem:[#allocation44_spill] sm:$0xff] %v14549_v13  ;;  %v6266_v20 = vld [vmem:[#allocation2 + $0xb0] sm:$0x1]  ;;  %v14559_v38 = vpop.f32.mrf.mxu0 }
 0x3f1   : > { %v7431_v9 = vrot.slane %v7429_v25, 4  ;;  %7235 = vmatmul.bf16.gmra.mxu1 %v7135_v42  ;;  %v7426_v29 = vrot.slane %v7425_v62, 4  ;;  %v5921_v14 = vshrl.u32 %v5601_v47, 16  ;;  %v5924_v43 = vshll.u32 %v5601_v47, 16  ;;  %v14555_v62 = vpop.f32.mrf.mxu3  ;;  %v14557_v47 = vpop.f32.mrf.mxu1 }
 0x3f2   : > { %v5915_v57 = vrot.slane %v16219_v2, 5  ;;  %v5916_v54 = vrot.slane %v16220_v33, 6  ;;  %v5913_v52 = vor.u32 %v5912_v61, %v5909_v46  ;;  %v6586_v56 = vshrl.u32 %v6264_v58, 16  ;;  %16222 = vst [vmem:[#allocation47_spill] sm:$0xff] %v14555_v62  ;;  %v11659_v2 = vld [vmem:[#allocation3 + $0x1e8] sm:$0xff] }
 0x3f3   : > { %v6589_v30 = vshll.u32 %v6264_v58, 16  ;;  %v7430_v8 = vsel %vm13779_vm13, %v7426_v29, %v7429_v25  ;;  %v7440_v15 = vsel %vm13779_vm13, %v7431_v9, %v7439_v4  ;;  %v5923_v42 = vrot.slane %v5921_v14, 5  ;;  %16223 = vst [vmem:[#allocation45_spill] sm:$0xff] %v14557_v47  ;;  %v11667_v9 = vld [vmem:[#allocation3 + $0x228] sm:$0xff]  ;;  %8957 = vmatpush.bf16.msra.mxu0 %v11659_v2  ;;  %v6267_v47 = vld [vmem:[#allocation2 + $0xb4] sm:$0xf] }
 0x3f4   : > { %v5917_v7 = vor.u32 %v5916_v54, %v5915_v57  ;;  %v7740_v45 = vunpack.c.l.b16 %v7430_v8  ;;  %v7741_v31 = vunpack.c.l.b16 %v7440_v15  ;;  %v5914_v36 = vrot.slane %v5913_v52, 4  ;;  %v11650_v54 = vld [vmem:[#allocation3 + $0x1a0] sm:$0xff]  ;;  %9591 = vmatpush.bf16.msra.mxu1 %v11667_v9  ;;  %v11757_v2 = vld [vmem:[#allocation2 + $0x44] sm:$0x1] }
 0x3f5   : > { %v5926_v10 = vrot.slane %v5924_v43, 6  ;;  %v6588_v46 = vrot.slane %v6586_v56, 4  ;;  %v6591_v61 = vrot.slane %v6589_v30, 5  ;;  %v16007_v25 = vshll.u32 %v14549_v13, 16  ;;  %v6911_v8 = vld [vmem:[#allocation2 + $0x3c] sm:$0xe]  ;;  %8532 = vmatpush.bf16.msra.mxu3 %v11650_v54 }
 0x3f6   : > { %v5919_v58 = vrot.slane %v5917_v7, 4  ;;  %v7769_v57 = vpack.c.b16 %v7741_v31, %v7740_v45  ;;  %v5918_v29 = vsel %vm13779_vm13, %v5914_v36, %v5917_v7  ;;  %v16008_v33 = vshrl.u32 %v14549_v13, 16  ;;  %v11658_v56 = vld [vmem:[#allocation3 + $0x1e0] sm:$0xff] }
 0x3f7   : > { %v5927_v4 = vor.u32 %v5926_v10, %v5923_v42  ;;  %v6592_v14 = vor.u32 %v6591_v61, %v6588_v46  ;;  %v6597_v52 = vrot.slane %v16007_v25, 5  ;;  %v6605_v43 = vshll.u32 %v6266_v20, 16  ;;  %v14579_v10 = vpop.f32.mrf.mxu2  ;;  %8958 = vmatpush.bf16.msra.mxu0 %v11658_v56 }
 0x3f8   : > { %7869 = vmatmul.bf16.gmra.mxu2 %v7769_v57  ;;  %v6601_v15 = vrot.slane %v16008_v33, 4  ;;  %v14573_v7 = vadd.f32 %v14511_v1, %v14471_v48  ;;  %v14577_v42 = vadd.f32 %v14529_v21, %v14234_v32  ;;  %v6018_v45 = vunpack.c.l.b16 %v5918_v29 }
 0x3f9   : > { %v5928_v30 = vsel %vm13779_vm13, %v5919_v58, %v5927_v4  ;;  %v6593_v36 = vrot.slane %v6592_v14, 4  ;;  %v11293_v46 = vrot.slane %v6911_v8, 9  ;;  %v11756_v58 = vld [vmem:[#allocation2 + $0x40] sm:$0xf]  ;;  %v7004_v9 = vrot.slane %v11757_v2, 5 }
 0x3fa   : > { %16224 = vst [vmem:[#allocation22_spill] sm:$0xff] %v14577_v42  ;;  %v6019_v31 = vunpack.c.l.b16 %v5928_v30  ;;  %v6602_v20 = vor.u32 %v6601_v15, %v6597_v52  ;;  %v7001_v61 = vrot.slane %v11756_v58, 5  ;;  %v6607_v1 = vrot.slane %v6605_v43, 5  ;;  %v7337_v4 = vld [vmem:[#allocation2 + $0x44] sm:$0x3] }
 0x3fb   : > { %v6598_v48 = vsel %vm12040_vm7, %v6593_v36, %v6597_v52  ;;  %v7442_v32 = vshrl.u32 %v6911_v8, 16  ;;  %v7445_v58 = vshll.u32 %v6911_v8, 16  ;;  %v16225_v2 = vshrl.u32 %v14014_v24, 16 }
 0x3fc   : > { %v6037_v57 = vpack.c.b16 %v6019_v31, %v6018_v45  ;;  %v6603_v21 = vrot.slane %v6602_v20, 4  ;;  %v6700_v29 = vunpack.c.l.b16 %v6598_v48  ;;  %v7002_v54 = vsel %vm12012_vm6, %v11293_v46, %v7001_v61  ;;  %v14593_v20 = vpop.f32.mrf.mxu3  ;;  %v14595_v46 = vpop.f32.mrf.mxu1 }
 0x3fd   : > { %v7003_v14 = vrot.slane %v7001_v61, 4  ;;  %v7108_v30 = vunpack.c.l.b16 %v7002_v54  ;;  %v7444_v15 = vrot.slane %v7442_v32, 5  ;;  %v7450_v45 = vrot.slane %v16225_v2, 5  ;;  %v14597_v61 = vpop.f32.mrf.mxu0 }
 0x3fe   : > { %6177 = vmatmul.bf16.gmra.mxu3 %v6037_v57  ;;  %v6608_v52 = vsel %vm12040_vm7, %v6603_v21, %v6607_v1  ;;  %v16226_v56 = vshll.u32 %v14014_v24, 16  ;;  %v7456_v36 = vshrl.u32 %v7337_v4, 16  ;;  %v7447_v48 = vrot.slane %v7445_v58, 6  ;;  %v5602_v1 = vld [vmem:[#allocation2 + $0xb0] sm:$0x3] }
 0x3ff   : > { %v7005_v43 = vsel %vm12012_vm6, %v7003_v14, %v7004_v9  ;;  %v6701_v8 = vunpack.c.l.b16 %v6608_v52  ;;  %v7459_v32 = vshll.u32 %v7337_v4, 16  ;;  %v11758_v21 = vld [vmem:[#allocation2 + $0xa8] sm:$0xe]  ;;  %v16227_v42 = vshrl.u32 %v14218_v37, 16 }
 0x400   : > { %v7451_v31 = vrot.slane %v16226_v56, 6  ;;  %v7109_v57 = vunpack.c.l.b16 %v7005_v43  ;;  %v7458_v2 = vrot.slane %v7456_v36, 5  ;;  %v5930_v25 = vshrl.u32 %v11758_v21, 16  ;;  %v14603_v36 = vpop.f32.mrf.mxu2 }
 0x401   : > { %v5933_v9 = vshll.u32 %v11758_v21, 16  ;;  %v6719_v14 = vpack.c.b16 %v6701_v8, %v6700_v29  ;;  %v7448_v56 = vor.u32 %v7447_v48, %v7444_v15  ;;  %v7461_v33 = vrot.slane %v7459_v32, 6  ;;  %16229 = vst [vmem:[#allocation9_spill] sm:$0xff] %v14603_v36  ;;  %v14605_v15 = vld [vmem:[#allocation2 + $0xb8] sm:$0xf] }
 0x402   : > { %v7452_v54 = vor.u32 %v7451_v31, %v7450_v45  ;;  %v7136_v24 = vpack.c.b16 %v7109_v57, %v7108_v30  ;;  %v5932_v62 = vrot.slane %v5930_v25, 5  ;;  %v5938_v52 = vrot.slane %v16227_v42, 5  ;;  %16230 = vst [vmem:[#allocation46_spill] sm:$0xff] %v14605_v15 }
 0x403   : > { %v5935_v13 = vrot.slane %v5933_v9, 6  ;;  %6859 = vmatmul.bf16.gmra.mxu0 %v6719_v14  ;;  %v7449_v4 = vrot.slane %v7448_v56, 4  ;;  %v7462_v58 = vor.u32 %v7461_v33, %v7458_v2  ;;  %v16228_v45 = vshll.u32 %v14218_v37, 16  ;;  %v6269_v9 = vld [vmem:[#allocation2 + $0xbc] sm:$0x1] }
 0x404   : > { %v7454_v51 = vrot.slane %v7452_v54, 4  ;;  %7240 = vmatmul.bf16.gmra.mxu1 %v7136_v24  ;;  %v5944_v31 = vshrl.u32 %v5602_v1, 16  ;;  %v5947_v30 = vshll.u32 %v5602_v1, 16  ;;  %v6610_v8 = vshrl.u32 %v6267_v47, 16  ;;  %v11649_v24 = vld [vmem:[#allocation3 + $0x198] sm:$0xff] }
 0x405   : > { %v5939_v43 = vrot.slane %v16228_v45, 6  ;;  %v5936_v29 = vor.u32 %v5935_v13, %v5932_v62  ;;  %v6613_v25 = vshll.u32 %v6267_v47, 16  ;;  %v7453_v57 = vsel %vm13779_vm13, %v7449_v4, %v7452_v54  ;;  %v11657_v47 = vld [vmem:[#allocation3 + $0x1d8] sm:$0xff]  ;;  %v14619_v45 = vpop.f32.mrf.mxu0  ;;  %8533 = vmatpush.bf16.msra.mxu3 %v11649_v24 }
 0x406   : > { %v7463_v42 = vsel %vm13779_vm13, %v7454_v51, %v7462_v58  ;;  %v5946_v33 = vrot.slane %v5944_v31, 5  ;;  %v7742_v32 = vunpack.c.l.b16 %v7453_v57  ;;  %v5949_v21 = vrot.slane %v5947_v30, 6  ;;  %v14617_v58 = vpop.f32.mrf.mxu1  ;;  %16233 = vst [vmem:[#allocation48_spill] sm:$0xff] %v14619_v45  ;;  %v6912_v30 = vld [vmem:[#allocation2 + $0x48] sm:$0xe]  ;;  %8959 = vmatpush.bf16.msra.mxu0 %v11657_v47 }
 0x407   : > { %v5940_v48 = vor.u32 %v5939_v43, %v5938_v52  ;;  %v7743_v37 = vunpack.c.l.b16 %v7463_v42  ;;  %v5937_v2 = vrot.slane %v5936_v29, 4  ;;  %v6612_v13 = vrot.slane %v6610_v8, 4  ;;  %v14615_v52 = vpop.f32.mrf.mxu3  ;;  %16232 = vst [vmem:[#allocation20_spill] sm:$0xff] %v14617_v58  ;;  %v11648_v8 = vld [vmem:[#allocation3 + $0x190] sm:$0xff]  ;;  %v11760_v24 = vld [vmem:[#allocation2 + $0x50] sm:$0x1] }
 0x408   : > { %v6615_v62 = vrot.slane %v6613_v25, 5  ;;  %v16011_v1 = vshll.u32 %v14605_v15, 16  ;;  %v5950_v4 = vor.u32 %v5949_v21, %v5946_v33  ;;  %v16012_v51 = vshrl.u32 %v14605_v15, 16  ;;  %16231 = vst [vmem:[#allocation27_spill] sm:$0xff] %v14615_v52  ;;  %v11656_v25 = vld [vmem:[#allocation3 + $0x1d0] sm:$0xff] }
 0x409   : > { %v5942_v14 = vrot.slane %v5940_v48, 4  ;;  %v7770_v56 = vpack.c.b16 %v7743_v37, %v7742_v32  ;;  %v5941_v54 = vsel %vm13779_vm13, %v5937_v2, %v5940_v48  ;;  %v6629_v29 = vshll.u32 %v6269_v9, 16  ;;  %8534 = vmatpush.bf16.msra.mxu3 %v11648_v8 }
 0x40a   : > { %v6616_v43 = vor.u32 %v6615_v62, %v6612_v13  ;;  %v6621_v31 = vrot.slane %v16011_v1, 5  ;;  %v6625_v42 = vrot.slane %v16012_v51, 4  ;;  %v14629_v48 = vadd.f32 %v14579_v10, %v14531_v11  ;;  %v11759_v13 = vld [vmem:[#allocation2 + $0x4c] sm:$0xf]  ;;  %v7338_v11 = vld [vmem:[#allocation2 + $0x50] sm:$0x3]  ;;  %v14637_v1 = vpop.f32.mrf.mxu2  ;;  %8960 = vmatpush.bf16.msra.mxu0 %v11656_v25 }
 0x40b   : > { %7874 = vmatmul.bf16.gmra.mxu2 %v7770_v56  ;;  %v5951_v57 = vsel %vm13779_vm13, %v5942_v14, %v5950_v4  ;;  %v14633_v33 = vadd.f32 %v14593_v20, %v14296_v16  ;;  %v6020_v32 = vunpack.c.l.b16 %v5941_v54  ;;  %v11294_v9 = vrot.slane %v6912_v30, 9  ;;  %v11647_v16 = vld [vmem:[#allocation3 + $0x188] sm:$0xff] }
 0x40c   : > { %v6021_v37 = vunpack.c.l.b16 %v5951_v57  ;;  %v6617_v2 = vrot.slane %v6616_v43, 4  ;;  %v6626_v21 = vor.u32 %v6625_v42, %v6621_v31  ;;  %v7008_v62 = vrot.slane %v11759_v13, 5  ;;  %v11655_v20 = vld [vmem:[#allocation3 + $0x1c8] sm:$0xff] }
 0x40d   : > { %16234 = vst [vmem:[#allocation49_spill] sm:$0xff] %v14633_v33  ;;  %v7011_v14 = vrot.slane %v11760_v24, 5  ;;  %v6631_v4 = vrot.slane %v6629_v29, 5  ;;  %v7465_v10 = vshrl.u32 %v6912_v30, 16  ;;  %v7468_v13 = vshll.u32 %v6912_v30, 16  ;;  %8535 = vmatpush.bf16.msra.mxu3 %v11647_v16 }
 0x40e   : > { %v6038_v47 = vpack.c.b16 %v6021_v37, %v6020_v32  ;;  %v6622_v56 = vsel %vm12040_vm7, %v6617_v2, %v6621_v31  ;;  %v6627_v54 = vrot.slane %v6626_v21, 4  ;;  %v7009_v57 = vsel %vm12012_vm6, %v11294_v9, %v7008_v62  ;;  %8961 = vmatpush.bf16.msra.mxu0 %v11655_v20 }
 0x40f   : > { %v6702_v43 = vunpack.c.l.b16 %v6622_v56  ;;  %v7010_v42 = vrot.slane %v7008_v62, 4  ;;  %v7110_v32 = vunpack.c.l.b16 %v7009_v57  ;;  %v7467_v37 = vrot.slane %v7465_v10, 5  ;;  %v5603_v57 = vld [vmem:[#allocation2 + $0xbc] sm:$0x3] }
 0x410   : > { %6182 = vmatmul.bf16.gmra.mxu3 %v6038_v47  ;;  %v16235_v31 = vshrl.u32 %v14080_v59, 16  ;;  %v6632_v2 = vsel %vm12040_vm7, %v6627_v54, %v6631_v4  ;;  %v16236_v25 = vshll.u32 %v14080_v59, 16  ;;  %v7479_v24 = vshrl.u32 %v7338_v11, 16  ;;  %v6148_v4 = vpop.f32.mrf.mxu3  ;;  %v14649_v54 = vpop.f32.mrf.mxu1 }
 0x411   : > { %v7012_v8 = vsel %vm12012_vm6, %v7010_v42, %v7011_v14  ;;  %v6703_v56 = vunpack.c.l.b16 %v6632_v2  ;;  %v7470_v62 = vrot.slane %v7468_v13, 6  ;;  %v7482_v47 = vshll.u32 %v7338_v11, 16  ;;  %v11646_v14 = vld [vmem:[#allocation3 + $0x180] sm:$0xff]  ;;  %v14651_v59 = vpop.f32.mrf.mxu0  ;;  %v6270_v11 = vld [vmem:[#allocation2 + $0xc0] sm:$0xf] }
 0x412   : > { %v7473_v29 = vrot.slane %v16235_v31, 5  ;;  %v7474_v21 = vrot.slane %v16236_v25, 6  ;;  %v7111_v9 = vunpack.c.l.b16 %v7012_v8  ;;  %v7481_v10 = vrot.slane %v7479_v24, 5  ;;  %v11761_v31 = vld [vmem:[#allocation2 + $0xb4] sm:$0xe]  ;;  %v11654_v42 = vld [vmem:[#allocation3 + $0x1c0] sm:$0xff]  ;;  %8536 = vmatpush.bf16.msra.mxu3 %v11646_v14 }
 0x413   : > { %v5953_v51 = vshrl.u32 %v11761_v31, 16  ;;  %v5956_v58 = vshll.u32 %v11761_v31, 16  ;;  %v6720_v25 = vpack.c.b16 %v6703_v56, %v6702_v43  ;;  %v7471_v8 = vor.u32 %v7470_v62, %v7467_v37  ;;  %8962 = vmatpush.bf16.msra.mxu0 %v11654_v42 }
 0x414   : > { %v7475_v30 = vor.u32 %v7474_v21, %v7473_v29  ;;  %v7137_v2 = vpack.c.b16 %v7111_v9, %v7110_v32  ;;  %v7484_v13 = vrot.slane %v7482_v47, 6  ;;  %v16237_v29 = vshrl.u32 %v14286_v60, 16  ;;  %v14657_v32 = vld [vmem:[#allocation2 + $0xc4] sm:$0xf]  ;;  %v14663_v47 = vpop.f32.mrf.mxu2 }
 0x415   : > { %v5955_v16 = vrot.slane %v5953_v51, 5  ;;  %v5958_v20 = vrot.slane %v5956_v58, 6  ;;  %6864 = vmatmul.bf16.gmra.mxu0 %v6720_v25  ;;  %v7472_v24 = vrot.slane %v7471_v8, 4  ;;  %v16238_v52 = vshll.u32 %v14286_v60, 16  ;;  %16239 = vst [vmem:[#allocation50_spill] sm:$0xff] %v14663_v47  ;;  %v11666_v60 = vld [vmem:[#allocation3 + $0x220] sm:$0xff] }
 0x416   : > { %v7477_v36 = vrot.slane %v7475_v30, 4  ;;  %v5961_v21 = vrot.slane %v16237_v29, 5  ;;  %7245 = vmatmul.bf16.gmra.mxu1 %v7137_v2  ;;  %v7485_v31 = vor.u32 %v7484_v13, %v7481_v10  ;;  %v5967_v15 = vshrl.u32 %v5603_v57, 16  ;;  %v6272_v2 = vld [vmem:[#allocation2 + $0xc8] sm:$0x1] }
 0x417   : > { %v5962_v45 = vrot.slane %v16238_v52, 6  ;;  %v5959_v33 = vor.u32 %v5958_v20, %v5955_v16  ;;  %v5970_v43 = vshll.u32 %v5603_v57, 16  ;;  %v6634_v37 = vshrl.u32 %v6270_v11, 16  ;;  %9592 = vmatpush.bf16.msra.mxu1 %v11666_v60  ;;  %v6913_v20 = vld [vmem:[#allocation2 + $0x54] sm:$0xe] }
 0x418   : > { %v6637_v56 = vshll.u32 %v6270_v11, 16  ;;  %v7476_v51 = vsel %vm13779_vm13, %v7472_v24, %v7475_v30  ;;  %v7486_v58 = vsel %vm13779_vm13, %v7477_v36, %v7485_v31  ;;  %v5969_v62 = vrot.slane %v5967_v15, 5 }
 0x419   : > { %v5963_v9 = vor.u32 %v5962_v45, %v5961_v21  ;;  %v7744_v52 = vunpack.c.l.b16 %v7476_v51  ;;  %v7745_v10 = vunpack.c.l.b16 %v7486_v58  ;;  %v5960_v57 = vrot.slane %v5959_v33, 4 }
 0x41a   : > { %v5972_v25 = vrot.slane %v5970_v43, 6  ;;  %v6636_v13 = vrot.slane %v6634_v37, 4  ;;  %v6639_v14 = vrot.slane %v6637_v56, 5  ;;  %v16015_v42 = vshll.u32 %v14657_v32, 16  ;;  %v14682_v43 = vpop.f32.mrf.mxu3  ;;  %v14684_v37 = vpop.f32.mrf.mxu1 }
 0x41b   : > { %v5965_v8 = vrot.slane %v5963_v9, 4  ;;  %v7771_v30 = vpack.c.b16 %v7745_v10, %v7744_v52  ;;  %v5964_v36 = vsel %vm13779_vm13, %v5960_v57, %v5963_v9  ;;  %v16016_v15 = vshrl.u32 %v14657_v32, 16  ;;  %16240 = vst [vmem:[#allocation51_spill] sm:$0xff] %v14682_v43  ;;  %v14686_v56 = vpop.f32.mrf.mxu0  ;;  %v11762_v52 = vld [vmem:[#allocation2 + $0x58] sm:$0xf] }
 0x41c   : > { %v5973_v45 = vor.u32 %v5972_v25, %v5969_v62  ;;  %v6640_v11 = vor.u32 %v6639_v14, %v6636_v13  ;;  %v6645_v16 = vrot.slane %v16015_v42, 5  ;;  %v6653_v33 = vshll.u32 %v6272_v2, 16  ;;  %16241 = vst [vmem:[#allocation52_spill] sm:$0xff] %v14684_v37  ;;  %v11763_v57 = vld [vmem:[#allocation2 + $0x5c] sm:$0x1] }
 0x41d   : > { %7879 = vmatmul.bf16.gmra.mxu2 %v7771_v30  ;;  %v6649_v21 = vrot.slane %v16016_v15, 4  ;;  %v14677_v24 = vadd.f32 %v14637_v1, %v14595_v46  ;;  %v14680_v31 = vadd.f32 %v6148_v4, %v14353_v40  ;;  %16242 = vst [vmem:[#allocation53_spill] sm:$0xff] %v14686_v56  ;;  %v6022_v51 = vunpack.c.l.b16 %v5964_v36  ;;  %v7339_v4 = vld [vmem:[#allocation2 + $0x5c] sm:$0x3]  ;;  %v8650_v37 = vld [vmem:[#allocation2 + $0x18] sm:$0xe] }
 0x41e   : > { %v5974_v29 = vsel %vm13779_vm13, %v5965_v8, %v5973_v45  ;;  %v6641_v9 = vrot.slane %v6640_v11, 4  ;;  %v11295_v60 = vrot.slane %v6913_v20, 9  ;;  %v7015_v10 = vrot.slane %v11762_v52, 5 }
 0x41f   : > { %v6023_v58 = vunpack.c.l.b16 %v5974_v29  ;;  %v6650_v62 = vor.u32 %v6649_v21, %v6645_v16  ;;  %v7018_v25 = vrot.slane %v11763_v57, 5  ;;  %v6655_v1 = vrot.slane %v6653_v33, 5 }
 0x420   : > { %v6646_v40 = vsel %vm12040_vm7, %v6641_v9, %v6645_v16  ;;  %v7488_v2 = vshrl.u32 %v6913_v20, 16  ;;  %v7016_v14 = vsel %vm12012_vm6, %v11295_v60, %v7015_v10  ;;  %v7017_v30 = vrot.slane %v7015_v10, 4 }
 0x421   : > { %v6039_v46 = vpack.c.b16 %v6023_v58, %v6022_v51  ;;  %v6651_v8 = vrot.slane %v6650_v62, 4  ;;  %v6704_v13 = vunpack.c.l.b16 %v6646_v40  ;;  %v7112_v36 = vunpack.c.l.b16 %v7016_v14  ;;  %v7968_v51 = vld [vmem:[#allocation2 + $0x18] sm:$0xf]  ;;  %v5578_v58 = vpop.f32.mrf.mxu2 }
 0x422   : > { %v7490_v45 = vrot.slane %v7488_v2, 5  ;;  %v7491_v11 = vshll.u32 %v6913_v20, 16  ;;  %v16243_v29 = vshrl.u32 %v14145_v0, 16  ;;  %v7019_v33 = vsel %vm12012_vm6, %v7017_v30, %v7018_v25  ;;  %v14700_v20 = vld [vmem:[#allocation2 + $0x1c] sm:$0xf] }
 0x423   : > { %6187 = vmatmul.bf16.gmra.mxu3 %v6039_v46  ;;  %v6656_v16 = vsel %vm12040_vm7, %v6651_v8, %v6655_v1  ;;  %v16244_v9 = vshll.u32 %v14145_v0, 16  ;;  %v7502_v60 = vshrl.u32 %v7339_v4, 16  ;;  %v7113_v10 = vunpack.c.l.b16 %v7019_v33  ;;  %v7970_v30 = vld [vmem:[#allocation2 + $0x20] sm:$0x1] }
 0x424   : > { %v7496_v21 = vrot.slane %v16243_v29, 5  ;;  %v6705_v52 = vunpack.c.l.b16 %v6656_v16  ;;  %v7493_v57 = vrot.slane %v7491_v11, 6  ;;  %v7505_v46 = vshll.u32 %v7339_v4, 16  ;;  %v6153_v33 = vpop.f32.mrf.mxu3  ;;  %v14703_v11 = vpop.f32.mrf.mxu1 }
 0x425   : > { %v7497_v62 = vrot.slane %v16244_v9, 6  ;;  %v7504_v2 = vrot.slane %v7502_v60, 5  ;;  %v8017_v14 = vshrl.u32 %v7968_v51, 16  ;;  %v8020_v29 = vshll.u32 %v7968_v51, 16  ;;  %v14705_v4 = vpop.f32.mrf.mxu0 }
 0x426   : > { %v6721_v42 = vpack.c.b16 %v6705_v52, %v6704_v13  ;;  %v7138_v15 = vpack.c.b16 %v7113_v10, %v7112_v36  ;;  %v7494_v1 = vor.u32 %v7493_v57, %v7490_v45  ;;  %v7507_v8 = vrot.slane %v7505_v46, 6 }
 0x427   : > { %v7498_v40 = vor.u32 %v7497_v62, %v7496_v21  ;;  %v8019_v0 = vrot.slane %v8017_v14, 4  ;;  %v8022_v9 = vrot.slane %v8020_v29, 5  ;;  %v16017_v16 = vshll.u32 %v14700_v20, 16 }
 0x428   : > { %6869 = vmatmul.bf16.gmra.mxu0 %v6721_v42  ;;  %7250 = vmatmul.bf16.gmra.mxu1 %v7138_v15  ;;  %v7495_v21 = vrot.slane %v7494_v1, 4  ;;  %v7508_v51 = vor.u32 %v7507_v8, %v7504_v2  ;;  %v16018_v13 = vshrl.u32 %v14700_v20, 16  ;;  %v11401_v62 = vrot.slane %v8650_v37, 9 }
 0x429   : > { %v7500_v25 = vrot.slane %v7498_v40, 4  ;;  %v8023_v36 = vor.u32 %v8022_v9, %v8019_v0  ;;  %v8028_v45 = vrot.slane %v16017_v16, 5  ;;  %v8716_v60 = vrot.slane %v14700_v20, 5  ;;  %v14719_v8 = vpop.f32.mrf.mxu2  ;;  %v6914_v0 = vld [vmem:[#allocation2 + $0x60] sm:$0xe] }
 0x42a   : > { %v7499_v52 = vsel %vm13779_vm13, %v7495_v21, %v7498_v40  ;;  %v8032_v42 = vrot.slane %v16018_v13, 4  ;;  %v8036_v15 = vshll.u32 %v7970_v30, 16  ;;  %v8719_v1 = vrot.slane %v7970_v30, 5  ;;  %16245 = vst [vmem:[#allocation54_spill] sm:$0xff] %v14719_v8 }
 0x42b   : > { %v7509_v10 = vsel %vm13779_vm13, %v7500_v25, %v7508_v51  ;;  %v7746_v57 = vunpack.c.l.b16 %v7499_v52  ;;  %v8024_v2 = vrot.slane %v8023_v36, 4  ;;  %v8717_v14 = vsel %vm12012_vm6, %v11401_v62, %v8716_v60 }
 0x42c   : > { %v7747_v46 = vunpack.c.l.b16 %v7509_v10  ;;  %v8033_v29 = vor.u32 %v8032_v42, %v8028_v45  ;;  %v8718_v37 = vrot.slane %v8716_v60, 4  ;;  %v14724_v9 = vadd.f32 %v5578_v58, %v14649_v54  ;;  %v11764_v10 = vld [vmem:[#allocation2 + $0x64] sm:$0xf]  ;;  %v14733_v54 = vpop.f32.mrf.mxu1 }
 0x42d   : > { %v8029_v25 = vsel %vm12040_vm7, %v8024_v2, %v8028_v45  ;;  %v14727_v21 = vadd.f32 %v6153_v33, %v14403_v35  ;;  %v8038_v36 = vrot.slane %v8036_v15, 5  ;;  %v8843_v60 = vunpack.c.l.b16 %v8717_v14  ;;  %v14731_v45 = vpop.f32.mrf.mxu3  ;;  %v7340_v33 = vld [vmem:[#allocation2 + $0x68] sm:$0x3] }
 0x42e   : > { %v7772_v40 = vpack.c.b16 %v7747_v46, %v7746_v57  ;;  %v8034_v51 = vrot.slane %v8033_v29, 4  ;;  %v8720_v62 = vsel %vm12012_vm6, %v8718_v37, %v8719_v1  ;;  %v11296_v52 = vrot.slane %v6914_v0, 9  ;;  %v11765_v57 = vld [vmem:[#allocation2 + $0x68] sm:$0x1]  ;;  %16246 = vst [vmem:[#allocation55_spill] sm:$0xff] %v14731_v45 }
 0x42f   : > { %v8844_v30 = vunpack.c.l.b16 %v8720_v62  ;;  %v7022_v42 = vrot.slane %v11764_v10, 5  ;;  %v7025_v46 = vrot.slane %v11765_v57, 5  ;;  %v8417_v58 = vunpack.c.l.b16 %v8029_v25  ;;  %v14739_v62 = vpop.f32.mrf.mxu0 }
 0x430   : > { %7884 = vmatmul.bf16.gmra.mxu2 %v7772_v40  ;;  %v8039_v35 = vsel %vm12040_vm7, %v8034_v51, %v8038_v36  ;;  %v7511_v15 = vshrl.u32 %v6914_v0, 16  ;;  %v7514_v2 = vshll.u32 %v6914_v0, 16  ;;  %v7971_v40 = vld [vmem:[#allocation2 + $0x24] sm:$0xf]  ;;  %16247 = vst [vmem:[#allocation56_spill] sm:$0xff] %v14739_v62  ;;  %v16248_v13 = vshrl.u32 %v14210_v22, 16 }
 0x431   : > { %v8418_v29 = vunpack.c.l.b16 %v8039_v35  ;;  %v8875_v14 = vpack.c.b16 %v8844_v30, %v8843_v60  ;;  %v7023_v37 = vsel %vm12012_vm6, %v11296_v52, %v7022_v42  ;;  %v7024_v1 = vrot.slane %v7022_v42, 4  ;;  %v14743_v51 = vld [vmem:[#allocation2 + $0x28] sm:$0xf] }
 0x432   : > { %v7114_v10 = vunpack.c.l.b16 %v7023_v37  ;;  %v7513_v57 = vrot.slane %v7511_v15, 5  ;;  %v7516_v16 = vrot.slane %v7514_v2, 6  ;;  %v7519_v8 = vrot.slane %v16248_v13, 5  ;;  %16249 = vst [vmem:[#allocation57_spill] sm:$0xff] %v14743_v51 }
 0x433   : > { %v8449_v25 = vpack.c.b16 %v8418_v29, %v8417_v58  ;;  %v7026_v0 = vsel %vm12012_vm6, %v7024_v1, %v7025_v46  ;;  %v16250_v36 = vshll.u32 %v14210_v22, 16  ;;  %v7525_v30 = vshrl.u32 %v7340_v33, 16  ;;  %v7973_v29 = vld [vmem:[#allocation2 + $0x2c] sm:$0x1]  ;;  %v5583_v46 = vpop.f32.mrf.mxu2 }
 0x434   : > { %v7115_v52 = vunpack.c.l.b16 %v7026_v0  ;;  %v7517_v42 = vor.u32 %v7516_v16, %v7513_v57  ;;  %v7528_v35 = vshll.u32 %v7340_v33, 16  ;;  %v8041_v47 = vshrl.u32 %v7971_v40, 16 }
 0x435   : > { %v7520_v60 = vrot.slane %v16250_v36, 6  ;;  %8537 = vmatmul.bf16.vlgmr.msra.gmra.mxu3 %v8449_v25  ;;  %v7527_v2 = vrot.slane %v7525_v30, 5  ;;  %v8044_v37 = vshll.u32 %v7971_v40, 16  ;;  %v16019_v13 = vshll.u32 %v14743_v51, 16  ;;  %v6158_v40 = vpop.f32.mrf.mxu3  ;;  %v8651_v36 = vld [vmem:[#allocation2 + $0x24] sm:$0xe] }
 0x436   : > { %v7139_v45 = vpack.c.b16 %v7115_v52, %v7114_v10  ;;  %v7518_v43 = vrot.slane %v7517_v42, 4  ;;  %v7530_v58 = vrot.slane %v7528_v35, 6  ;;  %v8043_v62 = vrot.slane %v8041_v47, 4  ;;  %v11665_v10 = vld [vmem:[#allocation3 + $0x218] sm:$0xff]  ;;  %v7221_v30 = vpop.f32.mrf.mxu1 }
 0x437   : > { %v7521_v15 = vor.u32 %v7520_v60, %v7519_v8  ;;  %v8046_v22 = vrot.slane %v8044_v37, 5  ;;  %v8052_v0 = vrot.slane %v16019_v13, 5  ;;  %v16020_v16 = vshrl.u32 %v14743_v51, 16  ;;  %9593 = vmatpush.bf16.msra.mxu1 %v11665_v10 }
 0x438   : > { %8963 = vmatmul.bf16.vlgmr.msra.gmra.mxu0 %v8875_v14  ;;  %7255 = vmatmul.bf16.gmra.mxu1 %v7139_v45  ;;  %v7531_v33 = vor.u32 %v7530_v58, %v7527_v2  ;;  %v8060_v25 = vshll.u32 %v7973_v29, 16  ;;  %v8723_v60 = vrot.slane %v14743_v51, 5  ;;  %v8726_v14 = vrot.slane %v7973_v29, 5 }
 0x439   : > { %v7523_v1 = vrot.slane %v7521_v15, 4  ;;  %v7522_v8 = vsel %vm13779_vm13, %v7518_v43, %v7521_v15  ;;  %v8047_v57 = vor.u32 %v8046_v22, %v8043_v62  ;;  %v8056_v47 = vrot.slane %v16020_v16, 4  ;;  %v14763_v15 = vpop.f32.mrf.mxu0 }
 0x43a   : > { %v14761_v45 = vadd.f32 %v5583_v46, %v14703_v11  ;;  %v7748_v43 = vunpack.c.l.b16 %v7522_v8  ;;  %v11402_v2 = vrot.slane %v8651_v36, 9  ;;  %v8725_v37 = vrot.slane %v8723_v60, 4 }
 0x43b   : > { %v7532_v52 = vsel %vm13779_vm13, %v7523_v1, %v7531_v33  ;;  %v8048_v35 = vrot.slane %v8047_v57, 4  ;;  %v8057_v62 = vor.u32 %v8056_v47, %v8052_v0  ;;  %v14766_v58 = vadd.f32 %v6158_v40, %v14463_v23  ;;  %v6915_v1 = vld [vmem:[#allocation2 + $0x6c] sm:$0xe]  ;;  %v5585_v23 = vpop.f32.mrf.mxu2  ;;  %v11766_v40 = vld [vmem:[#allocation2 + $0x70] sm:$0xf] }
 0x43c   : > { %v7749_v42 = vunpack.c.l.b16 %v7532_v52  ;;  %v6875_v22 = vadd.f32 %v14343_v3, %v14300_v41  ;;  %v8062_v8 = vrot.slane %v8060_v25, 5  ;;  %v8724_v33 = vsel %vm12012_vm6, %v11402_v2, %v8723_v60  ;;  %v11767_v25 = vld [vmem:[#allocation2 + $0x74] sm:$0x1] }
 0x43d   : > { %v8053_v11 = vsel %vm12040_vm7, %v8048_v35, %v8052_v0  ;;  %v8058_v46 = vrot.slane %v8057_v62, 4  ;;  %v8727_v10 = vsel %vm12012_vm6, %v8725_v37, %v8726_v14  ;;  %v7029_v47 = vrot.slane %v11766_v40, 5  ;;  %v14785_v2 = vpop.f32.mrf.mxu3 }
 0x43e   : > { %v7773_v29 = vpack.c.b16 %v7749_v42, %v7748_v43  ;;  %v14776_v57 = vadd.f32 %v7221_v30, %v6875_v22  ;;  %v14781_v3 = vadd.f32 %v5585_v23, %v14733_v54  ;;  %v11297_v0 = vrot.slane %v6915_v1, 9  ;;  %v7341_v42 = vld [vmem:[#allocation2 + $0x74] sm:$0x3]  ;;  %16251 = vst [vmem:[#allocation58_spill] sm:$0xff] %v14785_v2  ;;  %v14787_v22 = vpop.f32.mrf.mxu1  ;;  %v7974_v54 = vld [vmem:[#allocation2 + $0x30] sm:$0xf] }
 0x43f   : > { %v8063_v41 = vsel %vm12040_vm7, %v8058_v46, %v8062_v8  ;;  %v7032_v36 = vrot.slane %v11767_v25, 5  ;;  %v8419_v52 = vunpack.c.l.b16 %v8053_v11  ;;  %v7031_v43 = vrot.slane %v7029_v47, 4 }
 0x440   : > { %7889 = vmatmul.bf16.gmra.mxu2 %v7773_v29  ;;  %v8420_v60 = vunpack.c.l.b16 %v8063_v41  ;;  %v7534_v14 = vshrl.u32 %v6915_v1, 16  ;;  %v8845_v30 = vunpack.c.l.b16 %v8724_v33  ;;  %v8846_v35 = vunpack.c.l.b16 %v8727_v10 }
 0x441   : > { %v7030_v62 = vsel %vm12012_vm6, %v11297_v0, %v7029_v47  ;;  %v7537_v37 = vshll.u32 %v6915_v1, 16  ;;  %v7033_v46 = vsel %vm12012_vm6, %v7031_v43, %v7032_v36  ;;  %v16252_v8 = vshrl.u32 %v14272_v55, 16  ;;  %v14795_v1 = vld [vmem:[#allocation2 + $0x34] sm:$0xf]  ;;  %v14797_v2 = vpop.f32.mrf.mxu0 }
 0x442   : > { %v8450_v29 = vpack.c.b16 %v8420_v60, %v8419_v52  ;;  %v7536_v11 = vrot.slane %v7534_v14, 5  ;;  %v7117_v40 = vunpack.c.l.b16 %v7033_v46  ;;  %v16253_v10 = vshll.u32 %v14272_v55, 16  ;;  %16254 = vst [vmem:[#allocation59_spill] sm:$0xff] %v14795_v1  ;;  %v7976_v14 = vld [vmem:[#allocation2 + $0x38] sm:$0x1] }
 0x443   : > { %v7542_v23 = vrot.slane %v16252_v8, 5  ;;  %v7539_v33 = vrot.slane %v7537_v37, 6  ;;  %v7548_v47 = vshrl.u32 %v7341_v42, 16  ;;  %v7116_v0 = vunpack.c.l.b16 %v7030_v62  ;;  %16255 = vst [vmem:[#allocation60_spill] sm:$0xff] %v14797_v2 }
 0x444   : > { %v7543_v41 = vrot.slane %v16253_v10, 6  ;;  %v7551_v25 = vshll.u32 %v7341_v42, 16  ;;  %v8065_v13 = vshrl.u32 %v7974_v54, 16  ;;  %v8068_v16 = vshll.u32 %v7974_v54, 16  ;;  %v7855_v10 = vpop.f32.mrf.mxu2  ;;  %v8652_v54 = vld [vmem:[#allocation2 + $0x30] sm:$0xe] }
 0x445   : > { %8542 = vmatmul.bf16.gmra.mxu3 %v8450_v29  ;;  %v8876_v52 = vpack.c.b16 %v8846_v35, %v8845_v30  ;;  %v7540_v60 = vor.u32 %v7539_v33, %v7536_v11  ;;  %v7550_v43 = vrot.slane %v7548_v47, 5  ;;  %v7140_v46 = vpack.c.b16 %v7117_v40, %v7116_v0 }
 0x446   : > { %v7544_v36 = vor.u32 %v7543_v41, %v7542_v23  ;;  %v7553_v37 = vrot.slane %v7551_v25, 6  ;;  %v8067_v8 = vrot.slane %v8065_v13, 4  ;;  %v8070_v55 = vrot.slane %v8068_v16, 5 }
 0x447   : > { %v7541_v56 = vrot.slane %v7540_v60, 4  ;;  %v16023_v42 = vshll.u32 %v14795_v1, 16  ;;  %v16024_v51 = vshrl.u32 %v14795_v1, 16  ;;  %v8084_v29 = vshll.u32 %v7976_v14, 16 }
 0x448   : > { %v7546_v62 = vrot.slane %v7544_v36, 4  ;;  %8968 = vmatmul.bf16.gmra.mxu0 %v8876_v52  ;;  %7260 = vmatmul.bf16.gmra.mxu1 %v7140_v46  ;;  %v7554_v30 = vor.u32 %v7553_v37, %v7550_v43  ;;  %v8071_v35 = vor.u32 %v8070_v55, %v8067_v8  ;;  %v8730_v23 = vrot.slane %v14795_v1, 5  ;;  %v6916_v8 = vld [vmem:[#allocation2 + $0x78] sm:$0xe] }
 0x449   : > { %v7545_v11 = vsel %vm13779_vm13, %v7541_v56, %v7544_v36  ;;  %v8076_v13 = vrot.slane %v16023_v42, 5  ;;  %v8080_v16 = vrot.slane %v16024_v51, 4  ;;  %v11403_v41 = vrot.slane %v8652_v54, 9  ;;  %v6163_v60 = vpop.f32.mrf.mxu3  ;;  %v7226_v43 = vpop.f32.mrf.mxu1 }
 0x44a   : > { %v7555_v40 = vsel %vm13779_vm13, %v7546_v62, %v7554_v30  ;;  %v7750_v33 = vunpack.c.l.b16 %v7545_v11  ;;  %v8072_v0 = vrot.slane %v8071_v35, 4  ;;  %v8732_v52 = vrot.slane %v8730_v23, 4 }
 0x44b   : > { %v7751_v47 = vunpack.c.l.b16 %v7555_v40  ;;  %v8081_v25 = vor.u32 %v8080_v16, %v8076_v13  ;;  %v8086_v56 = vrot.slane %v8084_v29, 5  ;;  %v8731_v36 = vsel %vm12012_vm6, %v11403_v41, %v8730_v23  ;;  %v11769_v23 = vld [vmem:[#allocation2 + $0x80] sm:$0x1] }
 0x44c   : > { %v8733_v46 = vrot.slane %v7976_v14, 5  ;;  %v14813_v37 = vadd.f32 %v7855_v10, %v14776_v57  ;;  %v8077_v62 = vsel %vm12040_vm7, %v8072_v0, %v8076_v13  ;;  %v14818_v30 = vadd.f32 %v6163_v60, %v14519_v28  ;;  %v14824_v11 = vpop.f32.mrf.mxu2  ;;  %v11768_v14 = vld [vmem:[#allocation2 + $0x7c] sm:$0xf]  ;;  %v14828_v28 = vpop.f32.mrf.mxu0 }
 0x44d   : > { %v7774_v55 = vpack.c.b16 %v7751_v47, %v7750_v33  ;;  %v8082_v54 = vrot.slane %v8081_v25, 4  ;;  %v6877_v29 = vadd.f32 %v14417_v18, %v14357_v39  ;;  %v7036_v57 = vrot.slane %v11768_v14, 5  ;;  %v7342_v25 = vld [vmem:[#allocation2 + $0x80] sm:$0x3]  ;;  %v7977_v14 = vld [vmem:[#allocation2 + $0x3c] sm:$0xf] }
 0x44e   : > { %v8734_v35 = vsel %vm12012_vm6, %v8732_v52, %v8733_v46  ;;  %v8847_v16 = vunpack.c.l.b16 %v8731_v36  ;;  %v11298_v13 = vrot.slane %v6916_v8, 9  ;;  %v7039_v40 = vrot.slane %v11769_v23, 5 }
 0x44f   : > { %v8087_v10 = vsel %vm12040_vm7, %v8082_v54, %v8086_v56  ;;  %v8421_v33 = vunpack.c.l.b16 %v8077_v62  ;;  %v7303_v47 = vadd.f32 %v7226_v43, %v6877_v29  ;;  %v7038_v0 = vrot.slane %v7036_v57, 4 }
 0x450   : > { %7894 = vmatmul.bf16.gmra.mxu2 %v7774_v55  ;;  %v8422_v41 = vunpack.c.l.b16 %v8087_v10  ;;  %v8848_v39 = vunpack.c.l.b16 %v8734_v35  ;;  %v7037_v18 = vsel %vm12012_vm6, %v11298_v13, %v7036_v57  ;;  %v7557_v52 = vshrl.u32 %v6916_v8, 16 }
 0x451   : > { %v7560_v60 = vshll.u32 %v6916_v8, 16  ;;  %v7040_v56 = vsel %vm12012_vm6, %v7038_v0, %v7039_v40  ;;  %v16256_v36 = vshrl.u32 %v14327_v26, 16  ;;  %v16257_v54 = vshll.u32 %v14327_v26, 16  ;;  %v14838_v29 = vpop.f32.mrf.mxu3  ;;  %v7979_v26 = vld [vmem:[#allocation2 + $0x44] sm:$0x1] }
 0x452   : > { %v8451_v46 = vpack.c.b16 %v8422_v41, %v8421_v33  ;;  %v7119_v43 = vunpack.c.l.b16 %v7040_v56  ;;  %16258 = vst [vmem:[#allocation61_spill] sm:$0xff] %v14838_v29  ;;  %v7559_v35 = vrot.slane %v7557_v52, 5  ;;  %v7571_v23 = vshrl.u32 %v7342_v25, 16  ;;  %v14840_v33 = vpop.f32.mrf.mxu1  ;;  %v14842_v41 = vld [vmem:[#allocation2 + $0x40] sm:$0xf] }
 0x453   : > { %v7565_v55 = vrot.slane %v16256_v36, 5  ;;  %v7566_v62 = vrot.slane %v16257_v54, 6  ;;  %v7562_v10 = vrot.slane %v7560_v60, 6  ;;  %v7118_v57 = vunpack.c.l.b16 %v7037_v18  ;;  %16259 = vst [vmem:[#allocation62_spill] sm:$0xff] %v14842_v41 }
 0x454   : > { %v7574_v8 = vshll.u32 %v7342_v25, 16  ;;  %v8877_v40 = vpack.c.b16 %v8848_v39, %v8847_v16  ;;  %v7573_v36 = vrot.slane %v7571_v23, 5  ;;  %v8089_v54 = vshrl.u32 %v7977_v14, 16 }
 0x455   : > { %v7567_v13 = vor.u32 %v7566_v62, %v7565_v55  ;;  %8547 = vmatmul.bf16.gmra.mxu3 %v8451_v46  ;;  %v7563_v0 = vor.u32 %v7562_v10, %v7559_v35  ;;  %v7141_v42 = vpack.c.b16 %v7119_v43, %v7118_v57  ;;  %v8092_v29 = vshll.u32 %v7977_v14, 16  ;;  %v8653_v55 = vld [vmem:[#allocation2 + $0x3c] sm:$0xe]  ;;  %v11664_v35 = vld [vmem:[#allocation3 + $0x210] sm:$0xff]  ;;  %v14853_v57 = vpop.f32.mrf.mxu0 }
 0x456   : > { %v7576_v51 = vrot.slane %v7574_v8, 6  ;;  %v8091_v60 = vrot.slane %v8089_v54, 4  ;;  %v16025_v18 = vshll.u32 %v14842_v41, 16  ;;  %v16026_v25 = vshrl.u32 %v14842_v41, 16  ;;  %v7860_v39 = vpop.f32.mrf.mxu2  ;;  %16260 = vst [vmem:[#allocation63_spill] sm:$0xff] %v14853_v57  ;;  %9594 = vmatpush.bf16.msra.mxu1 %v11664_v35 }
 0x457   : > { %v7569_v56 = vrot.slane %v7567_v13, 4  ;;  %v7564_v52 = vrot.slane %v7563_v0, 4  ;;  %v8094_v46 = vrot.slane %v8092_v29, 5  ;;  %v8108_v16 = vshll.u32 %v7979_v26, 16 }
 0x458   : > { %8973 = vmatmul.bf16.gmra.mxu0 %v8877_v40  ;;  %7265 = vmatmul.bf16.gmra.mxu1 %v7141_v42  ;;  %v7577_v62 = vor.u32 %v7576_v51, %v7573_v36  ;;  %v8100_v14 = vrot.slane %v16025_v18, 5  ;;  %v8104_v10 = vrot.slane %v16026_v25, 4  ;;  %v8737_v23 = vrot.slane %v14842_v41, 5  ;;  %v6917_v25 = vld [vmem:[#allocation2 + $0x84] sm:$0xe] }
 0x459   : > { %v7568_v43 = vsel %vm13779_vm13, %v7564_v52, %v7567_v13  ;;  %v8095_v42 = vor.u32 %v8094_v46, %v8091_v60  ;;  %v11404_v29 = vrot.slane %v8653_v55, 9  ;;  %v8110_v54 = vrot.slane %v8108_v16, 5 }
 0x45a   : > { %v7578_v51 = vsel %vm13779_vm13, %v7569_v56, %v7577_v62  ;;  %v7752_v8 = vunpack.c.l.b16 %v7568_v43  ;;  %v8105_v0 = vor.u32 %v8104_v10, %v8100_v14  ;;  %v8739_v13 = vrot.slane %v8737_v23, 4  ;;  %v11770_v62 = vld [vmem:[#allocation2 + $0x88] sm:$0xf]  ;;  %v11771_v10 = vld [vmem:[#allocation2 + $0x8c] sm:$0x1] }
 0x45b   : > { %v7753_v40 = vunpack.c.l.b16 %v7578_v51  ;;  %v8096_v36 = vrot.slane %v8095_v42, 4  ;;  %v8740_v52 = vrot.slane %v7979_v26, 5  ;;  %v14857_v18 = vadd.f32 %v7860_v39, %v7303_v47  ;;  %v7231_v47 = vpop.f32.mrf.mxu1  ;;  %v7343_v51 = vld [vmem:[#allocation2 + $0x8c] sm:$0x3] }
 0x45c   : > { %v8106_v41 = vrot.slane %v8105_v0, 4  ;;  %v8738_v57 = vsel %vm12012_vm6, %v11404_v29, %v8737_v23  ;;  %v6168_v1 = vpop.f32.mrf.mxu3  ;;  %v6879_v56 = vadd.f32 %v14473_v19, %v14411_v44  ;;  %v7043_v46 = vrot.slane %v11770_v62, 5  ;;  %v7980_v29 = vld [vmem:[#allocation2 + $0x48] sm:$0xf] }
 0x45d   : > { %v7775_v2 = vpack.c.b16 %v7753_v40, %v7752_v8  ;;  %v8101_v60 = vsel %vm12040_vm7, %v8096_v36, %v8100_v14  ;;  %v8741_v55 = vsel %vm12012_vm6, %v8739_v13, %v8740_v52  ;;  %v14868_v26 = vadd.f32 %v6168_v1, %v14573_v7 }
 0x45e   : > { %v8111_v16 = vsel %vm12040_vm7, %v8106_v41, %v8110_v54  ;;  %v14872_v39 = vadd.f32 %v7231_v47, %v6879_v56  ;;  %v11299_v35 = vrot.slane %v6917_v25, 9  ;;  %v8423_v44 = vunpack.c.l.b16 %v8101_v60  ;;  %v14874_v43 = vpop.f32.mrf.mxu2  ;;  %v14884_v60 = vpop.f32.mrf.mxu0 }
 0x45f   : > { %v8424_v19 = vunpack.c.l.b16 %v8111_v16  ;;  %v7045_v14 = vrot.slane %v7043_v46, 4  ;;  %v7046_v23 = vrot.slane %v11771_v10, 5  ;;  %v8849_v7 = vunpack.c.l.b16 %v8738_v57 }
 0x460   : > { %7899 = vmatmul.bf16.gmra.mxu2 %v7775_v2  ;;  %v8850_v1 = vunpack.c.l.b16 %v8741_v55  ;;  %v7044_v42 = vsel %vm12012_vm6, %v11299_v35, %v7043_v46  ;;  %v7580_v2 = vshrl.u32 %v6917_v25, 16  ;;  %v7583_v40 = vshll.u32 %v6917_v25, 16  ;;  %v14886_v46 = vld [vmem:[#allocation2 + $0x4c] sm:$0xf] }
 0x461   : > { %v8452_v8 = vpack.c.b16 %v8424_v19, %v8423_v44  ;;  %v7047_v41 = vsel %vm12012_vm6, %v7045_v14, %v7046_v23  ;;  %v16261_v0 = vshrl.u32 %v14389_v50, 16  ;;  %v16262_v52 = vshll.u32 %v14389_v50, 16  ;;  %v7982_v14 = vld [vmem:[#allocation2 + $0x50] sm:$0x1] }
 0x462   : > { %v7121_v36 = vunpack.c.l.b16 %v7047_v41  ;;  %v7582_v54 = vrot.slane %v7580_v2, 5  ;;  %v7594_v57 = vshrl.u32 %v7343_v51, 16  ;;  %v7120_v55 = vunpack.c.l.b16 %v7044_v42  ;;  %v8654_v42 = vld [vmem:[#allocation2 + $0x48] sm:$0xe] }
 0x463   : > { %v7588_v13 = vrot.slane %v16261_v0, 5  ;;  %v7589_v56 = vrot.slane %v16262_v52, 6  ;;  %v7585_v47 = vrot.slane %v7583_v40, 6  ;;  %v7597_v62 = vshll.u32 %v7343_v51, 16  ;;  %v14890_v41 = vpop.f32.mrf.mxu1 }
 0x464   : > { %v8113_v16 = vshrl.u32 %v7980_v29, 16  ;;  %v8878_v35 = vpack.c.b16 %v8850_v1, %v8849_v7  ;;  %v14888_v25 = vpop.f32.mrf.mxu3  ;;  %v7596_v19 = vrot.slane %v7594_v57, 5  ;;  %v8116_v10 = vshll.u32 %v7980_v29, 16  ;;  %16264 = vst [vmem:[#allocation65_spill] sm:$0xff] %v14890_v41 }
 0x465   : > { %8552 = vmatmul.bf16.gmra.mxu3 %v8452_v8  ;;  %16263 = vst [vmem:[#allocation64_spill] sm:$0xff] %v14888_v25  ;;  %v7590_v44 = vor.u32 %v7589_v56, %v7588_v13  ;;  %v7142_v23 = vpack.c.b16 %v7121_v36, %v7120_v55  ;;  %v7586_v50 = vor.u32 %v7585_v47, %v7582_v54  ;;  %v7599_v2 = vrot.slane %v7597_v62, 6 }
 0x466   : > { %v8115_v0 = vrot.slane %v8113_v16, 4  ;;  %v8118_v51 = vrot.slane %v8116_v10, 5  ;;  %v16031_v52 = vshll.u32 %v14886_v46, 16  ;;  %v16032_v8 = vshrl.u32 %v14886_v46, 16 }
 0x467   : > { %v7592_v40 = vrot.slane %v7590_v44, 4  ;;  %v7587_v7 = vrot.slane %v7586_v50, 4  ;;  %v7600_v1 = vor.u32 %v7599_v2, %v7596_v19  ;;  %v8132_v13 = vshll.u32 %v7982_v14, 16 }
 0x468   : > { %8978 = vmatmul.bf16.gmra.mxu0 %v8878_v35  ;;  %7270 = vmatmul.bf16.gmra.mxu1 %v7142_v23  ;;  %v8119_v56 = vor.u32 %v8118_v51, %v8115_v0  ;;  %v8124_v29 = vrot.slane %v16031_v52, 5  ;;  %v11405_v36 = vrot.slane %v8654_v42, 9  ;;  %v8744_v54 = vrot.slane %v14886_v46, 5 }
 0x469   : > { %v5526_v57 = vadd.f32 %v14070_v12, %v14018_v6  ;;  %v7591_v55 = vsel %vm13779_vm13, %v7587_v7, %v7590_v44  ;;  %v7601_v47 = vsel %vm13779_vm13, %v7592_v40, %v7600_v1  ;;  %v8128_v62 = vrot.slane %v16032_v8, 4  ;;  %v7865_v16 = vpop.f32.mrf.mxu2  ;;  %v6918_v12 = vld [vmem:[#allocation2 + $0x90] sm:$0xe]  ;;  %v14912_v7 = vpop.f32.mrf.mxu0 }
 0x46a   : > { %v7754_v35 = vunpack.c.l.b16 %v7591_v55  ;;  %v7755_v19 = vunpack.c.l.b16 %v7601_v47  ;;  %v8120_v10 = vrot.slane %v8119_v56, 4  ;;  %v8745_v23 = vsel %vm12012_vm6, %v11405_v36, %v8744_v54  ;;  %16265 = vst [vmem:[#allocation66_spill] sm:$0xff] %v14912_v7  ;;  %v11772_v47 = vld [vmem:[#allocation2 + $0x94] sm:$0xf]  ;;  %v7985_v7 = vld [vmem:[#allocation2 + $0x5c] sm:$0x1] }
 0x46b   : > { %v8129_v50 = vor.u32 %v8128_v62, %v8124_v29  ;;  %v8134_v2 = vrot.slane %v8132_v13, 5  ;;  %v8746_v0 = vrot.slane %v8744_v54, 4  ;;  %v8747_v6 = vrot.slane %v7982_v14, 5 }
 0x46c   : > { %v7776_v42 = vpack.c.b16 %v7755_v19, %v7754_v35  ;;  %v8125_v44 = vsel %vm12040_vm7, %v8120_v10, %v8124_v29  ;;  %v8851_v40 = vunpack.c.l.b16 %v8745_v23  ;;  %v14910_v51 = vadd.f32 %v7865_v16, %v14872_v39  ;;  %v11773_v19 = vld [vmem:[#allocation2 + $0x98] sm:$0x1] }
 0x46d   : > { %v8130_v1 = vrot.slane %v8129_v50, 4  ;;  %v8425_v56 = vunpack.c.l.b16 %v8125_v44  ;;  %v8748_v36 = vsel %vm12012_vm6, %v8746_v0, %v8747_v6  ;;  %v6881_v13 = vadd.f32 %v14533_v53, %v14467_v63  ;;  %v7344_v23 = vld [vmem:[#allocation2 + $0x98] sm:$0x3]  ;;  %v16267_v44 = vld [vmem:[#allocation40_spill] sm:$0xff] }
 0x46e   : > { %v8852_v14 = vunpack.c.l.b16 %v8748_v36  ;;  %v6173_v54 = vpop.f32.mrf.mxu3  ;;  %v11300_v55 = vrot.slane %v6918_v12, 9  ;;  %v7050_v29 = vrot.slane %v11772_v47, 5  ;;  %v7603_v62 = vshrl.u32 %v6918_v12, 16  ;;  %v7236_v35 = vpop.f32.mrf.mxu1  ;;  %v7983_v47 = vld [vmem:[#allocation2 + $0x54] sm:$0xf] }
 0x46f   : > { %v8135_v39 = vsel %vm12040_vm7, %v8130_v1, %v8134_v2  ;;  %v14921_v16 = vadd.f32 %v6173_v54, %v14629_v48  ;;  %v7053_v10 = vrot.slane %v11773_v19, 5  ;;  %v7606_v50 = vshll.u32 %v6918_v12, 16 }
 0x470   : > { %7904 = vmatmul.bf16.gmra.mxu2 %v7776_v42  ;;  %v8426_v0 = vunpack.c.l.b16 %v8135_v39  ;;  %v14923_v63 = vadd.f32 %v7236_v35, %v6881_v13  ;;  %v7051_v53 = vsel %vm12012_vm6, %v11300_v55, %v7050_v29  ;;  %v16266_v6 = vshrl.u32 %v14443_v49, 16  ;;  %v14934_v35 = vld [vmem:[#allocation2 + $0x58] sm:$0xf] }
 0x471   : > { %v6200_v36 = vadd.f32 %v16267_v44, %v5526_v57  ;;  %v14930_v2 = vpop.f32.mrf.mxu2  ;;  %v7052_v48 = vrot.slane %v7050_v29, 4  ;;  %v7605_v1 = vrot.slane %v7603_v62, 5  ;;  %v7608_v54 = vrot.slane %v7606_v50, 6 }
 0x472   : > { %v7611_v42 = vrot.slane %v16266_v6, 5  ;;  %16268 = vst [vmem:[#allocation40_spill] sm:$0xff] %v14930_v2  ;;  %v8453_v19 = vpack.c.b16 %v8426_v0, %v8425_v56  ;;  %v8879_v52 = vpack.c.b16 %v8852_v14, %v8851_v40  ;;  %v16269_v12 = vshll.u32 %v14443_v49, 16 }
 0x473   : > { %v7617_v39 = vshrl.u32 %v7344_v23, 16  ;;  %v7054_v55 = vsel %vm12012_vm6, %v7052_v48, %v7053_v10  ;;  %v7122_v6 = vunpack.c.l.b16 %v7051_v53  ;;  %v7609_v8 = vor.u32 %v7608_v54, %v7605_v1  ;;  %v14942_v53 = vpop.f32.mrf.mxu0  ;;  %v11663_v54 = vld [vmem:[#allocation3 + $0x208] sm:$0xff] }
 0x474   : > { %v7612_v13 = vrot.slane %v16269_v12, 6  ;;  %v7620_v57 = vshll.u32 %v7344_v23, 16  ;;  %v7123_v44 = vunpack.c.l.b16 %v7054_v55  ;;  %v8137_v50 = vshrl.u32 %v7983_v47, 16  ;;  %9595 = vmatpush.bf16.msra.mxu1 %v11663_v54 }
 0x475   : > { %8557 = vmatmul.bf16.gmra.mxu3 %v8453_v19  ;;  %v7619_v62 = vrot.slane %v7617_v39, 5  ;;  %v7610_v25 = vrot.slane %v7609_v8, 4  ;;  %v8140_v40 = vshll.u32 %v7983_v47, 16  ;;  %v16033_v49 = vshll.u32 %v14934_v35, 16  ;;  %v8655_v39 = vld [vmem:[#allocation2 + $0x54] sm:$0xe] }
 0x476   : > { %v7613_v29 = vor.u32 %v7612_v13, %v7611_v42  ;;  %v7622_v56 = vrot.slane %v7620_v57, 6  ;;  %v7143_v14 = vpack.c.b16 %v7123_v44, %v7122_v6  ;;  %v14939_v0 = vpop.f32.mrf.mxu3  ;;  %v8139_v2 = vrot.slane %v8137_v50, 4  ;;  %v7238_v48 = vpop.f32.mrf.mxu1  ;;  %v6919_v57 = vld [vmem:[#allocation2 + $0x9c] sm:$0xe] }
 0x477   : > { %16270 = vst [vmem:[#allocation67_spill] sm:$0xff] %v14939_v0  ;;  %v16034_v10 = vshrl.u32 %v14934_v35, 16  ;;  %v6882_v8 = vadd.f32 %v14559_v38, %v6200_v36  ;;  %v8142_v1 = vrot.slane %v8140_v40, 5  ;;  %v8148_v19 = vrot.slane %v16033_v49, 5  ;;  %v7989_v0 = vld [vmem:[#allocation2 + $0x6c] sm:$0xf] }
 0x478   : > { %v7615_v12 = vrot.slane %v7613_v29, 4  ;;  %8983 = vmatmul.bf16.gmra.mxu0 %v8879_v52  ;;  %v7614_v23 = vsel %vm13779_vm13, %v7610_v25, %v7613_v29  ;;  %v7623_v42 = vor.u32 %v7622_v56, %v7619_v62  ;;  %7275 = vmatmul.bf16.gmra.mxu1 %v7143_v14  ;;  %v8156_v6 = vshll.u32 %v7985_v7, 16 }
 0x479   : > { %v7756_v47 = vunpack.c.l.b16 %v7614_v23  ;;  %v8152_v13 = vrot.slane %v16034_v10, 4  ;;  %v7308_v55 = vadd.f32 %v7238_v48, %v6882_v8  ;;  %v8143_v25 = vor.u32 %v8142_v1, %v8139_v2 }
 0x47a   : > { %v7624_v52 = vsel %vm13779_vm13, %v7615_v12, %v7623_v42  ;;  %v8751_v44 = vrot.slane %v14934_v35, 5  ;;  %v8754_v29 = vrot.slane %v7985_v7, 5  ;;  %v8158_v50 = vrot.slane %v8156_v6, 5  ;;  %v11774_v7 = vld [vmem:[#allocation2 + $0xa0] sm:$0xf] }
 0x47b   : > { %v7757_v38 = vunpack.c.l.b16 %v7624_v52  ;;  %v8153_v36 = vor.u32 %v8152_v13, %v8148_v19  ;;  %v8144_v62 = vrot.slane %v8143_v25, 4  ;;  %v11406_v56 = vrot.slane %v8655_v39, 9  ;;  %v7870_v40 = vpop.f32.mrf.mxu2 }
 0x47c   : > { %v6883_v14 = vadd.f32 %v14597_v61, %v14523_v27  ;;  %v8753_v12 = vrot.slane %v8751_v44, 4  ;;  %v11301_v42 = vrot.slane %v6919_v57, 9  ;;  %v14961_v48 = vadd.f32 %v7870_v40, %v14923_v63 }
 0x47d   : > { %v7777_v23 = vpack.c.b16 %v7757_v38, %v7756_v47  ;;  %v8154_v49 = vrot.slane %v8153_v36, 4  ;;  %v8149_v2 = vsel %vm12040_vm7, %v8144_v62, %v8148_v19  ;;  %v8752_v8 = vsel %vm12012_vm6, %v11406_v56, %v8751_v44  ;;  %v11775_v47 = vld [vmem:[#allocation2 + $0xa4] sm:$0x1]  ;;  %v14969_v56 = vpop.f32.mrf.mxu0 }
 0x47e   : > { %v7057_v1 = vrot.slane %v11774_v7, 5  ;;  %v8427_v27 = vunpack.c.l.b16 %v8149_v2  ;;  %v8755_v61 = vsel %vm12012_vm6, %v8753_v12, %v8754_v29  ;;  %v7060_v13 = vrot.slane %v11775_v47, 5  ;;  %v7345_v36 = vld [vmem:[#allocation2 + $0xa4] sm:$0x3]  ;;  %16271 = vst [vmem:[#allocation68_spill] sm:$0xff] %v14969_v56 }
 0x47f   : > { %v8159_v54 = vsel %vm12040_vm7, %v8154_v49, %v8158_v50  ;;  %v8854_v19 = vunpack.c.l.b16 %v8755_v61  ;;  %v8853_v63 = vunpack.c.l.b16 %v8752_v8  ;;  %v7626_v44 = vshrl.u32 %v6919_v57, 16  ;;  %v7986_v2 = vld [vmem:[#allocation2 + $0x60] sm:$0xf] }
 0x480   : > { %7909 = vmatmul.bf16.gmra.mxu2 %v7777_v23  ;;  %v8428_v39 = vunpack.c.l.b16 %v8159_v54  ;;  %v7058_v52 = vsel %vm12012_vm6, %v11301_v42, %v7057_v1  ;;  %v7059_v25 = vrot.slane %v7057_v1, 4  ;;  %v7629_v62 = vshll.u32 %v6919_v57, 16  ;;  %v16272_v23 = vld [vmem:[#allocation17_spill] sm:$0xff] }
 0x481   : > { %v6178_v6 = vpop.f32.mrf.mxu3  ;;  %v7124_v38 = vunpack.c.l.b16 %v7058_v52  ;;  %v7241_v29 = vpop.f32.mrf.mxu1  ;;  %v16273_v12 = vshrl.u32 %v16272_v23, 16  ;;  %v7628_v1 = vrot.slane %v7626_v44, 5  ;;  %v8880_v61 = vpack.c.b16 %v8854_v19, %v8853_v63  ;;  %v14980_v52 = vld [vmem:[#allocation2 + $0x64] sm:$0xf]  ;;  %v7988_v44 = vld [vmem:[#allocation2 + $0x68] sm:$0x1] }
 0x482   : > { %v8454_v49 = vpack.c.b16 %v8428_v39, %v8427_v27  ;;  %v14972_v50 = vadd.f32 %v6178_v6, %v14677_v24  ;;  %v7061_v40 = vsel %vm12012_vm6, %v7059_v25, %v7060_v13  ;;  %v7309_v8 = vadd.f32 %v7241_v29, %v6883_v14 }
 0x483   : > { %v7634_v42 = vrot.slane %v16273_v12, 5  ;;  %v7125_v7 = vunpack.c.l.b16 %v7061_v40  ;;  %v7631_v54 = vrot.slane %v7629_v62, 6  ;;  %v7872_v57 = vpop.f32.mrf.mxu2  ;;  %v16274_v47 = vshll.u32 %v16272_v23, 16 }
 0x484   : > { %v7640_v39 = vshrl.u32 %v7345_v36, 16  ;;  %v7643_v24 = vshll.u32 %v7345_v36, 16  ;;  %v14982_v6 = vadd.f32 %v7872_v57, %v7308_v55  ;;  %v8161_v12 = vshrl.u32 %v7986_v2, 16 }
 0x485   : > { %v7635_v27 = vrot.slane %v16274_v47, 6  ;;  %8562 = vmatmul.bf16.gmra.mxu3 %v8454_v49  ;;  %v7144_v13 = vpack.c.b16 %v7125_v7, %v7124_v38  ;;  %v7632_v25 = vor.u32 %v7631_v54, %v7628_v1  ;;  %v8164_v62 = vshll.u32 %v7986_v2, 16  ;;  %v8656_v1 = vld [vmem:[#allocation2 + $0x60] sm:$0xe] }
 0x486   : > { %16275 = vst [vmem:[#allocation17_spill] sm:$0xff] %v14982_v6  ;;  %v7642_v14 = vrot.slane %v7640_v39, 5  ;;  %v7645_v29 = vrot.slane %v7643_v24, 6  ;;  %v8163_v63 = vrot.slane %v8161_v12, 4  ;;  %v16035_v40 = vshll.u32 %v14980_v52, 16  ;;  %v16279_v39 = vld [vmem:[#allocation26_spill] sm:$0xff]  ;;  %v15002_v12 = vpop.f32.mrf.mxu0 }
 0x487   : > { %v7636_v10 = vor.u32 %v7635_v27, %v7634_v42  ;;  %v7633_v19 = vrot.slane %v7632_v25, 4  ;;  %v16036_v23 = vshrl.u32 %v14980_v52, 16  ;;  %v8166_v49 = vrot.slane %v8164_v62, 5  ;;  %v16278_v27 = vld [vmem:[#allocation24_spill] sm:$0xff] }
 0x488   : > { %8988 = vmatmul.bf16.gmra.mxu0 %v8880_v61  ;;  %v7646_v47 = vor.u32 %v7645_v29, %v7642_v14  ;;  %7280 = vmatmul.bf16.gmra.mxu1 %v7144_v13  ;;  %v8172_v42 = vrot.slane %v16035_v40, 5  ;;  %v8180_v7 = vshll.u32 %v7988_v44, 16  ;;  %v15000_v24 = vadd.f32 %v16279_v39, %v16278_v27  ;;  %v6920_v40 = vld [vmem:[#allocation2 + $0xa8] sm:$0xe]  ;;  %v11777_v27 = vld [vmem:[#allocation2 + $0xb0] sm:$0x1] }
 0x489   : > { %v7638_v36 = vrot.slane %v7636_v10, 4  ;;  %v14986_v55 = vpop.f32.mrf.mxu3  ;;  %v7637_v38 = vsel %vm13779_vm13, %v7633_v19, %v7636_v10  ;;  %v8176_v2 = vrot.slane %v16036_v23, 4  ;;  %v14996_v61 = vpop.f32.mrf.mxu1  ;;  %v8167_v57 = vor.u32 %v8166_v49, %v8163_v63  ;;  %v16281_v39 = vld [vmem:[#allocation22_spill] sm:$0xff] }
 0x48a   : > { %16276 = vst [vmem:[#allocation69_spill] sm:$0xff] %v14986_v55  ;;  %v7758_v13 = vunpack.c.l.b16 %v7637_v38  ;;  %v11407_v29 = vrot.slane %v8656_v1, 9  ;;  %v8758_v62 = vrot.slane %v14980_v52, 5  ;;  %v8761_v19 = vrot.slane %v7988_v44, 5  ;;  %v11776_v55 = vld [vmem:[#allocation2 + $0xac] sm:$0xf] }
 0x48b   : > { %v7647_v54 = vsel %vm13779_vm13, %v7638_v36, %v7646_v47  ;;  %16277 = vst [vmem:[#allocation70_spill] sm:$0xff] %v14996_v61  ;;  %v8177_v25 = vor.u32 %v8176_v2, %v8172_v42  ;;  %v8168_v14 = vrot.slane %v8167_v57, 4  ;;  %v8182_v47 = vrot.slane %v8180_v7, 5 }
 0x48c   : > { %v7759_v10 = vunpack.c.l.b16 %v7647_v54  ;;  %v7064_v63 = vrot.slane %v11776_v55, 5  ;;  %v8759_v38 = vsel %vm12012_vm6, %v11407_v29, %v8758_v62  ;;  %v8760_v2 = vrot.slane %v8758_v62, 4  ;;  %v7346_v62 = vld [vmem:[#allocation2 + $0xb0] sm:$0x3] }
 0x48d   : > { %v8178_v36 = vrot.slane %v8177_v25, 4  ;;  %v8173_v49 = vsel %vm12040_vm7, %v8168_v14, %v8172_v42  ;;  %v7067_v57 = vrot.slane %v11777_v27, 5  ;;  %v6885_v7 = vadd.f32 %v14651_v59, %v16281_v39 }
 0x48e   : > { %v7778_v23 = vpack.c.b16 %v7759_v10, %v7758_v13  ;;  %v7875_v54 = vpop.f32.mrf.mxu2  ;;  %v11302_v55 = vrot.slane %v6920_v40, 9  ;;  %v8429_v13 = vunpack.c.l.b16 %v8173_v49  ;;  %v8762_v42 = vsel %vm12012_vm6, %v8760_v2, %v8761_v19 }
 0x48f   : > { %v8183_v44 = vsel %vm12040_vm7, %v8178_v36, %v8182_v47  ;;  %v15011_v1 = vadd.f32 %v7875_v54, %v7309_v8  ;;  %v7066_v25 = vrot.slane %v7064_v63, 4  ;;  %v8855_v14 = vunpack.c.l.b16 %v8759_v38  ;;  %v16282_v47 = vld [vmem:[#allocation44_spill] sm:$0xff] }
 0x490   : > { %7914 = vmatmul.bf16.gmra.mxu2 %v7778_v23  ;;  %v8430_v10 = vunpack.c.l.b16 %v8183_v44  ;;  %v8856_v29 = vunpack.c.l.b16 %v8762_v42  ;;  %v7649_v27 = vshrl.u32 %v6920_v40, 16  ;;  %v7652_v23 = vshll.u32 %v6920_v40, 16 }
 0x491   : > { %16280 = vst [vmem:[#allocation24_spill] sm:$0xff] %v15011_v1  ;;  %v7065_v36 = vsel %vm12012_vm6, %v11302_v55, %v7064_v63  ;;  %v7068_v8 = vsel %vm12012_vm6, %v7066_v25, %v7067_v57  ;;  %v16283_v59 = vshrl.u32 %v16282_v47, 16  ;;  %v16284_v49 = vshll.u32 %v16282_v47, 16  ;;  %v15028_v57 = vld [vmem:[#allocation2 + $0x70] sm:$0xf] }
 0x492   : > { %v8455_v39 = vpack.c.b16 %v8430_v10, %v8429_v13  ;;  %v7127_v2 = vunpack.c.l.b16 %v7068_v8  ;;  %v7651_v38 = vrot.slane %v7649_v27, 5  ;;  %v7654_v42 = vrot.slane %v7652_v23, 6  ;;  %v7991_v10 = vld [vmem:[#allocation2 + $0x74] sm:$0x1]  ;;  %v15032_v8 = vpop.f32.mrf.mxu0 }
 0x493   : > { %v7657_v54 = vrot.slane %v16283_v59, 5  ;;  %v7658_v44 = vrot.slane %v16284_v49, 6  ;;  %v6183_v19 = vpop.f32.mrf.mxu3  ;;  %v7246_v56 = vpop.f32.mrf.mxu1  ;;  %v7663_v55 = vshrl.u32 %v7346_v62, 16  ;;  %v7666_v1 = vshll.u32 %v7346_v62, 16  ;;  %16285 = vst [vmem:[#allocation26_spill] sm:$0xff] %v15032_v8 }
 0x494   : > { %v15026_v40 = vadd.f32 %v6183_v19, %v14724_v9  ;;  %v8881_v25 = vpack.c.b16 %v8856_v29, %v8855_v14  ;;  %v15030_v59 = vadd.f32 %v7246_v56, %v6885_v7  ;;  %v7126_v47 = vunpack.c.l.b16 %v7065_v36  ;;  %v11662_v36 = vld [vmem:[#allocation3 + $0x200] sm:$0xff] }
 0x495   : > { %v7659_v63 = vor.u32 %v7658_v44, %v7657_v54  ;;  %8567 = vmatmul.bf16.gmra.mxu3 %v8455_v39  ;;  %v7655_v13 = vor.u32 %v7654_v42, %v7651_v38  ;;  %v7665_v9 = vrot.slane %v7663_v55, 5  ;;  %v7668_v49 = vrot.slane %v7666_v1, 6  ;;  %v16287_v42 = vld [vmem:[#allocation29_spill] sm:$0xff]  ;;  %9596 = vmatpush.bf16.msra.mxu1 %v11662_v36 }
 0x496   : > { %v15034_v27 = vpop.f32.mrf.mxu2  ;;  %v8185_v19 = vshrl.u32 %v7989_v0, 16  ;;  %v7145_v54 = vpack.c.b16 %v7127_v2, %v7126_v47  ;;  %v8188_v62 = vshll.u32 %v7989_v0, 16  ;;  %v16037_v61 = vshll.u32 %v15028_v57, 16  ;;  %v8657_v2 = vld [vmem:[#allocation2 + $0x6c] sm:$0xe] }
 0x497   : > { %16286 = vst [vmem:[#allocation22_spill] sm:$0xff] %v15034_v27  ;;  %v7661_v23 = vrot.slane %v7659_v63, 4  ;;  %v7656_v44 = vrot.slane %v7655_v13, 4  ;;  %v7669_v14 = vor.u32 %v7668_v49, %v7665_v9  ;;  %v16038_v7 = vshrl.u32 %v15028_v57, 16  ;;  %v16288_v0 = vld [vmem:[#allocation19_spill] sm:$0xff] }
 0x498   : > { %8993 = vmatmul.bf16.gmra.mxu0 %v8881_v25  ;;  %v8187_v56 = vrot.slane %v8185_v19, 4  ;;  %v8204_v29 = vshll.u32 %v7991_v10, 16  ;;  %7285 = vmatmul.bf16.gmra.mxu1 %v7145_v54  ;;  %v8190_v38 = vrot.slane %v8188_v62, 5  ;;  %v8196_v1 = vrot.slane %v16037_v61, 5  ;;  %v16289_v25 = vld [vmem:[#allocation35_spill] sm:$0xff] }
 0x499   : > { %v7660_v39 = vsel %vm13779_vm13, %v7656_v44, %v7659_v63  ;;  %v15044_v55 = vadd.f32 %v16288_v0, %v16287_v42  ;;  %v15048_v47 = vadd.f32 %v16289_v25, %v15000_v24  ;;  %v7670_v13 = vsel %vm13779_vm13, %v7661_v23, %v7669_v14  ;;  %v6921_v63 = vld [vmem:[#allocation2 + $0xb4] sm:$0xe]  ;;  %v16292_v14 = vld [vmem:[#allocation49_spill] sm:$0xff] }
 0x49a   : > { %v8200_v9 = vrot.slane %v16038_v7, 4  ;;  %v7760_v19 = vunpack.c.l.b16 %v7660_v39  ;;  %v7761_v54 = vunpack.c.l.b16 %v7670_v13  ;;  %v8191_v44 = vor.u32 %v8190_v38, %v8187_v56  ;;  %v11778_v56 = vld [vmem:[#allocation2 + $0xb8] sm:$0xf] }
 0x49b   : > { %v15054_v49 = vpop.f32.mrf.mxu3  ;;  %v8765_v62 = vrot.slane %v15028_v57, 5  ;;  %v15057_v42 = vpop.f32.mrf.mxu1  ;;  %v8206_v24 = vrot.slane %v8204_v29, 5  ;;  %v11408_v25 = vrot.slane %v8657_v2, 9  ;;  %v8768_v61 = vrot.slane %v7991_v10, 5  ;;  %v11779_v29 = vld [vmem:[#allocation2 + $0xbc] sm:$0x1] }
 0x49c   : > { %16290 = vst [vmem:[#allocation44_spill] sm:$0xff] %v15054_v49  ;;  %v8201_v0 = vor.u32 %v8200_v9, %v8196_v1  ;;  %v7779_v8 = vpack.c.b16 %v7761_v54, %v7760_v19  ;;  %v8192_v23 = vrot.slane %v8191_v44, 4  ;;  %v6887_v7 = vadd.f32 %v14705_v4, %v16292_v14  ;;  %v15065_v54 = vpop.f32.mrf.mxu0 }
 0x49d   : > { %16291 = vst [vmem:[#allocation29_spill] sm:$0xff] %v15057_v42  ;;  %v11303_v27 = vrot.slane %v6921_v63, 9  ;;  %v8766_v39 = vsel %vm12012_vm6, %v11408_v25, %v8765_v62  ;;  %v8767_v13 = vrot.slane %v8765_v62, 4  ;;  %v7071_v38 = vrot.slane %v11778_v56, 5  ;;  %v16294_v42 = vld [vmem:[#allocation46_spill] sm:$0xff] }
 0x49e   : > { %v8202_v36 = vrot.slane %v8201_v0, 4  ;;  %v8197_v9 = vsel %vm12040_vm7, %v8192_v23, %v8196_v1  ;;  %v7074_v2 = vrot.slane %v11779_v29, 5  ;;  %v7672_v10 = vshrl.u32 %v6921_v63, 16 }
 0x49f   : > { %v7675_v19 = vshll.u32 %v6921_v63, 16  ;;  %v8431_v44 = vunpack.c.l.b16 %v8197_v9  ;;  %v8769_v0 = vsel %vm12012_vm6, %v8767_v13, %v8768_v61  ;;  %v7073_v23 = vrot.slane %v7071_v38, 4  ;;  %v7347_v63 = vld [vmem:[#allocation2 + $0xbc] sm:$0x3]  ;;  %v7992_v9 = vld [vmem:[#allocation2 + $0x78] sm:$0xf] }
 0x4a0   : > { %7919 = vmatmul.bf16.gmra.mxu2 %v7779_v8  ;;  %v8207_v4 = vsel %vm12040_vm7, %v8202_v36, %v8206_v24  ;;  %v7880_v62 = vpop.f32.mrf.mxu2  ;;  %v7072_v8 = vsel %vm12012_vm6, %v11303_v27, %v7071_v38  ;;  %v8858_v14 = vunpack.c.l.b16 %v8769_v0  ;;  %v8857_v56 = vunpack.c.l.b16 %v8766_v39 }
 0x4a1   : > { %v8432_v25 = vunpack.c.l.b16 %v8207_v4  ;;  %v15074_v1 = vadd.f32 %v7880_v62, %v15030_v59  ;;  %v7674_v29 = vrot.slane %v7672_v10, 5  ;;  %v7677_v49 = vrot.slane %v7675_v19, 6 }
 0x4a2   : > { %v16295_v24 = vshrl.u32 %v16294_v42, 16  ;;  %v7075_v61 = vsel %vm12012_vm6, %v7073_v23, %v7074_v2  ;;  %v7128_v13 = vunpack.c.l.b16 %v7072_v8  ;;  %v16296_v27 = vshll.u32 %v16294_v42, 16  ;;  %v7994_v23 = vld [vmem:[#allocation2 + $0x80] sm:$0x1] }
 0x4a3   : > { %16293 = vst [vmem:[#allocation19_spill] sm:$0xff] %v15074_v1  ;;  %v8456_v6 = vpack.c.b16 %v8432_v25, %v8431_v44  ;;  %v7129_v0 = vunpack.c.l.b16 %v7075_v61  ;;  %v7678_v59 = vor.u32 %v7677_v49, %v7674_v29  ;;  %v7686_v62 = vshrl.u32 %v7347_v63, 16  ;;  %v15082_v1 = vld [vmem:[#allocation2 + $0x7c] sm:$0xf] }
 0x4a4   : > { %v7680_v36 = vrot.slane %v16295_v24, 5  ;;  %v7681_v4 = vrot.slane %v16296_v27, 6  ;;  %v7689_v38 = vshll.u32 %v7347_v63, 16  ;;  %v8882_v39 = vpack.c.b16 %v8858_v14, %v8857_v56 }
 0x4a5   : > { %8572 = vmatmul.bf16.gmra.mxu3 %v8456_v6  ;;  %v8209_v24 = vshrl.u32 %v7992_v9, 16  ;;  %v8212_v41 = vshll.u32 %v7992_v9, 16  ;;  %v7251_v2 = vpop.f32.mrf.mxu1  ;;  %v7146_v8 = vpack.c.b16 %v7129_v0, %v7128_v13  ;;  %v7679_v25 = vrot.slane %v7678_v59, 4  ;;  %v8658_v9 = vld [vmem:[#allocation2 + $0x78] sm:$0xe]  ;;  %v16297_v13 = vld [vmem:[#allocation11_spill] sm:$0xff] }
 0x4a6   : > { %v6188_v10 = vpop.f32.mrf.mxu3  ;;  %v7682_v19 = vor.u32 %v7681_v4, %v7680_v36  ;;  %v7688_v42 = vrot.slane %v7686_v62, 5  ;;  %v15087_v61 = vadd.f32 %v7251_v2, %v6887_v7  ;;  %v7691_v63 = vrot.slane %v7689_v38, 6  ;;  %v16298_v7 = vld [vmem:[#allocation13_spill] sm:$0xff]  ;;  %v15101_v62 = vpop.f32.mrf.mxu0 }
 0x4a7   : > { %v15085_v44 = vadd.f32 %v6188_v10, %v14761_v45  ;;  %v8211_v6 = vrot.slane %v8209_v24, 4  ;;  %v8214_v29 = vrot.slane %v8212_v41, 5  ;;  %v16039_v45 = vshll.u32 %v15082_v1, 16  ;;  %16299 = vst [vmem:[#allocation35_spill] sm:$0xff] %v15101_v62 }
 0x4a8   : > { %v7684_v49 = vrot.slane %v7682_v19, 4  ;;  %8998 = vmatmul.bf16.gmra.mxu0 %v8882_v39  ;;  %v15089_v14 = vpop.f32.mrf.mxu2  ;;  %v7683_v56 = vsel %vm13779_vm13, %v7679_v25, %v7682_v19  ;;  %v16040_v36 = vshrl.u32 %v15082_v1, 16  ;;  %v15097_v27 = vadd.f32 %v16297_v13, %v15044_v55  ;;  %7290 = vmatmul.bf16.gmra.mxu1 %v7146_v8  ;;  %v6922_v19 = vld [vmem:[#allocation2 + $0xc0] sm:$0xe] }
 0x4a9   : > { %v6876_v4 = vadd.f32 %v16298_v7, %v15048_v47  ;;  %v7692_v0 = vor.u32 %v7691_v63, %v7688_v42  ;;  %v8228_v59 = vshll.u32 %v7994_v23, 16  ;;  %v7762_v38 = vunpack.c.l.b16 %v7683_v56  ;;  %v11780_v7 = vld [vmem:[#allocation2 + $0xc4] sm:$0xf] }
 0x4aa   : > { %v8215_v39 = vor.u32 %v8214_v29, %v8211_v6  ;;  %v8220_v41 = vrot.slane %v16039_v45, 5  ;;  %v8224_v10 = vrot.slane %v16040_v36, 4  ;;  %v11409_v24 = vrot.slane %v8658_v9, 9 }
 0x4ab   : > { %v7693_v55 = vsel %vm13779_vm13, %v7684_v49, %v7692_v0  ;;  %v8772_v47 = vrot.slane %v15082_v1, 5  ;;  %v8775_v2 = vrot.slane %v7994_v23, 5  ;;  %v8230_v63 = vrot.slane %v8228_v59, 5 }
 0x4ac   : > { %v7763_v8 = vunpack.c.l.b16 %v7693_v55  ;;  %v8216_v25 = vrot.slane %v8215_v39, 4  ;;  %v8225_v42 = vor.u32 %v8224_v10, %v8220_v41  ;;  %v11304_v13 = vrot.slane %v6922_v19, 9 }
 0x4ad   : > { %v8773_v6 = vsel %vm12012_vm6, %v11409_v24, %v8772_v47  ;;  %v8774_v29 = vrot.slane %v8772_v47, 4  ;;  %v7078_v45 = vrot.slane %v11780_v7, 5  ;;  %v15115_v9 = vpop.f32.mrf.mxu1  ;;  %v7302_v59 = vadd.f32 %v14787_v22, %v6876_v4  ;;  %v7348_v4 = vld [vmem:[#allocation2 + $0xc8] sm:$0x3] }
 0x4ae   : > { %v6190_v56 = vpop.f32.mrf.mxu3  ;;  %v7780_v49 = vpack.c.b16 %v7763_v8, %v7762_v38  ;;  %v8221_v23 = vsel %vm12040_vm7, %v8216_v25, %v8220_v41  ;;  %v8226_v0 = vrot.slane %v8225_v42, 4  ;;  %v6889_v55 = vadd.f32 %v14763_v15, %v14680_v31  ;;  %v11781_v25 = vld [vmem:[#allocation2 + $0xc8] sm:$0x1] }
 0x4af   : > { %v15113_v36 = vadd.f32 %v6190_v56, %v14781_v3  ;;  %v8433_v39 = vunpack.c.l.b16 %v8221_v23  ;;  %v8776_v10 = vsel %vm12012_vm6, %v8774_v29, %v8775_v2  ;;  %v8859_v38 = vunpack.c.l.b16 %v8773_v6  ;;  %v7995_v6 = vld [vmem:[#allocation2 + $0x84] sm:$0xf] }
 0x4b0   : > { %7924 = vmatmul.bf16.gmra.mxu2 %v7780_v49  ;;  %v8231_v3 = vsel %vm12040_vm7, %v8226_v0, %v8230_v63  ;;  %v7079_v24 = vsel %vm12012_vm6, %v11304_v13, %v7078_v45  ;;  %v7080_v47 = vrot.slane %v7078_v45, 4  ;;  %v8860_v8 = vunpack.c.l.b16 %v8776_v10  ;;  %v15137_v0 = vpop.f32.mrf.mxu0 }
 0x4b1   : > { %16300 = vst [vmem:[#allocation49_spill] sm:$0xff] %v15113_v36  ;;  %v8434_v41 = vunpack.c.l.b16 %v8231_v3  ;;  %v7081_v22 = vrot.slane %v11781_v25, 5  ;;  %v7695_v42 = vshrl.u32 %v6922_v19, 16  ;;  %v7130_v2 = vunpack.c.l.b16 %v7079_v24 }
 0x4b2   : > { %v7698_v29 = vshll.u32 %v6922_v19, 16  ;;  %v16301_v31 = vshrl.u32 %v14657_v32, 16  ;;  %v16302_v7 = vshll.u32 %v14657_v32, 16  ;;  %v7709_v24 = vshrl.u32 %v7348_v4, 16  ;;  %v15139_v32 = vld [vmem:[#allocation2 + $0x88] sm:$0xf] }
 0x4b3   : > { %v7885_v56 = vpop.f32.mrf.mxu2  ;;  %v8457_v49 = vpack.c.b16 %v8434_v41, %v8433_v39  ;;  %v7082_v45 = vsel %vm12012_vm6, %v7080_v47, %v7081_v22  ;;  %v7697_v23 = vrot.slane %v7695_v42, 5  ;;  %v8883_v25 = vpack.c.b16 %v8860_v8, %v8859_v38  ;;  %v7997_v42 = vld [vmem:[#allocation2 + $0x8c] sm:$0x1] }
 0x4b4   : > { %v7703_v15 = vrot.slane %v16301_v31, 5  ;;  %v7704_v63 = vrot.slane %v16302_v7, 6  ;;  %v15133_v13 = vadd.f32 %v7885_v56, %v15087_v61  ;;  %v7131_v10 = vunpack.c.l.b16 %v7082_v45 }
 0x4b5   : > { %v7700_v3 = vrot.slane %v7698_v29, 6  ;;  %8577 = vmatmul.bf16.gmra.mxu3 %v8457_v49  ;;  %v7712_v31 = vshll.u32 %v7348_v4, 16  ;;  %v8233_v7 = vshrl.u32 %v7995_v6, 16  ;;  %v8236_v39 = vshll.u32 %v7995_v6, 16  ;;  %v7256_v41 = vpop.f32.mrf.mxu1  ;;  %v8659_v4 = vld [vmem:[#allocation2 + $0x84] sm:$0xe] }
 0x4b6   : > { %v7705_v19 = vor.u32 %v7704_v63, %v7703_v15  ;;  %v7147_v61 = vpack.c.b16 %v7131_v10, %v7130_v2  ;;  %v7711_v62 = vrot.slane %v7709_v24, 5  ;;  %v15141_v47 = vadd.f32 %v7256_v41, %v6889_v55 }
 0x4b7   : > { %v7701_v56 = vor.u32 %v7700_v3, %v7697_v23  ;;  %v7714_v22 = vrot.slane %v7712_v31, 6  ;;  %v8235_v45 = vrot.slane %v8233_v7, 4  ;;  %v8238_v29 = vrot.slane %v8236_v39, 5 }
 0x4b8   : > { %v7707_v36 = vrot.slane %v7705_v19, 4  ;;  %9003 = vmatmul.bf16.gmra.mxu0 %v8883_v25  ;;  %v8538_v15 = vpop.f32.mrf.mxu3  ;;  %v16041_v38 = vshll.u32 %v15139_v32, 16  ;;  %v16042_v8 = vshrl.u32 %v15139_v32, 16  ;;  %v7936_v6 = vadd.f32 %v14824_v11, %v7302_v59  ;;  %7295 = vmatmul.bf16.gmra.mxu1 %v7147_v61  ;;  %v16303_v11 = vld [vmem:[#allocation15_spill] sm:$0xff] }
 0x4b9   : > { %v7702_v63 = vrot.slane %v7701_v56, 4  ;;  %v15147_v2 = vadd.f32 %v8538_v15, %v14813_v37  ;;  %v7715_v55 = vor.u32 %v7714_v22, %v7711_v62  ;;  %v8239_v49 = vor.u32 %v8238_v29, %v8235_v45  ;;  %v11782_v22 = vld [vmem:[#allocation2 + $0x18] sm:$0xe]  ;;  %v15166_v15 = vpop.f32.mrf.mxu0 }
 0x4ba   : > { %v8244_v3 = vrot.slane %v16041_v38, 5  ;;  %v8248_v24 = vrot.slane %v16042_v8, 4  ;;  %v8252_v25 = vshll.u32 %v7997_v42, 16  ;;  %v15159_v59 = vadd.f32 %v16303_v11, %v15097_v27  ;;  %16304 = vst [vmem:[#allocation46_spill] sm:$0xff] %v15166_v15 }
 0x4bb   : > { %v15149_v23 = vpop.f32.mrf.mxu2  ;;  %v7706_v10 = vsel %vm13779_vm13, %v7702_v63, %v7705_v19  ;;  %v7716_v37 = vsel %vm13779_vm13, %v7707_v36, %v7715_v55  ;;  %v8240_v62 = vrot.slane %v8239_v49, 4  ;;  %v11410_v31 = vrot.slane %v8659_v4, 9  ;;  %v9076_v49 = vld [vmem:[#allocation2 + $0x20] sm:$0x3] }
 0x4bc   : > { %v7764_v7 = vunpack.c.l.b16 %v7706_v10  ;;  %v7765_v39 = vunpack.c.l.b16 %v7716_v37  ;;  %v8249_v41 = vor.u32 %v8248_v24, %v8244_v3  ;;  %v8779_v19 = vrot.slane %v15139_v32, 5 }
 0x4bd   : > { %v8245_v61 = vsel %vm12040_vm7, %v8240_v62, %v8244_v3  ;;  %v8782_v56 = vrot.slane %v7997_v42, 5  ;;  %v9093_v45 = vshrl.u32 %v11782_v22, 16  ;;  %v9096_v29 = vshll.u32 %v11782_v22, 16  ;;  %v15168_v63 = vpop.f32.mrf.mxu1 }
 0x4be   : > { %v7781_v27 = vpack.c.b16 %v7765_v39, %v7764_v7  ;;  %16305 = vst [vmem:[#allocation11_spill] sm:$0xff] %v15168_v63  ;;  %v8250_v36 = vrot.slane %v8249_v41, 4  ;;  %v8254_v4 = vrot.slane %v8252_v25, 5  ;;  %v6891_v55 = vadd.f32 %v14828_v28, %v14727_v21  ;;  %v11481_v28 = vld [vmem:[%s12001_s20 + $0xc] sm:$0xf] }
 0x4bf   : > { %v8435_v10 = vunpack.c.l.b16 %v8245_v61  ;;  %v8780_v3 = vsel %vm12012_vm6, %v11410_v31, %v8779_v19  ;;  %v8781_v42 = vrot.slane %v8779_v19, 4  ;;  %v9095_v24 = vrot.slane %v9093_v45, 5 }
 0x4c0   : > { %v8540_v11 = vpop.f32.mrf.mxu3  ;;  %7929 = vmatmul.bf16.gmra.mxu2 %v7781_v27  ;;  %v8255_v37 = vsel %vm12040_vm7, %v8250_v36, %v8254_v4  ;;  %v9098_v62 = vrot.slane %v9096_v29, 6  ;;  %v16306_v7 = vshrl.u32 %v14700_v20, 16  ;;  %v16307_v39 = vshll.u32 %v14700_v20, 16  ;;  %v11482_v4 = vld [vmem:[%s12001_s20 + $0x10] sm:$0xf] }
 0x4c1   : > { %v15181_v41 = vadd.f32 %v8540_v11, %v7936_v6  ;;  %v8436_v31 = vunpack.c.l.b16 %v8255_v37  ;;  %v8783_v19 = vsel %vm12012_vm6, %v8781_v42, %v8782_v56  ;;  %v9107_v61 = vshrl.u32 %v9076_v49, 16 }
 0x4c2   : > { %v9101_v25 = vrot.slane %v16306_v7, 5  ;;  %v9102_v21 = vrot.slane %v16307_v39, 6  ;;  %v8862_v22 = vunpack.c.l.b16 %v8783_v19  ;;  %v9099_v27 = vor.u32 %v9098_v62, %v9095_v24  ;;  %v11483_v39 = vld [vmem:[%s12001_s20 + $0x14] sm:$0x1]  ;;  %v7998_v24 = vld [vmem:[#allocation2 + $0x90] sm:$0xf] }
 0x4c3   : > { %v7890_v45 = vpop.f32.mrf.mxu2  ;;  %v9110_v29 = vshll.u32 %v9076_v49, 16  ;;  %v8458_v38 = vpack.c.b16 %v8436_v31, %v8435_v10  ;;  %v9109_v20 = vrot.slane %v9107_v61, 5  ;;  %v9759_v8 = vshrl.u32 %v11481_v28, 16 }
 0x4c4   : > { %v9103_v36 = vor.u32 %v9102_v21, %v9101_v25  ;;  %v15187_v7 = vadd.f32 %v7890_v45, %v15141_v47  ;;  %v8861_v6 = vunpack.c.l.b16 %v8780_v3  ;;  %v9100_v11 = vrot.slane %v9099_v27, 4  ;;  %v15194_v45 = vld [vmem:[#allocation2 + $0x94] sm:$0xf] }
 0x4c5   : > { %v9112_v15 = vrot.slane %v9110_v29, 6  ;;  %8582 = vmatmul.bf16.gmra.mxu3 %v8458_v38  ;;  %v9761_v56 = vrot.slane %v9759_v8, 4  ;;  %v9762_v42 = vshll.u32 %v11481_v28, 16  ;;  %v9768_v19 = vshll.u32 %v11482_v4, 16  ;;  %v7261_v49 = vpop.f32.mrf.mxu1  ;;  %v15196_v38 = vpop.f32.mrf.mxu0 }
 0x4c6   : > { %16308 = vst [vmem:[#allocation13_spill] sm:$0xff] %v15187_v7  ;;  %v9105_v37 = vrot.slane %v9103_v36, 4  ;;  %v9772_v63 = vshrl.u32 %v11482_v4, 16  ;;  %v8884_v62 = vpack.c.b16 %v8862_v22, %v8861_v6  ;;  %v9104_v10 = vsel %vm13779_vm13, %v9100_v11, %v9103_v36  ;;  %v8000_v4 = vld [vmem:[#allocation2 + $0x98] sm:$0x1] }
 0x4c7   : > { %v9113_v47 = vor.u32 %v9112_v15, %v9109_v20  ;;  %v9778_v25 = vshll.u32 %v11483_v39, 16  ;;  %v15192_v21 = vadd.f32 %v7261_v49, %v6891_v55  ;;  %v9477_v31 = vunpack.c.l.b16 %v9104_v10 }
 0x4c8   : > { %v9764_v3 = vrot.slane %v9762_v42, 5  ;;  %v9770_v61 = vrot.slane %v9768_v19, 5  ;;  %9008 = vmatmul.bf16.gmra.mxu0 %v8884_v62  ;;  %v8543_v8 = vpop.f32.mrf.mxu3  ;;  %v9774_v22 = vrot.slane %v9772_v63, 4  ;;  %v8257_v29 = vshrl.u32 %v7998_v24, 16  ;;  %v8660_v62 = vld [vmem:[#allocation2 + $0x90] sm:$0xe] }
 0x4c9   : > { %v9114_v28 = vsel %vm13779_vm13, %v9105_v37, %v9113_v47  ;;  %v9780_v27 = vrot.slane %v9778_v25, 5  ;;  %v15201_v15 = vadd.f32 %v8543_v8, %v14857_v18  ;;  %v8260_v20 = vshll.u32 %v7998_v24, 16 }
 0x4ca   : > { %v9478_v55 = vunpack.c.l.b16 %v9114_v28  ;;  %v9765_v36 = vor.u32 %v9764_v3, %v9761_v56  ;;  %v9775_v6 = vor.u32 %v9774_v22, %v9770_v61  ;;  %v8259_v11 = vrot.slane %v8257_v29, 4 }
 0x4cb   : > { %v15203_v39 = vpop.f32.mrf.mxu2  ;;  %v16043_v42 = vshll.u32 %v15194_v45, 16  ;;  %v16044_v19 = vshrl.u32 %v15194_v45, 16  ;;  %v7304_v63 = vadd.f32 %v14840_v33, %v15159_v59  ;;  %v8262_v18 = vrot.slane %v8260_v20, 5 }
 0x4cc   : > { %16309 = vst [vmem:[#allocation15_spill] sm:$0xff] %v15203_v39  ;;  %v9509_v37 = vpack.c.b16 %v9478_v55, %v9477_v31  ;;  %v9766_v49 = vrot.slane %v9765_v36, 4  ;;  %v9776_v10 = vrot.slane %v9775_v6, 4  ;;  %v8276_v47 = vshll.u32 %v8000_v4, 16 }
 0x4cd   : > { %v8268_v56 = vrot.slane %v16043_v42, 5  ;;  %v8272_v24 = vrot.slane %v16044_v19, 4  ;;  %v8263_v3 = vor.u32 %v8262_v18, %v8259_v11  ;;  %v11411_v8 = vrot.slane %v8660_v62, 9  ;;  %v15219_v22 = vpop.f32.mrf.mxu1  ;;  %v11486_v19 = vld [vmem:[%s12001_s20 + $0x20] sm:$0x1] }
 0x4ce   : > { %9597 = vmatmul.bf16.vlgmr.msra.gmra.mxu1 %v9509_v37  ;;  %v9771_v25 = vsel %vm12040_vm7, %v9766_v49, %v9770_v61  ;;  %v8786_v28 = vrot.slane %v15194_v45, 5  ;;  %v7938_v33 = vadd.f32 %v14874_v43, %v7304_v63  ;;  %v9781_v59 = vsel %vm12040_vm7, %v9776_v10, %v9780_v27  ;;  %16310 = vst [vmem:[#allocation71_spill] sm:$0xff] %v15219_v22  ;;  %v9077_v10 = vld [vmem:[#allocation2 + $0x2c] sm:$0x3] }
 0x4cf   : > { %v10143_v31 = vunpack.c.l.b16 %v9771_v25  ;;  %v8273_v29 = vor.u32 %v8272_v24, %v8268_v56  ;;  %v10144_v55 = vunpack.c.l.b16 %v9781_v59  ;;  %v8264_v36 = vrot.slane %v8263_v3, 4  ;;  %v15229_v24 = vpop.f32.mrf.mxu0  ;;  %v11484_v59 = vld [vmem:[%s12001_s20 + $0x18] sm:$0xf] }
 0x4d0   : > { %v8278_v20 = vrot.slane %v8276_v47, 5  ;;  %v8787_v6 = vsel %vm12012_vm6, %v11411_v8, %v8786_v28  ;;  %v8545_v61 = vpop.f32.mrf.mxu3  ;;  %v8788_v62 = vrot.slane %v8786_v28, 4  ;;  %v8789_v37 = vrot.slane %v8000_v4, 5  ;;  %16311 = vst [vmem:[#allocation72_spill] sm:$0xff] %v15229_v24  ;;  %v11783_v8 = vld [vmem:[#allocation2 + $0x24] sm:$0xe] }
 0x4d1   : > { %v8274_v11 = vrot.slane %v8273_v29, 4  ;;  %v8863_v49 = vunpack.c.l.b16 %v8787_v6  ;;  %v15223_v18 = vadd.f32 %v8545_v61, %v7938_v33  ;;  %v10175_v43 = vpack.c.b16 %v10144_v55, %v10143_v31  ;;  %v16313_v29 = vld [vmem:[#allocation57_spill] sm:$0xff] }
 0x4d2   : > { %v8269_v27 = vsel %vm12040_vm7, %v8264_v36, %v8268_v56  ;;  %v6893_v63 = vadd.f32 %v14884_v60, %v14766_v58  ;;  %v8790_v4 = vsel %vm12012_vm6, %v8788_v62, %v8789_v37  ;;  %v9116_v28 = vshrl.u32 %v11783_v8, 16 }
 0x4d3   : > { %v8279_v47 = vsel %vm12040_vm7, %v8274_v11, %v8278_v20  ;;  %v8437_v25 = vunpack.c.l.b16 %v8269_v27  ;;  %v7895_v3 = vpop.f32.mrf.mxu2  ;;  %11529 = vmatmul.msk.bf16.vlgmr.msra.gmra.mxu2 %vm754_vm3, %v10175_v43  ;;  %v8864_v33 = vunpack.c.l.b16 %v8790_v4  ;;  %v9119_v60 = vshll.u32 %v11783_v8, 16  ;;  %v11485_v11 = vld [vmem:[%s12001_s20 + $0x1c] sm:$0xf] }
 0x4d4   : > { %v8438_v56 = vunpack.c.l.b16 %v8279_v47  ;;  %v15237_v58 = vadd.f32 %v7895_v3, %v15192_v21  ;;  %v9118_v31 = vrot.slane %v9116_v28, 5  ;;  %v16314_v55 = vshrl.u32 %v16313_v29, 16 }
 0x4d5   : > { %v16315_v20 = vshll.u32 %v16313_v29, 16  ;;  %v9130_v61 = vshrl.u32 %v9077_v10, 16  ;;  %v8885_v37 = vpack.c.b16 %v8864_v33, %v8863_v49  ;;  %v9121_v43 = vrot.slane %v9119_v60, 6  ;;  %v7266_v47 = vpop.f32.mrf.mxu1 }
 0x4d6   : > { %16312 = vst [vmem:[#allocation73_spill] sm:$0xff] %v15237_v58  ;;  %v9124_v36 = vrot.slane %v16314_v55, 5  ;;  %v8459_v62 = vpack.c.b16 %v8438_v56, %v8437_v25  ;;  %v9133_v27 = vshll.u32 %v9077_v10, 16  ;;  %v9783_v3 = vshrl.u32 %v11484_v59, 16  ;;  %v8001_v56 = vld [vmem:[#allocation2 + $0x9c] sm:$0xf] }
 0x4d7   : > { %v9125_v6 = vrot.slane %v16315_v20, 6  ;;  %v9132_v21 = vrot.slane %v9130_v61, 5  ;;  %v9786_v8 = vshll.u32 %v11484_v59, 16  ;;  %v15245_v28 = vadd.f32 %v7266_v47, %v6893_v63  ;;  %v15253_v61 = vld [vmem:[#allocation2 + $0xa0] sm:$0xf] }
 0x4d8   : > { %8587 = vmatmul.bf16.gmra.mxu3 %v8459_v62  ;;  %v9122_v42 = vor.u32 %v9121_v43, %v9118_v31  ;;  %v9135_v55 = vrot.slane %v9133_v27, 6  ;;  %v9792_v29 = vshll.u32 %v11485_v11, 16  ;;  %9013 = vmatmul.bf16.gmra.mxu0 %v8885_v37  ;;  %v8548_v20 = vpop.f32.mrf.mxu3  ;;  %v9785_v22 = vrot.slane %v9783_v3, 4  ;;  %v15259_v43 = vpop.f32.mrf.mxu0  ;;  %v8003_v3 = vld [vmem:[#allocation2 + $0xa4] sm:$0x1] }
 0x4d9   : > { %v9126_v4 = vor.u32 %v9125_v6, %v9124_v36  ;;  %v9788_v25 = vrot.slane %v9786_v8, 5  ;;  %v9796_v49 = vshrl.u32 %v11485_v11, 16  ;;  %v15249_v10 = vadd.f32 %v8548_v20, %v14910_v51 }
 0x4da   : > { %v9123_v33 = vrot.slane %v9122_v42, 4  ;;  %v9136_v60 = vor.u32 %v9135_v55, %v9132_v21  ;;  %v9794_v59 = vrot.slane %v9792_v29, 5  ;;  %v9802_v6 = vshll.u32 %v11486_v19, 16 }
 0x4db   : > { %v9128_v24 = vrot.slane %v9126_v4, 4  ;;  %v15251_v36 = vpop.f32.mrf.mxu2  ;;  %v9789_v63 = vor.u32 %v9788_v25, %v9785_v22  ;;  %v9798_v31 = vrot.slane %v9796_v49, 4  ;;  %v8281_v37 = vshrl.u32 %v8001_v56, 16  ;;  %v8661_v25 = vld [vmem:[#allocation2 + $0x9c] sm:$0xe] }
 0x4dc   : > { %16316 = vst [vmem:[#allocation57_spill] sm:$0xff] %v15251_v36  ;;  %v9127_v62 = vsel %vm13779_vm13, %v9123_v33, %v9126_v4  ;;  %v9804_v21 = vrot.slane %v9802_v6, 5  ;;  %v8284_v8 = vshll.u32 %v8001_v56, 16  ;;  %v16045_v19 = vshll.u32 %v15253_v61, 16 }
 0x4dd   : > { %v9137_v11 = vsel %vm13779_vm13, %v9128_v24, %v9136_v60  ;;  %v9479_v51 = vunpack.c.l.b16 %v9127_v62  ;;  %v9790_v27 = vrot.slane %v9789_v63, 4  ;;  %v9799_v47 = vor.u32 %v9798_v31, %v9794_v59  ;;  %v15264_v20 = vpop.f32.mrf.mxu1 }
 0x4de   : > { %v9480_v42 = vunpack.c.l.b16 %v9137_v11  ;;  %v8283_v22 = vrot.slane %v8281_v37, 4  ;;  %16317 = vst [vmem:[#allocation74_spill] sm:$0xff] %v15264_v20  ;;  %v16046_v24 = vshrl.u32 %v15253_v61, 16  ;;  %v8286_v33 = vrot.slane %v8284_v8, 5 }
 0x4df   : > { %v9795_v4 = vsel %vm12040_vm7, %v9790_v27, %v9794_v59  ;;  %v9800_v29 = vrot.slane %v9799_v47, 4  ;;  %v8292_v60 = vrot.slane %v16045_v19, 5  ;;  %v8300_v31 = vshll.u32 %v8003_v3, 16 }
 0x4e0   : > { %v9510_v55 = vpack.c.b16 %v9480_v42, %v9479_v51  ;;  %v10145_v49 = vunpack.c.l.b16 %v9795_v4  ;;  %v15269_v63 = vpop.f32.mrf.mxu3  ;;  %v8296_v59 = vrot.slane %v16046_v24, 4  ;;  %v8287_v62 = vor.u32 %v8286_v33, %v8283_v22 }
 0x4e1   : > { %v9805_v56 = vsel %vm12040_vm7, %v9800_v29, %v9804_v21  ;;  %v11412_v11 = vrot.slane %v8661_v25, 9  ;;  %v8793_v37 = vrot.slane %v15253_v61, 5  ;;  %v8302_v42 = vrot.slane %v8300_v31, 5  ;;  %v11784_v25 = vld [vmem:[#allocation2 + $0x30] sm:$0xe] }
 0x4e2   : > { %9602 = vmatmul.bf16.gmra.mxu1 %v9510_v55  ;;  %v10146_v6 = vunpack.c.l.b16 %v9805_v56  ;;  %v8297_v51 = vor.u32 %v8296_v59, %v8292_v60  ;;  %v8796_v27 = vrot.slane %v8003_v3, 5  ;;  %v6895_v8 = vadd.f32 %v14942_v53, %v14818_v30  ;;  %v9078_v53 = vld [vmem:[#allocation2 + $0x38] sm:$0x3]  ;;  %v16319_v59 = vld [vmem:[#allocation59_spill] sm:$0xff] }
 0x4e3   : > { %v7900_v47 = vpop.f32.mrf.mxu2  ;;  %v8288_v4 = vrot.slane %v8287_v62, 4  ;;  %v8794_v21 = vsel %vm12012_vm6, %v11412_v11, %v8793_v37  ;;  %v8795_v29 = vrot.slane %v8793_v37, 4  ;;  %v9139_v33 = vshrl.u32 %v11784_v25, 16  ;;  %v11487_v62 = vld [vmem:[%s12001_s20 + $0x24] sm:$0xf]  ;;  %v15291_v11 = vpop.f32.mrf.mxu0 }
 0x4e4   : > { %v10176_v55 = vpack.c.b16 %v10146_v6, %v10145_v49  ;;  %v8298_v19 = vrot.slane %v8297_v51, 4  ;;  %v8865_v56 = vunpack.c.l.b16 %v8794_v21  ;;  %v15281_v22 = vadd.f32 %v7900_v47, %v15245_v28  ;;  %16321 = vst [vmem:[#allocation59_spill] sm:$0xff] %v15291_v11  ;;  %v11488_v11 = vld [vmem:[%s12001_s20 + $0x28] sm:$0xf] }
 0x4e5   : > { %v8293_v3 = vsel %vm12040_vm7, %v8288_v4, %v8292_v60  ;;  %v8797_v30 = vsel %vm12012_vm6, %v8795_v29, %v8796_v27  ;;  %v9142_v49 = vshll.u32 %v11784_v25, 16  ;;  %v16320_v31 = vshrl.u32 %v16319_v59, 16  ;;  %v7271_v47 = vpop.f32.mrf.mxu1 }
 0x4e6   : > { %16318 = vst [vmem:[#allocation75_spill] sm:$0xff] %v15281_v22  ;;  %11530 = vmatmul.msk.bf16.gmra.mxu2 %vm754_vm3, %v10176_v55  ;;  %v8303_v28 = vsel %vm12040_vm7, %v8298_v19, %v8302_v42  ;;  %v8439_v37 = vunpack.c.l.b16 %v8293_v3  ;;  %v8866_v51 = vunpack.c.l.b16 %v8797_v30  ;;  %v9141_v60 = vrot.slane %v9139_v33, 5  ;;  %v11489_v33 = vld [vmem:[%s12001_s20 + $0x2c] sm:$0x1] }
 0x4e7   : > { %v9147_v6 = vrot.slane %v16320_v31, 5  ;;  %v8440_v55 = vunpack.c.l.b16 %v8303_v28  ;;  %v15295_v4 = vadd.f32 %v7271_v47, %v6895_v8  ;;  %v9144_v27 = vrot.slane %v9142_v49, 6 }
 0x4e8   : > { %v16322_v21 = vshll.u32 %v16319_v59, 16  ;;  %v8886_v25 = vpack.c.b16 %v8866_v51, %v8865_v56  ;;  %v8553_v31 = vpop.f32.mrf.mxu3  ;;  %v9153_v24 = vshrl.u32 %v9078_v53, 16  ;;  %v9156_v20 = vshll.u32 %v9078_v53, 16  ;;  %v8004_v56 = vld [vmem:[#allocation2 + $0xa8] sm:$0xf] }
 0x4e9   : > { %v9807_v22 = vshrl.u32 %v11487_v62, 16  ;;  %v8460_v36 = vpack.c.b16 %v8440_v55, %v8439_v37  ;;  %v15301_v19 = vadd.f32 %v8553_v31, %v14961_v48  ;;  %v9145_v42 = vor.u32 %v9144_v27, %v9141_v60  ;;  %v15308_v27 = vld [vmem:[#allocation2 + $0xac] sm:$0xf] }
 0x4ea   : > { %v9148_v29 = vrot.slane %v16322_v21, 6  ;;  %9018 = vmatmul.bf16.gmra.mxu0 %v8886_v25  ;;  %v9155_v30 = vrot.slane %v9153_v24, 5  ;;  %v9158_v49 = vrot.slane %v9156_v20, 6  ;;  %v9810_v28 = vshll.u32 %v11487_v62, 16 }
 0x4eb   : > { %v15304_v8 = vpop.f32.mrf.mxu2  ;;  %v9809_v59 = vrot.slane %v9807_v22, 4  ;;  %8592 = vmatmul.bf16.gmra.mxu3 %v8460_v36  ;;  %v9146_v51 = vrot.slane %v9145_v42, 4  ;;  %v9816_v47 = vshll.u32 %v11488_v11, 16  ;;  %v9820_v55 = vshrl.u32 %v11488_v11, 16  ;;  %v8006_v42 = vld [vmem:[#allocation2 + $0xb0] sm:$0x1] }
 0x4ec   : > { %v9149_v3 = vor.u32 %v9148_v29, %v9147_v6  ;;  %16323 = vst [vmem:[#allocation76_spill] sm:$0xff] %v15304_v8  ;;  %v9159_v21 = vor.u32 %v9158_v49, %v9155_v30  ;;  %v9812_v37 = vrot.slane %v9810_v28, 5  ;;  %v9826_v48 = vshll.u32 %v11489_v33, 16  ;;  %v15314_v33 = vpop.f32.mrf.mxu0  ;;  %v8007_v8 = vld [vmem:[#allocation2 + $0xb4] sm:$0xf] }
 0x4ed   : > { %v9818_v60 = vrot.slane %v9816_v47, 5  ;;  %v8305_v29 = vshrl.u32 %v8004_v56, 16  ;;  %v9822_v22 = vrot.slane %v9820_v55, 4  ;;  %v15312_v36 = vpop.f32.mrf.mxu1  ;;  %v8308_v49 = vshll.u32 %v8004_v56, 16 }
 0x4ee   : > { %v9151_v53 = vrot.slane %v9149_v3, 4  ;;  %v9150_v6 = vsel %vm13779_vm13, %v9146_v51, %v9149_v3  ;;  %v9813_v24 = vor.u32 %v9812_v37, %v9809_v59  ;;  %16324 = vst [vmem:[#allocation77_spill] sm:$0xff] %v15312_v36  ;;  %v9828_v31 = vrot.slane %v9826_v48, 5  ;;  %v8662_v51 = vld [vmem:[#allocation2 + $0xa8] sm:$0xe] }
 0x4ef   : > { %v9481_v62 = vunpack.c.l.b16 %v9150_v6  ;;  %v8307_v11 = vrot.slane %v8305_v29, 4  ;;  %v9823_v3 = vor.u32 %v9822_v22, %v9818_v60  ;;  %v16047_v28 = vshll.u32 %v15308_v27, 16 }
 0x4f0   : > { %v9160_v20 = vsel %vm13779_vm13, %v9151_v53, %v9159_v21  ;;  %v9814_v30 = vrot.slane %v9813_v24, 4  ;;  %v16048_v53 = vshrl.u32 %v15308_v27, 16  ;;  %v8310_v37 = vrot.slane %v8308_v49, 5 }
 0x4f1   : > { %v9482_v25 = vunpack.c.l.b16 %v9160_v20  ;;  %v9824_v21 = vrot.slane %v9823_v3, 4  ;;  %v8316_v55 = vrot.slane %v16047_v28, 5  ;;  %v8324_v29 = vshll.u32 %v8006_v42, 16 }
 0x4f2   : > { %v9819_v59 = vsel %vm12040_vm7, %v9814_v30, %v9818_v60  ;;  %v8320_v56 = vrot.slane %v16048_v53, 4  ;;  %v11413_v20 = vrot.slane %v8662_v51, 9  ;;  %v8311_v22 = vor.u32 %v8310_v37, %v8307_v11  ;;  %v11785_v53 = vld [vmem:[#allocation2 + $0x3c] sm:$0xe] }
 0x4f3   : > { %v9511_v47 = vpack.c.b16 %v9482_v25, %v9481_v62  ;;  %v7905_v48 = vpop.f32.mrf.mxu2  ;;  %v10147_v6 = vunpack.c.l.b16 %v9819_v59  ;;  %v9829_v24 = vsel %vm12040_vm7, %v9824_v21, %v9828_v31  ;;  %v8800_v62 = vrot.slane %v15308_v27, 5 }
 0x4f4   : > { %v8803_v60 = vrot.slane %v8006_v42, 5  ;;  %v10148_v25 = vunpack.c.l.b16 %v9829_v24  ;;  %v8321_v30 = vor.u32 %v8320_v56, %v8316_v55  ;;  %v15328_v3 = vadd.f32 %v7905_v48, %v15295_v4 }
 0x4f5   : > { %9607 = vmatmul.bf16.gmra.mxu1 %v9511_v47  ;;  %v6897_v49 = vadd.f32 %v15002_v12, %v14868_v26  ;;  %v8312_v47 = vrot.slane %v8311_v22, 4  ;;  %v8801_v59 = vsel %vm12012_vm6, %v11413_v20, %v8800_v62  ;;  %v8802_v51 = vrot.slane %v8800_v62, 4  ;;  %v7276_v28 = vpop.f32.mrf.mxu1  ;;  %v9079_v12 = vld [vmem:[#allocation2 + $0x44] sm:$0x3]  ;;  %v15344_v22 = vpop.f32.mrf.mxu0 }
 0x4f6   : > { %16325 = vst [vmem:[#allocation78_spill] sm:$0xff] %v15328_v3  ;;  %v9162_v31 = vshrl.u32 %v11785_v53, 16  ;;  %v10177_v11 = vpack.c.b16 %v10148_v25, %v10147_v6  ;;  %v8322_v21 = vrot.slane %v8321_v30, 4  ;;  %v8326_v42 = vrot.slane %v8324_v29, 5  ;;  %v11490_v29 = vld [vmem:[%s12001_s20 + $0x30] sm:$0xf] }
 0x4f7   : > { %v15334_v37 = vadd.f32 %v7276_v28, %v6897_v49  ;;  %v8317_v4 = vsel %vm12040_vm7, %v8312_v47, %v8316_v55  ;;  %v8804_v26 = vsel %vm12012_vm6, %v8802_v51, %v8803_v60  ;;  %v9165_v56 = vshll.u32 %v11785_v53, 16  ;;  %v16327_v25 = vld [vmem:[#allocation62_spill] sm:$0xff]  ;;  %v11491_v51 = vld [vmem:[%s12001_s20 + $0x34] sm:$0xf] }
 0x4f8   : > { %v9164_v48 = vrot.slane %v9162_v31, 5  ;;  %11531 = vmatmul.msk.bf16.gmra.mxu2 %vm754_vm3, %v10177_v11  ;;  %v8327_v20 = vsel %vm12040_vm7, %v8322_v21, %v8326_v42  ;;  %v8441_v6 = vunpack.c.l.b16 %v8317_v4  ;;  %v8867_v24 = vunpack.c.l.b16 %v8801_v59 }
 0x4f9   : > { %v8868_v28 = vunpack.c.l.b16 %v8804_v26  ;;  %v8442_v55 = vunpack.c.l.b16 %v8327_v20  ;;  %v9167_v60 = vrot.slane %v9165_v56, 6  ;;  %v16328_v30 = vshrl.u32 %v16327_v25, 16  ;;  %v11492_v26 = vld [vmem:[%s12001_s20 + $0x38] sm:$0x1] }
 0x4fa   : > { %v16329_v53 = vshll.u32 %v16327_v25, 16  ;;  %v9176_v11 = vshrl.u32 %v9079_v12, 16  ;;  %v9179_v21 = vshll.u32 %v9079_v12, 16  ;;  %v9831_v36 = vshrl.u32 %v11490_v29, 16 }
 0x4fb   : > { %v15346_v62 = vpop.f32.mrf.mxu2  ;;  %v9170_v49 = vrot.slane %v16328_v30, 5  ;;  %v8887_v31 = vpack.c.b16 %v8868_v28, %v8867_v24  ;;  %v8461_v59 = vpack.c.b16 %v8442_v55, %v8441_v6  ;;  %v9168_v42 = vor.u32 %v9167_v60, %v9164_v48  ;;  %v15358_v60 = vld [vmem:[#allocation2 + $0xb8] sm:$0xf] }
 0x4fc   : > { %16326 = vst [vmem:[#allocation79_spill] sm:$0xff] %v15346_v62  ;;  %v9171_v47 = vrot.slane %v16329_v53, 6  ;;  %v9178_v20 = vrot.slane %v9176_v11, 5  ;;  %v9181_v3 = vrot.slane %v9179_v21, 6  ;;  %v9834_v62 = vshll.u32 %v11490_v29, 16 }
 0x4fd   : > { %9023 = vmatmul.bf16.gmra.mxu0 %v8887_v31  ;;  %v9840_v56 = vshll.u32 %v11491_v51, 16  ;;  %8597 = vmatmul.bf16.gmra.mxu3 %v8461_v59  ;;  %v9169_v30 = vrot.slane %v9168_v42, 4  ;;  %v9833_v25 = vrot.slane %v9831_v36, 4  ;;  %v9844_v53 = vshrl.u32 %v11491_v51, 16  ;;  %v15354_v39 = vpop.f32.mrf.mxu1  ;;  %v8009_v21 = vld [vmem:[#allocation2 + $0xbc] sm:$0x1] }
 0x4fe   : > { %v9172_v4 = vor.u32 %v9171_v47, %v9170_v49  ;;  %16330 = vst [vmem:[#allocation62_spill] sm:$0xff] %v15354_v39  ;;  %v9182_v24 = vor.u32 %v9181_v3, %v9178_v20  ;;  %v9836_v12 = vrot.slane %v9834_v62, 5  ;;  %v9850_v48 = vshll.u32 %v11492_v26, 16  ;;  %v15363_v20 = vpop.f32.mrf.mxu0 }
 0x4ff   : > { %v9842_v6 = vrot.slane %v9840_v56, 5  ;;  %v9846_v55 = vrot.slane %v9844_v53, 4  ;;  %v8329_v29 = vshrl.u32 %v8007_v8, 16  ;;  %v8332_v42 = vshll.u32 %v8007_v8, 16 }
 0x500   : > { %v9174_v58 = vrot.slane %v9172_v4, 4  ;;  %v9173_v28 = vsel %vm13779_vm13, %v9169_v30, %v9172_v4  ;;  %v9837_v47 = vor.u32 %v9836_v12, %v9833_v25  ;;  %v9852_v11 = vrot.slane %v9850_v48, 5  ;;  %v8663_v4 = vld [vmem:[#allocation2 + $0xb4] sm:$0xe] }
 0x501   : > { %v9483_v31 = vunpack.c.l.b16 %v9173_v28  ;;  %v9847_v51 = vor.u32 %v9846_v55, %v9842_v6  ;;  %v8331_v59 = vrot.slane %v8329_v29, 4  ;;  %v16049_v26 = vshll.u32 %v15358_v60, 16 }
 0x502   : > { %v9183_v49 = vsel %vm13779_vm13, %v9174_v58, %v9182_v24  ;;  %v9838_v62 = vrot.slane %v9837_v47, 4  ;;  %v16050_v53 = vshrl.u32 %v15358_v60, 16  ;;  %v8334_v25 = vrot.slane %v8332_v42, 5  ;;  %v11786_v42 = vld [vmem:[#allocation2 + $0x48] sm:$0xe] }
 0x503   : > { %v9484_v36 = vunpack.c.l.b16 %v9183_v49  ;;  %v7910_v3 = vpop.f32.mrf.mxu2  ;;  %v9848_v30 = vrot.slane %v9847_v51, 4  ;;  %v8340_v24 = vrot.slane %v16049_v26, 5  ;;  %v8348_v12 = vshll.u32 %v8009_v21, 16 }
 0x504   : > { %v9843_v58 = vsel %vm12040_vm7, %v9838_v62, %v9842_v6  ;;  %v8344_v28 = vrot.slane %v16050_v53, 4  ;;  %v11414_v55 = vrot.slane %v8663_v4, 9  ;;  %v8335_v47 = vor.u32 %v8334_v25, %v8331_v59 }
 0x505   : > { %v9512_v56 = vpack.c.b16 %v9484_v36, %v9483_v31  ;;  %v9853_v8 = vsel %vm12040_vm7, %v9848_v30, %v9852_v11  ;;  %v10149_v48 = vunpack.c.l.b16 %v9843_v58  ;;  %v7281_v29 = vpop.f32.mrf.mxu1  ;;  %v8807_v31 = vrot.slane %v15358_v60, 5 }
 0x506   : > { %v10150_v49 = vunpack.c.l.b16 %v9853_v8  ;;  %v8810_v6 = vrot.slane %v8009_v21, 5  ;;  %v8345_v36 = vor.u32 %v8344_v28, %v8340_v24  ;;  %v15376_v51 = vadd.f32 %v7910_v3, %v15334_v37  ;;  %v9080_v37 = vld [vmem:[#allocation2 + $0x50] sm:$0x3]  ;;  %v11493_v28 = vld [vmem:[%s12001_s20 + $0x3c] sm:$0xf] }
 0x507   : > { %9612 = vmatmul.bf16.gmra.mxu1 %v9512_v56  ;;  %v6899_v62 = vadd.f32 %v15065_v54, %v14921_v16  ;;  %v9185_v11 = vshrl.u32 %v11786_v42, 16  ;;  %v8336_v30 = vrot.slane %v8335_v47, 4  ;;  %v8808_v4 = vsel %vm12012_vm6, %v11414_v55, %v8807_v31 }
 0x508   : > { %16331 = vst [vmem:[#allocation80_spill] sm:$0xff] %v15376_v51  ;;  %v10178_v56 = vpack.c.b16 %v10150_v49, %v10149_v48  ;;  %v8809_v58 = vrot.slane %v8807_v31, 4  ;;  %v8346_v59 = vrot.slane %v8345_v36, 4  ;;  %v8350_v25 = vrot.slane %v8348_v12, 5 }
 0x509   : > { %v15382_v8 = vadd.f32 %v7281_v29, %v6899_v62  ;;  %v8341_v16 = vsel %vm12040_vm7, %v8336_v30, %v8340_v24  ;;  %v8869_v3 = vunpack.c.l.b16 %v8808_v4  ;;  %v9187_v48 = vrot.slane %v9185_v11, 5  ;;  %v11494_v30 = vld [vmem:[%s12001_s20 + $0x40] sm:$0xf] }
 0x50a   : > { %11532 = vmatmul.msk.bf16.gmra.mxu2 %vm754_vm3, %v10178_v56  ;;  %v8811_v54 = vsel %vm12012_vm6, %v8809_v58, %v8810_v6  ;;  %v8351_v12 = vsel %vm12040_vm7, %v8346_v59, %v8350_v25  ;;  %v8443_v55 = vunpack.c.l.b16 %v8341_v16  ;;  %v9188_v49 = vshll.u32 %v11786_v42, 16  ;;  %v15399_v6 = vpop.f32.mrf.mxu0 }
 0x50b   : > { %v15384_v21 = vpop.f32.mrf.mxu2  ;;  %v8870_v29 = vunpack.c.l.b16 %v8811_v54  ;;  %v8444_v47 = vunpack.c.l.b16 %v8351_v12  ;;  %v16333_v31 = vshrl.u32 %v14886_v46, 16  ;;  %v16334_v62 = vshll.u32 %v14886_v46, 16  ;;  %v11495_v54 = vld [vmem:[%s12001_s20 + $0x44] sm:$0x1] }
 0x50c   : > { %16332 = vst [vmem:[#allocation81_spill] sm:$0xff] %v15384_v21  ;;  %v9199_v56 = vshrl.u32 %v9080_v37, 16  ;;  %v9190_v4 = vrot.slane %v9188_v49, 6  ;;  %v9202_v58 = vshll.u32 %v9080_v37, 16  ;;  %v9855_v26 = vshrl.u32 %v11493_v28, 16 }
 0x50d   : > { %v9193_v36 = vrot.slane %v16333_v31, 5  ;;  %v9194_v24 = vrot.slane %v16334_v62, 6  ;;  %v8888_v11 = vpack.c.b16 %v8870_v29, %v8869_v3  ;;  %v15401_v59 = vpop.f32.mrf.mxu1  ;;  %v8462_v25 = vpack.c.b16 %v8444_v47, %v8443_v55  ;;  %v8010_v21 = vld [vmem:[#allocation2 + $0xc0] sm:$0xf] }
 0x50e   : > { %16335 = vst [vmem:[#allocation82_spill] sm:$0xff] %v15401_v59  ;;  %v9201_v42 = vrot.slane %v9199_v56, 5  ;;  %v9858_v12 = vshll.u32 %v11493_v28, 16  ;;  %v9191_v31 = vor.u32 %v9190_v4, %v9187_v48  ;;  %v9204_v53 = vrot.slane %v9202_v58, 6  ;;  %v8012_v58 = vld [vmem:[#allocation2 + $0xc8] sm:$0x1] }
 0x50f   : > { %v9195_v16 = vor.u32 %v9194_v24, %v9193_v36  ;;  %9028 = vmatmul.bf16.gmra.mxu0 %v8888_v11  ;;  %v9857_v46 = vrot.slane %v9855_v26, 4  ;;  %v9864_v62 = vshll.u32 %v11494_v30, 16  ;;  %8602 = vmatmul.bf16.gmra.mxu3 %v8462_v25  ;;  %v9868_v3 = vshrl.u32 %v11494_v30, 16  ;;  %v15404_v36 = vld [vmem:[#allocation2 + $0xc4] sm:$0xf] }
 0x510   : > { %v9860_v51 = vrot.slane %v9858_v12, 5  ;;  %v9192_v29 = vrot.slane %v9191_v31, 4  ;;  %v9205_v37 = vor.u32 %v9204_v53, %v9201_v42  ;;  %v9874_v7 = vshll.u32 %v11495_v54, 16  ;;  %v8664_v54 = vld [vmem:[#allocation2 + $0xc0] sm:$0xe] }
 0x511   : > { %v9197_v39 = vrot.slane %v9195_v16, 4  ;;  %v9866_v49 = vrot.slane %v9864_v62, 5  ;;  %v9870_v47 = vrot.slane %v9868_v3, 4  ;;  %v8353_v28 = vshrl.u32 %v8010_v21, 16 }
 0x512   : > { %v9861_v55 = vor.u32 %v9860_v51, %v9857_v46  ;;  %v9196_v48 = vsel %vm13779_vm13, %v9192_v29, %v9195_v16  ;;  %v9876_v24 = vrot.slane %v9874_v7, 5  ;;  %v8356_v56 = vshll.u32 %v8010_v21, 16  ;;  %v15414_v7 = vpop.f32.mrf.mxu0 }
 0x513   : > { %v7915_v59 = vpop.f32.mrf.mxu2  ;;  %v9206_v26 = vsel %vm13779_vm13, %v9197_v39, %v9205_v37  ;;  %v9485_v11 = vunpack.c.l.b16 %v9196_v48  ;;  %v9871_v53 = vor.u32 %v9870_v47, %v9866_v49  ;;  %v8355_v25 = vrot.slane %v8353_v28, 4 }
 0x514   : > { %v9486_v30 = vunpack.c.l.b16 %v9206_v26  ;;  %v9862_v4 = vrot.slane %v9861_v55, 4  ;;  %v8358_v42 = vrot.slane %v8356_v56, 5  ;;  %v16051_v51 = vshll.u32 %v15404_v36, 16 }
 0x515   : > { %v7286_v12 = vpop.f32.mrf.mxu1  ;;  %v9872_v46 = vrot.slane %v9871_v53, 4  ;;  %v16052_v39 = vshrl.u32 %v15404_v36, 16  ;;  %v8372_v29 = vshll.u32 %v8012_v58, 16  ;;  %v11415_v47 = vrot.slane %v8664_v54, 9 }
 0x516   : > { %v9513_v31 = vpack.c.b16 %v9486_v30, %v9485_v11  ;;  %v9867_v16 = vsel %vm12040_vm7, %v9862_v4, %v9866_v49  ;;  %v8359_v62 = vor.u32 %v8358_v42, %v8355_v25  ;;  %v8364_v3 = vrot.slane %v16051_v51, 5 }
 0x517   : > { %v10151_v21 = vunpack.c.l.b16 %v9867_v16  ;;  %v9877_v37 = vsel %vm12040_vm7, %v9872_v46, %v9876_v24  ;;  %v8368_v55 = vrot.slane %v16052_v39, 4  ;;  %v8814_v49 = vrot.slane %v15404_v36, 5 }
 0x518   : > { %9617 = vmatmul.bf16.gmra.mxu1 %v9513_v31  ;;  %v10152_v28 = vunpack.c.l.b16 %v9877_v37  ;;  %v8360_v48 = vrot.slane %v8359_v62, 4  ;;  %v8817_v26 = vrot.slane %v8012_v58, 5  ;;  %v15428_v53 = vadd.f32 %v7915_v59, %v15382_v8  ;;  %v9081_v59 = vld [vmem:[#allocation2 + $0x5c] sm:$0x3] }
 0x519   : > { %v8369_v11 = vor.u32 %v8368_v55, %v8364_v3  ;;  %v8815_v30 = vsel %vm12012_vm6, %v11415_v47, %v8814_v49  ;;  %v8816_v4 = vrot.slane %v8814_v49, 4  ;;  %v8374_v42 = vrot.slane %v8372_v29, 5 }
 0x51a   : > { %v10179_v24 = vpack.c.b16 %v10152_v28, %v10151_v21  ;;  %v8365_v25 = vsel %vm12040_vm7, %v8360_v48, %v8364_v3  ;;  %v8871_v31 = vunpack.c.l.b16 %v8815_v30  ;;  %v6901_v16 = vadd.f32 %v15137_v0, %v14972_v50  ;;  %v11787_v21 = vld [vmem:[#allocation2 + $0x54] sm:$0xe]  ;;  %v11496_v28 = vld [vmem:[%s12001_s20 + $0x48] sm:$0xf] }
 0x51b   : > { %v15423_v56 = vpop.f32.mrf.mxu2  ;;  %v8370_v54 = vrot.slane %v8369_v11, 4  ;;  %v8818_v58 = vsel %vm12012_vm6, %v8816_v4, %v8817_v26  ;;  %v8445_v46 = vunpack.c.l.b16 %v8365_v25  ;;  %v9208_v62 = vshrl.u32 %v11787_v21, 16  ;;  %v11497_v4 = vld [vmem:[%s12001_s20 + $0x4c] sm:$0xf] }
 0x51c   : > { %11533 = vmatmul.msk.bf16.gmra.mxu2 %vm754_vm3, %v10179_v24  ;;  %v8872_v8 = vunpack.c.l.b16 %v8818_v58  ;;  %v9211_v37 = vshll.u32 %v11787_v21, 16  ;;  %v7327_v55 = vadd.f32 %v7286_v12, %v6901_v16  ;;  %v16337_v47 = vshrl.u32 %v14934_v35, 16  ;;  %v15447_v21 = vpop.f32.mrf.mxu0 }
 0x51d   : > { %v15437_v3 = vpop.f32.mrf.mxu1  ;;  %v8375_v29 = vsel %vm12040_vm7, %v8370_v54, %v8374_v42  ;;  %v16338_v50 = vshll.u32 %v14934_v35, 16  ;;  %v9210_v11 = vrot.slane %v9208_v62, 5  ;;  %v9222_v25 = vshrl.u32 %v9081_v59, 16  ;;  %v11498_v54 = vld [vmem:[%s12001_s20 + $0x50] sm:$0x1] }
 0x51e   : > { %16336 = vst [vmem:[#allocation83_spill] sm:$0xff] %v15437_v3  ;;  %v9216_v49 = vrot.slane %v16337_v47, 5  ;;  %v8446_v48 = vunpack.c.l.b16 %v8375_v29  ;;  %v8889_v26 = vpack.c.b16 %v8872_v8, %v8871_v31  ;;  %v9213_v30 = vrot.slane %v9211_v37, 6  ;;  %v8013_v31 = vld [vmem:[#allocation2 + $0xcc] sm:$0xf] }
 0x51f   : > { %v9217_v0 = vrot.slane %v16338_v50, 6  ;;  %v9225_v58 = vshll.u32 %v9081_v59, 16  ;;  %v9879_v16 = vshrl.u32 %v11496_v28, 16  ;;  %v9882_v47 = vshll.u32 %v11496_v28, 16  ;;  %v15452_v28 = vld [vmem:[#allocation2 + $0xd0] sm:$0xf] }
 0x520   : > { %v8463_v42 = vpack.c.b16 %v8446_v48, %v8445_v46  ;;  %9033 = vmatmul.bf16.gmra.mxu0 %v8889_v26  ;;  %v9214_v12 = vor.u32 %v9213_v30, %v9210_v11  ;;  %v9224_v50 = vrot.slane %v9222_v25, 5  ;;  %v9888_v29 = vshll.u32 %v11497_v4, 16  ;;  %v8015_v11 = vld [vmem:[#allocation2 + $0xd4] sm:$0x1] }
 0x521   : > { %v9218_v24 = vor.u32 %v9217_v0, %v9216_v49  ;;  %v9227_v39 = vrot.slane %v9225_v58, 6  ;;  %v9881_v62 = vrot.slane %v9879_v16, 4  ;;  %v9884_v37 = vrot.slane %v9882_v47, 5 }
 0x522   : > { %8607 = vmatmul.bf16.gmra.mxu3 %v8463_v42  ;;  %v9215_v8 = vrot.slane %v9214_v12, 4  ;;  %v9892_v49 = vshrl.u32 %v11497_v4, 16  ;;  %v9890_v0 = vrot.slane %v9888_v29, 5  ;;  %v9898_v3 = vshll.u32 %v11498_v54, 16 }
 0x523   : > { %v7920_v51 = vpop.f32.mrf.mxu2  ;;  %v9220_v35 = vrot.slane %v9218_v24, 4  ;;  %v9228_v59 = vor.u32 %v9227_v39, %v9224_v50  ;;  %v9885_v48 = vor.u32 %v9884_v37, %v9881_v62  ;;  %v8377_v30 = vshrl.u32 %v8013_v31, 16 }
 0x524   : > { %v9219_v46 = vsel %vm13779_vm13, %v9215_v8, %v9218_v24  ;;  %v9894_v26 = vrot.slane %v9892_v49, 4  ;;  %v9900_v12 = vrot.slane %v9898_v3, 5  ;;  %v8380_v54 = vshll.u32 %v8013_v31, 16 }
 0x525   : > { %v7291_v25 = vpop.f32.mrf.mxu1  ;;  %v9229_v58 = vsel %vm13779_vm13, %v9220_v35, %v9228_v59  ;;  %v9487_v42 = vunpack.c.l.b16 %v9219_v46  ;;  %v9886_v4 = vrot.slane %v9885_v48, 4  ;;  %v8379_v47 = vrot.slane %v8377_v30, 4  ;;  %v8665_v35 = vld [vmem:[#allocation2 + $0xcc] sm:$0xe] }
 0x526   : > { %v9488_v16 = vunpack.c.l.b16 %v9229_v58  ;;  %v9895_v39 = vor.u32 %v9894_v26, %v9890_v0  ;;  %v16053_v50 = vshll.u32 %v15452_v28, 16  ;;  %v16054_v24 = vshrl.u32 %v15452_v28, 16 }
 0x527   : > { %v8396_v29 = vshll.u32 %v8015_v11, 16  ;;  %v9891_v62 = vsel %vm12040_vm7, %v9886_v4, %v9890_v0  ;;  %v15460_v49 = vadd.f32 %v7920_v51, %v7327_v55  ;;  %v8382_v46 = vrot.slane %v8380_v54, 5  ;;  %v15472_v55 = vpop.f32.mrf.mxu0 }
 0x528   : > { %v9514_v8 = vpack.c.b16 %v9488_v16, %v9487_v42  ;;  %v9896_v37 = vrot.slane %v9895_v39, 4  ;;  %v10153_v3 = vunpack.c.l.b16 %v9891_v62  ;;  %v8388_v31 = vrot.slane %v16053_v50, 5 }
 0x529   : > { %16339 = vst [vmem:[#allocation84_spill] sm:$0xff] %v15460_v49  ;;  %v8392_v48 = vrot.slane %v16054_v24, 4  ;;  %v8398_v30 = vrot.slane %v8396_v29, 5  ;;  %v6903_v51 = vadd.f32 %v15196_v38, %v15026_v40  ;;  %v8383_v58 = vor.u32 %v8382_v46, %v8379_v47  ;;  %v11788_v29 = vld [vmem:[#allocation2 + $0x60] sm:$0xe]  ;;  %v15493_v49 = vpop.f32.mrf.mxu3 }
 0x52a   : > { %9622 = vmatmul.bf16.gmra.mxu1 %v9514_v8  ;;  %v9901_v26 = vsel %vm12040_vm7, %v9896_v37, %v9900_v12  ;;  %v11416_v16 = vrot.slane %v8665_v35, 9  ;;  %v8821_v39 = vrot.slane %v15452_v28, 5  ;;  %v8824_v54 = vrot.slane %v8015_v11, 5 }
 0x52b   : > { %v15462_v59 = vpop.f32.mrf.mxu2  ;;  %v10154_v0 = vunpack.c.l.b16 %v9901_v26  ;;  %v8393_v42 = vor.u32 %v8392_v48, %v8388_v31  ;;  %v7329_v4 = vadd.f32 %v7291_v25, %v6903_v51  ;;  %v8384_v50 = vrot.slane %v8383_v58, 4  ;;  %v9082_v26 = vld [vmem:[#allocation2 + $0x68] sm:$0x3]  ;;  %v11499_v51 = vld [vmem:[%s12001_s20 + $0x54] sm:$0xf] }
 0x52c   : > { %16340 = vst [vmem:[#allocation85_spill] sm:$0xff] %v15462_v59  ;;  %v9231_v37 = vshrl.u32 %v11788_v29, 16  ;;  %v8822_v40 = vsel %vm12012_vm6, %v11416_v16, %v8821_v39  ;;  %v8823_v38 = vrot.slane %v8821_v39, 4  ;;  %v9234_v47 = vshll.u32 %v11788_v29, 16 }
 0x52d   : > { %v15475_v62 = vpop.f32.mrf.mxu1  ;;  %v10180_v8 = vpack.c.b16 %v10154_v0, %v10153_v3  ;;  %v8394_v12 = vrot.slane %v8393_v42, 4  ;;  %v16342_v35 = vshrl.u32 %v14980_v52, 16  ;;  %v8389_v11 = vsel %vm12040_vm7, %v8384_v50, %v8388_v31  ;;  %v11500_v50 = vld [vmem:[%s12001_s20 + $0x58] sm:$0xf] }
 0x52e   : > { %16341 = vst [vmem:[#allocation86_spill] sm:$0xff] %v15475_v62  ;;  %v8873_v46 = vunpack.c.l.b16 %v8822_v40  ;;  %v9233_v48 = vrot.slane %v9231_v37, 5  ;;  %v8447_v0 = vunpack.c.l.b16 %v8389_v11  ;;  %v8825_v42 = vsel %vm12012_vm6, %v8823_v38, %v8824_v54 }
 0x52f   : > { %v9239_v25 = vrot.slane %v16342_v35, 5  ;;  %11534 = vmatmul.msk.bf16.gmra.mxu2 %vm754_vm3, %v10180_v8  ;;  %v8399_v3 = vsel %vm12040_vm7, %v8394_v12, %v8398_v30  ;;  %v9236_v16 = vrot.slane %v9234_v47, 6  ;;  %v8874_v39 = vunpack.c.l.b16 %v8825_v42  ;;  %v11501_v12 = vld [vmem:[%s12001_s20 + $0x5c] sm:$0x1]  ;;  %v15495_v42 = vpop.f32.mrf.mxu0 }
 0x530   : > { %v8448_v58 = vunpack.c.l.b16 %v8399_v3  ;;  %v16343_v29 = vshll.u32 %v14980_v52, 16  ;;  %v9245_v35 = vshrl.u32 %v9082_v26, 16  ;;  %v9248_v24 = vshll.u32 %v9082_v26, 16 }
 0x531   : > { %v9237_v30 = vor.u32 %v9236_v16, %v9233_v48  ;;  %v9903_v40 = vshrl.u32 %v11499_v51, 16  ;;  %v8890_v37 = vpack.c.b16 %v8874_v39, %v8873_v46  ;;  %v9906_v38 = vshll.u32 %v11499_v51, 16 }
 0x532   : > { %v9240_v8 = vrot.slane %v16343_v29, 6  ;;  %v8464_v62 = vpack.c.b16 %v8448_v58, %v8447_v0  ;;  %v9247_v11 = vrot.slane %v9245_v35, 5  ;;  %v9250_v3 = vrot.slane %v9248_v24, 6 }
 0x533   : > { %v7925_v31 = vpop.f32.mrf.mxu2  ;;  %v9238_v5 = vrot.slane %v9237_v30, 4  ;;  %v9905_v54 = vrot.slane %v9903_v40, 4  ;;  %v9912_v52 = vshll.u32 %v11500_v50, 16  ;;  %9038 = vmatmul.bf16.gmra.mxu0 %v8890_v37  ;;  %v9916_v48 = vshrl.u32 %v11500_v50, 16  ;;  %v11789_v40 = vld [vmem:[#allocation2 + $0x6c] sm:$0xe] }
 0x534   : > { %v9241_v59 = vor.u32 %v9240_v8, %v9239_v25  ;;  %8612 = vmatmul.bf16.gmra.mxu3 %v8464_v62  ;;  %v9251_v0 = vor.u32 %v9250_v3, %v9247_v11  ;;  %v9922_v58 = vshll.u32 %v11501_v12, 16  ;;  %v9908_v46 = vrot.slane %v9906_v38, 5  ;;  %v11502_v38 = vld [vmem:[%s12001_s20 + $0x60] sm:$0xf] }
 0x535   : > { %v7296_v47 = vpop.f32.mrf.mxu1  ;;  %v9914_v24 = vrot.slane %v9912_v52, 5  ;;  %v9918_v16 = vrot.slane %v9916_v48, 4  ;;  %v15501_v8 = vadd.f32 %v7925_v31, %v7329_v4  ;;  %v6905_v50 = vadd.f32 %v15259_v43, %v15085_v44 }
 0x536   : > { %v9243_v26 = vrot.slane %v9241_v59, 4  ;;  %v9242_v25 = vsel %vm13779_vm13, %v9238_v5, %v9241_v59  ;;  %v9909_v29 = vor.u32 %v9908_v46, %v9905_v54  ;;  %v9924_v30 = vrot.slane %v9922_v58, 5  ;;  %v9083_v59 = vld [vmem:[#allocation2 + $0x74] sm:$0x3] }
 0x537   : > { %v9489_v51 = vunpack.c.l.b16 %v9242_v25  ;;  %v9919_v35 = vor.u32 %v9918_v16, %v9914_v24  ;;  %v9254_v37 = vshrl.u32 %v11789_v40, 16  ;;  %v9257_v5 = vshll.u32 %v11789_v40, 16 }
 0x538   : > { %v9252_v62 = vsel %vm13779_vm13, %v9243_v26, %v9251_v0  ;;  %v9910_v3 = vrot.slane %v9909_v29, 4  ;;  %v7331_v26 = vadd.f32 %v7296_v47, %v6905_v50  ;;  %v16344_v4 = vshrl.u32 %v15028_v57, 16  ;;  %v11503_v47 = vld [vmem:[%s12001_s20 + $0x64] sm:$0xf]  ;;  %v11504_v50 = vld [vmem:[%s12001_s20 + $0x68] sm:$0x1] }
 0x539   : > { %v9490_v39 = vunpack.c.l.b16 %v9252_v62  ;;  %v9920_v52 = vrot.slane %v9919_v35, 4  ;;  %v9256_v54 = vrot.slane %v9254_v37, 5  ;;  %v9259_v43 = vrot.slane %v9257_v5, 6 }
 0x53a   : > { %v9262_v31 = vrot.slane %v16344_v4, 5  ;;  %v9915_v44 = vsel %vm12040_vm7, %v9910_v3, %v9914_v24  ;;  %v16345_v0 = vshll.u32 %v15028_v57, 16  ;;  %v9268_v58 = vshrl.u32 %v9083_v59, 16 }
 0x53b   : > { %v15505_v12 = vpop.f32.mrf.mxu2  ;;  %v9515_v11 = vpack.c.b16 %v9490_v39, %v9489_v51  ;;  %v9925_v25 = vsel %vm12040_vm7, %v9920_v52, %v9924_v30  ;;  %v10155_v46 = vunpack.c.l.b16 %v9915_v44  ;;  %v9271_v62 = vshll.u32 %v9083_v59, 16 }
 0x53c   : > { %v9263_v48 = vrot.slane %v16345_v0, 6  ;;  %v9927_v16 = vshrl.u32 %v11502_v38, 16  ;;  %v10156_v51 = vunpack.c.l.b16 %v9925_v25  ;;  %v9260_v39 = vor.u32 %v9259_v43, %v9256_v54 }
 0x53d   : > { %9627 = vmatmul.bf16.gmra.mxu1 %v9515_v11  ;;  %v9270_v35 = vrot.slane %v9268_v58, 5  ;;  %v15518_v40 = vpop.f32.mrf.mxu1  ;;  %v9273_v24 = vrot.slane %v9271_v62, 6  ;;  %v9930_v11 = vshll.u32 %v11502_v38, 16  ;;  %v9936_v5 = vshll.u32 %v11503_v47, 16  ;;  %v9084_v58 = vld [vmem:[#allocation2 + $0x80] sm:$0x3] }
 0x53e   : > { %v9264_v29 = vor.u32 %v9263_v48, %v9262_v31  ;;  %16346 = vst [vmem:[#allocation87_spill] sm:$0xff] %v15518_v40  ;;  %v9929_v37 = vrot.slane %v9927_v16, 4  ;;  %v10181_v57 = vpack.c.b16 %v10156_v51, %v10155_v46  ;;  %v9940_v30 = vshrl.u32 %v11503_v47, 16  ;;  %v11790_v16 = vld [vmem:[#allocation2 + $0x78] sm:$0xe] }
 0x53f   : > { %v9274_v4 = vor.u32 %v9273_v24, %v9270_v35  ;;  %v9932_v0 = vrot.slane %v9930_v11, 5  ;;  %v9946_v52 = vshll.u32 %v11504_v50, 16  ;;  %v9261_v44 = vrot.slane %v9260_v39, 4 }
 0x540   : > { %v9266_v3 = vrot.slane %v9264_v29, 4  ;;  %11535 = vmatmul.msk.bf16.gmra.mxu2 %vm754_vm3, %v10181_v57  ;;  %v9938_v54 = vrot.slane %v9936_v5, 5  ;;  %v9942_v38 = vrot.slane %v9940_v30, 4  ;;  %v9277_v51 = vshrl.u32 %v11790_v16, 16  ;;  %v11505_v57 = vld [vmem:[%s12001_s20 + $0x6c] sm:$0xf] }
 0x541   : > { %v9933_v48 = vor.u32 %v9932_v0, %v9929_v37  ;;  %v9265_v25 = vsel %vm13779_vm13, %v9261_v44, %v9264_v29  ;;  %v9948_v46 = vrot.slane %v9946_v52, 5  ;;  %v9280_v39 = vshll.u32 %v11790_v16, 16 }
 0x542   : > { %v9275_v43 = vsel %vm13779_vm13, %v9266_v3, %v9274_v4  ;;  %v9943_v47 = vor.u32 %v9942_v38, %v9938_v54  ;;  %v16349_v24 = vshll.u32 %v15082_v1, 16  ;;  %v9291_v37 = vshrl.u32 %v9084_v58, 16 }
 0x543   : > { %v7930_v59 = vpop.f32.mrf.mxu2  ;;  %v9934_v62 = vrot.slane %v9933_v48, 4  ;;  %v9492_v35 = vunpack.c.l.b16 %v9275_v43  ;;  %v9279_v5 = vrot.slane %v9277_v51, 5  ;;  %v9491_v4 = vunpack.c.l.b16 %v9265_v25 }
 0x544   : > { %v15521_v31 = vadd.f32 %v7930_v59, %v7331_v26  ;;  %v16348_v26 = vshrl.u32 %v15082_v1, 16  ;;  %v9286_v11 = vrot.slane %v16349_v24, 6  ;;  %v9944_v29 = vrot.slane %v9943_v47, 4  ;;  %v11506_v59 = vld [vmem:[%s12001_s20 + $0x70] sm:$0xf] }
 0x545   : > { %v9939_v3 = vsel %vm12040_vm7, %v9934_v62, %v9938_v54  ;;  %v9282_v30 = vrot.slane %v9280_v39, 6  ;;  %v9293_v43 = vrot.slane %v9291_v37, 5  ;;  %v9294_v48 = vshll.u32 %v9084_v58, 16  ;;  %v11507_v47 = vld [vmem:[%s12001_s20 + $0x74] sm:$0x1] }
 0x546   : > { %16347 = vst [vmem:[#allocation88_spill] sm:$0xff] %v15521_v31  ;;  %v9285_v50 = vrot.slane %v16348_v26, 5  ;;  %v9949_v44 = vsel %vm12040_vm7, %v9944_v29, %v9948_v46  ;;  %v9951_v1 = vshrl.u32 %v11505_v57, 16  ;;  %v9516_v38 = vpack.c.b16 %v9492_v35, %v9491_v4 }
 0x547   : > { %v10157_v16 = vunpack.c.l.b16 %v9939_v3  ;;  %v10158_v26 = vunpack.c.l.b16 %v9949_v44  ;;  %v9283_v54 = vor.u32 %v9282_v30, %v9279_v5  ;;  %v9296_v62 = vrot.slane %v9294_v48, 6  ;;  %v11791_v48 = vld [vmem:[#allocation2 + $0x84] sm:$0xe] }
 0x548   : > { %v9287_v52 = vor.u32 %v9286_v11, %v9285_v50  ;;  %v9953_v51 = vrot.slane %v9951_v1, 4  ;;  %v9954_v25 = vshll.u32 %v11505_v57, 16  ;;  %v9960_v40 = vshll.u32 %v11506_v59, 16 }
 0x549   : > { %v9964_v39 = vshrl.u32 %v11506_v59, 16  ;;  %v9297_v11 = vor.u32 %v9296_v62, %v9293_v43  ;;  %v10182_v58 = vpack.c.b16 %v10158_v26, %v10157_v16  ;;  %v9970_v35 = vshll.u32 %v11507_v47, 16 }
 0x54a   : > { %v9289_v50 = vrot.slane %v9287_v52, 4  ;;  %v9956_v31 = vrot.slane %v9954_v25, 5  ;;  %v9962_v46 = vrot.slane %v9960_v40, 5  ;;  %v9284_v3 = vrot.slane %v9283_v54, 4 }
 0x54b   : > { %v9598_v0 = vpop.f32.mrf.mxu1  ;;  %v15537_v24 = vpop.f32.mrf.mxu2  ;;  %v9966_v37 = vrot.slane %v9964_v39, 4  ;;  %v9044_v5 = vadd.f32 %v15314_v33, %v15147_v2  ;;  %v9972_v43 = vrot.slane %v9970_v35, 5  ;;  %v9300_v1 = vshrl.u32 %v11791_v48, 16  ;;  %v15551_v2 = vld [vmem:[%s15947_s5] ss:$0 sm:$0xff] }
 0x54c   : > { %v9957_v29 = vor.u32 %v9956_v31, %v9953_v51  ;;  %v9288_v57 = vsel %vm13779_vm13, %v9284_v3, %v9287_v52  ;;  %v9298_v30 = vsel %vm13779_vm13, %v9289_v50, %v9297_v11  ;;  %v9085_v31 = vld [vmem:[#allocation2 + $0x8c] sm:$0x3]  ;;  %v9303_v33 = vshll.u32 %v11791_v48, 16  ;;  %v11508_v52 = vld [vmem:[%s12001_s20 + $0x78] sm:$0xf] }
 0x54d   : > { %9632 = vmatmul.bf16.gmra.mxu1 %v9516_v38  ;;  %v9967_v4 = vor.u32 %v9966_v37, %v9962_v46  ;;  %v9678_v38 = vadd.f32 %v9598_v0, %v9044_v5  ;;  %v9493_v16 = vunpack.c.l.b16 %v9288_v57  ;;  %v9494_v26 = vunpack.c.l.b16 %v9298_v30  ;;  %v11509_v39 = vld [vmem:[%s12001_s20 + $0x7c] sm:$0xf] }
 0x54e   : > { %v9958_v59 = vrot.slane %v9957_v29, 4  ;;  %v16350_v62 = vshrl.u32 %v15139_v32, 16  ;;  %v16351_v51 = vshll.u32 %v15139_v32, 16  ;;  %v9314_v11 = vshrl.u32 %v9085_v31, 16 }
 0x54f   : > { %v9968_v40 = vrot.slane %v9967_v4, 4  ;;  %v9302_v35 = vrot.slane %v9300_v1, 5  ;;  %v9975_v3 = vshrl.u32 %v11508_v52, 16  ;;  %v9978_v29 = vshll.u32 %v11508_v52, 16 }
 0x550   : > { %11536 = vmatmul.msk.bf16.gmra.mxu2 %vm754_vm3, %v10182_v58  ;;  %v9308_v47 = vrot.slane %v16350_v62, 5  ;;  %v9309_v25 = vrot.slane %v16351_v51, 6  ;;  %v9963_v0 = vsel %vm12040_vm7, %v9958_v59, %v9962_v46  ;;  %v9317_v58 = vshll.u32 %v9085_v31, 16 }
 0x551   : > { %v9973_v37 = vsel %vm12040_vm7, %v9968_v40, %v9972_v43  ;;  %v9305_v5 = vrot.slane %v9303_v33, 6  ;;  %v9984_v32 = vshll.u32 %v11509_v39, 16  ;;  %v9988_v57 = vshrl.u32 %v11509_v39, 16 }
 0x552   : > { %v9517_v30 = vpack.c.b16 %v9494_v26, %v9493_v16  ;;  %v10159_v48 = vunpack.c.l.b16 %v9963_v0  ;;  %v9045_v46 = vadd.f32 %v15344_v22, %v15181_v41  ;;  %v9310_v59 = vor.u32 %v9309_v25, %v9308_v47  ;;  %v11510_v26 = vld [vmem:[%s12001_s20 + $0x80] sm:$0x1] }
 0x553   : > { %v9600_v44 = vpop.f32.mrf.mxu1  ;;  %v9319_v62 = vrot.slane %v9317_v58, 6  ;;  %v9977_v40 = vrot.slane %v9975_v3, 4  ;;  %v9980_v43 = vrot.slane %v9978_v29, 5  ;;  %v9986_v1 = vrot.slane %v9984_v32, 5 }
 0x554   : > { %v9990_v52 = vrot.slane %v9988_v57, 4  ;;  %v9679_v51 = vadd.f32 %v9600_v44, %v9045_v46  ;;  %v9306_v16 = vor.u32 %v9305_v5, %v9302_v35  ;;  %v9312_v22 = vrot.slane %v9310_v59, 4 }
 0x555   : > { %v9981_v0 = vor.u32 %v9980_v43, %v9977_v40  ;;  %v9046_v35 = vadd.f32 %v15363_v20, %v15201_v15  ;;  %v11512_v40 = vld [vmem:[%s12001_s20 + $0x88] sm:$0xf] }
 0x556   : > { %v10251_v54 = vpop.f32.mrf.mxu2  ;;  %v9307_v58 = vrot.slane %v9306_v16, 4 }
 0x557   : > { %v10331_v50 = vadd.f32 %v10251_v54, %v9678_v38  ;;  %v10160_v38 = vunpack.c.l.b16 %v9973_v37  ;;  %v9316_v54 = vrot.slane %v9314_v11, 5  ;;  %v9994_v11 = vshll.u32 %v11510_v26, 16  ;;  %v11792_v37 = vld [vmem:[#allocation2 + $0x90] sm:$0xe] }
 0x558   : > { %v9323_v3 = vshrl.u32 %v11792_v37, 16  ;;  %v9982_v32 = vrot.slane %v9981_v0, 4  ;;  %v9326_v46 = vshll.u32 %v11792_v37, 16 }
 0x559   : > { %v10367_v4 = vadd.f32 %v15551_v2, %v10331_v50  ;;  %v9320_v47 = vor.u32 %v9319_v62, %v9316_v54  ;;  %v10183_v25 = vpack.c.b16 %v10160_v38, %v10159_v48  ;;  %v9991_v50 = vor.u32 %v9990_v52, %v9986_v1  ;;  %v9086_v48 = vld [vmem:[#allocation2 + $0x98] sm:$0x3]  ;;  %v11511_v38 = vld [vmem:[%s12001_s20 + $0x84] sm:$0xf] }
 0x55a   : > { %v9325_v62 = vrot.slane %v9323_v3, 5  ;;  %v16353_v52 = vshll.u32 %v15194_v45, 16  ;;  %v9337_v16 = vshrl.u32 %v9086_v48, 16  ;;  %v9340_v26 = vshll.u32 %v9086_v48, 16 }
 0x55b   : > { %v10399_v31 = vmax.f32 %v10367_v4, 0.0  ;;  %v9311_v4 = vsel %vm13779_vm13, %v9307_v58, %v9310_v59  ;;  %v9321_v5 = vsel %vm13779_vm13, %v9312_v22, %v9320_v47  ;;  %v9992_v57 = vrot.slane %v9991_v50, 4  ;;  %v16355_v58 = vld [vmem:[#allocation23_spill] sm:$0xff] }
 0x55c   : > { %v9495_v54 = vunpack.c.l.b16 %v9311_v4  ;;  %v9496_v15 = vunpack.c.l.b16 %v9321_v5  ;;  %v16352_v59 = vshrl.u32 %v15194_v45, 16  ;;  %v9328_v22 = vrot.slane %v9326_v46, 6  ;;  %v11513_v46 = vld [vmem:[%s12001_s20 + $0x8c] sm:$0x1] }
 0x55d   : > { %10431 = vst [vmem:[%s15568_s29] sm:$0xff] %v10399_v31  ;;  %9637 = vmatmul.bf16.gmra.mxu1 %v9517_v30  ;;  %v9996_v30 = vrot.slane %v9994_v11, 5  ;;  %v9999_v47 = vshrl.u32 %v11511_v38, 16  ;;  %v10002_v0 = vshll.u32 %v11511_v38, 16  ;;  %v10008_v50 = vshll.u32 %v11512_v40, 16 }
 0x55e   : > { %v10253_v39 = vpop.f32.mrf.mxu2  ;;  %v9331_v43 = vrot.slane %v16352_v59, 5  ;;  %v10012_v11 = vshrl.u32 %v11512_v40, 16  ;;  %v9518_v37 = vpack.c.b16 %v9496_v15, %v9495_v54  ;;  %v9047_v3 = vadd.f32 %v15399_v6, %v15223_v18  ;;  %v16356_v54 = vld [vmem:[#allocation39_spill] sm:$0xff]  ;;  %v15598_v59 = vpop.f32.mrf.mxu3 }
 0x55f   : > { %v9603_v33 = vpop.f32.mrf.mxu1  ;;  %v10332_v41 = vadd.f32 %v10253_v39, %v9679_v51  ;;  %v9332_v51 = vrot.slane %v16353_v52, 6  ;;  %v9987_v39 = vsel %vm12040_vm7, %v9982_v32, %v9986_v1  ;;  %v9342_v4 = vrot.slane %v9340_v26, 6 }
 0x560   : > { %11537 = vmatmul.msk.bf16.gmra.mxu2 %vm754_vm3, %v10183_v25  ;;  %v9680_v31 = vadd.f32 %v9603_v33, %v9046_v35  ;;  %v10161_v5 = vunpack.c.l.b16 %v9987_v39  ;;  %v10004_v38 = vrot.slane %v10002_v0, 5  ;;  %v10014_v40 = vrot.slane %v10012_v11, 4  ;;  %v11514_v11 = vld [vmem:[%s12001_s20 + $0x90] sm:$0xf] }
 0x561   : > { %v10368_v44 = vadd.f32 %v15551_v2, %v10332_v41  ;;  %v9997_v41 = vsel %vm12040_vm7, %v9992_v57, %v9996_v30  ;;  %v9333_v35 = vor.u32 %v9332_v51, %v9331_v43  ;;  %v9329_v57 = vor.u32 %v9328_v22, %v9325_v62  ;;  %v9087_v22 = vld [vmem:[#allocation2 + $0xa4] sm:$0x3] }
 0x562   : > { %v10162_v32 = vunpack.c.l.b16 %v9997_v41  ;;  %v10001_v30 = vrot.slane %v9999_v47, 4  ;;  %v10018_v62 = vshll.u32 %v11513_v46, 16  ;;  %v16357_v47 = vld [vmem:[#allocation42_spill] sm:$0xff] }
 0x563   : > { %v10400_v29 = vmax.f32 %v10368_v44, 0.0  ;;  %v16354_v44 = vld [vmem:[#allocation21_spill] sm:$0xff]  ;;  %v9335_v6 = vrot.slane %v9333_v35, 4  ;;  %v9330_v39 = vrot.slane %v9329_v57, 4  ;;  %v9363_v57 = vshll.u32 %v9087_v22, 16 }
 0x564   : > { %v5521_v45 = vadd.f32 %v16355_v58, %v16354_v44  ;;  %v10184_v52 = vpack.c.b16 %v10162_v32, %v10161_v5  ;;  %v10005_v41 = vor.u32 %v10004_v38, %v10001_v30  ;;  %v15608_v44 = vpop.f32.mrf.mxu0  ;;  %v10020_v58 = vrot.slane %v10018_v62, 5 }
 0x565   : > { %10432 = vst [vmem:[%s15568_s29 + $0x8] sm:$0xff] %v10400_v29  ;;  %v9339_v29 = vrot.slane %v9337_v16, 5  ;;  %v10023_v38 = vshrl.u32 %v11514_v11, 16 }
 0x566   : > { %v6198_v15 = vadd.f32 %v16356_v54, %v5521_v45  ;;  %v11793_v45 = vld [vmem:[#allocation2 + $0x9c] sm:$0xe]  ;;  %v10006_v5 = vrot.slane %v10005_v41, 4 }
 0x567   : > { %v9605_v20 = vpop.f32.mrf.mxu1  ;;  %v9343_v43 = vor.u32 %v9342_v4, %v9339_v29  ;;  %v11515_v29 = vld [vmem:[%s12001_s20 + $0x94] sm:$0xf]  ;;  %v16360_v54 = vld [vmem:[#allocation65_spill] sm:$0xff] }
 0x568   : > { %v9681_v18 = vadd.f32 %v9605_v20, %v9047_v3  ;;  %v9334_v20 = vsel %vm13779_vm13, %v9330_v39, %v9333_v35  ;;  %v9349_v3 = vshll.u32 %v11793_v45, 16  ;;  %v16358_v35 = vshrl.u32 %v15253_v61, 16 }
 0x569   : > { %v10256_v33 = vpop.f32.mrf.mxu2  ;;  %v9497_v39 = vunpack.c.l.b16 %v9334_v20 }
 0x56a   : > { %v10333_v25 = vadd.f32 %v10256_v33, %v9680_v31  ;;  %v10010_v31 = vrot.slane %v10008_v50, 5  ;;  %v9344_v50 = vsel %vm13779_vm13, %v9335_v6, %v9343_v43  ;;  %v9354_v30 = vrot.slane %v16358_v35, 5 }
 0x56b   : > { %v10036_v6 = vshrl.u32 %v11515_v29, 16  ;;  %v9048_v43 = vadd.f32 %v15414_v7, %v15249_v10  ;;  %v9351_v62 = vrot.slane %v9349_v3, 6  ;;  %v16361_v10 = vld [vmem:[#allocation40_spill] sm:$0xff] }
 0x56c   : > { %v10369_v1 = vadd.f32 %v15551_v2, %v10333_v25  ;;  %v10015_v33 = vor.u32 %v10014_v40, %v10010_v31  ;;  %v6880_v25 = vadd.f32 %v16357_v47, %v6198_v15  ;;  %v10026_v40 = vshll.u32 %v11514_v11, 16  ;;  %v15629_v35 = vpop.f32.mrf.mxu0 }
 0x56d   : > { %9642 = vmatmul.bf16.gmra.mxu1 %v9518_v37  ;;  %v9346_v37 = vshrl.u32 %v11793_v45, 16 }
 0x56e   : > { %v10401_v48 = vmax.f32 %v10369_v1, 0.0  ;;  %v9360_v1 = vshrl.u32 %v9087_v22, 16  ;;  %v10016_v32 = vrot.slane %v10015_v33, 4  ;;  %v7306_v15 = vadd.f32 %v16360_v54, %v6880_v25 }
 0x56f   : > { %v9365_v25 = vrot.slane %v9363_v57, 6  ;;  %v10028_v11 = vrot.slane %v10026_v40, 5 }
 0x570   : > { %10433 = vst [vmem:[%s15568_s29 + $0x10] sm:$0xff] %v10401_v48  ;;  %11538 = vmatmul.msk.bf16.gmra.mxu2 %vm754_vm3, %v10184_v52  ;;  %v16359_v48 = vshll.u32 %v15253_v61, 16  ;;  %v9498_v52 = vunpack.c.l.b16 %v9344_v50  ;;  %v10011_v61 = vsel %vm12040_vm7, %v10006_v5, %v10010_v31  ;;  %v10021_v41 = vsel %vm12040_vm7, %v10016_v32, %v10020_v58  ;;  %v11516_v5 = vld [vmem:[%s12001_s20 + $0x98] sm:$0x1] }
 0x571   : > { %v10258_v16 = vpop.f32.mrf.mxu2  ;;  %v9362_v22 = vrot.slane %v9360_v1, 5  ;;  %v7940_v7 = vadd.f32 %v16361_v10, %v7306_v15  ;;  %v10163_v20 = vunpack.c.l.b16 %v10011_v61 }
 0x572   : > { %v9608_v51 = vpop.f32.mrf.mxu1  ;;  %v10334_v26 = vadd.f32 %v10258_v16, %v9681_v18  ;;  %v9355_v46 = vrot.slane %v16359_v48, 6  ;;  %v10032_v18 = vshll.u32 %v11515_v29, 16  ;;  %v9348_v16 = vrot.slane %v9346_v37, 5 }
 0x573   : > { %v9682_v50 = vadd.f32 %v9608_v51, %v9048_v43  ;;  %v10038_v37 = vrot.slane %v10036_v6, 4  ;;  %v9519_v3 = vpack.c.b16 %v9498_v52, %v9497_v39  ;;  %v10164_v29 = vunpack.c.l.b16 %v10021_v41  ;;  %v11794_v43 = vld [vmem:[#allocation2 + $0xa8] sm:$0xe] }
 0x574   : > { %v10370_v0 = vadd.f32 %v15551_v2, %v10334_v26  ;;  %v15620_v26 = vpop.f32.mrf.mxu3  ;;  %v9356_v47 = vor.u32 %v9355_v46, %v9354_v30  ;;  %v10034_v45 = vrot.slane %v10032_v18, 5  ;;  %v9352_v31 = vor.u32 %v9351_v62, %v9348_v16 }
 0x575   : > { %v8623_v58 = vadd.f32 %v15269_v63, %v7940_v7  ;;  %v9366_v57 = vor.u32 %v9365_v25, %v9362_v22  ;;  %v10042_v46 = vshll.u32 %v11516_v5, 16  ;;  %v9369_v52 = vshrl.u32 %v11794_v43, 16  ;;  %v16362_v25 = vld [vmem:[#allocation25_spill] sm:$0xff] }
 0x576   : > { %v10402_v4 = vmax.f32 %v10370_v0, 0.0  ;;  %v10025_v0 = vrot.slane %v10023_v38, 4  ;;  %v9358_v1 = vrot.slane %v9356_v47, 4  ;;  %v10039_v48 = vor.u32 %v10038_v37, %v10034_v45  ;;  %v11517_v7 = vld [vmem:[%s12001_s20 + $0x9c] sm:$0xf] }
 0x577   : > { %v10185_v38 = vpack.c.b16 %v10164_v29, %v10163_v20  ;;  %v9353_v40 = vrot.slane %v9352_v31, 4  ;;  %v9049_v54 = vadd.f32 %v15447_v21, %v8623_v58  ;;  %v10044_v41 = vrot.slane %v10042_v46, 5  ;;  %v11518_v20 = vld [vmem:[%s12001_s20 + $0xa0] sm:$0xf]  ;;  %v15650_v58 = vpop.f32.mrf.mxu0 }
 0x578   : > { %10434 = vst [vmem:[%s15568_s29 + $0x18] sm:$0xff] %v10402_v4  ;;  %v10029_v30 = vor.u32 %v10028_v11, %v10025_v0  ;;  %v9367_v18 = vsel %vm13779_vm13, %v9358_v1, %v9366_v57  ;;  %v10040_v61 = vrot.slane %v10039_v48, 4  ;;  %v9372_v21 = vshll.u32 %v11794_v43, 16  ;;  %v16363_v0 = vld [vmem:[#allocation28_spill] sm:$0xff] }
 0x579   : > { %v9357_v63 = vsel %vm13779_vm13, %v9353_v40, %v9356_v47  ;;  %v9088_v47 = vld [vmem:[#allocation2 + $0xb0] sm:$0x3]  ;;  %v5531_v11 = vadd.f32 %v16363_v0, %v16362_v25  ;;  %v9500_v37 = vunpack.c.l.b16 %v9367_v18  ;;  %v16365_v57 = vshll.u32 %v15308_v27, 16  ;;  %v11519_v25 = vld [vmem:[%s12001_s20 + $0xa4] sm:$0x1] }
 0x57a   : > { %v9610_v33 = vpop.f32.mrf.mxu1  ;;  %v10030_v6 = vrot.slane %v10029_v30, 4  ;;  %v9374_v31 = vrot.slane %v9372_v21, 6  ;;  %v9383_v5 = vshrl.u32 %v9088_v47, 16  ;;  %v10050_v46 = vshll.u32 %v11517_v7, 16 }
 0x57b   : > { %v10261_v4 = vpop.f32.mrf.mxu2  ;;  %v9683_v62 = vadd.f32 %v9610_v33, %v9049_v54  ;;  %v9378_v30 = vrot.slane %v16365_v57, 6  ;;  %v10060_v40 = vshrl.u32 %v11518_v20, 16  ;;  %v16366_v54 = vld [vmem:[#allocation41_spill] sm:$0xff]  ;;  %v16370_v57 = vld [vmem:[#allocation10_spill] sm:$0xff] }
 0x57c   : > { %v10335_v32 = vadd.f32 %v10261_v4, %v9682_v50  ;;  %v15637_v16 = vpop.f32.mrf.mxu3  ;;  %v9499_v50 = vunpack.c.l.b16 %v9357_v63  ;;  %v10035_v33 = vsel %vm12040_vm7, %v10030_v6, %v10034_v45  ;;  %v10045_v4 = vsel %vm12040_vm7, %v10040_v61, %v10044_v41 }
 0x57d   : > { %9647 = vmatmul.bf16.gmra.mxu1 %v9519_v3  ;;  %v9371_v3 = vrot.slane %v9369_v52, 5  ;;  %v10047_v45 = vshrl.u32 %v11517_v7, 16  ;;  %v9050_v63 = vadd.f32 %v15472_v55, %v15301_v19  ;;  %v10165_v6 = vunpack.c.l.b16 %v10035_v33  ;;  %v16367_v55 = vld [vmem:[#allocation48_spill] sm:$0xff] }
 0x57e   : > { %v10371_v51 = vadd.f32 %v15551_v2, %v10335_v32  ;;  %v16364_v32 = vshrl.u32 %v15308_v27, 16  ;;  %v9520_v18 = vpack.c.b16 %v9500_v37, %v9499_v50  ;;  %v10166_v43 = vunpack.c.l.b16 %v10045_v4  ;;  %v16368_v50 = vld [vmem:[#allocation17_spill] sm:$0xff] }
 0x57f   : > { %v9375_v52 = vor.u32 %v9374_v31, %v9371_v3  ;;  %v9385_v61 = vrot.slane %v9383_v5, 5  ;;  %v10049_v21 = vrot.slane %v10047_v45, 4  ;;  %v10052_v0 = vrot.slane %v10050_v46, 5  ;;  %v16371_v45 = vld [vmem:[#allocation70_spill] sm:$0xff] }
 0x580   : > { %v10403_v15 = vmax.f32 %v10371_v51, 0.0  ;;  %11539 = vmatmul.msk.bf16.gmra.mxu2 %vm754_vm3, %v10185_v38  ;;  %v9377_v1 = vrot.slane %v16364_v32, 5  ;;  %v9386_v51 = vshll.u32 %v9088_v47, 16  ;;  %v10056_v38 = vshll.u32 %v11518_v20, 16 }
 0x581   : > { %v8625_v37 = vadd.f32 %v15493_v49, %v16368_v50  ;;  %v10186_v3 = vpack.c.b16 %v10166_v43, %v10165_v6  ;;  %v10066_v4 = vshll.u32 %v11519_v25, 16  ;;  %v9376_v31 = vrot.slane %v9375_v52, 4  ;;  %v9089_v49 = vld [vmem:[#allocation2 + $0xbc] sm:$0x3]  ;;  %v11521_v52 = vld [vmem:[%s12001_s20 + $0xac] sm:$0xf] }
 0x582   : > { %10435 = vst [vmem:[%s15568_s29 + $0x20] sm:$0xff] %v10403_v15  ;;  %v6202_v15 = vadd.f32 %v16366_v54, %v5531_v11  ;;  %v9379_v27 = vor.u32 %v9378_v30, %v9377_v1  ;;  %v9388_v41 = vrot.slane %v9386_v51, 6  ;;  %v10062_v11 = vrot.slane %v10060_v40, 4  ;;  %v16369_v1 = vld [vmem:[#allocation30_spill] sm:$0xff]  ;;  %v15672_v51 = vpop.f32.mrf.mxu0  ;;  %v11520_v54 = vld [vmem:[%s12001_s20 + $0xa8] sm:$0xf] }
 0x583   : > { %v10263_v22 = vpop.f32.mrf.mxu2  ;;  %v10053_v5 = vor.u32 %v10052_v0, %v10049_v21  ;;  %v5536_v30 = vadd.f32 %v16370_v57, %v16369_v1  ;;  %v9051_v46 = vadd.f32 %v15495_v42, %v8625_v37  ;;  %v9406_v42 = vshrl.u32 %v9089_v49, 16 }
 0x584   : > { %v9613_v39 = vpop.f32.mrf.mxu1  ;;  %v10336_v10 = vadd.f32 %v10263_v22, %v9683_v62  ;;  %v15660_v22 = vpop.f32.mrf.mxu3  ;;  %v6884_v7 = vadd.f32 %v16367_v55, %v6202_v15  ;;  %v9381_v20 = vrot.slane %v9379_v27, 4  ;;  %v9380_v40 = vsel %vm13779_vm13, %v9376_v31, %v9379_v27 }
 0x585   : > { %v9684_v47 = vadd.f32 %v9613_v39, %v9050_v63  ;;  %v10068_v63 = vrot.slane %v10066_v4, 5  ;;  %v16372_v27 = vshrl.u32 %v15358_v60, 16  ;;  %v9409_v55 = vshll.u32 %v9089_v49, 16 }
 0x586   : > { %v10372_v29 = vadd.f32 %v15551_v2, %v10336_v10  ;;  %v15663_v10 = vrot.slane %v10056_v38, 5  ;;  %v9408_v49 = vrot.slane %v9406_v42, 5 }
 0x587   : > { %v9400_v0 = vrot.slane %v16372_v27, 5 }
 0x588   : > { %v10404_v48 = vmax.f32 %v10372_v29, 0.0  ;;  %v9389_v29 = vor.u32 %v9388_v41, %v9385_v61  ;;  %v10063_v32 = vor.u32 %v10062_v11, %v15663_v10  ;;  %v10054_v41 = vrot.slane %v10053_v5, 4 }
 0x589   : > { %v16373_v11 = vshll.u32 %v15358_v60, 16 }
 0x58a   : > { %10436 = vst [vmem:[%s15568_s29 + $0x28] sm:$0xff] %v10404_v48  ;;  %v7310_v48 = vadd.f32 %v16371_v45, %v6884_v7  ;;  %v9390_v15 = vsel %vm13779_vm13, %v9381_v20, %v9389_v29  ;;  %v10064_v21 = vrot.slane %v10063_v32, 4  ;;  %v10071_v7 = vshrl.u32 %v11520_v54, 16  ;;  %v16374_v20 = vld [vmem:[#allocation24_spill] sm:$0xff] }
 0x58b   : > { %v8626_v29 = vadd.f32 %v15598_v59, %v16374_v20  ;;  %v9502_v4 = vunpack.c.l.b16 %v9390_v15  ;;  %v9501_v32 = vunpack.c.l.b16 %v9380_v40  ;;  %v10059_v60 = vsel %vm12040_vm7, %v10054_v41, %v15663_v10  ;;  %v11522_v10 = vld [vmem:[%s12001_s20 + $0xb0] sm:$0x1] }
 0x58c   : > { %v9615_v62 = vpop.f32.mrf.mxu1  ;;  %v15688_v50 = vpop.f32.mrf.mxu3  ;;  %v10069_v1 = vsel %vm12040_vm7, %v10064_v21, %v10068_v63  ;;  %v9411_v45 = vrot.slane %v9409_v55, 6  ;;  %v16376_v63 = vld [vmem:[#allocation22_spill] sm:$0xff]  ;;  %v10090_v55 = vshll.u32 %v11522_v10, 16 }
 0x58d   : > { %9652 = vmatmul.bf16.gmra.mxu1 %v9520_v18  ;;  %v10266_v19 = vpop.f32.mrf.mxu2  ;;  %v11795_v18 = vld [vmem:[#allocation2 + $0xb4] sm:$0xe]  ;;  %v9685_v61 = vadd.f32 %v9615_v62, %v9051_v46  ;;  %v10084_v62 = vshrl.u32 %v11521_v52, 16  ;;  %v10073_v46 = vrot.slane %v10071_v7, 4  ;;  %v9521_v40 = vpack.c.b16 %v9502_v4, %v9501_v32  ;;  %v16378_v32 = vld [vmem:[#allocation29_spill] sm:$0xff] }
 0x58e   : > { %v10337_v33 = vadd.f32 %v10266_v19, %v9684_v47  ;;  %v9392_v6 = vshrl.u32 %v11795_v18, 16  ;;  %v9395_v43 = vshll.u32 %v11795_v18, 16  ;;  %v9401_v19 = vrot.slane %v16373_v11, 6  ;;  %v15700_v18 = vpop.f32.mrf.mxu0 }
 0x58f   : > { %v10086_v15 = vrot.slane %v10084_v62, 4  ;;  %v7944_v21 = vadd.f32 %v16376_v63, %v7310_v48  ;;  %v9052_v42 = vadd.f32 %v15608_v44, %v8626_v29  ;;  %v16377_v48 = vld [vmem:[#allocation53_spill] sm:$0xff] }
 0x590   : > { %v10373_v39 = vadd.f32 %v15551_v2, %v10337_v33  ;;  %11540 = vmatmul.msk.bf16.gmra.mxu2 %vm754_vm3, %v10186_v3  ;;  %v10074_v33 = vshll.u32 %v11520_v54, 16  ;;  %v10080_v3 = vshll.u32 %v11521_v52, 16  ;;  %v9397_v31 = vrot.slane %v9395_v43, 6 }
 0x591   : > { %v9402_v57 = vor.u32 %v9401_v19, %v9400_v0  ;;  %v10168_v43 = vunpack.c.l.b16 %v10069_v1 }
 0x592   : > { %v10405_v38 = vmax.f32 %v10373_v39, 0.0  ;;  %v9394_v39 = vrot.slane %v9392_v6, 5  ;;  %v15698_v54 = vrot.slane %v10080_v3, 5  ;;  %v10167_v6 = vunpack.c.l.b16 %v10059_v60 }
 0x593   : > { %v9404_v0 = vrot.slane %v9402_v57, 4  ;;  %v8627_v3 = vadd.f32 %v15620_v26, %v7944_v21 }
 0x594   : > { %10437 = vst [vmem:[%s15568_s29 + $0x30] sm:$0xff] %v10405_v38  ;;  %v10076_v38 = vrot.slane %v10074_v33, 5  ;;  %v9398_v52 = vor.u32 %v9397_v31, %v9394_v39  ;;  %v10087_v19 = vor.u32 %v10086_v15, %v15698_v54  ;;  %v15709_v62 = vpop.f32.mrf.mxu3  ;;  %v10092_v31 = vrot.slane %v10090_v55, 5 }
 0x595   : > { %v9618_v47 = vpop.f32.mrf.mxu1  ;;  %v10268_v25 = vpop.f32.mrf.mxu2  ;;  %v9053_v1 = vadd.f32 %v15629_v35, %v8627_v3  ;;  %v16379_v35 = vshrl.u32 %v15404_v36, 16 }
 0x596   : > { %v10338_v37 = vadd.f32 %v10268_v25, %v9685_v61  ;;  %v16375_v61 = vld [vmem:[#allocation47_spill] sm:$0xff]  ;;  %v9412_v25 = vor.u32 %v9411_v45, %v9408_v49  ;;  %v10077_v11 = vor.u32 %v10076_v38, %v10073_v46  ;;  %v9686_v7 = vadd.f32 %v9618_v47, %v9052_v42  ;;  %v11523_v49 = vld [vmem:[%s12001_s20 + $0xb4] sm:$0xf]  ;;  %v15721_v45 = vpop.f32.mrf.mxu0  ;;  %v11796_v38 = vld [vmem:[#allocation2 + $0xc0] sm:$0xe] }
 0x597   : > { %v6204_v41 = vadd.f32 %v16375_v61, %v5536_v30  ;;  %v9399_v33 = vrot.slane %v9398_v52, 4  ;;  %v10088_v47 = vrot.slane %v10087_v19, 4  ;;  %v9415_v15 = vshrl.u32 %v11796_v38, 16 }
 0x598   : > { %v10374_v5 = vadd.f32 %v15551_v2, %v10338_v37  ;;  %v10187_v37 = vpack.c.b16 %v10168_v43, %v10167_v6  ;;  %v9413_v4 = vsel %vm13779_vm13, %v9404_v0, %v9412_v25  ;;  %v10078_v39 = vrot.slane %v10077_v11, 4 }
 0x599   : > { %v6886_v20 = vadd.f32 %v16377_v48, %v6204_v41  ;;  %v9403_v29 = vsel %vm13779_vm13, %v9399_v33, %v9402_v57  ;;  %v10093_v43 = vsel %vm12040_vm7, %v10088_v47, %v10092_v31  ;;  %v9418_v52 = vshll.u32 %v11796_v38, 16 }
 0x59a   : > { %v10406_v59 = vmax.f32 %v10374_v5, 0.0  ;;  %v9090_v5 = vld [vmem:[#allocation2 + $0xc8] sm:$0x3]  ;;  %v9503_v46 = vunpack.c.l.b16 %v9403_v29  ;;  %v10083_v6 = vsel %vm12040_vm7, %v10078_v39, %v15698_v54  ;;  %v9423_v41 = vrot.slane %v16379_v35, 5 }
 0x59b   : > { %v7312_v60 = vadd.f32 %v16378_v32, %v6886_v20  ;;  %v9429_v10 = vshrl.u32 %v9090_v5, 16  ;;  %v10095_v63 = vshrl.u32 %v11523_v49, 16  ;;  %v10098_v21 = vshll.u32 %v11523_v49, 16  ;;  %v11525_v32 = vld [vmem:[%s12001_s20 + $0xbc] sm:$0x1] }
 0x59c   : > { %10438 = vst [vmem:[%s15568_s29 + $0x38] sm:$0xff] %v10406_v59  ;;  %v9504_v59 = vunpack.c.l.b16 %v9413_v4  ;;  %v16380_v0 = vshll.u32 %v15404_v36, 16  ;;  %v9432_v19 = vshll.u32 %v9090_v5, 16  ;;  %v10169_v48 = vunpack.c.l.b16 %v10083_v6 }
 0x59d   : > { %9657 = vmatmul.bf16.gmra.mxu1 %v9521_v40  ;;  %v9620_v27 = vpop.f32.mrf.mxu1  ;;  %v11524_v40 = vld [vmem:[%s12001_s20 + $0xb8] sm:$0xf]  ;;  %v10170_v20 = vunpack.c.l.b16 %v10093_v43  ;;  %v9420_v29 = vrot.slane %v9418_v52, 6  ;;  %v9431_v4 = vrot.slane %v9429_v10, 5  ;;  %v10097_v39 = vrot.slane %v10095_v63, 4 }
 0x59e   : > { %v9687_v61 = vadd.f32 %v9620_v27, %v9053_v1  ;;  %v9424_v11 = vrot.slane %v16380_v0, 6  ;;  %v10104_v55 = vshll.u32 %v11524_v40, 16  ;;  %v10108_v54 = vshrl.u32 %v11524_v40, 16  ;;  %v15742_v1 = vpop.f32.mrf.mxu0  ;;  %v9091_v0 = vld [vmem:[#allocation2 + $0xd4] sm:$0x3] }
 0x59f   : > { %v10271_v30 = vpop.f32.mrf.mxu2  ;;  %v9522_v3 = vpack.c.b16 %v9504_v59, %v9503_v46  ;;  %v10100_v47 = vrot.slane %v10098_v21, 5  ;;  %v10114_v43 = vshll.u32 %v11525_v32, 16 }
 0x5a0   : > { %v10339_v44 = vadd.f32 %v10271_v30, %v9686_v7  ;;  %11541 = vmatmul.msk.bf16.gmra.mxu2 %vm754_vm3, %v10187_v37  ;;  %v7946_v7 = vadd.f32 %v15089_v14, %v7312_v60  ;;  %v16381_v37 = vld [vmem:[#allocation19_spill] sm:$0xff]  ;;  %v15737_v30 = vpop.f32.mrf.mxu3  ;;  %v9425_v31 = vor.u32 %v9424_v11, %v9423_v41  ;;  %v9434_v14 = vrot.slane %v9432_v19, 6 }
 0x5a1   : > { %v8628_v33 = vadd.f32 %v15637_v16, %v16381_v37  ;;  %v10110_v5 = vrot.slane %v10108_v54, 4  ;;  %v10101_v59 = vor.u32 %v10100_v47, %v10097_v39  ;;  %v11797_v11 = vld [vmem:[#allocation2 + $0xcc] sm:$0xe]  ;;  %v16383_v54 = vshll.u32 %v15452_v28, 16 }
 0x5a2   : > { %v10375_v26 = vadd.f32 %v15551_v2, %v10339_v44  ;;  %v9417_v44 = vrot.slane %v9415_v15, 5  ;;  %v8629_v60 = vadd.f32 %v15660_v22, %v7946_v7  ;;  %v9427_v15 = vrot.slane %v9425_v31, 4 }
 0x5a3   : > { %v9054_v49 = vadd.f32 %v15650_v58, %v8628_v33  ;;  %v9435_v40 = vor.u32 %v9434_v14, %v9431_v4  ;;  %v10102_v35 = vrot.slane %v10101_v59, 4  ;;  %v9441_v19 = vshll.u32 %v11797_v11, 16  ;;  %v11527_v4 = vld [vmem:[%s12001_s20 + $0xc4] sm:$0xf] }
 0x5a4   : > { %v10407_v57 = vmax.f32 %v10375_v26, 0.0  ;;  %v10106_v26 = vrot.slane %v10104_v55, 5  ;;  %v9421_v46 = vor.u32 %v9420_v29, %v9417_v44  ;;  %v9055_v10 = vadd.f32 %v15672_v51, %v8629_v60 }
 0x5a5   : > { %v9436_v63 = vsel %vm13779_vm13, %v9427_v15, %v9435_v40  ;;  %v16382_v55 = vshrl.u32 %v15452_v28, 16  ;;  %v9447_v7 = vrot.slane %v16383_v54, 6  ;;  %v10132_v59 = vshrl.u32 %v11527_v4, 16  ;;  %v16384_v15 = vld [vmem:[#allocation31_spill] sm:$0xff]  ;;  %v16385_v40 = vld [vmem:[#allocation33_spill] sm:$0xff] }
 0x5a6   : > { %10439 = vst [vmem:[%s15568_s29 + $0x40] sm:$0xff] %v10407_v57  ;;  %v10188_v57 = vpack.c.b16 %v10170_v20, %v10169_v48  ;;  %v10111_v6 = vor.u32 %v10110_v5, %v10106_v26  ;;  %v9422_v22 = vrot.slane %v9421_v46, 4  ;;  %v11526_v48 = vld [vmem:[%s12001_s20 + $0xc0] sm:$0xf]  ;;  %v9506_v20 = vunpack.c.l.b16 %v9436_v63  ;;  %v15765_v5 = vpop.f32.mrf.mxu0  ;;  %v16386_v63 = vld [vmem:[#allocation27_spill] sm:$0xff] }
 0x5a7   : > { %v9623_v42 = vpop.f32.mrf.mxu1  ;;  %v10273_v25 = vpop.f32.mrf.mxu2  ;;  %v9446_v51 = vrot.slane %v16382_v55, 5  ;;  %v10107_v44 = vsel %vm12040_vm7, %v10102_v35, %v10106_v26  ;;  %v10119_v47 = vshrl.u32 %v11526_v48, 16  ;;  %v10122_v14 = vshll.u32 %v11526_v48, 16  ;;  %v16387_v48 = vld [vmem:[#allocation56_spill] sm:$0xff] }
 0x5a8   : > { %v10340_v27 = vadd.f32 %v10273_v25, %v9687_v61  ;;  %v9688_v52 = vadd.f32 %v9623_v42, %v9054_v49  ;;  %v15748_v41 = vpop.f32.mrf.mxu3  ;;  %v10112_v21 = vrot.slane %v10111_v6, 4  ;;  %v10116_v25 = vrot.slane %v10114_v43, 5 }
 0x5a9   : > { %v9438_v42 = vshrl.u32 %v11797_v11, 16  ;;  %v9426_v33 = vsel %vm13779_vm13, %v9422_v22, %v9425_v31  ;;  %v9448_v32 = vor.u32 %v9447_v7, %v9446_v51  ;;  %v10128_v46 = vshll.u32 %v11527_v4, 16 }
 0x5aa   : > { %v10376_v36 = vadd.f32 %v15551_v2, %v10340_v27  ;;  %v9452_v27 = vshrl.u32 %v9091_v0, 16  ;;  %v10117_v28 = vsel %vm12040_vm7, %v10112_v21, %v10116_v25  ;;  %v5541_v6 = vadd.f32 %v16385_v40, %v16384_v15  ;;  %v11528_v25 = vld [vmem:[%s12001_s20 + $0xc8] sm:$0x1]  ;;  %v16388_v15 = vld [vmem:[#allocation32_spill] sm:$0xff] }
 0x5ab   : > { %v9440_v29 = vrot.slane %v9438_v42, 5  ;;  %v10172_v22 = vunpack.c.l.b16 %v10117_v28  ;;  %v9450_v55 = vrot.slane %v9448_v32, 4  ;;  %v8630_v54 = vadd.f32 %v15688_v50, %v15133_v13 }
 0x5ac   : > { %v10408_v16 = vmax.f32 %v10376_v36, 0.0  ;;  %v9443_v36 = vrot.slane %v9441_v19, 6  ;;  %v9454_v60 = vrot.slane %v9452_v27, 5  ;;  %v6206_v21 = vadd.f32 %v16386_v63, %v5541_v6 }
 0x5ad   : > { %9662 = vmatmul.bf16.gmra.mxu1 %v9522_v3  ;;  %v9455_v3 = vshll.u32 %v9091_v0, 16  ;;  %v10134_v0 = vrot.slane %v10132_v59, 4  ;;  %v9056_v13 = vadd.f32 %v15700_v18, %v8630_v54 }
 0x5ae   : > { %10440 = vst [vmem:[%s15568_s29 + $0x48] sm:$0xff] %v10408_v16  ;;  %v9505_v16 = vunpack.c.l.b16 %v9426_v33 }
 0x5af   : > { %v9625_v38 = vpop.f32.mrf.mxu1  ;;  %v9457_v26 = vrot.slane %v9455_v3, 6  ;;  %v10138_v3 = vshll.u32 %v11528_v25, 16  ;;  %v16392_v25 = vld [vmem:[#allocation60_spill] sm:$0xff] }
 0x5b0   : > { %11542 = vmatmul.msk.bf16.gmra.mxu2 %vm754_vm3, %v10188_v57  ;;  %v9689_v31 = vadd.f32 %v9625_v38, %v9055_v10  ;;  %v9444_v57 = vor.u32 %v9443_v36, %v9440_v29  ;;  %v10124_v38 = vrot.slane %v10122_v14, 5  ;;  %v10130_v10 = vrot.slane %v10128_v46, 5  ;;  %v15772_v11 = vpop.f32.mrf.mxu3 }
 0x5b1   : > { %v9458_v51 = vor.u32 %v9457_v26, %v9454_v60 }
 0x5b2   : > { %v10276_v61 = vpop.f32.mrf.mxu2  ;;  %v9445_v19 = vrot.slane %v9444_v57, 4  ;;  %v10135_v27 = vor.u32 %v10134_v0, %v10130_v10 }
 0x5b3   : > { %v10341_v58 = vadd.f32 %v10276_v61, %v9688_v52  ;;  %v9523_v52 = vpack.c.b16 %v9506_v20, %v9505_v16  ;;  %v10171_v61 = vunpack.c.l.b16 %v10107_v44  ;;  %v6888_v20 = vadd.f32 %v16387_v48, %v6206_v21 }
 0x5b4   : > { %v9449_v29 = vsel %vm13779_vm13, %v9445_v19, %v9448_v32  ;;  %v9459_v36 = vsel %vm13779_vm13, %v9450_v55, %v9458_v51  ;;  %v10136_v28 = vrot.slane %v10135_v27, 4  ;;  %v16393_v55 = vld [vmem:[#allocation11_spill] sm:$0xff] }
 0x5b5   : > { %v10377_v37 = vadd.f32 %v15551_v2, %v10341_v58  ;;  %v10121_v58 = vrot.slane %v10119_v47, 4  ;;  %v10189_v7 = vpack.c.b16 %v10172_v22, %v10171_v61  ;;  %v7314_v4 = vadd.f32 %v15115_v9, %v6888_v20  ;;  %v16390_v61 = vld [vmem:[#allocation51_spill] sm:$0xff] }
 0x5b6   : > { %v10140_v47 = vrot.slane %v10138_v3, 5  ;;  %v9507_v16 = vunpack.c.l.b16 %v9449_v29  ;;  %v9508_v60 = vunpack.c.l.b16 %v9459_v36  ;;  %v16395_v36 = vld [vmem:[#allocation36_spill] sm:$0xff] }
 0x5b7   : > { %v10409_v39 = vmax.f32 %v10377_v37, 0.0  ;;  %v10125_v33 = vor.u32 %v10124_v38, %v10121_v58  ;;  %v7948_v14 = vadd.f32 %v15149_v23, %v7314_v4  ;;  %v16389_v23 = vld [vmem:[#allocation34_spill] sm:$0xff]  ;;  %v16391_v38 = vld [vmem:[#allocation13_spill] sm:$0xff] }
 0x5b8   : > { %v8580_v9 = vpop.f32.mrf.mxu3  ;;  %v10141_v18 = vsel %vm12040_vm7, %v10136_v28, %v10140_v47  ;;  %v9524_v59 = vpack.c.b16 %v9508_v60, %v9507_v16  ;;  %v16396_v4 = vld [vmem:[#allocation37_spill] sm:$0xff]  ;;  %v16397_v47 = vld [vmem:[#allocation55_spill] sm:$0xff] }
 0x5b9   : > { %10441 = vst [vmem:[%s15568_s29 + $0x50] sm:$0xff] %v10409_v39  ;;  %v15784_v39 = vpop.f32.mrf.mxu0  ;;  %v10126_v50 = vrot.slane %v10125_v33, 4  ;;  %v8631_v17 = vadd.f32 %v15709_v62, %v7948_v14  ;;  %v16398_v60 = vld [vmem:[#allocation73_spill] sm:$0xff] }
 0x5ba   : > { %v9628_v49 = vpop.f32.mrf.mxu1  ;;  %v10278_v43 = vpop.f32.mrf.mxu2 }
 0x5bb   : > { %v10342_v35 = vadd.f32 %v10278_v43, %v9689_v31  ;;  %v9690_v31 = vadd.f32 %v9628_v49, %v9056_v13  ;;  %v10131_v26 = vsel %vm12040_vm7, %v10126_v50, %v10130_v10  ;;  %v5546_v49 = vadd.f32 %v16389_v23, %v16388_v15 }
 0x5bc   : > { %v9057_v6 = vadd.f32 %v15721_v45, %v8631_v17  ;;  %v10173_v62 = vunpack.c.l.b16 %v10131_v26  ;;  %v8632_v10 = vadd.f32 %v15737_v30, %v16391_v38  ;;  %v5551_v13 = vadd.f32 %v16396_v4, %v16395_v36  ;;  %v16399_v17 = vld [vmem:[#allocation63_spill] sm:$0xff] }
 0x5bd   : > { %9667 = vmatmul.bf16.gmra.mxu1 %v9523_v52  ;;  %v10378_v42 = vadd.f32 %v15551_v2, %v10342_v35  ;;  %v10174_v52 = vunpack.c.l.b16 %v10141_v18  ;;  %v6208_v22 = vadd.f32 %v16390_v61, %v5546_v49  ;;  %v16401_v49 = vld [vmem:[#allocation57_spill] sm:$0xff]  ;;  %v15827_v61 = vld [vmem:[%s15947_s5] ss:$0 sm:$0xff] }
 0x5be   : > { %v9058_v54 = vadd.f32 %v15742_v1, %v8632_v10  ;;  %v6210_v14 = vadd.f32 %v16397_v47, %v5551_v13 }
 0x5bf   : > { %v10410_v37 = vmax.f32 %v10378_v42, 0.0  ;;  %v10190_v21 = vpack.c.b16 %v10174_v52, %v10173_v62  ;;  %v6890_v0 = vadd.f32 %v16392_v25, %v6208_v22 }
 0x5c0   : > { %11543 = vmatmul.msk.bf16.gmra.mxu2 %vm754_vm3, %v10189_v7  ;;  %v8583_v42 = vpop.f32.mrf.mxu3 }
 0x5c1   : > { %10442 = vst [vmem:[%s15568_s29 + $0x58] sm:$0xff] %v10410_v37  ;;  %v9006_v35 = vpop.f32.mrf.mxu0  ;;  %v7316_v51 = vadd.f32 %v16393_v55, %v6890_v0  ;;  %v16394_v37 = vld [vmem:[#allocation15_spill] sm:$0xff] }
 0x5c2   : > { %v9630_v44 = vpop.f32.mrf.mxu1 }
 0x5c3   : > { %v10281_v32 = vpop.f32.mrf.mxu2  ;;  %v9691_v58 = vadd.f32 %v9630_v44, %v9057_v6  ;;  %v7950_v33 = vadd.f32 %v16394_v37, %v7316_v51 }
 0x5c4   : > { %v10343_v57 = vadd.f32 %v10281_v32, %v9690_v31 }
 0x5c5   : > { %v8633_v3 = vadd.f32 %v15748_v41, %v7950_v33  ;;  %v8634_v41 = vadd.f32 %v15772_v11, %v16398_v60 }
 0x5c6   : > { %v10379_v46 = vadd.f32 %v15551_v2, %v10343_v57  ;;  %v6892_v57 = vadd.f32 %v16399_v17, %v6210_v14  ;;  %v16409_v14 = vld [vmem:[#allocation14_spill] sm:$0xff] }
 0x5c7   : > { %v9059_v1 = vadd.f32 %v15765_v5, %v8633_v3  ;;  %v9060_v15 = vadd.f32 %v15784_v39, %v8634_v41  ;;  %v16403_v39 = vld [vmem:[#allocation38_spill] sm:$0xff] }
 0x5c8   : > { %v10411_v43 = vmax.f32 %v10379_v46, 0.0  ;;  %v8585_v28 = vpop.f32.mrf.mxu3 }
 0x5c9   : > { %v9009_v48 = vpop.f32.mrf.mxu0 }
 0x5ca   : > { %v9633_v40 = vpop.f32.mrf.mxu1  ;;  %10443 = vst [vmem:[%s15568_s29 + $0x60] sm:$0xff] %v10411_v43 }
 0x5cb   : > { %v10283_v34 = vpop.f32.mrf.mxu2  ;;  %v9692_v27 = vadd.f32 %v9633_v40, %v9058_v54  ;;  %v16406_v54 = vld [vmem:[#allocation66_spill] sm:$0xff] }
 0x5cc   : > { %v10344_v63 = vadd.f32 %v10283_v34, %v9691_v58  ;;  %v16402_v58 = vld [vmem:[#allocation12_spill] sm:$0xff] }
 0x5cd   : > { %9672 = vmatmul.bf16.gmra.mxu1 %v9524_v59  ;;  %v16400_v59 = vld [vmem:[#allocation71_spill] sm:$0xff]  ;;  %v5556_v34 = vadd.f32 %v16403_v39, %v16402_v58 }
 0x5ce   : > { %v10380_v45 = vadd.f32 %v15551_v2, %v10344_v63  ;;  %v7318_v5 = vadd.f32 %v16400_v59, %v6892_v57 }
 0x5d0   : > { %v10412_v7 = vmax.f32 %v10380_v45, 0.0  ;;  %11544 = vmatmul.msk.bf16.gmra.mxu2 %vm754_vm3, %v10190_v21  ;;  %v7952_v40 = vadd.f32 %v16401_v49, %v7318_v5  ;;  %v8588_v43 = vpop.f32.mrf.mxu3  ;;  %v16404_v21 = vld [vmem:[#allocation58_spill] sm:$0xff]  ;;  %v16405_v45 = vld [vmem:[#allocation75_spill] sm:$0xff]  ;;  %v16413_v5 = vld [vmem:[#allocation68_spill] sm:$0xff] }
 0x5d1   : > { %v9011_v26 = vpop.f32.mrf.mxu0  ;;  %v6212_v25 = vadd.f32 %v16404_v21, %v5556_v34  ;;  %v16416_v21 = vld [vmem:[#allocation18_spill] sm:$0xff] }
 0x5d2   : > { %v9635_v19 = vpop.f32.mrf.mxu1  ;;  %10444 = vst [vmem:[%s15568_s29 + $0x68] sm:$0xff] %v10412_v7  ;;  %v8635_v11 = vadd.f32 %v8580_v9, %v7952_v40  ;;  %v16414_v40 = vld [vmem:[#allocation77_spill] sm:$0xff] }
 0x5d3   : > { %v10286_v30 = vpop.f32.mrf.mxu2  ;;  %v9693_v31 = vadd.f32 %v9635_v19, %v9059_v1  ;;  %v8636_v19 = vadd.f32 %v8583_v42, %v16405_v45  ;;  %v6894_v7 = vadd.f32 %v16406_v54, %v6212_v25  ;;  %v16417_v25 = vld [vmem:[#allocation43_spill] sm:$0xff] }
 0x5d4   : > { %v10345_v20 = vadd.f32 %v10286_v30, %v9692_v27  ;;  %v9061_v10 = vadd.f32 %v9006_v35, %v8635_v11  ;;  %v16407_v27 = vld [vmem:[#allocation74_spill] sm:$0xff] }
 0x5d5   : > { %v7320_v30 = vadd.f32 %v16407_v27, %v6894_v7  ;;  %v9062_v3 = vadd.f32 %v9009_v48, %v8636_v19  ;;  %v16411_v48 = vld [vmem:[#allocation61_spill] sm:$0xff]  ;;  %v16420_v27 = vld [vmem:[#allocation26_spill] sm:$0xff] }
 0x5d6   : > { %v10381_v44 = vadd.f32 %v15551_v2, %v10345_v20  ;;  %v16408_v20 = vld [vmem:[#allocation76_spill] sm:$0xff] }
 0x5d8   : > { %v10413_v50 = vmax.f32 %v10381_v44, 0.0  ;;  %v8590_v51 = vpop.f32.mrf.mxu3  ;;  %v7954_v44 = vadd.f32 %v16408_v20, %v7320_v30  ;;  %v16421_v20 = vld [vmem:[#allocation62_spill] sm:$0xff] }
 0x5d9   : > { %v9014_v38 = vpop.f32.mrf.mxu0 }
 0x5da   : > { %v9638_v29 = vpop.f32.mrf.mxu1  ;;  %10445 = vst [vmem:[%s15568_s29 + $0x70] sm:$0xff] %v10413_v50  ;;  %v8637_v13 = vadd.f32 %v8585_v28, %v7954_v44 }
 0x5db   : > { %v10288_v16 = vpop.f32.mrf.mxu2  ;;  %v9694_v6 = vadd.f32 %v9638_v29, %v9060_v15 }
 0x5dc   : > { %v10346_v32 = vadd.f32 %v10288_v16, %v9693_v31  ;;  %v16410_v31 = vld [vmem:[#allocation16_spill] sm:$0xff]  ;;  %v9063_v60 = vadd.f32 %v9011_v26, %v8637_v13  ;;  %v16422_v13 = vld [vmem:[#allocation81_spill] sm:$0xff] }
 0x5dd   : > { %v5561_v16 = vadd.f32 %v16410_v31, %v16409_v14 }
 0x5de   : > { %v10382_v18 = vadd.f32 %v15551_v2, %v10346_v32 }
 0x5df   : > { %v6214_v32 = vadd.f32 %v16411_v48, %v5561_v16  ;;  %v16424_v48 = vld [vmem:[#allocation9_spill] sm:$0xff] }
 0x5e0   : > { %v10414_v23 = vmax.f32 %v10382_v18, 0.0  ;;  %v8593_v50 = vpop.f32.mrf.mxu3  ;;  %v16412_v18 = vld [vmem:[#allocation78_spill] sm:$0xff] }
 0x5e1   : > { %v9016_v29 = vpop.f32.mrf.mxu0  ;;  %v6896_v15 = vadd.f32 %v16413_v5, %v6214_v32 }
 0x5e2   : > { %v9640_v46 = vpop.f32.mrf.mxu1  ;;  %10446 = vst [vmem:[%s15568_s29 + $0x78] sm:$0xff] %v10414_v23 }
 0x5e3   : > { %v10291_v62 = vpop.f32.mrf.mxu2  ;;  %v9695_v0 = vadd.f32 %v9640_v46, %v9061_v10  ;;  %v8638_v46 = vadd.f32 %v8588_v43, %v16412_v18  ;;  %v16425_v18 = vld [vmem:[#allocation67_spill] sm:$0xff] }
 0x5e4   : > { %v10347_v52 = vadd.f32 %v10291_v62, %v9694_v6  ;;  %v7322_v6 = vadd.f32 %v16414_v40, %v6896_v15 }
 0x5e5   : > { %v9064_v62 = vadd.f32 %v9014_v38, %v8638_v46  ;;  %v16418_v38 = vld [vmem:[#allocation64_spill] sm:$0xff] }
 0x5e6   : > { %v10383_v2 = vadd.f32 %v15827_v61, %v10347_v52  ;;  %v16415_v52 = vld [vmem:[#allocation79_spill] sm:$0xff] }
 0x5e8   : > { %v10415_v63 = vmax.f32 %v10383_v2, 0.0  ;;  %v8595_v11 = vpop.f32.mrf.mxu3  ;;  %v7956_v2 = vadd.f32 %v16415_v52, %v7322_v6 }
 0x5e9   : > { %v9019_v59 = vpop.f32.mrf.mxu0 }
 0x5ea   : > { %v9643_v22 = vpop.f32.mrf.mxu1  ;;  %10447 = vst [vmem:[%s15568_s29 + $0x80] sm:$0xff] %v10415_v63  ;;  %v8639_v39 = vadd.f32 %v8590_v51, %v7956_v2 }
 0x5eb   : > { %v10293_v9 = vpop.f32.mrf.mxu2  ;;  %v9696_v36 = vadd.f32 %v9643_v22, %v9062_v3 }
 0x5ec   : > { %v10348_v55 = vadd.f32 %v10293_v9, %v9695_v0  ;;  %v5566_v0 = vadd.f32 %v16417_v25, %v16416_v21  ;;  %v9065_v9 = vadd.f32 %v9016_v29, %v8639_v39  ;;  %v16428_v25 = vld [vmem:[#allocation20_spill] sm:$0xff] }
 0x5ee   : > { %v10384_v37 = vadd.f32 %v15827_v61, %v10348_v55  ;;  %v6216_v19 = vadd.f32 %v16418_v38, %v5566_v0  ;;  %v16429_v0 = vld [vmem:[#allocation50_spill] sm:$0xff] }
 0x5f0   : > { %v10416_v35 = vmax.f32 %v10384_v37, 0.0  ;;  %v8598_v54 = vpop.f32.mrf.mxu3  ;;  %v16419_v37 = vld [vmem:[#allocation80_spill] sm:$0xff]  ;;  %v6898_v30 = vadd.f32 %v16420_v27, %v6216_v19  ;;  %v16432_v27 = vld [vmem:[#allocation46_spill] sm:$0xff] }
 0x5f1   : > { %v9021_v34 = vpop.f32.mrf.mxu0  ;;  %v8642_v15 = vadd.f32 %v8598_v54, %v15428_v53 }
 0x5f2   : > { %v9645_v33 = vpop.f32.mrf.mxu1  ;;  %10448 = vst [vmem:[%s15568_s29 + $0x88] sm:$0xff] %v10416_v35  ;;  %v7324_v44 = vadd.f32 %v16421_v20, %v6898_v30 }
 0x5f3   : > { %v10296_v4 = vpop.f32.mrf.mxu2  ;;  %v9697_v17 = vadd.f32 %v9645_v33, %v9063_v60  ;;  %v8640_v33 = vadd.f32 %v8593_v50, %v16419_v37  ;;  %v16431_v37 = vld [vmem:[#allocation84_spill] sm:$0xff] }
 0x5f4   : > { %v10349_v42 = vadd.f32 %v10296_v4, %v9696_v36 }
 0x5f5   : > { %v9066_v29 = vadd.f32 %v9019_v59, %v8640_v33 }
 0x5f6   : > { %v10385_v1 = vadd.f32 %v15827_v61, %v10349_v42  ;;  %v7958_v42 = vadd.f32 %v16422_v13, %v7324_v44  ;;  %v16433_v44 = vld [vmem:[#allocation83_spill] sm:$0xff]  ;;  %v16434_v13 = vld [vmem:[#allocation85_spill] sm:$0xff] }
 0x5f8   : > { %v10417_v41 = vmax.f32 %v10385_v1, 0.0  ;;  %v8641_v14 = vadd.f32 %v8595_v11, %v7958_v42  ;;  %v8600_v50 = vpop.f32.mrf.mxu3  ;;  %v16427_v11 = vld [vmem:[#allocation82_spill] sm:$0xff] }
 0x5f9   : > { %v9024_v36 = vpop.f32.mrf.mxu0 }
 0x5fa   : > { %v9648_v47 = vpop.f32.mrf.mxu1  ;;  %10449 = vst [vmem:[%s15568_s29 + $0x90] sm:$0xff] %v10417_v41  ;;  %v16423_v41 = vld [vmem:[#allocation45_spill] sm:$0xff]  ;;  %v9068_v2 = vadd.f32 %v9024_v36, %v8642_v15 }
 0x5fb   : > { %v10298_v57 = vpop.f32.mrf.mxu2  ;;  %v9698_v22 = vadd.f32 %v9648_v47, %v9064_v62  ;;  %v5571_v32 = vadd.f32 %v16424_v48, %v16423_v41  ;;  %v16436_v41 = vld [vmem:[#allocation54_spill] sm:$0xff] }
 0x5fc   : > { %v10350_v28 = vadd.f32 %v10298_v57, %v9697_v17  ;;  %v9067_v17 = vadd.f32 %v9021_v34, %v8641_v14 }
 0x5fd   : > { %v6218_v46 = vadd.f32 %v16425_v18, %v5571_v32 }
 0x5fe   : > { %v10386_v23 = vadd.f32 %v15827_v61, %v10350_v28 }
 0x600   : > { %v10418_v26 = vmax.f32 %v10386_v23, 0.0  ;;  %v8603_v62 = vpop.f32.mrf.mxu3 }
 0x601   : > { %v9026_v59 = vpop.f32.mrf.mxu0  ;;  %v8644_v33 = vadd.f32 %v8603_v62, %v16431_v37 }
 0x602   : > { %v9650_v49 = vpop.f32.mrf.mxu1  ;;  %10450 = vst [vmem:[%s15568_s29 + $0x98] sm:$0xff] %v10418_v26 }
 0x603   : > { %v10301_v58 = vpop.f32.mrf.mxu2  ;;  %v9699_v55 = vadd.f32 %v9650_v49, %v9065_v9  ;;  %v16426_v49 = vld [vmem:[#allocation35_spill] sm:$0xff]  ;;  %v5576_v9 = vadd.f32 %v16429_v0, %v16428_v25 }
 0x604   : > { %v10351_v43 = vadd.f32 %v10301_v58, %v9698_v22  ;;  %v6900_v40 = vadd.f32 %v16426_v49, %v6218_v46  ;;  %v16437_v46 = vld [vmem:[#allocation44_spill] sm:$0xff] }
 0x606   : > { %v10387_v10 = vadd.f32 %v15827_v61, %v10351_v43  ;;  %v7326_v52 = vadd.f32 %v16427_v11, %v6900_v40  ;;  %v16438_v40 = vld [vmem:[#allocation72_spill] sm:$0xff] }
 0x608   : > { %v10419_v45 = vmax.f32 %v10387_v10, 0.0  ;;  %v7960_v58 = vadd.f32 %v15423_v56, %v7326_v52  ;;  %v8605_v19 = vpop.f32.mrf.mxu3 }
 0x609   : > { %v9029_v10 = vpop.f32.mrf.mxu0 }
 0x60a   : > { %v9653_v63 = vpop.f32.mrf.mxu1  ;;  %10451 = vst [vmem:[%s15568_s29 + $0xa0] sm:$0xff] %v10419_v45  ;;  %v8643_v34 = vadd.f32 %v8600_v50, %v7960_v58 }
 0x60b   : > { %v10303_v7 = vpop.f32.mrf.mxu2  ;;  %v9700_v1 = vadd.f32 %v9653_v63, %v9066_v29  ;;  %v9070_v29 = vadd.f32 %v9029_v10, %v8644_v33  ;;  %v16443_v33 = vld [vmem:[#allocation87_spill] sm:$0xff] }
 0x60c   : > { %v10352_v51 = vadd.f32 %v10303_v7, %v9699_v55  ;;  %v9069_v45 = vadd.f32 %v9026_v59, %v8643_v34  ;;  %v16430_v55 = vld [vmem:[#allocation69_spill] sm:$0xff] }
 0x60d   : > { %v6220_v54 = vadd.f32 %v16430_v55, %v5576_v9 }
 0x60e   : > { %v10388_v3 = vadd.f32 %v15827_v61, %v10352_v51 }
 0x60f   : > { %v6902_v30 = vadd.f32 %v16432_v27, %v6220_v54  ;;  %v16441_v54 = vld [vmem:[#allocation49_spill] sm:$0xff] }
 0x610   : > { %v10420_v4 = vmax.f32 %v10388_v3, 0.0 }
 0x611   : > { %v9031_v3 = vpop.f32.mrf.mxu0  ;;  %v7328_v36 = vadd.f32 %v16433_v44, %v6902_v30 }
 0x612   : > { %v9655_v35 = vpop.f32.mrf.mxu1  ;;  %10452 = vst [vmem:[%s15568_s29 + $0xa8] sm:$0xff] %v10420_v4 }
 0x613   : > { %v10306_v47 = vpop.f32.mrf.mxu2  ;;  %v9701_v28 = vadd.f32 %v9655_v35, %v9067_v17  ;;  %v7962_v42 = vadd.f32 %v16434_v13, %v7328_v36 }
 0x614   : > { %v10353_v31 = vadd.f32 %v10306_v47, %v9700_v1  ;;  %v8608_v47 = vpop.f32.mrf.mxu3 }
 0x615   : > { %v8646_v15 = vadd.f32 %v8608_v47, %v15501_v8 }
 0x616   : > { %v10389_v16 = vadd.f32 %v15827_v61, %v10353_v31  ;;  %v8645_v31 = vadd.f32 %v8605_v19, %v7962_v42 }
 0x618   : > { %v10421_v57 = vmax.f32 %v10389_v16, 0.0  ;;  %v9071_v17 = vadd.f32 %v9031_v3, %v8645_v31 }
 0x619   : > { %v9034_v32 = vpop.f32.mrf.mxu0 }
 0x61a   : > { %v9658_v60 = vpop.f32.mrf.mxu1  ;;  %10453 = vst [vmem:[%s15568_s29 + $0xb0] sm:$0xff] %v10421_v57  ;;  %v9072_v52 = vadd.f32 %v9034_v32, %v8646_v15 }
 0x61b   : > { %v10308_v5 = vpop.f32.mrf.mxu2  ;;  %v9702_v39 = vadd.f32 %v9658_v60, %v9068_v2  ;;  %v16435_v60 = vld [vmem:[#allocation52_spill] sm:$0xff] }
 0x61c   : > { %v10354_v23 = vadd.f32 %v10308_v5, %v9701_v28  ;;  %v5581_v48 = vadd.f32 %v16436_v41, %v16435_v60  ;;  %v8610_v49 = vpop.f32.mrf.mxu3 }
 0x61e   : > { %v10390_v6 = vadd.f32 %v15827_v61, %v10354_v23  ;;  %v6222_v59 = vadd.f32 %v16437_v46, %v5581_v48 }
 0x620   : > { %v10422_v22 = vmax.f32 %v10390_v6, 0.0  ;;  %v6904_v6 = vadd.f32 %v16438_v40, %v6222_v59 }
 0x621   : > { %v9036_v58 = vpop.f32.mrf.mxu0 }
 0x622   : > { %v9660_v26 = vpop.f32.mrf.mxu1  ;;  %10454 = vst [vmem:[%s15568_s29 + $0xb8] sm:$0xff] %v10422_v22 }
 0x623   : > { %v10311_v43 = vpop.f32.mrf.mxu2  ;;  %v9703_v7 = vadd.f32 %v9660_v26, %v9069_v45  ;;  %v16439_v26 = vld [vmem:[#allocation86_spill] sm:$0xff] }
 0x624   : > { %v10355_v53 = vadd.f32 %v10311_v43, %v9702_v39  ;;  %v7330_v11 = vadd.f32 %v16439_v26, %v6904_v6 }
 0x626   : > { %v10391_v63 = vadd.f32 %v15827_v61, %v10355_v53  ;;  %v7964_v22 = vadd.f32 %v15505_v12, %v7330_v11 }
 0x628   : > { %v10423_v38 = vmax.f32 %v10391_v63, 0.0  ;;  %v8647_v10 = vadd.f32 %v8610_v49, %v7964_v22  ;;  %v8613_v63 = vpop.f32.mrf.mxu3 }
 0x629   : > { %v9039_v9 = vpop.f32.mrf.mxu0 }
 0x62a   : > { %v9663_v21 = vpop.f32.mrf.mxu1  ;;  %10455 = vst [vmem:[%s15568_s29 + $0xc0] sm:$0xff] %v10423_v38  ;;  %v16440_v38 = vld [vmem:[#allocation88_spill] sm:$0xff] }
 0x62b   : > { %v10313_v56 = vpop.f32.mrf.mxu2  ;;  %v9704_v1 = vadd.f32 %v9663_v21, %v9070_v29  ;;  %v9073_v21 = vadd.f32 %v9036_v58, %v8647_v10  ;;  %v8648_v19 = vadd.f32 %v8613_v63, %v16440_v38 }
 0x62c   : > { %v10356_v51 = vadd.f32 %v10313_v56, %v9703_v7  ;;  %v16442_v7 = vld [vmem:[#allocation59_spill] sm:$0xff] }
 0x62d   : > { %v6906_v56 = vadd.f32 %v16442_v7, %v16441_v54  ;;  %v9074_v27 = vadd.f32 %v9039_v9, %v8648_v19 }
 0x62e   : > { %v10392_v35 = vadd.f32 %v15827_v61, %v10356_v51 }
 0x62f   : > { %v7332_v51 = vadd.f32 %v16443_v33, %v6906_v56 }
 0x630   : > { %v10424_v4 = vmax.f32 %v10392_v35, 0.0  ;;  %v8615_v3 = vpop.f32.mrf.mxu3 }
 0x631   : > { %v7966_v35 = vadd.f32 %v15537_v24, %v7332_v51 }
 0x632   : > { %v9665_v20 = vpop.f32.mrf.mxu1  ;;  %10456 = vst [vmem:[%s15568_s29 + $0xc8] sm:$0xff] %v10424_v4  ;;  %v9041_v4 = vpop.f32.mrf.mxu0 }
 0x633   : > { %v10316_v14 = vpop.f32.mrf.mxu2  ;;  %v9705_v28 = vadd.f32 %v9665_v20, %v9071_v17  ;;  %v8649_v36 = vadd.f32 %v8615_v3, %v7966_v35 }
 0x634   : > { %v10357_v50 = vadd.f32 %v10316_v14, %v9704_v1 }
 0x635   : > { %v9075_v1 = vadd.f32 %v9041_v4, %v8649_v36 }
 0x636   : > { %v10393_v16 = vadd.f32 %v15827_v61, %v10357_v50 }
 0x638   : > { %v10425_v57 = vmax.f32 %v10393_v16, 0.0 }
 0x63a   : > { %v9668_v18 = vpop.f32.mrf.mxu1  ;;  %10457 = vst [vmem:[%s15568_s29 + $0xd0] sm:$0xff] %v10425_v57 }
 0x63b   : > { %v10318_v5 = vpop.f32.mrf.mxu2  ;;  %v9706_v39 = vadd.f32 %v9668_v18, %v9072_v52 }
 0x63c   : > { %v10358_v23 = vadd.f32 %v10318_v5, %v9705_v28 }
 0x63e   : > { %v10394_v62 = vadd.f32 %v15827_v61, %v10358_v23 }
 0x640   : > { %v10426_v2 = vmax.f32 %v10394_v62, 0.0 }
 0x642   : > { %10458 = vst [vmem:[%s15568_s29 + $0xd8] sm:$0xff] %v10426_v2  ;;  %v9670_v43 = vpop.f32.mrf.mxu1 }
 0x643   : > { %v10321_v34 = vpop.f32.mrf.mxu2  ;;  %v9707_v0 = vadd.f32 %v9670_v43, %v9073_v21 }
 0x644   : > { %v10359_v8 = vadd.f32 %v10321_v34, %v9706_v39 }
 0x646   : > { %v10395_v53 = vadd.f32 %v15827_v61, %v10359_v8 }
 0x648   : > { %v10427_v25 = vmax.f32 %v10395_v53, 0.0 }
 0x64a   : > { %10459 = vst [vmem:[%s15568_s29 + $0xe0] sm:$0xff] %v10427_v25  ;;  %v9673_v55 = vpop.f32.mrf.mxu1 }
 0x64b   : > { %v10323_v45 = vpop.f32.mrf.mxu2  ;;  %v9708_v20 = vadd.f32 %v9673_v55, %v9074_v27 }
 0x64c   : > { %v10360_v12 = vadd.f32 %v10323_v45, %v9707_v0 }
 0x64e   : > { %v10396_v37 = vadd.f32 %v15827_v61, %v10360_v12 }
 0x650   : > { %v10428_v30 = vmax.f32 %v10396_v37, 0.0 }
 0x652   : > { %10460 = vst [vmem:[%s15568_s29 + $0xe8] sm:$0xff] %v10428_v30  ;;  %v9675_v42 = vpop.f32.mrf.mxu1 }
 0x653   : > { %v10326_v44 = vpop.f32.mrf.mxu2  ;;  %v9709_v24 = vadd.f32 %v9675_v42, %v9075_v1 }
 0x654   : > { %v10361_v29 = vadd.f32 %v10326_v44, %v9708_v20 }
 0x656   : > { %v10397_v13 = vadd.f32 %v15827_v61, %v10361_v29 }
 0x658   : > { %v10429_v47 = vmax.f32 %v10397_v13, 0.0 }
 0x65a   : > { %10461 = vst [vmem:[%s15568_s29 + $0xf0] sm:$0xff] %v10429_v47 }
 0x65b   : > { %v10328_v14 = vpop.f32.mrf.mxu2 }
 0x65c   : > { %v10362_v31 = vadd.f32 %v10328_v14, %v9709_v24 }
 0x65e   : > { %v10398_v50 = vadd.f32 %v15827_v61, %v10362_v31 }
 0x660   : > { %v10430_v16 = vmax.f32 %v10398_v50, 0.0 }
 0x662   : > { %10462 = vst [vmem:[%s15568_s29 + $0xf8] sm:$0xff] %v10430_v16 }
 0x663   : > { %11856 = shalt.err (!%p11853_p8)
}
 0x664   : > { %s11901_s18 = smov 128   ;;  %s11902_s29 = smov 8  }
 0x665   : > { %11679 = dma.vmem_to_hbm [thread:$0]  (%p11976_p5), %s10477_s14, 4096, %s10479_s15, %s10464_s25, %s11901_s18, %s11901_s18, %s11902_s29  }
 0x666 PF: > { %p11691_p9 = scmp.ge.s32.totalorder %s11895_s24, 2  ;;  %s10493_s10 = sand.u32 1, %s11883_s21  }
 0x667   : > { %s10494_s11 = scalar_lea.sflag [#allocation5], %s10493_s10 }
 0x668   : > { %p11686_p10 = pnand %p11691_p9, %p11980_p6 }
 0x66a   : > { %p11687_p11 = pneg %p11686_p10 }
 0x66c   : > { %11878 = dma.done.wait (%p11687_p11), %s10494_s11, 4096  }
 0x66d   : > { %11880 = vsyncadd (%p11687_p11), %s10494_s11, 4294963200  ;;  %p17_p12 = scmp.ge.s32.totalorder %s11963_s27, 4   ;;  %s16444_s21 = smov %s11887_s22 }
 0x66e   : > { %s16445_s22 = smov %s11891_s23  ;;  %s16446_s23 = smov %s11974_s30 }
 0x66f   : > { %s16447_s24 = smov %s11963_s27  ;;  %19 = sbr.rel (!%p17_p12) target bundleno = 4 (0x4), region = 104 }
 0x674   :  { %10500 = vsyncpa [#allocation4], 1 }
 0x675   :  { %10502 = vsyncpa [#allocation4 + $0x1], 1 }
 0x676   :  { %10503 = vsyncpa [#allocation5], 1 }
 0x677   :  { %10505 = vsyncpa [#allocation5 + $0x1], 1 }

</bundles_post_ra>
